<compile_context>
chip_gen: v6e
topology: v6e:2x2x1
jax: 0.10.0
libtpu: 0.0.40
codegen_flags: <defaults>
</compile_context>

<pallas_src>
import jax
import jax.numpy as jnp
from jax.experimental import pallas as pl
from jax.experimental.pallas import tpu as pltpu

C_IN = 1024
C_OUT = 128
BN_EPS = 1e-5

TARGET_X_TILE_BYTES = 4 * 1024 * 1024   # ~4 MiB per x tile (x2 double-buffer is fine everywhere)
SPATIAL_TILE_CAP = 128                  # lane-dim tile cap (multiple of 128)
VMEM_LIMIT_BYTES = 32 * 1024 * 1024     # explicit scoped-VMEM budget with headroom


def _pick_tile(total, cap, align):
    """Largest divisor of `total` that is <= cap and a multiple of `align` (or == total).

    Falls back to the smallest legal (aligned-or-full) divisor if none fits under `cap`,
    so the (8,128) block constraints are always satisfied."""
    if total <= cap:
        return total
    divisors = [d for d in range(1, total + 1) if total % d == 0]
    aligned = [d for d in divisors if d % align == 0 or d == total]
    under = [d for d in aligned if d <= cap]
    if under:
        return max(under)
    return min(aligned)


def _dim_reduce_kernel(x_ref, w_ref, b_ref, o_ref, acc_ref):
    # x_ref: (TN, C, THW)   w_ref: (C, F)   b_ref: (1, F)   o_ref: (TN, F)
    # acc_ref: (TN, C) f32 accumulator (persists across the spatial grid axis).
    s = pl.program_id(1)

    @pl.when(s == 0)
    def _():
        acc_ref[...] = jnp.zeros_like(acc_ref)

    # Partial spatial sum for this tile (cross-lane reduce -> XLU).
    acc_ref[...] += jnp.sum(x_ref[...].astype(jnp.float32), axis=-1)

    @pl.when(s == pl.num_programs(1) - 1)
    def _():
        # BN affine and the 1/HW of the mean are folded into w/b, so the matmul
        # consumes the raw accumulated sum directly.
        out = jnp.dot(acc_ref[...], w_ref[...], preferred_element_type=jnp.float32)
        o_ref[...] = (out + b_ref[...]).astype(o_ref.dtype)


def dim_reduce_forward(x_nchw, gamma, beta, running_mean, running_var, fc_w, fc_b):
    """x_nchw: (N, 1024, H, W) float32 (or bf16). Returns (N, 128) float32."""
    N, C, H, W = x_nchw.shape
    assert C == C_IN
    HW = H * W

    # NCHW -> (N, C, HW): contiguous reshape, no transpose / extra HBM round trip.
    x = x_nchw.reshape(N, C, HW)

    f32 = jnp.float32
    # Fold BN (eval mode, running statistics) + the 1/HW mean factor into the FC weights.
    scale = gamma.astype(f32) / jnp.sqrt(running_var.astype(f32) + BN_EPS)   # (C,)
    shift = beta.astype(f32) - running_mean.astype(f32) * scale              # (C,)
    w = jnp.transpose(fc_w.astype(f32), (1, 0))                              # (C, F)
    w_folded = (scale / HW)[:, None] * w                                     # (C, F)
    b_folded = (shift @ w + fc_b.astype(f32)).reshape(1, C_OUT)              # (1, F)

    # Tile sizing: spatial (lane) tile a multiple of 128 (or full HW), batch tile a
    # multiple of 8 (or full N), targeting ~4 MiB x tiles.
    thw = _pick_tile(HW, SPATIAL_TILE_CAP, 128)
    row_bytes = thw * C * x.dtype.itemsize
    tn = _pick_tile(N, max(1, TARGET_X_TILE_BYTES // row_bytes), 8)

    grid = (N // tn, HW // thw)

    grid_spec = pltpu.PrefetchScalarGridSpec(
        num_scalar_prefetch=0,
        grid=grid,
        in_specs=[
            pl.BlockSpec((tn, C, thw), lambda n, s: (n, 0, s)),
            # Constant index maps -> weights/bias stay resident, not re-DMA'd per step.
            pl.BlockSpec((C, C_OUT), lambda n, s: (0, 0)),
            pl.BlockSpec((1, C_OUT), lambda n, s: (0, 0)),
        ],
        out_specs=pl.BlockSpec((tn, C_OUT), lambda n, s: (n, 0)),
        scratch_shapes=[pltpu.VMEM((tn, C), jnp.float32)],
    )

    bytes_accessed = (
        x.size * x.dtype.itemsize
        + w_folded.size * 4
        + b_folded.size * 4
        + N * C_OUT * 4
    )

    return pl.pallas_call(
        _dim_reduce_kernel,
        out_shape=jax.ShapeDtypeStruct((N, C_OUT), jnp.float32),
        grid_spec=grid_spec,
        compiler_params=pltpu.CompilerParams(
            dimension_semantics=("parallel", "arbitrary"),
            vmem_limit_bytes=VMEM_LIMIT_BYTES,
        ),
        cost_estimate=pl.CostEstimate(
            flops=N * C * HW + 2 * N * C * C_OUT,
            transcendentals=0,
            bytes_accessed=bytes_accessed,
        ),
    )(x, w_folded, b_folded)


def _reference_forward(x_nchw, gamma, beta, running_mean, running_var, fc_w, fc_b):
    pooled = jnp.mean(x_nchw.astype(jnp.float32), axis=(2, 3))               # (N, C)
    bn = (pooled - running_mean) / jnp.sqrt(running_var + BN_EPS) * gamma + beta
    return bn @ fc_w.T + fc_b


if __name__ == "__main__":
    key = jax.random.PRNGKey(0)
    k_x, k_w, k_b, k_g, k_be, k_rm, k_rv = jax.random.split(key, 7)

    # Small shapes consistent with the module: C is fixed at 1024 by BatchNorm2d/Linear.
    # N=16, 16x16 spatial exercises a multi-step grid on both the batch ("parallel")
    # and spatial-reduction ("arbitrary") axes: tiles (tn=8, thw=128) -> grid (2, 2).
    N, H, W = 16, 16, 16
    x = jax.random.normal(k_x, (N, C_IN, H, W), dtype=jnp.float32)

    # Deterministic parameter init (synthetic, PyTorch-style ranges).
    bound = 1.0 / jnp.sqrt(jnp.float32(C_IN))
    fc_w = jax.random.uniform(k_w, (C_OUT, C_IN), minval=-bound, maxval=bound,
                              dtype=jnp.float32)
    fc_b = jax.random.uniform(k_b, (C_OUT,), minval=-bound, maxval=bound,
                              dtype=jnp.float32)
    gamma = jnp.ones((C_IN,), jnp.float32) + 0.1 * jax.random.normal(k_g, (C_IN,))
    beta = 0.1 * jax.random.normal(k_be, (C_IN,))
    running_mean = 0.1 * jax.random.normal(k_rm, (C_IN,))
    running_var = jnp.abs(1.0 + 0.1 * jax.random.normal(k_rv, (C_IN,)))

    out = dim_reduce_forward(x, gamma, beta, running_mean, running_var, fc_w, fc_b)
    out = jax.block_until_ready(out)

    ref = _reference_forward(x, gamma, beta, running_mean, running_var, fc_w, fc_b)
    assert out.shape == (N, C_OUT)
    assert jnp.allclose(out, ref, atol=1e-4, rtol=1e-4), (
        float(jnp.max(jnp.abs(out - ref))))

    print("KERNEL_OK")
</pallas_src>

<mosaic_0001>
module attributes {stable_mosaic.version = 11 : i64} {
  func.func @_dim_reduce_kernel(%arg0: i32, %arg1: i32, %arg2: memref<8x1024x128xf32, #tpu.memory_space<vmem>>, %arg3: memref<1024x128xf32, #tpu.memory_space<vmem>>, %arg4: memref<1x128xf32, #tpu.memory_space<vmem>>, %arg5: memref<8x128xf32, #tpu.memory_space<vmem>>, %arg6: memref<8x1024xf32, #tpu.memory_space<vmem>>) attributes {dimension_semantics = [#tpu.dimension_semantics<parallel>, #tpu.dimension_semantics<arbitrary>], iteration_bounds = array<i64: 2, 2>, scalar_prefetch = 0 : i64, scratch_operands = 1 : i64, tpu.core_type = #tpu.core_type<tc>, window_params = [{transform_indices = @transform_0, window_bounds = array<i64: 8, 1024, 128>}, {pipeline_mode = #tpu.pipeline_mode<synchronous>, transform_indices = @transform_1, window_bounds = array<i64: 1024, 128>}, {pipeline_mode = #tpu.pipeline_mode<synchronous>, transform_indices = @transform_2, window_bounds = array<i64: 1, 128>}, {transform_indices = @transform_3, window_bounds = array<i64: 8, 128>}]} {
    %c0_i32 = arith.constant 0 : i32
    %0 = arith.cmpi eq, %arg1, %c0_i32 : i32
    %1 = arith.extui %0 : i1 to i32
    %c0_i32_0 = arith.constant 0 : i32
    %2 = arith.cmpi ne, %1, %c0_i32_0 : i32
    scf.if %2 {
      %cst_8 = arith.constant 0.000000e+00 : f32
      %11 = vector.broadcast %cst_8 : f32 to vector<8x1024xf32>
      %c0_9 = arith.constant 0 : index
      %c0_10 = arith.constant 0 : index
      %12 = vector.load %arg6[%c0_9, %c0_10] : memref<8x1024xf32, #tpu.memory_space<vmem>>, vector<8x1024xf32>
      tpu.vector_store %arg6[%c0_9, %c0_10], %11 {strides = array<i32>} : memref<8x1024xf32, #tpu.memory_space<vmem>>, vector<8x1024xf32>,
    } else {
    }
    %c0 = arith.constant 0 : index
    %c0_1 = arith.constant 0 : index
    %3 = vector.load %arg6[%c0, %c0_1] : memref<8x1024xf32, #tpu.memory_space<vmem>>, vector<8x1024xf32>
    %c0_2 = arith.constant 0 : index
    %c0_3 = arith.constant 0 : index
    %c0_4 = arith.constant 0 : index
    %4 = vector.load %arg2[%c0_2, %c0_3, %c0_4] : memref<8x1024x128xf32, #tpu.memory_space<vmem>>, vector<8x1024x128xf32>
    %cst = arith.constant dense<0.000000e+00> : vector<8x1024xf32>
    %5 = vector.multi_reduction <add>, %4, %cst [2] : vector<8x1024x128xf32> to vector<8x1024xf32>
    %6 = arith.addf %3, %5 : vector<8x1024xf32>
    %c0_5 = arith.constant 0 : index
    %c0_6 = arith.constant 0 : index
    %7 = vector.load %arg6[%c0_5, %c0_6] : memref<8x1024xf32, #tpu.memory_space<vmem>>, vector<8x1024xf32>
    tpu.vector_store %arg6[%c0_5, %c0_6], %6 {strides = array<i32>} : memref<8x1024xf32, #tpu.memory_space<vmem>>, vector<8x1024xf32>,
    %c1_i32 = arith.constant 1 : i32
    %8 = arith.cmpi eq, %arg1, %c1_i32 : i32
    %9 = arith.extui %8 : i1 to i32
    %c0_i32_7 = arith.constant 0 : i32
    %10 = arith.cmpi ne, %9, %c0_i32_7 : i32
    scf.if %10 {
      %c0_8 = arith.constant 0 : index
      %c0_9 = arith.constant 0 : index
      %11 = vector.load %arg6[%c0_8, %c0_9] : memref<8x1024xf32, #tpu.memory_space<vmem>>, vector<8x1024xf32>
      %c0_10 = arith.constant 0 : index
      %c0_11 = arith.constant 0 : index
      %12 = vector.load %arg3[%c0_10, %c0_11] : memref<1024x128xf32, #tpu.memory_space<vmem>>, vector<1024x128xf32>
      %cst_12 = arith.constant dense<0.000000e+00> : vector<8x128xf32>
      %13 = tpu.matmul %11, %12, %cst_12 {dimension_numbers = #tpu.dot_dimension_numbers<[1], [0], [0], [1], [0, 0, 1, 1], [], []>} : vector<8x1024xf32>, vector<1024x128xf32>, vector<8x128xf32> -> vector<8x128xf32>
      %c0_13 = arith.constant 0 : index
      %c0_14 = arith.constant 0 : index
      %14 = vector.load %arg4[%c0_13, %c0_14] : memref<1x128xf32, #tpu.memory_space<vmem>>, vector<1x128xf32>
      %15 = vector.broadcast %14 : vector<1x128xf32> to vector<8x128xf32>
      %16 = arith.addf %13, %15 : vector<8x128xf32>
      %c0_15 = arith.constant 0 : index
      %c0_16 = arith.constant 0 : index
      %17 = vector.load %arg5[%c0_15, %c0_16] : memref<8x128xf32, #tpu.memory_space<vmem>>, vector<8x128xf32>
      tpu.vector_store %arg5[%c0_15, %c0_16], %16 {strides = array<i32>} : memref<8x128xf32, #tpu.memory_space<vmem>>, vector<8x128xf32>,
    } else {
    }
    return
  }
  func.func @transform_0(%arg0: i32, %arg1: i32) -> (i32, i32, i32) {
    %c0_i32 = arith.constant 0 : i32
    %c0_i32_0 = arith.constant 0 : i32
    return %arg0, %c0_i32, %arg1 : i32, i32, i32
  }
  func.func @transform_1(%arg0: i32, %arg1: i32) -> (i32, i32) {
    %c0_i32 = arith.constant 0 : i32
    %c0_i32_0 = arith.constant 0 : i32
    %c0_i32_1 = arith.constant 0 : i32
    return %c0_i32, %c0_i32_0 : i32, i32
  }
  func.func @transform_2(%arg0: i32, %arg1: i32) -> (i32, i32) {
    %c0_i32 = arith.constant 0 : i32
    %c0_i32_0 = arith.constant 0 : i32
    %c0_i32_1 = arith.constant 0 : i32
    return %c0_i32, %c0_i32_0 : i32, i32
  }
  func.func @transform_3(%arg0: i32, %arg1: i32) -> (i32, i32) {
    %c0_i32 = arith.constant 0 : i32
    %c0_i32_0 = arith.constant 0 : i32
    return %arg0, %c0_i32 : i32, i32
  }
}

</mosaic_0001>

<bundles_post_ra>
// kernel: tpu_custom_call.1
= control target key start
LH: loop header
LB: loop body
LE: loop exit
PB: predicated region body
PF: predicated region fallthrough
CT: control target
= control target key end

     0   :  { %s14173_s0 = inlined_call_operand.hbm [shape: f32[16,1024,256], index: 0, kind: input, shape index: {}]   ;;  %s14174_s1 = inlined_call_operand.hbm [shape: f32[1024,128], index: 1, kind: input, shape index: {}]   ;;  %s14175_s2 = inlined_call_operand.hbm [shape: f32[1,128], index: 2, kind: input, shape index: {}]   ;;  %s14176_s3 = inlined_call_operand.hbm [shape: f32[16,128], index: 3, kind: output, shape index: {}]  }
   0x1   :  { %14189 = sst [smem:[#allocation18_spill]] %s14174_s1 }
   0x2   :  { %14190 = sst [smem:[#allocation19_spill]] %s14175_s2 }
   0x3   :  { %14191 = sst [smem:[#allocation20_spill]] %s14176_s3 }
   0x4   :  { %8 = vsyncpa [#allocation4], 0 }
   0x5   :  { %10 = vsyncpa [#allocation4 + $0x1], 0 }
   0x6   :  { %11 = vsyncpa [#allocation7], 0 }
   0x7   :  { %12 = vsyncpa [#allocation5], 0 }
   0x8   :  { %14 = vsyncpa [#allocation5 + $0x1], 0  ;;  %s10592_s12 = smov 0   ;;  %s10594_s13 = smov 0  }
   0x9   :  { %s10596_s14 = smov 0   ;;  %s10598_s15 = smov 0  }
   0xa   :  { %s10600_s16 = smov 0   ;;  %s10602_s17 = smov 0  }
   0xb   :  { %s10604_s18 = smov 0   ;;  %s10606_s19 = smov 0  }
   0xc   :  { %s10608_s20 = smov 0   ;;  %s10610_s21 = smov 0  }
   0xd   :  { %s10612_s22 = smov 0  }
   0xe LB: > { %14192 = sst [smem:[#allocation13_spill]] %s10522_s12  ;;  %s10068_s23 = sadd.s32 4294967295, %s10562_s22   ;;  %s10562_s22 = sphi %s10612_s22, %s14228_s22   ;;  %s10558_s21 = sphi %s10610_s21, %s14227_s21   ;;  %s10554_s20 = sphi %s10608_s20, %s14219_s20   ;;  %s10550_s19 = sphi %s10606_s19, %s14226_s19   ;;  %s10546_s18 = sphi %s10604_s18, %s14218_s18   ;;  %s10542_s17 = sphi %s10602_s17, %s14225_s17   ;;  %s10538_s16 = sphi %s10600_s16, %s14224_s16   ;;  %s10534_s15 = sphi %s10598_s15, %s14223_s15   ;;  %s10530_s14 = sphi %s10596_s14, %s14222_s14   ;;  %s10526_s13 = sphi %s10594_s13, %s14221_s13   ;;  %s10522_s12 = sphi %s10592_s12, %s14220_s12  }
   0xf   : > { %14193 = sst [smem:[#allocation14_spill]] %s10554_s20  ;;  %s10069_s24 = sadd.s32 4294967294, %s10562_s22  }
  0x10   : > { %14194 = sst [smem:[#allocation15_spill]] %s10562_s22  ;;  %p48_p0 = scmp.ne.s32.totalorder %s10542_s17, %s10538_s16 }
  0x11   : > { %p49_p1 = scmp.eq.s32.totalorder %s10562_s22, 0  ;;  %p54_p2 = scmp.ne.s32.totalorder %s10538_s16, %s10534_s15 }
  0x12   : > { %p10652_p3 = scmp.eq.s32.totalorder %s10068_s23, 0  ;;  %p119_p5 = scmp.ne.s32.totalorder %s10530_s14, %s10526_s13 }
  0x13   : > { %p10657_p4 = por %p49_p1, %p48_p0  ;;  %p120_p7 = scmp.eq.s32.totalorder %s10068_s23, 3 }
  0x14   : > { %s14195_s26 = scalar_select %p10652_p3, 1, 0 }
  0x15   : > { %p10665_p6 = por %p10652_p3, %p54_p2  ;;  %p125_p8 = scmp.ne.s32.totalorder %s10526_s13, %s10522_s12 }
  0x16   : > { %p126_p9 = scmp.eq.s32.totalorder %s10069_s24, 3  ;;  %p10671_p10 = por %p120_p7, %p119_p5 }
  0x17   : > { %p10070_p11 = scmp.ge.s32.totalorder %s10562_s22, 1  ;;  %p133_p13 = scmp.lt.s32.totalorder %s10562_s22, 5 }
  0x18   : > { %s14198_s30 = scalar_select %p10671_p10, 1, 0 }
  0x19   : > { %p10676_p12 = por %p126_p9, %p125_p8  ;;  %p10681_p0 = pnand %p10070_p11, %p133_p13 }
  0x1a   : > { %s10564_s6 = smov [#allocation6]   ;;  %p10260_p2 = scmp.lt.s32.totalorder %s10562_s22, 4 }
  0x1b   : > { %s14199_s4 = scalar_select %p10676_p12, 1, 0 }
  0x1c   : > { %s145_s7 = sshll.u32 %s10564_s6, 4  ;;  %p10243_p1 = pneg %p10681_p0  ;;  %s146_s7 = int_to_ptr.vmem [resolvable:$true] %s145_s7 }
  0x1d   : > { %14200 = sst [smem:[#allocation16_spill]] %s14199_s4  ;;  %p10696_p7 = pnand %p10260_p2, %p10657_p4 }
  0x1e   : > { %p10690_p5 = pnand %p10243_p1, %p10652_p3  ;;  %s10565_s10 = smov [#allocation8]  }
  0x1f   : > { %s159_s11 = sshll.u32 %s10565_s10, 4  ;;  %s10369_s15 = scalar_lea.vmem %s146_s7, 16384  ;;  %s160_s11 = int_to_ptr.vmem [resolvable:$true] %s159_s11 }
  0x20   : > { %p10360_p8 = pneg %p10690_p5  ;;  %p10370_p9 = scmp.ne.s32.totalorder %s146_s7, %s10369_s15 }
  0x21   : > { %p10377_p1 = scmp.lt.s32.totalorder %s146_s7, %s146_s7  ;;  %p10378_p12 = scmp.lt.s32.totalorder %s10369_s15, %s10369_s15 }
  0x22   : > { %p10372_p11 = pnand %p10370_p9, %p10360_p8 }
  0x23   : > { %p10379_p10 = por %p10378_p12, %p10377_p1 }
  0x24   : > { %p10373_p13 = pneg %p10372_p11 }
  0x26   : > { %p10380_p3 = pnand %p10379_p10, %p10373_p13 }
  0x28   : > { %10383 = shalt.err (!%p10380_p3)
}
  0x29   : > { %s14180_s23 = smov 128   ;;  %s14181_s24 = smov 8  }
  0x2a   : > { %s14204_s1 = sld [smem:[#allocation18_spill]]  ;;  %s10395_s10 = scalar_lea.vmem %s160_s11, 16 }
  0x2b   : > { %p10396_p4 = scmp.ne.s32.totalorder %s160_s11, %s10395_s10  ;;  %s10402_s15 = scalar_lea.vmem %s160_s11, 32 }
  0x2c   : > { %p10403_p3 = scmp.lt.s32.totalorder %s160_s11, %s160_s11  ;;  %p10404_p10 = scmp.lt.s32.totalorder %s10402_s15, %s10395_s10 }
  0x2d   : > { %p10398_p2 = pnand %p10396_p4, %p10360_p8 }
  0x2e   : > { %p10405_p9 = por %p10404_p10, %p10403_p3 }
  0x2f   : > { %p10399_p12 = pneg %p10398_p2 }
  0x30   : > { %10246 = dma.hbm_to_vmem [thread:$0]  (!%p10690_p5), %s14204_s1, 16384, %s146_s7, [#allocation7], %s14180_s23, %s14180_s23, %s14181_s24  }
  0x31   : > { %p10406_p11 = pnand %p10405_p9, %p10399_p12 }
  0x33   : > { %10409 = shalt.err (!%p10406_p11)
}
  0x34   : > { %s14205_s2 = sld [smem:[#allocation19_spill]]  ;;  %s29_s7 = sadd.s32 1, %s10554_s20 }
  0x35   : > { %p30_p8 = scmp.ge.s32.totalorder %s29_s7, 2  ;;  %s32_s28 = sadd.s32 1, %s10558_s21 }
  0x36   : > { %s170_s6 = sand.u32 1, %s10542_s17   ;;  %s10090_s10 = sshll.u32 %s10558_s21, 11 }
  0x37   : > { %s14230_s7 = smov (%p30_p8, %s29_s7), 0  ;;  %s14232_s28 = smov (!%p30_p8, %s32_s28), %s10558_s21 }
  0x38   : > { %14206 = sst [smem:[#allocation17_spill]] %s14230_s7  ;;  %s37_s25 = ssub.s32 %s10554_s20, %s14230_s7 }
  0x39   : > { %p34_p13 = scmp.ge.s32.totalorder %s14232_s28, 2  ;;  %s10074_s27 = sshll.u32 %s170_s6, 13 }
  0x3a   : > { %10249 = dma.hbm_to_vmem [thread:$0]  (!%p10690_p5), %s14205_s2, 16, %s160_s11, [#allocation7]  }
  0x3b   : > { %s180_s8 = sadd.s32 %s10554_s20, %s10090_s10  ;;  %s14234_s28 = smov (%p34_p13, %s14232_s28), 0 }
  0x3c   : > { %s10077_s11 = sshll.u32 %s180_s8, 7  ;;  %s174_s15 = scalar_lea.vmem [#allocation3], %s10074_s27 }
  0x3d   : > { %s183_s23 = sshll.u32 %s174_s15, 4  ;;  %s36_s24 = ssub.s32 %s10558_s21, %s14234_s28  ;;  %s184_s23 = int_to_ptr.vmem [resolvable:$true] %s183_s23 }
  0x3e   : > { %s182_s4 = scalar_lea.hbm %s14173_s0, %s10077_s11  ;;  %s38_s12 = sor.u32 %s37_s25, %s36_s24 }
  0x3f   : > { %p107_p5 = scmp.eq.s32.totalorder %s36_s24, 0  ;;  %p39_p1 = scmp.eq.s32.totalorder %s38_s12, 0 }
  0x40   : > { %s14207_s7 = sadd.s32 1, %s10530_s14  ;;  %s14208_s3 = sadd.s32 1, %s10542_s17 }
  0x41   : > { %s10741_s22 = scalar_select %p107_p5, %s10530_s14, %s14207_s7  }
  0x42   : > { %s10746_s10 = scalar_select %p39_p1, %s10542_s17, %s14208_s3  }
  0x43   : > { %s171_s20 = scalar_lea.sflag [#allocation4], %s170_s6  ;;  %p10412_p4 = pneg %p10696_p7 }
  0x44   : > { %s10423_s27 = scalar_lea.vmem %s184_s23, 131072  ;;  %s10568_s8 = smov [#allocation3]  }
  0x45   : > { %p10424_p2 = scmp.ne.s32.totalorder %s184_s23, %s10423_s27  ;;  %s10428_s1 = sshll.u32 %s10568_s8, 4  ;;  %s10429_s1 = int_to_ptr.vmem [resolvable:$false] %s10428_s1 }
  0x46   : > { %s10430_s2 = scalar_lea.vmem %s10429_s1, 262144  ;;  %p10431_p10 = scmp.lt.s32.totalorder %s184_s23, %s10429_s1 }
  0x47   : > { %p10426_p12 = pnand %p10424_p2, %p10412_p4  ;;  %p10432_p9 = scmp.lt.s32.totalorder %s10430_s2, %s10423_s27 }
  0x49   : > { %p10427_p3 = pneg %p10426_p12  ;;  %p10433_p11 = por %p10432_p9, %p10431_p10 }
  0x4b   : > { %p10434_p8 = pnand %p10433_p11, %p10427_p3 }
  0x4d   : > { %10437 = shalt.err (!%p10434_p8)
}
  0x4e   : > { %s10569_s12 = smov 256   ;;  %s14209_s3 = smov 8  }
  0x4f   : > { %s14210_s24 = smov 128   ;;  %195 = sbr.rel (%p10681_p0) target bundleno = 2586 (0xa1a), region = 32 }
  0x50   : > { %10253 = dma.hbm_to_vmem [thread:$0]  (!%p10696_p7), %s182_s4, 131072, %s184_s23, %s171_s20, %s10569_s12, %s14210_s24, %s14209_s3  }
  0x51   : > { %s197_s7 = sand.u32 (!%p10681_p0), 1, %s10538_s16  }
  0x52   : > { %s10079_s6 = sshll.u32 (!%p10681_p0), %s197_s7, 13  ;;  %s198_s25 = scalar_lea.sflag (!%p10681_p0), [#allocation4], %s197_s7 }
  0x53   : > { %s10757_s11 = scalar_lea.vmem (!%p10681_p0), [#allocation3], %s10079_s6 }
  0x54   : > { %10509 = dma.done.wait (%p10665_p6), %s198_s25, 131072  }
  0x55   : > { %10511 = vsyncadd (%p10665_p6), %s198_s25, 4294836224  ;;  %p14211_p13 = scmp.ne.s32.totalorder %s14195_s26, 0 }
  0x57   : > { %10513 = dma.done.wait (%p14211_p13), [#allocation7], 16400  }
  0x58   : > { %10515 = vsyncadd (%p14211_p13), [#allocation7], 4294950896  ;;  %s229_s20 = sand.u32 1, %s10526_s13   ;;  %p10083_p0 = scmp.ne.s32.totalorder %s10546_s18, 0 }
  0x59   : > { %s10770_s4 = sshll.u32 %s229_s20, 3 }
  0x5a   : > { %s231_s5 = scalar_lea.vmem [#allocation9], %s10770_s4  ;;  %236 = sbr.rel (%p10083_p0) target bundleno = 100 (0x64), region = 48 }
  0x5f   : > { %v10570_v0 = vmov 0.0  }
  0x60   : > { %237 = vst [vmem:[#allocation2 + $0x30] sm:$0xff] %v10570_v0  ;;  %238 = vst [vmem:[#allocation2] sm:$0xff] %v10570_v0 }
  0x61   : > { %239 = vst [vmem:[#allocation2 + $0x18] sm:$0xff] %v10570_v0  ;;  %240 = vst [vmem:[#allocation2 + $0x10] sm:$0xff] %v10570_v0 }
  0x62   : > { %241 = vst [vmem:[#allocation2 + $0x8] sm:$0xff] %v10570_v0  ;;  %242 = vst [vmem:[#allocation2 + $0x20] sm:$0xff] %v10570_v0 }
  0x63   : > { %243 = vst [vmem:[#allocation2 + $0x28] sm:$0xff] %v10570_v0  ;;  %244 = vst [vmem:[#allocation2 + $0x38] sm:$0xff] %v10570_v0 }
  0x64 PF: > { %v255_v1 = vld [vmem:[%s10757_s11 + $0x10] sm:$0xff]  ;;  %v253_v2 = vld [vmem:[%s10757_s11] sm:$0xff]  ;;  %v256_v3 = vld [vmem:[%s10757_s11 + $0x18] sm:$0xff]  ;;  %vm4360_vm0 = vcmask 130112   ;;  %vm4367_vm1 = vcmask 195712   ;;  %vm4374_vm2 = vcmask 261312  }
  0x65   : > { %1281 = vadd.xlane.f32.xlu1 %v255_v1  ;;  %1277 = vadd.xlane.f32.xlu0 %v253_v2  ;;  %v254_v4 = vld [vmem:[%s10757_s11 + $0x8] sm:$0xff]  ;;  %v257_v6 = vld [vmem:[%s10757_s11 + $0x20] sm:$0xff]  ;;  %v260_v7 = vld [vmem:[%s10757_s11 + $0x38] sm:$0xff]  ;;  %vm4381_vm3 = vcmask 326912   ;;  %vm4388_vm4 = vcmask 392512   ;;  %vm4395_vm5 = vcmask 458112  }
  0x66   : > { %v258_v5 = vld [vmem:[%s10757_s11 + $0x28] sm:$0xff]  ;;  %v259_v8 = vld [vmem:[%s10757_s11 + $0x30] sm:$0xff]  ;;  %v261_v10 = vld [vmem:[%s10757_s11 + $0x40] sm:$0xff]  ;;  %vm4402_vm6 = vcmask 523712   ;;  %vm4409_vm7 = vcmask 589312   ;;  %vm4416_vm8 = vcmask 654912  }
  0x67   : > { %v262_v9 = vld [vmem:[%s10757_s11 + $0x48] sm:$0xff]  ;;  %v264_v11 = vld [vmem:[%s10757_s11 + $0x58] sm:$0xff]  ;;  %v263_v12 = vld [vmem:[%s10757_s11 + $0x50] sm:$0xff]  ;;  %vm4423_vm9 = vcmask 720512   ;;  %vm4430_vm10 = vcmask 786112   ;;  %vm4437_vm11 = vcmask 851712  }
  0x68   : > { %v266_v13 = vld [vmem:[%s10757_s11 + $0x68] sm:$0xff]  ;;  %v265_v14 = vld [vmem:[%s10757_s11 + $0x60] sm:$0xff]  ;;  %v268_v15 = vld [vmem:[%s10757_s11 + $0x78] sm:$0xff]  ;;  %vm4444_vm12 = vcmask 917312   ;;  %vm4451_vm13 = vcmask 982912   ;;  %vm4458_vm14 = vcmask 1048512  }
  0x69   : > { %1283 = vadd.xlane.f32.xlu1 %v256_v3  ;;  %1279 = vadd.xlane.f32.xlu0 %v254_v4  ;;  %v267_v16 = vld [vmem:[%s10757_s11 + $0x70] sm:$0xff]  ;;  %v270_v17 = vld [vmem:[%s10757_s11 + $0x88] sm:$0xff]  ;;  %v269_v18 = vld [vmem:[%s10757_s11 + $0x80] sm:$0xff]  ;;  %v4349_v3 = vlaneseq  ;;  %vm9437_vm15 = vcmask 1041409   ;;  %p10084_p6 = scmp.ne.s32.totalorder %s10546_s18, 1 }
  0x6a   : > { %v272_v19 = vld [vmem:[%s10757_s11 + $0x98] sm:$0xff]  ;;  %v271_v20 = vld [vmem:[%s10757_s11 + $0x90] sm:$0xff]  ;;  %v274_v21 = vld [vmem:[%s10757_s11 + $0xa8] sm:$0xff] }
  0x6b   : > { %v273_v22 = vld [vmem:[%s10757_s11 + $0xa0] sm:$0xff]  ;;  %v276_v23 = vld [vmem:[%s10757_s11 + $0xb8] sm:$0xff]  ;;  %v275_v24 = vld [vmem:[%s10757_s11 + $0xb0] sm:$0xff] }
  0x6c   : > { %v278_v25 = vld [vmem:[%s10757_s11 + $0xc8] sm:$0xff]  ;;  %v277_v26 = vld [vmem:[%s10757_s11 + $0xc0] sm:$0xff]  ;;  %v280_v27 = vld [vmem:[%s10757_s11 + $0xd8] sm:$0xff] }
  0x6d   : > { %1287 = vadd.xlane.f32.xlu1 %v258_v5  ;;  %1285 = vadd.xlane.f32.xlu0 %v257_v6  ;;  %v279_v28 = vld [vmem:[%s10757_s11 + $0xd0] sm:$0xff]  ;;  %v282_v29 = vld [vmem:[%s10757_s11 + $0xe8] sm:$0xff]  ;;  %v281_v30 = vld [vmem:[%s10757_s11 + $0xe0] sm:$0xff]  ;;  %v10842_v6 = vand.u32 127, %v4349_v3 }
  0x6e   : > { %v284_v31 = vld [vmem:[%s10757_s11 + $0xf8] sm:$0xff]  ;;  %v283_v32 = vld [vmem:[%s10757_s11 + $0xf0] sm:$0xff]  ;;  %v286_v33 = vld [vmem:[%s10757_s11 + $0x108] sm:$0xff] }
  0x6f   : > { %v285_v34 = vld [vmem:[%s10757_s11 + $0x100] sm:$0xff]  ;;  %v288_v35 = vld [vmem:[%s10757_s11 + $0x118] sm:$0xff]  ;;  %v287_v36 = vld [vmem:[%s10757_s11 + $0x110] sm:$0xff] }
  0x70   : > { %v290_v37 = vld [vmem:[%s10757_s11 + $0x128] sm:$0xff]  ;;  %v289_v38 = vld [vmem:[%s10757_s11 + $0x120] sm:$0xff]  ;;  %v292_v39 = vld [vmem:[%s10757_s11 + $0x138] sm:$0xff] }
  0x71   : > { %1291 = vadd.xlane.f32.xlu1 %v260_v7  ;;  %1289 = vadd.xlane.f32.xlu0 %v259_v8  ;;  %v291_v40 = vld [vmem:[%s10757_s11 + $0x130] sm:$0xff]  ;;  %v294_v41 = vld [vmem:[%s10757_s11 + $0x148] sm:$0xff]  ;;  %v293_v42 = vld [vmem:[%s10757_s11 + $0x140] sm:$0xff] }
  0x72   : > { %v296_v43 = vld [vmem:[%s10757_s11 + $0x158] sm:$0xff]  ;;  %v295_v44 = vld [vmem:[%s10757_s11 + $0x150] sm:$0xff]  ;;  %v298_v45 = vld [vmem:[%s10757_s11 + $0x168] sm:$0xff] }
  0x73   : > { %v297_v46 = vld [vmem:[%s10757_s11 + $0x160] sm:$0xff]  ;;  %v300_v47 = vld [vmem:[%s10757_s11 + $0x178] sm:$0xff]  ;;  %v299_v48 = vld [vmem:[%s10757_s11 + $0x170] sm:$0xff] }
  0x74   : > { %v302_v49 = vld [vmem:[%s10757_s11 + $0x188] sm:$0xff]  ;;  %v301_v50 = vld [vmem:[%s10757_s11 + $0x180] sm:$0xff]  ;;  %v304_v51 = vld [vmem:[%s10757_s11 + $0x198] sm:$0xff] }
  0x75   : > { %1295 = vadd.xlane.f32.xlu1 %v262_v9  ;;  %1293 = vadd.xlane.f32.xlu0 %v261_v10  ;;  %v303_v52 = vld [vmem:[%s10757_s11 + $0x190] sm:$0xff]  ;;  %v306_v53 = vld [vmem:[%s10757_s11 + $0x1a8] sm:$0xff]  ;;  %v305_v54 = vld [vmem:[%s10757_s11 + $0x1a0] sm:$0xff]  ;;  %v10846_v9 = vshrl.u32 %v4349_v3, 7  ;;  %v4355_v10 = vadd.s32 4294967288, %v10842_v6  ;;  %v4439_v3 = vadd.s32 4294967192, %v10842_v6 }
  0x76   : > { %v308_v55 = vld [vmem:[%s10757_s11 + $0x1b8] sm:$0xff]  ;;  %v307_v56 = vld [vmem:[%s10757_s11 + $0x1b0] sm:$0xff]  ;;  %v310_v57 = vld [vmem:[%s10757_s11 + $0x1c8] sm:$0xff] }
  0x77   : > { %v309_v58 = vld [vmem:[%s10757_s11 + $0x1c0] sm:$0xff]  ;;  %v312_v59 = vld [vmem:[%s10757_s11 + $0x1d8] sm:$0xff]  ;;  %v311_v60 = vld [vmem:[%s10757_s11 + $0x1d0] sm:$0xff] }
  0x78   : > { %v314_v61 = vld [vmem:[%s10757_s11 + $0x1e8] sm:$0xff]  ;;  %v313_v62 = vld [vmem:[%s10757_s11 + $0x1e0] sm:$0xff]  ;;  %v316_v63 = vld [vmem:[%s10757_s11 + $0x1f8] sm:$0xff] }
  0x79   : > { %1299 = vadd.xlane.f32.xlu1 %v264_v11  ;;  %1297 = vadd.xlane.f32.xlu0 %v263_v12  ;;  %v315_v0 = vld [vmem:[%s10757_s11 + $0x1f0] sm:$0xff]  ;;  %v318_v1 = vld [vmem:[%s10757_s11 + $0x208] sm:$0xff]  ;;  %v317_v2 = vld [vmem:[%s10757_s11 + $0x200] sm:$0xff]  ;;  %v4362_v11 = vadd.s32 4294967280, %v10842_v6  ;;  %v4369_v12 = vadd.s32 4294967272, %v10842_v6 }
  0x7a   : > { %v320_v4 = vld [vmem:[%s10757_s11 + $0x218] sm:$0xff]  ;;  %v319_v5 = vld [vmem:[%s10757_s11 + $0x210] sm:$0xff]  ;;  %v322_v7 = vld [vmem:[%s10757_s11 + $0x228] sm:$0xff] }
  0x7b   : > { %v321_v8 = vld [vmem:[%s10757_s11 + $0x220] sm:$0xff] }
  0x7d   : > { %1303 = vadd.xlane.f32.xlu1 %v266_v13  ;;  %1301 = vadd.xlane.f32.xlu0 %v265_v14 }
  0x81   : > { %1307 = vadd.xlane.f32.xlu1 %v268_v15  ;;  %1305 = vadd.xlane.f32.xlu0 %v267_v16  ;;  %v324_v15 = vld [vmem:[%s10757_s11 + $0x238] sm:$0xff]  ;;  %v323_v16 = vld [vmem:[%s10757_s11 + $0x230] sm:$0xff] }
  0x85   : > { %1311 = vadd.xlane.f32.xlu1 %v270_v17  ;;  %1309 = vadd.xlane.f32.xlu0 %v269_v18  ;;  %v10855_v17 = vsub.s32 %v10842_v6, %v10846_v9  ;;  %v10858_v18 = vsub.s32 %v4355_v10, %v10846_v9 }
  0x89   : > { %1315 = vadd.xlane.f32.xlu1 %v272_v19  ;;  %1313 = vadd.xlane.f32.xlu0 %v271_v20  ;;  %v4383_v19 = vadd.s32 4294967256, %v10842_v6  ;;  %v4376_v20 = vadd.s32 4294967264, %v10842_v6 }
  0x8d   : > { %1319 = vadd.xlane.f32.xlu1 %v274_v21  ;;  %1317 = vadd.xlane.f32.xlu0 %v273_v22  ;;  %v10863_v21 = vsub.s32 %v4362_v11, %v10846_v9  ;;  %v10866_v22 = vsub.s32 %v4369_v12, %v10846_v9 }
  0x91   : > { %1323 = vadd.xlane.f32.xlu1 %v276_v23  ;;  %1321 = vadd.xlane.f32.xlu0 %v275_v24  ;;  %v4397_v23 = vadd.s32 4294967240, %v10842_v6 }
  0x95   : > { %1327 = vadd.xlane.f32.xlu1 %v278_v25  ;;  %1325 = vadd.xlane.f32.xlu0 %v277_v26  ;;  %v326_v26 = vld [vmem:[%s10757_s11 + $0x248] sm:$0xff] }
  0x99   : > { %1331 = vadd.xlane.f32.xlu1 %v280_v27  ;;  %1329 = vadd.xlane.f32.xlu0 %v279_v28  ;;  %v325_v27 = vld [vmem:[%s10757_s11 + $0x240] sm:$0xff]  ;;  %v4390_v28 = vadd.s32 4294967248, %v10842_v6 }
  0x9d   : > { %1335 = vadd.xlane.f32.xlu1 %v282_v29  ;;  %1333 = vadd.xlane.f32.xlu0 %v281_v30 }
  0xa1   : > { %1339 = vadd.xlane.f32.xlu1 %v284_v31  ;;  %1337 = vadd.xlane.f32.xlu0 %v283_v32  ;;  %v10875_v31 = vsub.s32 %v4383_v19, %v10846_v9  ;;  %v10878_v32 = vsub.s32 %v4376_v20, %v10846_v9  ;;  %v4453_v19 = vadd.s32 4294967176, %v10842_v6 }
  0xa5   : > { %1343 = vadd.xlane.f32.xlu1 %v286_v33  ;;  %1341 = vadd.xlane.f32.xlu0 %v285_v34 }
  0xa9   : > { %1347 = vadd.xlane.f32.xlu1 %v288_v35  ;;  %1345 = vadd.xlane.f32.xlu0 %v287_v36  ;;  %v10884_v36 = vsub.s32 %v4397_v23, %v10846_v9 }
  0xad   : > { %1351 = vadd.xlane.f32.xlu1 %v290_v37  ;;  %1349 = vadd.xlane.f32.xlu0 %v289_v38 }
  0xb1   : > { %1355 = vadd.xlane.f32.xlu1 %v292_v39  ;;  %1353 = vadd.xlane.f32.xlu0 %v291_v40  ;;  %v328_v40 = vld [vmem:[%s10757_s11 + $0x258] sm:$0xff] }
  0xb5   : > { %1359 = vadd.xlane.f32.xlu1 %v294_v41  ;;  %1357 = vadd.xlane.f32.xlu0 %v293_v42  ;;  %v327_v41 = vld [vmem:[%s10757_s11 + $0x250] sm:$0xff]  ;;  %v10890_v42 = vsub.s32 %v4390_v28, %v10846_v9 }
  0xb9   : > { %1363 = vadd.xlane.f32.xlu1 %v296_v43  ;;  %1361 = vadd.xlane.f32.xlu0 %v295_v44  ;;  %v4411_v43 = vadd.s32 4294967224, %v10842_v6 }
  0xbd   : > { %1367 = vadd.xlane.f32.xlu1 %v298_v45  ;;  %1365 = vadd.xlane.f32.xlu0 %v297_v46 }
  0xc1   : > { %1371 = vadd.xlane.f32.xlu1 %v300_v47  ;;  %1369 = vadd.xlane.f32.xlu0 %v299_v48  ;;  %v4404_v47 = vadd.s32 4294967232, %v10842_v6 }
  0xc5   : > { %1375 = vadd.xlane.f32.xlu1 %v302_v49  ;;  %1373 = vadd.xlane.f32.xlu0 %v301_v50 }
  0xc9   : > { %1379 = vadd.xlane.f32.xlu1 %v304_v51  ;;  %1377 = vadd.xlane.f32.xlu0 %v303_v52  ;;  %v330_v52 = vld [vmem:[%s10757_s11 + $0x268] sm:$0xff] }
  0xcd   : > { %1383 = vadd.xlane.f32.xlu1 %v306_v53  ;;  %1381 = vadd.xlane.f32.xlu0 %v305_v54  ;;  %v329_v53 = vld [vmem:[%s10757_s11 + $0x260] sm:$0xff]  ;;  %v10902_v54 = vsub.s32 %v4411_v43, %v10846_v9  ;;  %v338_v43 = vld [vmem:[%s10757_s11 + $0x2a8] sm:$0xff] }
  0xd1   : > { %1387 = vadd.xlane.f32.xlu1 %v308_v55  ;;  %1385 = vadd.xlane.f32.xlu0 %v307_v56  ;;  %v4425_v55 = vadd.s32 4294967208, %v10842_v6 }
  0xd5   : > { %1391 = vadd.xlane.f32.xlu1 %v310_v57  ;;  %1389 = vadd.xlane.f32.xlu0 %v309_v58  ;;  %v10908_v58 = vsub.s32 %v4404_v47, %v10846_v9 }
  0xd9   : > { %1395 = vadd.xlane.f32.xlu1 %v312_v59  ;;  %1393 = vadd.xlane.f32.xlu0 %v311_v60  ;;  %v4418_v59 = vadd.s32 4294967216, %v10842_v6 }
  0xdd   : > { %1399 = vadd.xlane.f32.xlu1 %v314_v61  ;;  %1397 = vadd.xlane.f32.xlu0 %v313_v62 }
  0xe1   : > { %1403 = vadd.xlane.f32.xlu1 %v316_v63  ;;  %1401 = vadd.xlane.f32.xlu0 %v315_v0  ;;  %v332_v0 = vld [vmem:[%s10757_s11 + $0x278] sm:$0xff] }
  0xe5   : > { %1407 = vadd.xlane.f32.xlu1 %v318_v1  ;;  %1405 = vadd.xlane.f32.xlu0 %v317_v2  ;;  %v331_v1 = vld [vmem:[%s10757_s11 + $0x270] sm:$0xff]  ;;  %v10916_v2 = vsub.s32 %v4425_v55, %v10846_v9 }
  0xe9   : > { %1411 = vadd.xlane.f32.xlu1 %v320_v4  ;;  %1409 = vadd.xlane.f32.xlu0 %v319_v5 }
  0xed   : > { %1415 = vadd.xlane.f32.xlu1 %v322_v7  ;;  %1413 = vadd.xlane.f32.xlu0 %v321_v8  ;;  %v10922_v7 = vsub.s32 %v4418_v59, %v10846_v9  ;;  %v4432_v8 = vadd.s32 4294967200, %v10842_v6  ;;  %v342_v59 = vld [vmem:[%s10757_s11 + $0x2c8] sm:$0xff] }
  0xee   : > { %v1282_v13 = vpop.xlane.xlu1 %1281  ;;  %v1278_v14 = vpop.xlane.xlu0 %1277 }
  0xef   : > { %v4354_v29 = vrot.slane %v1278_v14, %v10855_v17  ;;  %v4366_v33 = vrot.slane %v1282_v13, %v10863_v21  ;;  %v334_v14 = vld [vmem:[%s10757_s11 + $0x288] sm:$0xff] }
  0xf1   : > { %1419 = vadd.xlane.f32.xlu1 %v324_v15  ;;  %1417 = vadd.xlane.f32.xlu0 %v323_v16  ;;  %v333_v15 = vld [vmem:[%s10757_s11 + $0x280] sm:$0xff]  ;;  %v10930_v16 = vsub.s32 %v4439_v3, %v10846_v9 }
  0xf2   : > { %v1284_v24 = vpop.xlane.xlu1 %1283  ;;  %v1280_v25 = vpop.xlane.xlu0 %1279 }
  0xf3   : > { %v4359_v30 = vrot.slane %v1280_v25, %v10858_v18  ;;  %v4373_v34 = vrot.slane %v1284_v24, %v10866_v22  ;;  %v10936_v24 = vsub.s32 %v4432_v8, %v10846_v9  ;;  %v4446_v25 = vadd.s32 4294967184, %v10842_v6 }
  0xf5   : > { %v4361_v35 = vsel %vm4360_vm0, %v4359_v30, %v4354_v29  ;;  %1423 = vadd.xlane.f32.xlu1 %v326_v26  ;;  %1421 = vadd.xlane.f32.xlu0 %v325_v27  ;;  %v336_v30 = vld [vmem:[%s10757_s11 + $0x298] sm:$0xff] }
  0xf6   : > { %v4368_v37 = vsel %vm4367_vm1, %v4366_v33, %v4361_v35  ;;  %v1288_v38 = vpop.xlane.xlu1 %1287  ;;  %v1286_v39 = vpop.xlane.xlu0 %1285  ;;  %v335_v33 = vld [vmem:[%s10757_s11 + $0x290] sm:$0xff] }
  0xf7   : > { %v4387_v44 = vrot.slane %v1288_v38, %v10875_v31  ;;  %v4375_v45 = vsel %vm4374_vm2, %v4373_v34, %v4368_v37  ;;  %v4380_v46 = vrot.slane %v1286_v39, %v10878_v32  ;;  %v10944_v34 = vsub.s32 %v4453_v19, %v10846_v9  ;;  %v345_v19 = vld [vmem:[%s10757_s11 + $0x2e0] sm:$0xff] }
  0xf8   : > { %v10949_v37 = vsub.s32 %v4446_v25, %v10846_v9 }
  0xf9   : > { %v4382_v48 = vsel %vm4381_vm3, %v4380_v46, %v4375_v45  ;;  %1427 = vadd.xlane.f32.xlu1 %v328_v40  ;;  %1425 = vadd.xlane.f32.xlu0 %v327_v41 }
  0xfa   : > { %v1292_v49 = vpop.xlane.xlu1 %1291  ;;  %v4389_v50 = vsel %vm4388_vm4, %v4387_v44, %v4382_v48  ;;  %v1290_v51 = vpop.xlane.xlu0 %1289  ;;  %v337_v44 = vld [vmem:[%s10757_s11 + $0x2a0] sm:$0xff] }
  0xfb   : > { %v4401_v56 = vrot.slane %v1292_v49, %v10884_v36  ;;  %v4394_v57 = vrot.slane %v1290_v51, %v10890_v42  ;;  %v339_v51 = vld [vmem:[%s10757_s11 + $0x2b0] sm:$0xff] }
  0xfd   : > { %v4396_v60 = vsel %vm4395_vm5, %v4394_v57, %v4389_v50  ;;  %1431 = vadd.xlane.f32.xlu1 %v330_v52  ;;  %1429 = vadd.xlane.f32.xlu0 %v329_v53  ;;  %v340_v50 = vld [vmem:[%s10757_s11 + $0x2b8] sm:$0xff] }
  0xfe   : > { %v1296_v61 = vpop.xlane.xlu1 %1295  ;;  %v4403_v62 = vsel %vm4402_vm6, %v4401_v56, %v4396_v60  ;;  %v1294_v63 = vpop.xlane.xlu0 %1293  ;;  %v341_v60 = vld [vmem:[%s10757_s11 + $0x2c0] sm:$0xff] }
  0xff   : > { %v4415_v4 = vrot.slane %v1296_v61, %v10902_v54  ;;  %v4408_v5 = vrot.slane %v1294_v63, %v10908_v58 }
 0x101   : > { %v4410_v10 = vsel %vm4409_vm7, %v4408_v5, %v4403_v62  ;;  %1435 = vadd.xlane.f32.xlu1 %v332_v0  ;;  %1433 = vadd.xlane.f32.xlu0 %v331_v1  ;;  %v343_v5 = vld [vmem:[%s10757_s11 + $0x2d0] sm:$0xff] }
 0x102   : > { %v1300_v11 = vpop.xlane.xlu1 %1299  ;;  %v4417_v12 = vsel %vm4416_vm8, %v4415_v4, %v4410_v10  ;;  %v1298_v13 = vpop.xlane.xlu0 %1297  ;;  %v344_v4 = vld [vmem:[%s10757_s11 + $0x2d8] sm:$0xff] }
 0x103   : > { %v4429_v20 = vrot.slane %v1300_v11, %v10916_v2  ;;  %v4422_v23 = vrot.slane %v1298_v13, %v10922_v7 }
 0x105   : > { %v4424_v26 = vsel %vm4423_vm9, %v4422_v23, %v4417_v12  ;;  %1439 = vadd.xlane.f32.xlu1 %v334_v14  ;;  %1437 = vadd.xlane.f32.xlu0 %v333_v15  ;;  %v346_v15 = vld [vmem:[%s10757_s11 + $0x2e8] sm:$0xff] }
 0x106   : > { %v1304_v27 = vpop.xlane.xlu1 %1303  ;;  %v4431_v28 = vsel %vm4430_vm10, %v4429_v20, %v4424_v26  ;;  %v1302_v29 = vpop.xlane.xlu0 %1301 }
 0x107   : > { %v4443_v35 = vrot.slane %v1304_v27, %v10930_v16  ;;  %v4436_v6 = vrot.slane %v1302_v29, %v10936_v24  ;;  %v348_v29 = vld [vmem:[%s10757_s11 + $0x2f8] sm:$0xff] }
 0x109   : > { %v4438_v38 = vsel %vm4437_vm11, %v4436_v6, %v4431_v28  ;;  %1443 = vadd.xlane.f32.xlu1 %v336_v30  ;;  %1441 = vadd.xlane.f32.xlu0 %v335_v33  ;;  %v347_v30 = vld [vmem:[%s10757_s11 + $0x2f0] sm:$0xff] }
 0x10a   : > { %v1308_v39 = vpop.xlane.xlu1 %1307  ;;  %v4445_v40 = vsel %vm4444_vm12, %v4443_v35, %v4438_v38  ;;  %v1306_v41 = vpop.xlane.xlu0 %1305 }
 0x10b   : > { %v4457_v45 = vrot.slane %v1308_v39, %v10944_v34  ;;  %v4450_v46 = vrot.slane %v1306_v41, %v10949_v37  ;;  %v350_v41 = vld [vmem:[%s10757_s11 + $0x308] sm:$0xff] }
 0x10d   : > { %v4452_v9 = vsel %vm4451_vm13, %v4450_v46, %v4445_v40  ;;  %1447 = vadd.xlane.f32.xlu1 %v338_v43  ;;  %1445 = vadd.xlane.f32.xlu0 %v337_v44  ;;  %v349_v43 = vld [vmem:[%s10757_s11 + $0x300] sm:$0xff] }
 0x10e   : > { %v10959_v47 = vsel %vm4458_vm14, %v4457_v45, %v4452_v9  ;;  %v1312_v48 = vpop.xlane.xlu1 %1311  ;;  %v1310_v49 = vpop.xlane.xlu0 %1309 }
 0x10f   : > { %v4467_v52 = vrot.slane %v1312_v48, %v10858_v18  ;;  %v4463_v53 = vrot.slane %v1310_v49, %v10855_v17 }
 0x111   : > { %v4468_v55 = vsel %vm4360_vm0, %v4467_v52, %v4463_v53  ;;  %1451 = vadd.xlane.f32.xlu1 %v340_v50  ;;  %1449 = vadd.xlane.f32.xlu0 %v339_v51  ;;  %v352_v50 = vld [vmem:[%s10757_s11 + $0x318] sm:$0xff]  ;;  %v351_v51 = vld [vmem:[%s10757_s11 + $0x310] sm:$0xff] }
 0x112   : > { %v1316_v56 = vpop.xlane.xlu1 %1315  ;;  %v1314_v57 = vpop.xlane.xlu0 %1313 }
 0x113   : > { %v4477_v61 = vrot.slane %v1316_v56, %v10866_v22  ;;  %v4472_v62 = vrot.slane %v1314_v57, %v10863_v21 }
 0x115   : > { %v4473_v63 = vsel %vm4367_vm1, %v4472_v62, %v4468_v55  ;;  %1455 = vadd.xlane.f32.xlu1 %v342_v59  ;;  %1453 = vadd.xlane.f32.xlu0 %v341_v60  ;;  %v354_v60 = vld [vmem:[%s10757_s11 + $0x328] sm:$0xff] }
 0x116   : > { %v1320_v0 = vpop.xlane.xlu1 %1319  ;;  %v4478_v1 = vsel %vm4374_vm2, %v4477_v61, %v4473_v63  ;;  %v1318_v3 = vpop.xlane.xlu0 %1317  ;;  %v353_v61 = vld [vmem:[%s10757_s11 + $0x320] sm:$0xff] }
 0x117   : > { %v4487_v8 = vrot.slane %v1320_v0, %v10875_v31  ;;  %v4482_v10 = vrot.slane %v1318_v3, %v10878_v32 }
 0x119   : > { %v4483_v11 = vsel %vm4381_vm3, %v4482_v10, %v4478_v1  ;;  %1459 = vadd.xlane.f32.xlu1 %v344_v4  ;;  %1457 = vadd.xlane.f32.xlu0 %v343_v5  ;;  %v356_v5 = vld [vmem:[%s10757_s11 + $0x338] sm:$0xff] }
 0x11a   : > { %v1324_v12 = vpop.xlane.xlu1 %1323  ;;  %v4488_v13 = vsel %vm4388_vm4, %v4487_v8, %v4483_v11  ;;  %v1322_v14 = vpop.xlane.xlu0 %1321  ;;  %v355_v8 = vld [vmem:[%s10757_s11 + $0x330] sm:$0xff] }
 0x11b   : > { %v4497_v20 = vrot.slane %v1324_v12, %v10884_v36  ;;  %v4492_v23 = vrot.slane %v1322_v14, %v10890_v42 }
 0x11d   : > { %v4493_v25 = vsel %vm4395_vm5, %v4492_v23, %v4488_v13  ;;  %1463 = vadd.xlane.f32.xlu1 %v346_v15  ;;  %1461 = vadd.xlane.f32.xlu0 %v345_v19  ;;  %v358_v15 = vld [vmem:[%s10757_s11 + $0x348] sm:$0xff]  ;;  %v357_v19 = vld [vmem:[%s10757_s11 + $0x340] sm:$0xff] }
 0x11e   : > { %v1328_v26 = vpop.xlane.xlu1 %1327  ;;  %v4498_v27 = vsel %vm4402_vm6, %v4497_v20, %v4493_v25  ;;  %v1326_v28 = vpop.xlane.xlu0 %1325 }
 0x11f   : > { %v4507_v33 = vrot.slane %v1328_v26, %v10902_v54  ;;  %v4502_v35 = vrot.slane %v1326_v28, %v10908_v58 }
 0x121   : > { %v4503_v6 = vsel %vm4409_vm7, %v4502_v35, %v4498_v27  ;;  %1467 = vadd.xlane.f32.xlu1 %v348_v29  ;;  %1465 = vadd.xlane.f32.xlu0 %v347_v30  ;;  %v360_v29 = vld [vmem:[%s10757_s11 + $0x358] sm:$0xff]  ;;  %v359_v30 = vld [vmem:[%s10757_s11 + $0x350] sm:$0xff] }
 0x122   : > { %v1332_v38 = vpop.xlane.xlu1 %1331  ;;  %v4508_v39 = vsel %vm4416_vm8, %v4507_v33, %v4503_v6  ;;  %v1330_v40 = vpop.xlane.xlu0 %1329 }
 0x123   : > { %v4517_v44 = vrot.slane %v1332_v38, %v10916_v2  ;;  %v4512_v45 = vrot.slane %v1330_v40, %v10922_v7 }
 0x125   : > { %v4513_v46 = vsel %vm4423_vm9, %v4512_v45, %v4508_v39  ;;  %1471 = vadd.xlane.f32.xlu1 %v350_v41  ;;  %1469 = vadd.xlane.f32.xlu0 %v349_v43  ;;  %v362_v41 = vld [vmem:[%s10757_s11 + $0x368] sm:$0xff]  ;;  %v361_v43 = vld [vmem:[%s10757_s11 + $0x360] sm:$0xff] }
 0x126   : > { %v1336_v9 = vpop.xlane.xlu1 %1335  ;;  %v4518_v48 = vsel %vm4430_vm10, %v4517_v44, %v4513_v46  ;;  %v1334_v49 = vpop.xlane.xlu0 %1333 }
 0x127   : > { %v4527_v52 = vrot.slane %v1336_v9, %v10930_v16  ;;  %v4522_v53 = vrot.slane %v1334_v49, %v10936_v24 }
 0x129   : > { %v4523_v55 = vsel %vm4437_vm11, %v4522_v53, %v4518_v48  ;;  %1475 = vadd.xlane.f32.xlu1 %v352_v50  ;;  %1473 = vadd.xlane.f32.xlu0 %v351_v51  ;;  %v364_v50 = vld [vmem:[%s10757_s11 + $0x378] sm:$0xff]  ;;  %v363_v51 = vld [vmem:[%s10757_s11 + $0x370] sm:$0xff] }
 0x12a   : > { %v1340_v56 = vpop.xlane.xlu1 %1339  ;;  %v4528_v57 = vsel %vm4444_vm12, %v4527_v52, %v4523_v55  ;;  %v1338_v59 = vpop.xlane.xlu0 %1337 }
 0x12b   : > { %v4537_v62 = vrot.slane %v1340_v56, %v10944_v34  ;;  %v4532_v63 = vrot.slane %v1338_v59, %v10949_v37 }
 0x12d   : > { %v4533_v0 = vsel %vm4451_vm13, %v4532_v63, %v4528_v57  ;;  %1479 = vadd.xlane.f32.xlu1 %v354_v60  ;;  %1477 = vadd.xlane.f32.xlu0 %v353_v61  ;;  %v366_v60 = vld [vmem:[%s10757_s11 + $0x388] sm:$0xff]  ;;  %v365_v61 = vld [vmem:[%s10757_s11 + $0x380] sm:$0xff] }
 0x12e   : > { %v11008_v1 = vsel %vm4458_vm14, %v4537_v62, %v4533_v0  ;;  %v1344_v3 = vpop.xlane.xlu1 %1343  ;;  %v1342_v4 = vpop.xlane.xlu0 %1341 }
 0x12f   : > { %v4546_v10 = vrot.slane %v1344_v3, %v10858_v18  ;;  %v4542_v11 = vrot.slane %v1342_v4, %v10855_v17 }
 0x131   : > { %v4547_v12 = vsel %vm4360_vm0, %v4546_v10, %v4542_v11  ;;  %1483 = vadd.xlane.f32.xlu1 %v356_v5  ;;  %1481 = vadd.xlane.f32.xlu0 %v355_v8  ;;  %v368_v8 = vld [vmem:[%s10757_s11 + $0x398] sm:$0xff]  ;;  %v367_v10 = vld [vmem:[%s10757_s11 + $0x390] sm:$0xff] }
 0x132   : > { %v1348_v13 = vpop.xlane.xlu1 %1347  ;;  %v1346_v14 = vpop.xlane.xlu0 %1345 }
 0x133   : > { %v4556_v20 = vrot.slane %v1348_v13, %v10866_v22  ;;  %v4551_v23 = vrot.slane %v1346_v14, %v10863_v21 }
 0x135   : > { %v4552_v25 = vsel %vm4367_vm1, %v4551_v23, %v4547_v12  ;;  %1487 = vadd.xlane.f32.xlu1 %v358_v15  ;;  %1485 = vadd.xlane.f32.xlu0 %v357_v19  ;;  %v369_v23 = vld [vmem:[%s10757_s11 + $0x3a0] sm:$0xff] }
 0x136   : > { %v1352_v26 = vpop.xlane.xlu1 %1351  ;;  %v4557_v27 = vsel %vm4374_vm2, %v4556_v20, %v4552_v25  ;;  %v1350_v28 = vpop.xlane.xlu0 %1349  ;;  %v370_v20 = vld [vmem:[%s10757_s11 + $0x3a8] sm:$0xff] }
 0x137   : > { %v4566_v33 = vrot.slane %v1352_v26, %v10875_v31  ;;  %v4561_v35 = vrot.slane %v1350_v28, %v10878_v32 }
 0x139   : > { %v4562_v6 = vsel %vm4381_vm3, %v4561_v35, %v4557_v27  ;;  %1491 = vadd.xlane.f32.xlu1 %v360_v29  ;;  %1489 = vadd.xlane.f32.xlu0 %v359_v30  ;;  %v371_v35 = vld [vmem:[%s10757_s11 + $0x3b0] sm:$0xff] }
 0x13a   : > { %v1356_v38 = vpop.xlane.xlu1 %1355  ;;  %v4567_v39 = vsel %vm4388_vm4, %v4566_v33, %v4562_v6  ;;  %v1354_v40 = vpop.xlane.xlu0 %1353  ;;  %v372_v33 = vld [vmem:[%s10757_s11 + $0x3b8] sm:$0xff] }
 0x13b   : > { %v4576_v44 = vrot.slane %v1356_v38, %v10884_v36  ;;  %v4571_v45 = vrot.slane %v1354_v40, %v10890_v42 }
 0x13d   : > { %v4572_v46 = vsel %vm4395_vm5, %v4571_v45, %v4567_v39  ;;  %1495 = vadd.xlane.f32.xlu1 %v362_v41  ;;  %1493 = vadd.xlane.f32.xlu0 %v361_v43  ;;  %v374_v43 = vld [vmem:[%s10757_s11 + $0x3c8] sm:$0xff] }
 0x13e   : > { %v1360_v9 = vpop.xlane.xlu1 %1359  ;;  %v4577_v48 = vsel %vm4402_vm6, %v4576_v44, %v4572_v46  ;;  %v1358_v49 = vpop.xlane.xlu0 %1357  ;;  %v373_v44 = vld [vmem:[%s10757_s11 + $0x3c0] sm:$0xff] }
 0x13f   : > { %v4586_v52 = vrot.slane %v1360_v9, %v10902_v54  ;;  %v4581_v53 = vrot.slane %v1358_v49, %v10908_v58 }
 0x141   : > { %v4582_v55 = vsel %vm4409_vm7, %v4581_v53, %v4577_v48  ;;  %1499 = vadd.xlane.f32.xlu1 %v364_v50  ;;  %1497 = vadd.xlane.f32.xlu0 %v363_v51  ;;  %v376_v51 = vld [vmem:[%s10757_s11 + $0x3d8] sm:$0xff] }
 0x142   : > { %v1364_v56 = vpop.xlane.xlu1 %1363  ;;  %v4587_v57 = vsel %vm4416_vm8, %v4586_v52, %v4582_v55  ;;  %v1362_v59 = vpop.xlane.xlu0 %1361  ;;  %v375_v52 = vld [vmem:[%s10757_s11 + $0x3d0] sm:$0xff] }
 0x143   : > { %v4596_v62 = vrot.slane %v1364_v56, %v10916_v2  ;;  %v4591_v63 = vrot.slane %v1362_v59, %v10922_v7 }
 0x145   : > { %v4592_v0 = vsel %vm4423_vm9, %v4591_v63, %v4587_v57  ;;  %1503 = vadd.xlane.f32.xlu1 %v366_v60  ;;  %1501 = vadd.xlane.f32.xlu0 %v365_v61  ;;  %v378_v61 = vld [vmem:[%s10757_s11 + $0x3e8] sm:$0xff] }
 0x146   : > { %v1368_v3 = vpop.xlane.xlu1 %1367  ;;  %v4597_v4 = vsel %vm4430_vm10, %v4596_v62, %v4592_v0  ;;  %v1366_v5 = vpop.xlane.xlu0 %1365  ;;  %v377_v62 = vld [vmem:[%s10757_s11 + $0x3e0] sm:$0xff] }
 0x147   : > { %v4606_v11 = vrot.slane %v1368_v3, %v10930_v16  ;;  %v4601_v12 = vrot.slane %v1366_v5, %v10936_v24 }
 0x149   : > { %v4602_v13 = vsel %vm4437_vm11, %v4601_v12, %v4597_v4  ;;  %1507 = vadd.xlane.f32.xlu1 %v368_v8  ;;  %1505 = vadd.xlane.f32.xlu0 %v367_v10  ;;  %v380_v10 = vld [vmem:[%s10757_s11 + $0x3f8] sm:$0xff] }
 0x14a   : > { %v1372_v14 = vpop.xlane.xlu1 %1371  ;;  %v4607_v15 = vsel %vm4444_vm12, %v4606_v11, %v4602_v13  ;;  %v1370_v19 = vpop.xlane.xlu0 %1369  ;;  %v379_v11 = vld [vmem:[%s10757_s11 + $0x3f0] sm:$0xff] }
 0x14b   : > { %v4616_v25 = vrot.slane %v1372_v14, %v10944_v34  ;;  %v4611_v26 = vrot.slane %v1370_v19, %v10949_v37 }
 0x14d   : > { %v4612_v27 = vsel %vm4451_vm13, %v4611_v26, %v4607_v15  ;;  %1511 = vadd.xlane.f32.xlu1 %v370_v20  ;;  %1509 = vadd.xlane.f32.xlu0 %v369_v23  ;;  %v382_v23 = vld [vmem:[%s10757_s11 + $0x408] sm:$0xff] }
 0x14e   : > { %v11057_v28 = vsel %vm4458_vm14, %v4616_v25, %v4612_v27  ;;  %v1376_v29 = vpop.xlane.xlu1 %1375  ;;  %v1374_v30 = vpop.xlane.xlu0 %1373  ;;  %v381_v25 = vld [vmem:[%s10757_s11 + $0x400] sm:$0xff] }
 0x14f   : > { %v4625_v6 = vrot.slane %v1376_v29, %v10858_v18  ;;  %v4621_v38 = vrot.slane %v1374_v30, %v10855_v17 }
 0x151   : > { %v4626_v39 = vsel %vm4360_vm0, %v4625_v6, %v4621_v38  ;;  %1515 = vadd.xlane.f32.xlu1 %v372_v33  ;;  %1513 = vadd.xlane.f32.xlu0 %v371_v35  ;;  %v384_v6 = vld [vmem:[%s10757_s11 + $0x418] sm:$0xff]  ;;  %v383_v38 = vld [vmem:[%s10757_s11 + $0x410] sm:$0xff] }
 0x152   : > { %v1380_v40 = vpop.xlane.xlu1 %1379  ;;  %v1378_v41 = vpop.xlane.xlu0 %1377 }
 0x153   : > { %v4635_v45 = vrot.slane %v1380_v40, %v10866_v22  ;;  %v4630_v46 = vrot.slane %v1378_v41, %v10863_v21 }
 0x155   : > { %v4631_v9 = vsel %vm4367_vm1, %v4630_v46, %v4626_v39  ;;  %1519 = vadd.xlane.f32.xlu1 %v374_v43  ;;  %1517 = vadd.xlane.f32.xlu0 %v373_v44  ;;  %v386_v46 = vld [vmem:[%s10757_s11 + $0x428] sm:$0xff] }
 0x156   : > { %v1384_v48 = vpop.xlane.xlu1 %1383  ;;  %v4636_v49 = vsel %vm4374_vm2, %v4635_v45, %v4631_v9  ;;  %v1382_v50 = vpop.xlane.xlu0 %1381  ;;  %v385_v9 = vld [vmem:[%s10757_s11 + $0x420] sm:$0xff] }
 0x157   : > { %v4645_v53 = vrot.slane %v1384_v48, %v10875_v31  ;;  %v4640_v55 = vrot.slane %v1382_v50, %v10878_v32 }
 0x159   : > { %v4641_v56 = vsel %vm4381_vm3, %v4640_v55, %v4636_v49  ;;  %1523 = vadd.xlane.f32.xlu1 %v376_v51  ;;  %1521 = vadd.xlane.f32.xlu0 %v375_v52  ;;  %v388_v55 = vld [vmem:[%s10757_s11 + $0x438] sm:$0xff] }
 0x15a   : > { %v1388_v57 = vpop.xlane.xlu1 %1387  ;;  %v4646_v59 = vsel %vm4388_vm4, %v4645_v53, %v4641_v56  ;;  %v1386_v60 = vpop.xlane.xlu0 %1385  ;;  %v387_v56 = vld [vmem:[%s10757_s11 + $0x430] sm:$0xff] }
 0x15b   : > { %v4655_v63 = vrot.slane %v1388_v57, %v10884_v36  ;;  %v4650_v0 = vrot.slane %v1386_v60, %v10890_v42 }
 0x15d   : > { %v4651_v3 = vsel %vm4395_vm5, %v4650_v0, %v4646_v59  ;;  %1527 = vadd.xlane.f32.xlu1 %v378_v61  ;;  %1525 = vadd.xlane.f32.xlu0 %v377_v62  ;;  %v389_v0 = vld [vmem:[%s10757_s11 + $0x440] sm:$0xff] }
 0x15e   : > { %v1392_v4 = vpop.xlane.xlu1 %1391  ;;  %v4656_v5 = vsel %vm4402_vm6, %v4655_v63, %v4651_v3  ;;  %v1390_v8 = vpop.xlane.xlu0 %1389  ;;  %v390_v63 = vld [vmem:[%s10757_s11 + $0x448] sm:$0xff] }
 0x15f   : > { %v4665_v12 = vrot.slane %v1392_v4, %v10902_v54  ;;  %v4660_v13 = vrot.slane %v1390_v8, %v10908_v58 }
 0x161   : > { %v4661_v14 = vsel %vm4409_vm7, %v4660_v13, %v4656_v5  ;;  %1531 = vadd.xlane.f32.xlu1 %v380_v10  ;;  %1529 = vadd.xlane.f32.xlu0 %v379_v11  ;;  %v391_v13 = vld [vmem:[%s10757_s11 + $0x450] sm:$0xff] }
 0x162   : > { %v1396_v15 = vpop.xlane.xlu1 %1395  ;;  %v4666_v19 = vsel %vm4416_vm8, %v4665_v12, %v4661_v14  ;;  %v1394_v20 = vpop.xlane.xlu0 %1393  ;;  %v392_v12 = vld [vmem:[%s10757_s11 + $0x458] sm:$0xff] }
 0x163   : > { %v4675_v26 = vrot.slane %v1396_v15, %v10916_v2  ;;  %v4670_v27 = vrot.slane %v1394_v20, %v10922_v7 }
 0x165   : > { %v4671_v29 = vsel %vm4423_vm9, %v4670_v27, %v4666_v19  ;;  %1535 = vadd.xlane.f32.xlu1 %v382_v23  ;;  %1533 = vadd.xlane.f32.xlu0 %v381_v25  ;;  %v393_v27 = vld [vmem:[%s10757_s11 + $0x460] sm:$0xff] }
 0x166   : > { %v1400_v30 = vpop.xlane.xlu1 %1399  ;;  %v4676_v33 = vsel %vm4430_vm10, %v4675_v26, %v4671_v29  ;;  %v1398_v35 = vpop.xlane.xlu0 %1397  ;;  %v394_v26 = vld [vmem:[%s10757_s11 + $0x468] sm:$0xff] }
 0x167   : > { %v4685_v39 = vrot.slane %v1400_v30, %v10930_v16  ;;  %v4680_v40 = vrot.slane %v1398_v35, %v10936_v24 }
 0x169   : > { %v4681_v41 = vsel %vm4437_vm11, %v4680_v40, %v4676_v33  ;;  %1539 = vadd.xlane.f32.xlu1 %v384_v6  ;;  %1537 = vadd.xlane.f32.xlu0 %v383_v38  ;;  %v395_v40 = vld [vmem:[%s10757_s11 + $0x470] sm:$0xff] }
 0x16a   : > { %v1404_v43 = vpop.xlane.xlu1 %1403  ;;  %v4686_v44 = vsel %vm4444_vm12, %v4685_v39, %v4681_v41  ;;  %v1402_v45 = vpop.xlane.xlu0 %1401  ;;  %v396_v39 = vld [vmem:[%s10757_s11 + $0x478] sm:$0xff] }
 0x16b   : > { %v4695_v48 = vrot.slane %v1404_v43, %v10944_v34  ;;  %v4690_v49 = vrot.slane %v1402_v45, %v10949_v37 }
 0x16d   : > { %v4691_v50 = vsel %vm4451_vm13, %v4690_v49, %v4686_v44  ;;  %1543 = vadd.xlane.f32.xlu1 %v386_v46  ;;  %1541 = vadd.xlane.f32.xlu0 %v385_v9  ;;  %v397_v49 = vld [vmem:[%s10757_s11 + $0x480] sm:$0xff] }
 0x16e   : > { %v11106_v51 = vsel %vm4458_vm14, %v4695_v48, %v4691_v50  ;;  %v1408_v52 = vpop.xlane.xlu1 %1407  ;;  %v1406_v53 = vpop.xlane.xlu0 %1405  ;;  %v398_v48 = vld [vmem:[%s10757_s11 + $0x488] sm:$0xff] }
 0x16f   : > { %v4704_v57 = vrot.slane %v1408_v52, %v10858_v18  ;;  %v4700_v59 = vrot.slane %v1406_v53, %v10855_v17 }
 0x171   : > { %v4705_v60 = vsel %vm4360_vm0, %v4704_v57, %v4700_v59  ;;  %1547 = vadd.xlane.f32.xlu1 %v388_v55  ;;  %1545 = vadd.xlane.f32.xlu0 %v387_v56  ;;  %v400_v59 = vld [vmem:[%s10757_s11 + $0x498] sm:$0xff] }
 0x172   : > { %v1412_v61 = vpop.xlane.xlu1 %1411  ;;  %v1410_v62 = vpop.xlane.xlu0 %1409 }
 0x173   : > { %v4714_v3 = vrot.slane %v1412_v61, %v10866_v22  ;;  %v4709_v4 = vrot.slane %v1410_v62, %v10863_v21 }
 0x175   : > { %v4710_v5 = vsel %vm4367_vm1, %v4709_v4, %v4705_v60  ;;  %1551 = vadd.xlane.f32.xlu1 %v390_v63  ;;  %1549 = vadd.xlane.f32.xlu0 %v389_v0  ;;  %v399_v60 = vld [vmem:[%s10757_s11 + $0x490] sm:$0xff] }
 0x176   : > { %v1416_v8 = vpop.xlane.xlu1 %1415  ;;  %v4715_v10 = vsel %vm4374_vm2, %v4714_v3, %v4710_v5  ;;  %v1414_v11 = vpop.xlane.xlu0 %1413  ;;  %v402_v5 = vld [vmem:[%s10757_s11 + $0x4a8] sm:$0xff] }
 0x177   : > { %v4724_v14 = vrot.slane %v1416_v8, %v10875_v31  ;;  %v4719_v15 = vrot.slane %v1414_v11, %v10878_v32  ;;  %v401_v8 = vld [vmem:[%s10757_s11 + $0x4a0] sm:$0xff] }
 0x179   : > { %v4720_v19 = vsel %vm4381_vm3, %v4719_v15, %v4715_v10  ;;  %1555 = vadd.xlane.f32.xlu1 %v392_v12  ;;  %1553 = vadd.xlane.f32.xlu0 %v391_v13 }
 0x17a   : > { %v1420_v20 = vpop.xlane.xlu1 %1419  ;;  %v4725_v23 = vsel %vm4388_vm4, %v4724_v14, %v4720_v19  ;;  %v1418_v25 = vpop.xlane.xlu0 %1417  ;;  %v404_v19 = vld [vmem:[%s10757_s11 + $0x4b8] sm:$0xff] }
 0x17b   : > { %v4734_v29 = vrot.slane %v1420_v20, %v10884_v36  ;;  %v4729_v30 = vrot.slane %v1418_v25, %v10890_v42  ;;  %v403_v20 = vld [vmem:[%s10757_s11 + $0x4b0] sm:$0xff] }
 0x17d   : > { %v4730_v33 = vsel %vm4395_vm5, %v4729_v30, %v4725_v23  ;;  %1559 = vadd.xlane.f32.xlu1 %v394_v26  ;;  %1557 = vadd.xlane.f32.xlu0 %v393_v27  ;;  %v406_v30 = vld [vmem:[%s10757_s11 + $0x4c8] sm:$0xff] }
 0x17e   : > { %v1424_v35 = vpop.xlane.xlu1 %1423  ;;  %v4735_v6 = vsel %vm4402_vm6, %v4734_v29, %v4730_v33  ;;  %v1422_v38 = vpop.xlane.xlu0 %1421  ;;  %v405_v33 = vld [vmem:[%s10757_s11 + $0x4c0] sm:$0xff] }
 0x17f   : > { %v4744_v41 = vrot.slane %v1424_v35, %v10902_v54  ;;  %v4739_v43 = vrot.slane %v1422_v38, %v10908_v58 }
 0x181   : > { %v4740_v44 = vsel %vm4409_vm7, %v4739_v43, %v4735_v6  ;;  %1563 = vadd.xlane.f32.xlu1 %v396_v39  ;;  %1561 = vadd.xlane.f32.xlu0 %v395_v40  ;;  %v408_v43 = vld [vmem:[%s10757_s11 + $0x4d8] sm:$0xff] }
 0x182   : > { %v1428_v45 = vpop.xlane.xlu1 %1427  ;;  %v4745_v46 = vsel %vm4416_vm8, %v4744_v41, %v4740_v44  ;;  %v1426_v9 = vpop.xlane.xlu0 %1425  ;;  %v407_v44 = vld [vmem:[%s10757_s11 + $0x4d0] sm:$0xff] }
 0x183   : > { %v4754_v50 = vrot.slane %v1428_v45, %v10916_v2  ;;  %v4749_v52 = vrot.slane %v1426_v9, %v10922_v7 }
 0x185   : > { %v4750_v53 = vsel %vm4423_vm9, %v4749_v52, %v4745_v46  ;;  %1567 = vadd.xlane.f32.xlu1 %v398_v48  ;;  %1565 = vadd.xlane.f32.xlu0 %v397_v49  ;;  %v410_v52 = vld [vmem:[%s10757_s11 + $0x4e8] sm:$0xff] }
 0x186   : > { %v1432_v55 = vpop.xlane.xlu1 %1431  ;;  %v4755_v56 = vsel %vm4430_vm10, %v4754_v50, %v4750_v53  ;;  %v1430_v57 = vpop.xlane.xlu0 %1429  ;;  %v409_v53 = vld [vmem:[%s10757_s11 + $0x4e0] sm:$0xff] }
 0x187   : > { %v4764_v61 = vrot.slane %v1432_v55, %v10930_v16  ;;  %v4759_v62 = vrot.slane %v1430_v57, %v10936_v24 }
 0x189   : > { %v4760_v63 = vsel %vm4437_vm11, %v4759_v62, %v4755_v56  ;;  %1571 = vadd.xlane.f32.xlu1 %v400_v59  ;;  %1569 = vadd.xlane.f32.xlu0 %v399_v60  ;;  %v412_v62 = vld [vmem:[%s10757_s11 + $0x4f8] sm:$0xff] }
 0x18a   : > { %v1436_v0 = vpop.xlane.xlu1 %1435  ;;  %v4765_v3 = vsel %vm4444_vm12, %v4764_v61, %v4760_v63  ;;  %v1434_v4 = vpop.xlane.xlu0 %1433  ;;  %v411_v63 = vld [vmem:[%s10757_s11 + $0x4f0] sm:$0xff] }
 0x18b   : > { %v4774_v10 = vrot.slane %v1436_v0, %v10944_v34  ;;  %v4769_v11 = vrot.slane %v1434_v4, %v10949_v37 }
 0x18d   : > { %v4770_v12 = vsel %vm4451_vm13, %v4769_v11, %v4765_v3  ;;  %1575 = vadd.xlane.f32.xlu1 %v402_v5  ;;  %1573 = vadd.xlane.f32.xlu0 %v401_v8  ;;  %v414_v11 = vld [vmem:[%s10757_s11 + $0x508] sm:$0xff] }
 0x18e   : > { %v11155_v13 = vsel %vm4458_vm14, %v4774_v10, %v4770_v12  ;;  %v1440_v14 = vpop.xlane.xlu1 %1439  ;;  %v1438_v15 = vpop.xlane.xlu0 %1437  ;;  %v413_v12 = vld [vmem:[%s10757_s11 + $0x500] sm:$0xff] }
 0x18f   : > { %v4783_v23 = vrot.slane %v1440_v14, %v10858_v18  ;;  %v4779_v25 = vrot.slane %v1438_v15, %v10855_v17 }
 0x191   : > { %v4784_v26 = vsel %vm4360_vm0, %v4783_v23, %v4779_v25  ;;  %1579 = vadd.xlane.f32.xlu1 %v404_v19  ;;  %1577 = vadd.xlane.f32.xlu0 %v403_v20 }
 0x192   : > { %v1444_v27 = vpop.xlane.xlu1 %1443  ;;  %v1442_v29 = vpop.xlane.xlu0 %1441 }
 0x193   : > { %v4793_v35 = vrot.slane %v1444_v27, %v10866_v22  ;;  %v4788_v6 = vrot.slane %v1442_v29, %v10863_v21  ;;  %v415_v27 = vld [vmem:[%s10757_s11 + $0x510] sm:$0xff] }
 0x195   : > { %v4789_v38 = vsel %vm4367_vm1, %v4788_v6, %v4784_v26  ;;  %1583 = vadd.xlane.f32.xlu1 %v406_v30  ;;  %1581 = vadd.xlane.f32.xlu0 %v405_v33  ;;  %v416_v26 = vld [vmem:[%s10757_s11 + $0x518] sm:$0xff] }
 0x196   : > { %v1448_v39 = vpop.xlane.xlu1 %1447  ;;  %v4794_v40 = vsel %vm4374_vm2, %v4793_v35, %v4789_v38  ;;  %v1446_v41 = vpop.xlane.xlu0 %1445 }
 0x197   : > { %v4803_v45 = vrot.slane %v1448_v39, %v10875_v31  ;;  %v4798_v46 = vrot.slane %v1446_v41, %v10878_v32  ;;  %v418_v39 = vld [vmem:[%s10757_s11 + $0x528] sm:$0xff] }
 0x199   : > { %v4799_v9 = vsel %vm4381_vm3, %v4798_v46, %v4794_v40  ;;  %1587 = vadd.xlane.f32.xlu1 %v408_v43  ;;  %1585 = vadd.xlane.f32.xlu0 %v407_v44  ;;  %v417_v40 = vld [vmem:[%s10757_s11 + $0x520] sm:$0xff] }
 0x19a   : > { %v1452_v48 = vpop.xlane.xlu1 %1451  ;;  %v4804_v49 = vsel %vm4388_vm4, %v4803_v45, %v4799_v9  ;;  %v1450_v50 = vpop.xlane.xlu0 %1449 }
 0x19b   : > { %v4813_v55 = vrot.slane %v1452_v48, %v10884_v36  ;;  %v4808_v56 = vrot.slane %v1450_v50, %v10890_v42  ;;  %v420_v48 = vld [vmem:[%s10757_s11 + $0x538] sm:$0xff] }
 0x19d   : > { %v4809_v57 = vsel %vm4395_vm5, %v4808_v56, %v4804_v49  ;;  %1591 = vadd.xlane.f32.xlu1 %v410_v52  ;;  %1589 = vadd.xlane.f32.xlu0 %v409_v53  ;;  %v419_v49 = vld [vmem:[%s10757_s11 + $0x530] sm:$0xff] }
 0x19e   : > { %v1456_v59 = vpop.xlane.xlu1 %1455  ;;  %v4814_v60 = vsel %vm4402_vm6, %v4813_v55, %v4809_v57  ;;  %v1454_v61 = vpop.xlane.xlu0 %1453  ;;  %v422_v57 = vld [vmem:[%s10757_s11 + $0x548] sm:$0xff] }
 0x19f   : > { %v4823_v0 = vrot.slane %v1456_v59, %v10902_v54  ;;  %v4818_v3 = vrot.slane %v1454_v61, %v10908_v58  ;;  %v421_v59 = vld [vmem:[%s10757_s11 + $0x540] sm:$0xff] }
 0x1a1   : > { %v4819_v4 = vsel %vm4409_vm7, %v4818_v3, %v4814_v60  ;;  %1595 = vadd.xlane.f32.xlu1 %v412_v62  ;;  %1593 = vadd.xlane.f32.xlu0 %v411_v63 }
 0x1a2   : > { %v1460_v5 = vpop.xlane.xlu1 %1459  ;;  %v4824_v8 = vsel %vm4416_vm8, %v4823_v0, %v4819_v4  ;;  %v1458_v10 = vpop.xlane.xlu0 %1457  ;;  %v424_v4 = vld [vmem:[%s10757_s11 + $0x558] sm:$0xff] }
 0x1a3   : > { %v4833_v14 = vrot.slane %v1460_v5, %v10916_v2  ;;  %v4828_v15 = vrot.slane %v1458_v10, %v10922_v7  ;;  %v423_v5 = vld [vmem:[%s10757_s11 + $0x550] sm:$0xff] }
 0x1a5   : > { %v4829_v19 = vsel %vm4423_vm9, %v4828_v15, %v4824_v8  ;;  %1599 = vadd.xlane.f32.xlu1 %v414_v11  ;;  %1597 = vadd.xlane.f32.xlu0 %v413_v12 }
 0x1a6   : > { %v1464_v20 = vpop.xlane.xlu1 %1463  ;;  %v4834_v23 = vsel %vm4430_vm10, %v4833_v14, %v4829_v19  ;;  %v1462_v25 = vpop.xlane.xlu0 %1461  ;;  %v426_v19 = vld [vmem:[%s10757_s11 + $0x568] sm:$0xff] }
 0x1a7   : > { %v4843_v29 = vrot.slane %v1464_v20, %v10930_v16  ;;  %v4838_v30 = vrot.slane %v1462_v25, %v10936_v24  ;;  %v425_v20 = vld [vmem:[%s10757_s11 + $0x560] sm:$0xff] }
 0x1a9   : > { %v4839_v33 = vsel %vm4437_vm11, %v4838_v30, %v4834_v23  ;;  %1603 = vadd.xlane.f32.xlu1 %v416_v26  ;;  %1601 = vadd.xlane.f32.xlu0 %v415_v27 }
 0x1aa   : > { %v1468_v35 = vpop.xlane.xlu1 %1467  ;;  %v4844_v6 = vsel %vm4444_vm12, %v4843_v29, %v4839_v33  ;;  %v1466_v38 = vpop.xlane.xlu0 %1465  ;;  %v428_v33 = vld [vmem:[%s10757_s11 + $0x578] sm:$0xff] }
 0x1ab   : > { %v4853_v41 = vrot.slane %v1468_v35, %v10944_v34  ;;  %v4848_v43 = vrot.slane %v1466_v38, %v10949_v37  ;;  %v427_v35 = vld [vmem:[%s10757_s11 + $0x570] sm:$0xff] }
 0x1ad   : > { %v4849_v44 = vsel %vm4451_vm13, %v4848_v43, %v4844_v6  ;;  %1607 = vadd.xlane.f32.xlu1 %v418_v39  ;;  %1605 = vadd.xlane.f32.xlu0 %v417_v40 }
 0x1ae   : > { %v11204_v45 = vsel %vm4458_vm14, %v4853_v41, %v4849_v44  ;;  %v1472_v46 = vpop.xlane.xlu1 %1471  ;;  %v1470_v9 = vpop.xlane.xlu0 %1469  ;;  %v430_v44 = vld [vmem:[%s10757_s11 + $0x588] sm:$0xff] }
 0x1af   : > { %v4862_v50 = vrot.slane %v1472_v46, %v10858_v18  ;;  %v4858_v52 = vrot.slane %v1470_v9, %v10855_v17  ;;  %v429_v46 = vld [vmem:[%s10757_s11 + $0x580] sm:$0xff] }
 0x1b1   : > { %v4863_v53 = vsel %vm4360_vm0, %v4862_v50, %v4858_v52  ;;  %1611 = vadd.xlane.f32.xlu1 %v420_v48  ;;  %1609 = vadd.xlane.f32.xlu0 %v419_v49 }
 0x1b2   : > { %v1476_v55 = vpop.xlane.xlu1 %1475  ;;  %v1474_v56 = vpop.xlane.xlu0 %1473 }
 0x1b3   : > { %v4872_v60 = vrot.slane %v1476_v55, %v10866_v22  ;;  %v4867_v61 = vrot.slane %v1474_v56, %v10863_v21  ;;  %v432_v55 = vld [vmem:[%s10757_s11 + $0x598] sm:$0xff]  ;;  %v431_v56 = vld [vmem:[%s10757_s11 + $0x590] sm:$0xff] }
 0x1b5   : > { %v4868_v62 = vsel %vm4367_vm1, %v4867_v61, %v4863_v53  ;;  %1615 = vadd.xlane.f32.xlu1 %v422_v57  ;;  %1613 = vadd.xlane.f32.xlu0 %v421_v59 }
 0x1b6   : > { %v1480_v63 = vpop.xlane.xlu1 %1479  ;;  %v4873_v0 = vsel %vm4374_vm2, %v4872_v60, %v4868_v62  ;;  %v1478_v3 = vpop.xlane.xlu0 %1477 }
 0x1b7   : > { %v4882_v8 = vrot.slane %v1480_v63, %v10875_v31  ;;  %v4877_v10 = vrot.slane %v1478_v3, %v10878_v32  ;;  %v433_v3 = vld [vmem:[%s10757_s11 + $0x5a0] sm:$0xff] }
 0x1b9   : > { %v4878_v11 = vsel %vm4381_vm3, %v4877_v10, %v4873_v0  ;;  %1619 = vadd.xlane.f32.xlu1 %v424_v4  ;;  %1617 = vadd.xlane.f32.xlu0 %v423_v5  ;;  %v434_v0 = vld [vmem:[%s10757_s11 + $0x5a8] sm:$0xff] }
 0x1ba   : > { %v1484_v12 = vpop.xlane.xlu1 %1483  ;;  %v4883_v14 = vsel %vm4388_vm4, %v4882_v8, %v4878_v11  ;;  %v1482_v15 = vpop.xlane.xlu0 %1481 }
 0x1bb   : > { %v4892_v23 = vrot.slane %v1484_v12, %v10884_v36  ;;  %v4887_v25 = vrot.slane %v1482_v15, %v10890_v42  ;;  %v435_v15 = vld [vmem:[%s10757_s11 + $0x5b0] sm:$0xff] }
 0x1bd   : > { %v4888_v26 = vsel %vm4395_vm5, %v4887_v25, %v4883_v14  ;;  %1623 = vadd.xlane.f32.xlu1 %v426_v19  ;;  %1621 = vadd.xlane.f32.xlu0 %v425_v20  ;;  %v436_v14 = vld [vmem:[%s10757_s11 + $0x5b8] sm:$0xff] }
 0x1be   : > { %v1488_v27 = vpop.xlane.xlu1 %1487  ;;  %v4893_v29 = vsel %vm4402_vm6, %v4892_v23, %v4888_v26  ;;  %v1486_v30 = vpop.xlane.xlu0 %1485 }
 0x1bf   : > { %v4902_v6 = vrot.slane %v1488_v27, %v10902_v54  ;;  %v4897_v38 = vrot.slane %v1486_v30, %v10908_v58  ;;  %v438_v27 = vld [vmem:[%s10757_s11 + $0x5c8] sm:$0xff] }
 0x1c1   : > { %v4898_v39 = vsel %vm4409_vm7, %v4897_v38, %v4893_v29  ;;  %1627 = vadd.xlane.f32.xlu1 %v428_v33  ;;  %1625 = vadd.xlane.f32.xlu0 %v427_v35  ;;  %v437_v29 = vld [vmem:[%s10757_s11 + $0x5c0] sm:$0xff] }
 0x1c2   : > { %v1492_v40 = vpop.xlane.xlu1 %1491  ;;  %v4903_v41 = vsel %vm4416_vm8, %v4902_v6, %v4898_v39  ;;  %v1490_v43 = vpop.xlane.xlu0 %1489 }
 0x1c3   : > { %v4912_v9 = vrot.slane %v1492_v40, %v10916_v2  ;;  %v4907_v48 = vrot.slane %v1490_v43, %v10922_v7  ;;  %v440_v40 = vld [vmem:[%s10757_s11 + $0x5d8] sm:$0xff] }
 0x1c5   : > { %v4908_v49 = vsel %vm4423_vm9, %v4907_v48, %v4903_v41  ;;  %1631 = vadd.xlane.f32.xlu1 %v430_v44  ;;  %1629 = vadd.xlane.f32.xlu0 %v429_v46  ;;  %v439_v41 = vld [vmem:[%s10757_s11 + $0x5d0] sm:$0xff] }
 0x1c6   : > { %v1496_v50 = vpop.xlane.xlu1 %1495  ;;  %v4913_v52 = vsel %vm4430_vm10, %v4912_v9, %v4908_v49  ;;  %v1494_v53 = vpop.xlane.xlu0 %1493 }
 0x1c7   : > { %v4922_v57 = vrot.slane %v1496_v50, %v10930_v16  ;;  %v4917_v59 = vrot.slane %v1494_v53, %v10936_v24  ;;  %v442_v50 = vld [vmem:[%s10757_s11 + $0x5e8] sm:$0xff] }
 0x1c9   : > { %v4918_v60 = vsel %vm4437_vm11, %v4917_v59, %v4913_v52  ;;  %1635 = vadd.xlane.f32.xlu1 %v432_v55  ;;  %1633 = vadd.xlane.f32.xlu0 %v431_v56  ;;  %v441_v52 = vld [vmem:[%s10757_s11 + $0x5e0] sm:$0xff] }
 0x1ca   : > { %v1500_v61 = vpop.xlane.xlu1 %1499  ;;  %v4923_v62 = vsel %vm4444_vm12, %v4922_v57, %v4918_v60  ;;  %v1498_v63 = vpop.xlane.xlu0 %1497 }
 0x1cb   : > { %v4932_v4 = vrot.slane %v1500_v61, %v10944_v34  ;;  %v4927_v5 = vrot.slane %v1498_v63, %v10949_v37  ;;  %v444_v61 = vld [vmem:[%s10757_s11 + $0x5f8] sm:$0xff] }
 0x1cd   : > { %v4928_v8 = vsel %vm4451_vm13, %v4927_v5, %v4923_v62  ;;  %1639 = vadd.xlane.f32.xlu1 %v434_v0  ;;  %1637 = vadd.xlane.f32.xlu0 %v433_v3  ;;  %v443_v62 = vld [vmem:[%s10757_s11 + $0x5f0] sm:$0xff] }
 0x1ce   : > { %v11253_v10 = vsel %vm4458_vm14, %v4932_v4, %v4928_v8  ;;  %v1504_v11 = vpop.xlane.xlu1 %1503  ;;  %v1502_v12 = vpop.xlane.xlu0 %1501 }
 0x1cf   : > { %v4941_v19 = vrot.slane %v1504_v11, %v10858_v18  ;;  %v4937_v20 = vrot.slane %v1502_v12, %v10855_v17  ;;  %v446_v11 = vld [vmem:[%s10757_s11 + $0x608] sm:$0xff]  ;;  %v445_v12 = vld [vmem:[%s10757_s11 + $0x600] sm:$0xff] }
 0x1d1   : > { %v4942_v23 = vsel %vm4360_vm0, %v4941_v19, %v4937_v20  ;;  %1643 = vadd.xlane.f32.xlu1 %v436_v14  ;;  %1641 = vadd.xlane.f32.xlu0 %v435_v15 }
 0x1d2   : > { %v1508_v25 = vpop.xlane.xlu1 %1507  ;;  %v1506_v26 = vpop.xlane.xlu0 %1505 }
 0x1d3   : > { %v4951_v30 = vrot.slane %v1508_v25, %v10866_v22  ;;  %v4946_v33 = vrot.slane %v1506_v26, %v10863_v21  ;;  %v448_v26 = vld [vmem:[%s10757_s11 + $0x618] sm:$0xff] }
 0x1d5   : > { %v4947_v35 = vsel %vm4367_vm1, %v4946_v33, %v4942_v23  ;;  %1647 = vadd.xlane.f32.xlu1 %v438_v27  ;;  %1645 = vadd.xlane.f32.xlu0 %v437_v29  ;;  %v447_v27 = vld [vmem:[%s10757_s11 + $0x610] sm:$0xff] }
 0x1d6   : > { %v1512_v6 = vpop.xlane.xlu1 %1511  ;;  %v4952_v38 = vsel %vm4374_vm2, %v4951_v30, %v4947_v35  ;;  %v1510_v39 = vpop.xlane.xlu0 %1509 }
 0x1d7   : > { %v4961_v43 = vrot.slane %v1512_v6, %v10875_v31  ;;  %v4956_v44 = vrot.slane %v1510_v39, %v10878_v32  ;;  %v450_v39 = vld [vmem:[%s10757_s11 + $0x628] sm:$0xff] }
 0x1d9   : > { %v4957_v46 = vsel %vm4381_vm3, %v4956_v44, %v4952_v38  ;;  %1651 = vadd.xlane.f32.xlu1 %v440_v40  ;;  %1649 = vadd.xlane.f32.xlu0 %v439_v41  ;;  %v449_v40 = vld [vmem:[%s10757_s11 + $0x620] sm:$0xff] }
 0x1da   : > { %v1516_v9 = vpop.xlane.xlu1 %1515  ;;  %v4962_v48 = vsel %vm4388_vm4, %v4961_v43, %v4957_v46  ;;  %v1514_v49 = vpop.xlane.xlu0 %1513 }
 0x1db   : > { %v4971_v53 = vrot.slane %v1516_v9, %v10884_v36  ;;  %v4966_v55 = vrot.slane %v1514_v49, %v10890_v42  ;;  %v452_v49 = vld [vmem:[%s10757_s11 + $0x638] sm:$0xff] }
 0x1dd   : > { %v4967_v56 = vsel %vm4395_vm5, %v4966_v55, %v4962_v48  ;;  %1655 = vadd.xlane.f32.xlu1 %v442_v50  ;;  %1653 = vadd.xlane.f32.xlu0 %v441_v52  ;;  %v451_v50 = vld [vmem:[%s10757_s11 + $0x630] sm:$0xff] }
 0x1de   : > { %v1520_v57 = vpop.xlane.xlu1 %1519  ;;  %v4972_v59 = vsel %vm4402_vm6, %v4971_v53, %v4967_v56  ;;  %v1518_v60 = vpop.xlane.xlu0 %1517 }
 0x1df   : > { %v4981_v63 = vrot.slane %v1520_v57, %v10902_v54  ;;  %v4976_v0 = vrot.slane %v1518_v60, %v10908_v58  ;;  %v453_v60 = vld [vmem:[%s10757_s11 + $0x640] sm:$0xff] }
 0x1e1   : > { %v4977_v3 = vsel %vm4409_vm7, %v4976_v0, %v4972_v59  ;;  %1659 = vadd.xlane.f32.xlu1 %v444_v61  ;;  %1657 = vadd.xlane.f32.xlu0 %v443_v62  ;;  %v454_v59 = vld [vmem:[%s10757_s11 + $0x648] sm:$0xff] }
 0x1e2   : > { %v1524_v4 = vpop.xlane.xlu1 %1523  ;;  %v4982_v5 = vsel %vm4416_vm8, %v4981_v63, %v4977_v3  ;;  %v1522_v8 = vpop.xlane.xlu0 %1521 }
 0x1e3   : > { %v4991_v14 = vrot.slane %v1524_v4, %v10916_v2  ;;  %v4986_v15 = vrot.slane %v1522_v8, %v10922_v7  ;;  %v455_v8 = vld [vmem:[%s10757_s11 + $0x650] sm:$0xff] }
 0x1e5   : > { %v4987_v19 = vsel %vm4423_vm9, %v4986_v15, %v4982_v5  ;;  %1663 = vadd.xlane.f32.xlu1 %v446_v11  ;;  %1661 = vadd.xlane.f32.xlu0 %v445_v12  ;;  %v456_v5 = vld [vmem:[%s10757_s11 + $0x658] sm:$0xff] }
 0x1e6   : > { %v1528_v20 = vpop.xlane.xlu1 %1527  ;;  %v4992_v23 = vsel %vm4430_vm10, %v4991_v14, %v4987_v19  ;;  %v1526_v25 = vpop.xlane.xlu0 %1525 }
 0x1e7   : > { %v5001_v29 = vrot.slane %v1528_v20, %v10930_v16  ;;  %v4996_v30 = vrot.slane %v1526_v25, %v10936_v24  ;;  %v457_v25 = vld [vmem:[%s10757_s11 + $0x660] sm:$0xff] }
 0x1e9   : > { %v4997_v33 = vsel %vm4437_vm11, %v4996_v30, %v4992_v23  ;;  %1667 = vadd.xlane.f32.xlu1 %v448_v26  ;;  %1665 = vadd.xlane.f32.xlu0 %v447_v27  ;;  %v458_v23 = vld [vmem:[%s10757_s11 + $0x668] sm:$0xff] }
 0x1ea   : > { %v1532_v35 = vpop.xlane.xlu1 %1531  ;;  %v5002_v6 = vsel %vm4444_vm12, %v5001_v29, %v4997_v33  ;;  %v1530_v38 = vpop.xlane.xlu0 %1529 }
 0x1eb   : > { %v5011_v41 = vrot.slane %v1532_v35, %v10944_v34  ;;  %v5006_v43 = vrot.slane %v1530_v38, %v10949_v37  ;;  %v459_v38 = vld [vmem:[%s10757_s11 + $0x670] sm:$0xff] }
 0x1ed   : > { %v5007_v44 = vsel %vm4451_vm13, %v5006_v43, %v5002_v6  ;;  %1671 = vadd.xlane.f32.xlu1 %v450_v39  ;;  %1669 = vadd.xlane.f32.xlu0 %v449_v40  ;;  %v460_v6 = vld [vmem:[%s10757_s11 + $0x678] sm:$0xff] }
 0x1ee   : > { %v11302_v46 = vsel %vm4458_vm14, %v5011_v41, %v5007_v44  ;;  %v1536_v9 = vpop.xlane.xlu1 %1535  ;;  %v1534_v48 = vpop.xlane.xlu0 %1533 }
 0x1ef   : > { %v5020_v52 = vrot.slane %v1536_v9, %v10858_v18  ;;  %v5016_v53 = vrot.slane %v1534_v48, %v10855_v17  ;;  %v462_v48 = vld [vmem:[%s10757_s11 + $0x688] sm:$0xff] }
 0x1f1   : > { %v5021_v55 = vsel %vm4360_vm0, %v5020_v52, %v5016_v53  ;;  %1675 = vadd.xlane.f32.xlu1 %v452_v49  ;;  %1673 = vadd.xlane.f32.xlu0 %v451_v50  ;;  %v461_v49 = vld [vmem:[%s10757_s11 + $0x680] sm:$0xff] }
 0x1f2   : > { %v1540_v56 = vpop.xlane.xlu1 %1539  ;;  %v1538_v57 = vpop.xlane.xlu0 %1537 }
 0x1f3   : > { %v5030_v61 = vrot.slane %v1540_v56, %v10866_v22  ;;  %v5025_v62 = vrot.slane %v1538_v57, %v10863_v21 }
 0x1f5   : > { %v5026_v63 = vsel %vm4367_vm1, %v5025_v62, %v5021_v55  ;;  %1679 = vadd.xlane.f32.xlu1 %v454_v59  ;;  %1677 = vadd.xlane.f32.xlu0 %v453_v60  ;;  %v464_v59 = vld [vmem:[%s10757_s11 + $0x698] sm:$0xff]  ;;  %v463_v60 = vld [vmem:[%s10757_s11 + $0x690] sm:$0xff] }
 0x1f6   : > { %v1544_v0 = vpop.xlane.xlu1 %1543  ;;  %v5031_v3 = vsel %vm4374_vm2, %v5030_v61, %v5026_v63  ;;  %v1542_v4 = vpop.xlane.xlu0 %1541 }
 0x1f7   : > { %v5040_v11 = vrot.slane %v1544_v0, %v10875_v31  ;;  %v5035_v12 = vrot.slane %v1542_v4, %v10878_v32 }
 0x1f9   : > { %v5036_v14 = vsel %vm4381_vm3, %v5035_v12, %v5031_v3  ;;  %1683 = vadd.xlane.f32.xlu1 %v456_v5  ;;  %1681 = vadd.xlane.f32.xlu0 %v455_v8  ;;  %v466_v5 = vld [vmem:[%s10757_s11 + $0x6a8] sm:$0xff]  ;;  %v465_v8 = vld [vmem:[%s10757_s11 + $0x6a0] sm:$0xff] }
 0x1fa   : > { %v1548_v15 = vpop.xlane.xlu1 %1547  ;;  %v5041_v19 = vsel %vm4388_vm4, %v5040_v11, %v5036_v14  ;;  %v1546_v20 = vpop.xlane.xlu0 %1545 }
 0x1fb   : > { %v5050_v26 = vrot.slane %v1548_v15, %v10884_v36  ;;  %v5045_v27 = vrot.slane %v1546_v20, %v10890_v42 }
 0x1fd   : > { %v5046_v29 = vsel %vm4395_vm5, %v5045_v27, %v5041_v19  ;;  %1687 = vadd.xlane.f32.xlu1 %v458_v23  ;;  %1685 = vadd.xlane.f32.xlu0 %v457_v25  ;;  %v468_v23 = vld [vmem:[%s10757_s11 + $0x6b8] sm:$0xff]  ;;  %v467_v25 = vld [vmem:[%s10757_s11 + $0x6b0] sm:$0xff] }
 0x1fe   : > { %v1552_v30 = vpop.xlane.xlu1 %1551  ;;  %v5051_v33 = vsel %vm4402_vm6, %v5050_v26, %v5046_v29  ;;  %v1550_v35 = vpop.xlane.xlu0 %1549 }
 0x1ff   : > { %v5060_v39 = vrot.slane %v1552_v30, %v10902_v54  ;;  %v5055_v40 = vrot.slane %v1550_v35, %v10908_v58 }
 0x201   : > { %v5056_v41 = vsel %vm4409_vm7, %v5055_v40, %v5051_v33  ;;  %1691 = vadd.xlane.f32.xlu1 %v460_v6  ;;  %1689 = vadd.xlane.f32.xlu0 %v459_v38  ;;  %v470_v6 = vld [vmem:[%s10757_s11 + $0x6c8] sm:$0xff]  ;;  %v469_v38 = vld [vmem:[%s10757_s11 + $0x6c0] sm:$0xff] }
 0x202   : > { %v1556_v43 = vpop.xlane.xlu1 %1555  ;;  %v5061_v44 = vsel %vm4416_vm8, %v5060_v39, %v5056_v41  ;;  %v1554_v9 = vpop.xlane.xlu0 %1553 }
 0x203   : > { %v5070_v50 = vrot.slane %v1556_v43, %v10916_v2  ;;  %v5065_v52 = vrot.slane %v1554_v9, %v10922_v7  ;;  %v472_v9 = vld [vmem:[%s10757_s11 + $0x6d8] sm:$0xff] }
 0x205   : > { %v5066_v53 = vsel %vm4423_vm9, %v5065_v52, %v5061_v44  ;;  %1695 = vadd.xlane.f32.xlu1 %v462_v48  ;;  %1693 = vadd.xlane.f32.xlu0 %v461_v49  ;;  %v471_v48 = vld [vmem:[%s10757_s11 + $0x6d0] sm:$0xff] }
 0x206   : > { %v1560_v55 = vpop.xlane.xlu1 %1559  ;;  %v5071_v56 = vsel %vm4430_vm10, %v5070_v50, %v5066_v53  ;;  %v1558_v57 = vpop.xlane.xlu0 %1557 }
 0x207   : > { %v5080_v61 = vrot.slane %v1560_v55, %v10930_v16  ;;  %v5075_v62 = vrot.slane %v1558_v57, %v10936_v24  ;;  %v474_v57 = vld [vmem:[%s10757_s11 + $0x6e8] sm:$0xff] }
 0x209   : > { %v5076_v63 = vsel %vm4437_vm11, %v5075_v62, %v5071_v56  ;;  %1699 = vadd.xlane.f32.xlu1 %v464_v59  ;;  %1697 = vadd.xlane.f32.xlu0 %v463_v60  ;;  %v473_v59 = vld [vmem:[%s10757_s11 + $0x6e0] sm:$0xff] }
 0x20a   : > { %v1564_v0 = vpop.xlane.xlu1 %1563  ;;  %v5081_v3 = vsel %vm4444_vm12, %v5080_v61, %v5076_v63  ;;  %v1562_v4 = vpop.xlane.xlu0 %1561 }
 0x20b   : > { %v5090_v11 = vrot.slane %v1564_v0, %v10944_v34  ;;  %v5085_v12 = vrot.slane %v1562_v4, %v10949_v37  ;;  %v476_v4 = vld [vmem:[%s10757_s11 + $0x6f8] sm:$0xff] }
 0x20d   : > { %v5086_v14 = vsel %vm4451_vm13, %v5085_v12, %v5081_v3  ;;  %1703 = vadd.xlane.f32.xlu1 %v466_v5  ;;  %1701 = vadd.xlane.f32.xlu0 %v465_v8  ;;  %v475_v5 = vld [vmem:[%s10757_s11 + $0x6f0] sm:$0xff] }
 0x20e   : > { %v5091_v15 = vsel %vm4458_vm14, %v5090_v11, %v5086_v14  ;;  %v1568_v19 = vpop.xlane.xlu1 %1567  ;;  %v1566_v20 = vpop.xlane.xlu0 %1565 }
 0x20f   : > { %v11355_v26 = vsel %vm9437_vm15, %v5091_v15, %v10959_v47  ;;  %v5099_v27 = vrot.slane %v1568_v19, %v10858_v18  ;;  %v5095_v29 = vrot.slane %v1566_v20, %v10855_v17  ;;  %v478_v20 = vld [vmem:[%s10757_s11 + $0x708] sm:$0xff] }
 0x211   : > { %v5100_v30 = vsel %vm4360_vm0, %v5099_v27, %v5095_v29  ;;  %1707 = vadd.xlane.f32.xlu1 %v468_v23  ;;  %1705 = vadd.xlane.f32.xlu0 %v467_v25  ;;  %v477_v23 = vld [vmem:[%s10757_s11 + $0x700] sm:$0xff] }
 0x212   : > { %v1572_v33 = vpop.xlane.xlu1 %1571  ;;  %v1570_v35 = vpop.xlane.xlu0 %1569 }
 0x213   : > { %v5109_v39 = vrot.slane %v1572_v33, %v10866_v22  ;;  %v5104_v40 = vrot.slane %v1570_v35, %v10863_v21 }
 0x215   : > { %v5105_v47 = vsel %vm4367_vm1, %v5104_v40, %v5100_v30  ;;  %1711 = vadd.xlane.f32.xlu1 %v470_v6  ;;  %1709 = vadd.xlane.f32.xlu0 %v469_v38  ;;  %v480_v6 = vld [vmem:[%s10757_s11 + $0x718] sm:$0xff]  ;;  %v479_v38 = vld [vmem:[%s10757_s11 + $0x710] sm:$0xff] }
 0x216   : > { %v1576_v41 = vpop.xlane.xlu1 %1575  ;;  %v5110_v43 = vsel %vm4374_vm2, %v5109_v39, %v5105_v47  ;;  %v1574_v44 = vpop.xlane.xlu0 %1573 }
 0x217   : > { %v5119_v49 = vrot.slane %v1576_v41, %v10875_v31  ;;  %v5114_v50 = vrot.slane %v1574_v44, %v10878_v32 }
 0x219   : > { %v5115_v52 = vsel %vm4381_vm3, %v5114_v50, %v5110_v43  ;;  %1715 = vadd.xlane.f32.xlu1 %v472_v9  ;;  %1713 = vadd.xlane.f32.xlu0 %v471_v48  ;;  %v482_v9 = vld [vmem:[%s10757_s11 + $0x728] sm:$0xff]  ;;  %v481_v48 = vld [vmem:[%s10757_s11 + $0x720] sm:$0xff] }
 0x21a   : > { %v1580_v53 = vpop.xlane.xlu1 %1579  ;;  %v5120_v55 = vsel %vm4388_vm4, %v5119_v49, %v5115_v52  ;;  %v1578_v56 = vpop.xlane.xlu0 %1577 }
 0x21b   : > { %v5129_v60 = vrot.slane %v1580_v53, %v10884_v36  ;;  %v5124_v61 = vrot.slane %v1578_v56, %v10890_v42 }
 0x21d   : > { %v5125_v62 = vsel %vm4395_vm5, %v5124_v61, %v5120_v55  ;;  %1719 = vadd.xlane.f32.xlu1 %v474_v57  ;;  %1717 = vadd.xlane.f32.xlu0 %v473_v59  ;;  %v484_v57 = vld [vmem:[%s10757_s11 + $0x738] sm:$0xff]  ;;  %v483_v59 = vld [vmem:[%s10757_s11 + $0x730] sm:$0xff] }
 0x21e   : > { %v1584_v63 = vpop.xlane.xlu1 %1583  ;;  %v5130_v0 = vsel %vm4402_vm6, %v5129_v60, %v5125_v62  ;;  %v1582_v3 = vpop.xlane.xlu0 %1581 }
 0x21f   : > { %v5139_v8 = vrot.slane %v1584_v63, %v10902_v54  ;;  %v5134_v11 = vrot.slane %v1582_v3, %v10908_v58 }
 0x221   : > { %v5135_v12 = vsel %vm4409_vm7, %v5134_v11, %v5130_v0  ;;  %1723 = vadd.xlane.f32.xlu1 %v476_v4  ;;  %1721 = vadd.xlane.f32.xlu0 %v475_v5  ;;  %v486_v4 = vld [vmem:[%s10757_s11 + $0x748] sm:$0xff]  ;;  %v485_v5 = vld [vmem:[%s10757_s11 + $0x740] sm:$0xff] }
 0x222   : > { %v1588_v14 = vpop.xlane.xlu1 %1587  ;;  %v5140_v15 = vsel %vm4416_vm8, %v5139_v8, %v5135_v12  ;;  %v1586_v19 = vpop.xlane.xlu0 %1585 }
 0x223   : > { %v5149_v25 = vrot.slane %v1588_v14, %v10916_v2  ;;  %v5144_v27 = vrot.slane %v1586_v19, %v10922_v7  ;;  %v488_v19 = vld [vmem:[%s10757_s11 + $0x758] sm:$0xff] }
 0x225   : > { %v5145_v29 = vsel %vm4423_vm9, %v5144_v27, %v5140_v15  ;;  %1727 = vadd.xlane.f32.xlu1 %v478_v20  ;;  %1725 = vadd.xlane.f32.xlu0 %v477_v23  ;;  %v487_v20 = vld [vmem:[%s10757_s11 + $0x750] sm:$0xff] }
 0x226   : > { %v1592_v30 = vpop.xlane.xlu1 %1591  ;;  %v5150_v33 = vsel %vm4430_vm10, %v5149_v25, %v5145_v29  ;;  %v1590_v35 = vpop.xlane.xlu0 %1589 }
 0x227   : > { %v5159_v39 = vrot.slane %v1592_v30, %v10930_v16  ;;  %v5154_v40 = vrot.slane %v1590_v35, %v10936_v24  ;;  %v490_v35 = vld [vmem:[%s10757_s11 + $0x768] sm:$0xff] }
 0x229   : > { %v5155_v47 = vsel %vm4437_vm11, %v5154_v40, %v5150_v33  ;;  %1731 = vadd.xlane.f32.xlu1 %v480_v6  ;;  %1729 = vadd.xlane.f32.xlu0 %v479_v38  ;;  %v489_v6 = vld [vmem:[%s10757_s11 + $0x760] sm:$0xff] }
 0x22a   : > { %v1596_v41 = vpop.xlane.xlu1 %1595  ;;  %v5160_v43 = vsel %vm4444_vm12, %v5159_v39, %v5155_v47  ;;  %v1594_v44 = vpop.xlane.xlu0 %1593 }
 0x22b   : > { %v5169_v49 = vrot.slane %v1596_v41, %v10944_v34  ;;  %v5164_v50 = vrot.slane %v1594_v44, %v10949_v37  ;;  %v492_v44 = vld [vmem:[%s10757_s11 + $0x778] sm:$0xff] }
 0x22d   : > { %v5165_v52 = vsel %vm4451_vm13, %v5164_v50, %v5160_v43  ;;  %1735 = vadd.xlane.f32.xlu1 %v482_v9  ;;  %1733 = vadd.xlane.f32.xlu0 %v481_v48  ;;  %v491_v9 = vld [vmem:[%s10757_s11 + $0x770] sm:$0xff] }
 0x22e   : > { %v5170_v53 = vsel %vm4458_vm14, %v5169_v49, %v5165_v52  ;;  %v1600_v55 = vpop.xlane.xlu1 %1599  ;;  %v1598_v56 = vpop.xlane.xlu0 %1597 }
 0x22f   : > { %v11406_v60 = vsel %vm9437_vm15, %v5170_v53, %v11008_v1  ;;  %v5178_v61 = vrot.slane %v1600_v55, %v10858_v18  ;;  %v5174_v62 = vrot.slane %v1598_v56, %v10855_v17  ;;  %v494_v56 = vld [vmem:[%s10757_s11 + $0x788] sm:$0xff] }
 0x231   : > { %v5179_v63 = vsel %vm4360_vm0, %v5178_v61, %v5174_v62  ;;  %1739 = vadd.xlane.f32.xlu1 %v484_v57  ;;  %1737 = vadd.xlane.f32.xlu0 %v483_v59  ;;  %v493_v57 = vld [vmem:[%s10757_s11 + $0x780] sm:$0xff] }
 0x232   : > { %v1604_v0 = vpop.xlane.xlu1 %1603  ;;  %v1602_v3 = vpop.xlane.xlu0 %1601 }
 0x233   : > { %v5188_v8 = vrot.slane %v1604_v0, %v10866_v22  ;;  %v5183_v11 = vrot.slane %v1602_v3, %v10863_v21 }
 0x235   : > { %v5184_v1 = vsel %vm4367_vm1, %v5183_v11, %v5179_v63  ;;  %1743 = vadd.xlane.f32.xlu1 %v486_v4  ;;  %1741 = vadd.xlane.f32.xlu0 %v485_v5  ;;  %v496_v4 = vld [vmem:[%s10757_s11 + $0x798] sm:$0xff]  ;;  %v495_v5 = vld [vmem:[%s10757_s11 + $0x790] sm:$0xff] }
 0x236   : > { %v1608_v12 = vpop.xlane.xlu1 %1607  ;;  %v5189_v14 = vsel %vm4374_vm2, %v5188_v8, %v5184_v1  ;;  %v1606_v15 = vpop.xlane.xlu0 %1605 }
 0x237   : > { %v5198_v23 = vrot.slane %v1608_v12, %v10875_v31  ;;  %v5193_v25 = vrot.slane %v1606_v15, %v10878_v32 }
 0x239   : > { %v5194_v27 = vsel %vm4381_vm3, %v5193_v25, %v5189_v14  ;;  %1747 = vadd.xlane.f32.xlu1 %v488_v19  ;;  %1745 = vadd.xlane.f32.xlu0 %v487_v20  ;;  %v498_v19 = vld [vmem:[%s10757_s11 + $0x7a8] sm:$0xff]  ;;  %v497_v20 = vld [vmem:[%s10757_s11 + $0x7a0] sm:$0xff] }
 0x23a   : > { %v1612_v29 = vpop.xlane.xlu1 %1611  ;;  %v5199_v30 = vsel %vm4388_vm4, %v5198_v23, %v5194_v27  ;;  %v1610_v33 = vpop.xlane.xlu0 %1609 }
 0x23b   : > { %v5208_v38 = vrot.slane %v1612_v29, %v10884_v36  ;;  %v5203_v39 = vrot.slane %v1610_v33, %v10890_v42 }
 0x23d   : > { %v5204_v40 = vsel %vm4395_vm5, %v5203_v39, %v5199_v30  ;;  %1751 = vadd.xlane.f32.xlu1 %v490_v35  ;;  %1749 = vadd.xlane.f32.xlu0 %v489_v6  ;;  %v500_v35 = vld [vmem:[%s10757_s11 + $0x7b8] sm:$0xff]  ;;  %v499_v6 = vld [vmem:[%s10757_s11 + $0x7b0] sm:$0xff] }
 0x23e   : > { %v1616_v47 = vpop.xlane.xlu1 %1615  ;;  %v5209_v41 = vsel %vm4402_vm6, %v5208_v38, %v5204_v40  ;;  %v1614_v43 = vpop.xlane.xlu0 %1613 }
 0x23f   : > { %v5218_v48 = vrot.slane %v1616_v47, %v10902_v54  ;;  %v5213_v49 = vrot.slane %v1614_v43, %v10908_v58 }
 0x241   : > { %v5214_v50 = vsel %vm4409_vm7, %v5213_v49, %v5209_v41  ;;  %1755 = vadd.xlane.f32.xlu1 %v492_v44  ;;  %1753 = vadd.xlane.f32.xlu0 %v491_v9  ;;  %v502_v44 = vld [vmem:[%s10757_s11 + $0x7c8] sm:$0xff]  ;;  %v501_v9 = vld [vmem:[%s10757_s11 + $0x7c0] sm:$0xff] }
 0x242   : > { %v1620_v52 = vpop.xlane.xlu1 %1619  ;;  %v5219_v53 = vsel %vm4416_vm8, %v5218_v48, %v5214_v50  ;;  %v1618_v55 = vpop.xlane.xlu0 %1617 }
 0x243   : > { %v5228_v59 = vrot.slane %v1620_v52, %v10916_v2  ;;  %v5223_v61 = vrot.slane %v1618_v55, %v10922_v7  ;;  %v504_v55 = vld [vmem:[%s10757_s11 + $0x7d8] sm:$0xff] }
 0x245   : > { %v5224_v62 = vsel %vm4423_vm9, %v5223_v61, %v5219_v53  ;;  %1759 = vadd.xlane.f32.xlu1 %v494_v56  ;;  %1757 = vadd.xlane.f32.xlu0 %v493_v57  ;;  %v503_v56 = vld [vmem:[%s10757_s11 + $0x7d0] sm:$0xff] }
 0x246   : > { %v1624_v63 = vpop.xlane.xlu1 %1623  ;;  %v5229_v0 = vsel %vm4430_vm10, %v5228_v59, %v5224_v62  ;;  %v1622_v3 = vpop.xlane.xlu0 %1621 }
 0x247   : > { %v5238_v8 = vrot.slane %v1624_v63, %v10930_v16  ;;  %v5233_v11 = vrot.slane %v1622_v3, %v10936_v24  ;;  %v506_v3 = vld [vmem:[%s10757_s11 + $0x7e8] sm:$0xff] }
 0x249   : > { %v5234_v1 = vsel %vm4437_vm11, %v5233_v11, %v5229_v0  ;;  %1763 = vadd.xlane.f32.xlu1 %v496_v4  ;;  %1761 = vadd.xlane.f32.xlu0 %v495_v5  ;;  %v505_v4 = vld [vmem:[%s10757_s11 + $0x7e0] sm:$0xff] }
 0x24a   : > { %v1628_v12 = vpop.xlane.xlu1 %1627  ;;  %v5239_v14 = vsel %vm4444_vm12, %v5238_v8, %v5234_v1  ;;  %v1626_v15 = vpop.xlane.xlu0 %1625 }
 0x24b   : > { %v5248_v23 = vrot.slane %v1628_v12, %v10944_v34  ;;  %v5243_v25 = vrot.slane %v1626_v15, %v10949_v37  ;;  %v508_v15 = vld [vmem:[%s10757_s11 + $0x7f8] sm:$0xff] }
 0x24d   : > { %v5244_v27 = vsel %vm4451_vm13, %v5243_v25, %v5239_v14  ;;  %1767 = vadd.xlane.f32.xlu1 %v498_v19  ;;  %1765 = vadd.xlane.f32.xlu0 %v497_v20  ;;  %v507_v19 = vld [vmem:[%s10757_s11 + $0x7f0] sm:$0xff] }
 0x24e   : > { %v5249_v29 = vsel %vm4458_vm14, %v5248_v23, %v5244_v27  ;;  %v1632_v30 = vpop.xlane.xlu1 %1631  ;;  %v1630_v33 = vpop.xlane.xlu0 %1629 }
 0x24f   : > { %v11457_v38 = vsel %vm9437_vm15, %v5249_v29, %v11057_v28  ;;  %v5257_v39 = vrot.slane %v1632_v30, %v10858_v18  ;;  %v5253_v40 = vrot.slane %v1630_v33, %v10855_v17  ;;  %v510_v33 = vld [vmem:[%s10757_s11 + $0x808] sm:$0xff] }
 0x251   : > { %v5258_v47 = vsel %vm4360_vm0, %v5257_v39, %v5253_v40  ;;  %1771 = vadd.xlane.f32.xlu1 %v500_v35  ;;  %1769 = vadd.xlane.f32.xlu0 %v499_v6  ;;  %v509_v35 = vld [vmem:[%s10757_s11 + $0x800] sm:$0xff] }
 0x252   : > { %v1636_v41 = vpop.xlane.xlu1 %1635  ;;  %v1634_v43 = vpop.xlane.xlu0 %1633 }
 0x253   : > { %v5267_v48 = vrot.slane %v1636_v41, %v10866_v22  ;;  %v5262_v49 = vrot.slane %v1634_v43, %v10863_v21 }
 0x255   : > { %v5263_v28 = vsel %vm4367_vm1, %v5262_v49, %v5258_v47  ;;  %1775 = vadd.xlane.f32.xlu1 %v502_v44  ;;  %1773 = vadd.xlane.f32.xlu0 %v501_v9  ;;  %v512_v44 = vld [vmem:[%s10757_s11 + $0x818] sm:$0xff]  ;;  %v511_v9 = vld [vmem:[%s10757_s11 + $0x810] sm:$0xff] }
 0x256   : > { %v1640_v50 = vpop.xlane.xlu1 %1639  ;;  %v5268_v52 = vsel %vm4374_vm2, %v5267_v48, %v5263_v28  ;;  %v1638_v53 = vpop.xlane.xlu0 %1637 }
 0x257   : > { %v5277_v57 = vrot.slane %v1640_v50, %v10875_v31  ;;  %v5272_v59 = vrot.slane %v1638_v53, %v10878_v32 }
 0x259   : > { %v5273_v61 = vsel %vm4381_vm3, %v5272_v59, %v5268_v52  ;;  %1779 = vadd.xlane.f32.xlu1 %v504_v55  ;;  %1777 = vadd.xlane.f32.xlu0 %v503_v56  ;;  %v514_v55 = vld [vmem:[%s10757_s11 + $0x828] sm:$0xff]  ;;  %v513_v56 = vld [vmem:[%s10757_s11 + $0x820] sm:$0xff] }
 0x25a   : > { %v1644_v62 = vpop.xlane.xlu1 %1643  ;;  %v5278_v63 = vsel %vm4388_vm4, %v5277_v57, %v5273_v61  ;;  %v1642_v0 = vpop.xlane.xlu0 %1641 }
 0x25b   : > { %v5287_v5 = vrot.slane %v1644_v62, %v10884_v36  ;;  %v5282_v8 = vrot.slane %v1642_v0, %v10890_v42 }
 0x25d   : > { %v5283_v11 = vsel %vm4395_vm5, %v5282_v8, %v5278_v63  ;;  %1783 = vadd.xlane.f32.xlu1 %v506_v3  ;;  %1781 = vadd.xlane.f32.xlu0 %v505_v4  ;;  %v516_v3 = vld [vmem:[%s10757_s11 + $0x838] sm:$0xff]  ;;  %v515_v4 = vld [vmem:[%s10757_s11 + $0x830] sm:$0xff] }
 0x25e   : > { %v1648_v1 = vpop.xlane.xlu1 %1647  ;;  %v5288_v12 = vsel %vm4402_vm6, %v5287_v5, %v5283_v11  ;;  %v1646_v14 = vpop.xlane.xlu0 %1645 }
 0x25f   : > { %v5297_v20 = vrot.slane %v1648_v1, %v10902_v54  ;;  %v5292_v23 = vrot.slane %v1646_v14, %v10908_v58 }
 0x261   : > { %v5293_v25 = vsel %vm4409_vm7, %v5292_v23, %v5288_v12  ;;  %1787 = vadd.xlane.f32.xlu1 %v508_v15  ;;  %1785 = vadd.xlane.f32.xlu0 %v507_v19  ;;  %v518_v15 = vld [vmem:[%s10757_s11 + $0x848] sm:$0xff]  ;;  %v517_v19 = vld [vmem:[%s10757_s11 + $0x840] sm:$0xff] }
 0x262   : > { %v1652_v27 = vpop.xlane.xlu1 %1651  ;;  %v5298_v29 = vsel %vm4416_vm8, %v5297_v20, %v5293_v25  ;;  %v1650_v30 = vpop.xlane.xlu0 %1649 }
 0x263   : > { %v5307_v6 = vrot.slane %v1652_v27, %v10916_v2  ;;  %v5302_v39 = vrot.slane %v1650_v30, %v10922_v7  ;;  %v520_v30 = vld [vmem:[%s10757_s11 + $0x858] sm:$0xff] }
 0x265   : > { %v5303_v40 = vsel %vm4423_vm9, %v5302_v39, %v5298_v29  ;;  %1791 = vadd.xlane.f32.xlu1 %v510_v33  ;;  %1789 = vadd.xlane.f32.xlu0 %v509_v35  ;;  %v519_v33 = vld [vmem:[%s10757_s11 + $0x850] sm:$0xff] }
 0x266   : > { %v1656_v47 = vpop.xlane.xlu1 %1655  ;;  %v5308_v41 = vsel %vm4430_vm10, %v5307_v6, %v5303_v40  ;;  %v1654_v43 = vpop.xlane.xlu0 %1653 }
 0x267   : > { %v5317_v48 = vrot.slane %v1656_v47, %v10930_v16  ;;  %v5312_v49 = vrot.slane %v1654_v43, %v10936_v24  ;;  %v522_v43 = vld [vmem:[%s10757_s11 + $0x868] sm:$0xff] }
 0x269   : > { %v5313_v28 = vsel %vm4437_vm11, %v5312_v49, %v5308_v41  ;;  %1795 = vadd.xlane.f32.xlu1 %v512_v44  ;;  %1793 = vadd.xlane.f32.xlu0 %v511_v9  ;;  %v521_v44 = vld [vmem:[%s10757_s11 + $0x860] sm:$0xff] }
 0x26a   : > { %v1660_v50 = vpop.xlane.xlu1 %1659  ;;  %v5318_v52 = vsel %vm4444_vm12, %v5317_v48, %v5313_v28  ;;  %v1658_v53 = vpop.xlane.xlu0 %1657 }
 0x26b   : > { %v5327_v57 = vrot.slane %v1660_v50, %v10944_v34  ;;  %v5322_v59 = vrot.slane %v1658_v53, %v10949_v37  ;;  %v524_v53 = vld [vmem:[%s10757_s11 + $0x878] sm:$0xff] }
 0x26d   : > { %v5323_v61 = vsel %vm4451_vm13, %v5322_v59, %v5318_v52  ;;  %1799 = vadd.xlane.f32.xlu1 %v514_v55  ;;  %1797 = vadd.xlane.f32.xlu0 %v513_v56  ;;  %v523_v55 = vld [vmem:[%s10757_s11 + $0x870] sm:$0xff] }
 0x26e   : > { %v5328_v62 = vsel %vm4458_vm14, %v5327_v57, %v5323_v61  ;;  %v1664_v63 = vpop.xlane.xlu1 %1663  ;;  %v1662_v0 = vpop.xlane.xlu0 %1661 }
 0x26f   : > { %v11508_v5 = vsel %vm9437_vm15, %v5328_v62, %v11106_v51  ;;  %v5336_v8 = vrot.slane %v1664_v63, %v10858_v18  ;;  %v5332_v11 = vrot.slane %v1662_v0, %v10855_v17  ;;  %v526_v0 = vld [vmem:[%s10757_s11 + $0x888] sm:$0xff] }
 0x271   : > { %v5337_v1 = vsel %vm4360_vm0, %v5336_v8, %v5332_v11  ;;  %1803 = vadd.xlane.f32.xlu1 %v516_v3  ;;  %1801 = vadd.xlane.f32.xlu0 %v515_v4  ;;  %v525_v3 = vld [vmem:[%s10757_s11 + $0x880] sm:$0xff] }
 0x272   : > { %v1668_v12 = vpop.xlane.xlu1 %1667  ;;  %v1666_v14 = vpop.xlane.xlu0 %1665 }
 0x273   : > { %v5346_v20 = vrot.slane %v1668_v12, %v10866_v22  ;;  %v5341_v23 = vrot.slane %v1666_v14, %v10863_v21 }
 0x275   : > { %v5342_v51 = vsel %vm4367_vm1, %v5341_v23, %v5337_v1  ;;  %1807 = vadd.xlane.f32.xlu1 %v518_v15  ;;  %1805 = vadd.xlane.f32.xlu0 %v517_v19  ;;  %v528_v15 = vld [vmem:[%s10757_s11 + $0x898] sm:$0xff]  ;;  %v527_v19 = vld [vmem:[%s10757_s11 + $0x890] sm:$0xff] }
 0x276   : > { %v1672_v25 = vpop.xlane.xlu1 %1671  ;;  %v5347_v27 = vsel %vm4374_vm2, %v5346_v20, %v5342_v51  ;;  %v1670_v29 = vpop.xlane.xlu0 %1669 }
 0x277   : > { %v5356_v35 = vrot.slane %v1672_v25, %v10875_v31  ;;  %v5351_v6 = vrot.slane %v1670_v29, %v10878_v32 }
 0x279   : > { %v5352_v39 = vsel %vm4381_vm3, %v5351_v6, %v5347_v27  ;;  %1811 = vadd.xlane.f32.xlu1 %v520_v30  ;;  %1809 = vadd.xlane.f32.xlu0 %v519_v33  ;;  %v530_v30 = vld [vmem:[%s10757_s11 + $0x8a8] sm:$0xff]  ;;  %v529_v33 = vld [vmem:[%s10757_s11 + $0x8a0] sm:$0xff] }
 0x27a   : > { %v1676_v40 = vpop.xlane.xlu1 %1675  ;;  %v5357_v47 = vsel %vm4388_vm4, %v5356_v35, %v5352_v39  ;;  %v1674_v41 = vpop.xlane.xlu0 %1673 }
 0x27b   : > { %v5366_v9 = vrot.slane %v1676_v40, %v10884_v36  ;;  %v5361_v48 = vrot.slane %v1674_v41, %v10890_v42 }
 0x27d   : > { %v5362_v49 = vsel %vm4395_vm5, %v5361_v48, %v5357_v47  ;;  %1815 = vadd.xlane.f32.xlu1 %v522_v43  ;;  %1813 = vadd.xlane.f32.xlu0 %v521_v44  ;;  %v532_v43 = vld [vmem:[%s10757_s11 + $0x8b8] sm:$0xff]  ;;  %v531_v44 = vld [vmem:[%s10757_s11 + $0x8b0] sm:$0xff] }
 0x27e   : > { %v1680_v28 = vpop.xlane.xlu1 %1679  ;;  %v5367_v50 = vsel %vm4402_vm6, %v5366_v9, %v5362_v49  ;;  %v1678_v52 = vpop.xlane.xlu0 %1677 }
 0x27f   : > { %v5376_v56 = vrot.slane %v1680_v28, %v10902_v54  ;;  %v5371_v57 = vrot.slane %v1678_v52, %v10908_v58 }
 0x281   : > { %v5372_v59 = vsel %vm4409_vm7, %v5371_v57, %v5367_v50  ;;  %1819 = vadd.xlane.f32.xlu1 %v524_v53  ;;  %1817 = vadd.xlane.f32.xlu0 %v523_v55  ;;  %v534_v53 = vld [vmem:[%s10757_s11 + $0x8c8] sm:$0xff]  ;;  %v533_v55 = vld [vmem:[%s10757_s11 + $0x8c0] sm:$0xff] }
 0x282   : > { %v1684_v61 = vpop.xlane.xlu1 %1683  ;;  %v5377_v62 = vsel %vm4416_vm8, %v5376_v56, %v5372_v59  ;;  %v1682_v63 = vpop.xlane.xlu0 %1681 }
 0x283   : > { %v5386_v4 = vrot.slane %v1684_v61, %v10916_v2  ;;  %v5381_v8 = vrot.slane %v1682_v63, %v10922_v7  ;;  %v536_v63 = vld [vmem:[%s10757_s11 + $0x8d8] sm:$0xff] }
 0x285   : > { %v5382_v11 = vsel %vm4423_vm9, %v5381_v8, %v5377_v62  ;;  %1823 = vadd.xlane.f32.xlu1 %v526_v0  ;;  %1821 = vadd.xlane.f32.xlu0 %v525_v3  ;;  %v535_v0 = vld [vmem:[%s10757_s11 + $0x8d0] sm:$0xff] }
 0x286   : > { %v1688_v1 = vpop.xlane.xlu1 %1687  ;;  %v5387_v12 = vsel %vm4430_vm10, %v5386_v4, %v5382_v11  ;;  %v1686_v14 = vpop.xlane.xlu0 %1685 }
 0x287   : > { %v5396_v20 = vrot.slane %v1688_v1, %v10930_v16  ;;  %v5391_v23 = vrot.slane %v1686_v14, %v10936_v24  ;;  %v538_v14 = vld [vmem:[%s10757_s11 + $0x8e8] sm:$0xff] }
 0x289   : > { %v5392_v51 = vsel %vm4437_vm11, %v5391_v23, %v5387_v12  ;;  %1827 = vadd.xlane.f32.xlu1 %v528_v15  ;;  %1825 = vadd.xlane.f32.xlu0 %v527_v19  ;;  %v537_v15 = vld [vmem:[%s10757_s11 + $0x8e0] sm:$0xff] }
 0x28a   : > { %v1692_v25 = vpop.xlane.xlu1 %1691  ;;  %v5397_v27 = vsel %vm4444_vm12, %v5396_v20, %v5392_v51  ;;  %v1690_v29 = vpop.xlane.xlu0 %1689 }
 0x28b   : > { %v5406_v35 = vrot.slane %v1692_v25, %v10944_v34  ;;  %v5401_v6 = vrot.slane %v1690_v29, %v10949_v37  ;;  %v540_v29 = vld [vmem:[%s10757_s11 + $0x8f8] sm:$0xff] }
 0x28d   : > { %v5402_v39 = vsel %vm4451_vm13, %v5401_v6, %v5397_v27  ;;  %1831 = vadd.xlane.f32.xlu1 %v530_v30  ;;  %1829 = vadd.xlane.f32.xlu0 %v529_v33  ;;  %v539_v30 = vld [vmem:[%s10757_s11 + $0x8f0] sm:$0xff] }
 0x28e   : > { %v5407_v40 = vsel %vm4458_vm14, %v5406_v35, %v5402_v39  ;;  %v1696_v47 = vpop.xlane.xlu1 %1695  ;;  %v1694_v41 = vpop.xlane.xlu0 %1693 }
 0x28f   : > { %v11559_v9 = vsel %vm9437_vm15, %v5407_v40, %v11155_v13  ;;  %v5415_v48 = vrot.slane %v1696_v47, %v10858_v18  ;;  %v5411_v49 = vrot.slane %v1694_v41, %v10855_v17  ;;  %v542_v41 = vld [vmem:[%s10757_s11 + $0x908] sm:$0xff] }
 0x291   : > { %v5416_v28 = vsel %vm4360_vm0, %v5415_v48, %v5411_v49  ;;  %1835 = vadd.xlane.f32.xlu1 %v532_v43  ;;  %1833 = vadd.xlane.f32.xlu0 %v531_v44  ;;  %v541_v43 = vld [vmem:[%s10757_s11 + $0x900] sm:$0xff] }
 0x292   : > { %v1700_v50 = vpop.xlane.xlu1 %1699  ;;  %v1698_v52 = vpop.xlane.xlu0 %1697 }
 0x293   : > { %v5425_v56 = vrot.slane %v1700_v50, %v10866_v22  ;;  %v5420_v57 = vrot.slane %v1698_v52, %v10863_v21 }
 0x295   : > { %v5421_v13 = vsel %vm4367_vm1, %v5420_v57, %v5416_v28  ;;  %1839 = vadd.xlane.f32.xlu1 %v534_v53  ;;  %1837 = vadd.xlane.f32.xlu0 %v533_v55  ;;  %v544_v53 = vld [vmem:[%s10757_s11 + $0x918] sm:$0xff]  ;;  %v543_v55 = vld [vmem:[%s10757_s11 + $0x910] sm:$0xff] }
 0x296   : > { %v1704_v59 = vpop.xlane.xlu1 %1703  ;;  %v5426_v61 = vsel %vm4374_vm2, %v5425_v56, %v5421_v13  ;;  %v1702_v62 = vpop.xlane.xlu0 %1701 }
 0x297   : > { %v5435_v3 = vrot.slane %v1704_v59, %v10875_v31  ;;  %v5430_v4 = vrot.slane %v1702_v62, %v10878_v32 }
 0x299   : > { %v5431_v8 = vsel %vm4381_vm3, %v5430_v4, %v5426_v61  ;;  %1843 = vadd.xlane.f32.xlu1 %v536_v63  ;;  %1841 = vadd.xlane.f32.xlu0 %v535_v0  ;;  %v546_v63 = vld [vmem:[%s10757_s11 + $0x928] sm:$0xff]  ;;  %v545_v0 = vld [vmem:[%s10757_s11 + $0x920] sm:$0xff] }
 0x29a   : > { %v1708_v11 = vpop.xlane.xlu1 %1707  ;;  %v5436_v1 = vsel %vm4388_vm4, %v5435_v3, %v5431_v8  ;;  %v1706_v12 = vpop.xlane.xlu0 %1705 }
 0x29b   : > { %v5445_v19 = vrot.slane %v1708_v11, %v10884_v36  ;;  %v5440_v20 = vrot.slane %v1706_v12, %v10890_v42 }
 0x29d   : > { %v5441_v23 = vsel %vm4395_vm5, %v5440_v20, %v5436_v1  ;;  %1847 = vadd.xlane.f32.xlu1 %v538_v14  ;;  %1845 = vadd.xlane.f32.xlu0 %v537_v15  ;;  %v548_v14 = vld [vmem:[%s10757_s11 + $0x938] sm:$0xff]  ;;  %v547_v15 = vld [vmem:[%s10757_s11 + $0x930] sm:$0xff] }
 0x29e   : > { %v1712_v51 = vpop.xlane.xlu1 %1711  ;;  %v5446_v25 = vsel %vm4402_vm6, %v5445_v19, %v5441_v23  ;;  %v1710_v27 = vpop.xlane.xlu0 %1709 }
 0x29f   : > { %v5455_v33 = vrot.slane %v1712_v51, %v10902_v54  ;;  %v5450_v35 = vrot.slane %v1710_v27, %v10908_v58 }
 0x2a1   : > { %v5451_v6 = vsel %vm4409_vm7, %v5450_v35, %v5446_v25  ;;  %1851 = vadd.xlane.f32.xlu1 %v540_v29  ;;  %1849 = vadd.xlane.f32.xlu0 %v539_v30  ;;  %v550_v29 = vld [vmem:[%s10757_s11 + $0x948] sm:$0xff]  ;;  %v549_v30 = vld [vmem:[%s10757_s11 + $0x940] sm:$0xff] }
 0x2a2   : > { %v1716_v39 = vpop.xlane.xlu1 %1715  ;;  %v5456_v40 = vsel %vm4416_vm8, %v5455_v33, %v5451_v6  ;;  %v1714_v47 = vpop.xlane.xlu0 %1713 }
 0x2a3   : > { %v5465_v44 = vrot.slane %v1716_v39, %v10916_v2  ;;  %v5460_v48 = vrot.slane %v1714_v47, %v10922_v7  ;;  %v552_v47 = vld [vmem:[%s10757_s11 + $0x958] sm:$0xff] }
 0x2a5   : > { %v5461_v49 = vsel %vm4423_vm9, %v5460_v48, %v5456_v40  ;;  %1855 = vadd.xlane.f32.xlu1 %v542_v41  ;;  %1853 = vadd.xlane.f32.xlu0 %v541_v43  ;;  %v551_v41 = vld [vmem:[%s10757_s11 + $0x950] sm:$0xff] }
 0x2a6   : > { %v1720_v28 = vpop.xlane.xlu1 %1719  ;;  %v5466_v50 = vsel %vm4430_vm10, %v5465_v44, %v5461_v49  ;;  %v1718_v52 = vpop.xlane.xlu0 %1717 }
 0x2a7   : > { %v5475_v56 = vrot.slane %v1720_v28, %v10930_v16  ;;  %v5470_v57 = vrot.slane %v1718_v52, %v10936_v24  ;;  %v554_v52 = vld [vmem:[%s10757_s11 + $0x968] sm:$0xff] }
 0x2a9   : > { %v5471_v13 = vsel %vm4437_vm11, %v5470_v57, %v5466_v50  ;;  %1859 = vadd.xlane.f32.xlu1 %v544_v53  ;;  %1857 = vadd.xlane.f32.xlu0 %v543_v55  ;;  %v553_v53 = vld [vmem:[%s10757_s11 + $0x960] sm:$0xff] }
 0x2aa   : > { %v1724_v59 = vpop.xlane.xlu1 %1723  ;;  %v5476_v61 = vsel %vm4444_vm12, %v5475_v56, %v5471_v13  ;;  %v1722_v62 = vpop.xlane.xlu0 %1721 }
 0x2ab   : > { %v5485_v3 = vrot.slane %v1724_v59, %v10944_v34  ;;  %v5480_v4 = vrot.slane %v1722_v62, %v10949_v37  ;;  %v556_v62 = vld [vmem:[%s10757_s11 + $0x978] sm:$0xff] }
 0x2ad   : > { %v5481_v8 = vsel %vm4451_vm13, %v5480_v4, %v5476_v61  ;;  %1863 = vadd.xlane.f32.xlu1 %v546_v63  ;;  %1861 = vadd.xlane.f32.xlu0 %v545_v0  ;;  %v555_v63 = vld [vmem:[%s10757_s11 + $0x970] sm:$0xff] }
 0x2ae   : > { %v5486_v11 = vsel %vm4458_vm14, %v5485_v3, %v5481_v8  ;;  %v1728_v1 = vpop.xlane.xlu1 %1727  ;;  %v1726_v12 = vpop.xlane.xlu0 %1725 }
 0x2af   : > { %v11610_v19 = vsel %vm9437_vm15, %v5486_v11, %v11204_v45  ;;  %v5494_v20 = vrot.slane %v1728_v1, %v10858_v18  ;;  %v5490_v23 = vrot.slane %v1726_v12, %v10855_v17  ;;  %v558_v12 = vld [vmem:[%s10757_s11 + $0x988] sm:$0xff] }
 0x2b1   : > { %v5495_v51 = vsel %vm4360_vm0, %v5494_v20, %v5490_v23  ;;  %1867 = vadd.xlane.f32.xlu1 %v548_v14  ;;  %1865 = vadd.xlane.f32.xlu0 %v547_v15  ;;  %v557_v14 = vld [vmem:[%s10757_s11 + $0x980] sm:$0xff] }
 0x2b2   : > { %v1732_v25 = vpop.xlane.xlu1 %1731  ;;  %v1730_v27 = vpop.xlane.xlu0 %1729 }
 0x2b3   : > { %v5504_v33 = vrot.slane %v1732_v25, %v10866_v22  ;;  %v5499_v35 = vrot.slane %v1730_v27, %v10863_v21 }
 0x2b5   : > { %v5500_v45 = vsel %vm4367_vm1, %v5499_v35, %v5495_v51  ;;  %1871 = vadd.xlane.f32.xlu1 %v550_v29  ;;  %1869 = vadd.xlane.f32.xlu0 %v549_v30  ;;  %v560_v29 = vld [vmem:[%s10757_s11 + $0x998] sm:$0xff]  ;;  %v559_v30 = vld [vmem:[%s10757_s11 + $0x990] sm:$0xff] }
 0x2b6   : > { %v1736_v6 = vpop.xlane.xlu1 %1735  ;;  %v5505_v39 = vsel %vm4374_vm2, %v5504_v33, %v5500_v45  ;;  %v1734_v40 = vpop.xlane.xlu0 %1733 }
 0x2b7   : > { %v5514_v43 = vrot.slane %v1736_v6, %v10875_v31  ;;  %v5509_v44 = vrot.slane %v1734_v40, %v10878_v32 }
 0x2b9   : > { %v5510_v48 = vsel %vm4381_vm3, %v5509_v44, %v5505_v39  ;;  %1875 = vadd.xlane.f32.xlu1 %v552_v47  ;;  %1873 = vadd.xlane.f32.xlu0 %v551_v41  ;;  %v562_v47 = vld [vmem:[%s10757_s11 + $0x9a8] sm:$0xff]  ;;  %v561_v41 = vld [vmem:[%s10757_s11 + $0x9a0] sm:$0xff] }
 0x2ba   : > { %v1740_v49 = vpop.xlane.xlu1 %1739  ;;  %v5515_v28 = vsel %vm4388_vm4, %v5514_v43, %v5510_v48  ;;  %v1738_v50 = vpop.xlane.xlu0 %1737 }
 0x2bb   : > { %v5524_v55 = vrot.slane %v1740_v49, %v10884_v36  ;;  %v5519_v56 = vrot.slane %v1738_v50, %v10890_v42 }
 0x2bd   : > { %v5520_v57 = vsel %vm4395_vm5, %v5519_v56, %v5515_v28  ;;  %1879 = vadd.xlane.f32.xlu1 %v554_v52  ;;  %1877 = vadd.xlane.f32.xlu0 %v553_v53  ;;  %v564_v52 = vld [vmem:[%s10757_s11 + $0x9b8] sm:$0xff]  ;;  %v563_v53 = vld [vmem:[%s10757_s11 + $0x9b0] sm:$0xff] }
 0x2be   : > { %v1744_v13 = vpop.xlane.xlu1 %1743  ;;  %v5525_v59 = vsel %vm4402_vm6, %v5524_v55, %v5520_v57  ;;  %v1742_v61 = vpop.xlane.xlu0 %1741 }
 0x2bf   : > { %v5534_v0 = vrot.slane %v1744_v13, %v10902_v54  ;;  %v5529_v3 = vrot.slane %v1742_v61, %v10908_v58 }
 0x2c1   : > { %v5530_v4 = vsel %vm4409_vm7, %v5529_v3, %v5525_v59  ;;  %1883 = vadd.xlane.f32.xlu1 %v556_v62  ;;  %1881 = vadd.xlane.f32.xlu0 %v555_v63  ;;  %v566_v62 = vld [vmem:[%s10757_s11 + $0x9c8] sm:$0xff]  ;;  %v565_v63 = vld [vmem:[%s10757_s11 + $0x9c0] sm:$0xff] }
 0x2c2   : > { %v1748_v8 = vpop.xlane.xlu1 %1747  ;;  %v5535_v11 = vsel %vm4416_vm8, %v5534_v0, %v5530_v4  ;;  %v1746_v1 = vpop.xlane.xlu0 %1745 }
 0x2c3   : > { %v5544_v15 = vrot.slane %v1748_v8, %v10916_v2  ;;  %v5539_v20 = vrot.slane %v1746_v1, %v10922_v7  ;;  %v568_v1 = vld [vmem:[%s10757_s11 + $0x9d8] sm:$0xff] }
 0x2c5   : > { %v5540_v23 = vsel %vm4423_vm9, %v5539_v20, %v5535_v11  ;;  %1887 = vadd.xlane.f32.xlu1 %v558_v12  ;;  %1885 = vadd.xlane.f32.xlu0 %v557_v14  ;;  %v567_v12 = vld [vmem:[%s10757_s11 + $0x9d0] sm:$0xff] }
 0x2c6   : > { %v1752_v51 = vpop.xlane.xlu1 %1751  ;;  %v5545_v25 = vsel %vm4430_vm10, %v5544_v15, %v5540_v23  ;;  %v1750_v27 = vpop.xlane.xlu0 %1749 }
 0x2c7   : > { %v5554_v33 = vrot.slane %v1752_v51, %v10930_v16  ;;  %v5549_v35 = vrot.slane %v1750_v27, %v10936_v24  ;;  %v570_v27 = vld [vmem:[%s10757_s11 + $0x9e8] sm:$0xff] }
 0x2c9   : > { %v5550_v45 = vsel %vm4437_vm11, %v5549_v35, %v5545_v25  ;;  %1891 = vadd.xlane.f32.xlu1 %v560_v29  ;;  %1889 = vadd.xlane.f32.xlu0 %v559_v30  ;;  %v569_v29 = vld [vmem:[%s10757_s11 + $0x9e0] sm:$0xff] }
 0x2ca   : > { %v1756_v6 = vpop.xlane.xlu1 %1755  ;;  %v5555_v39 = vsel %vm4444_vm12, %v5554_v33, %v5550_v45  ;;  %v1754_v40 = vpop.xlane.xlu0 %1753 }
 0x2cb   : > { %v5564_v43 = vrot.slane %v1756_v6, %v10944_v34  ;;  %v5559_v44 = vrot.slane %v1754_v40, %v10949_v37  ;;  %v572_v40 = vld [vmem:[%s10757_s11 + $0x9f8] sm:$0xff] }
 0x2cd   : > { %v5560_v48 = vsel %vm4451_vm13, %v5559_v44, %v5555_v39  ;;  %1895 = vadd.xlane.f32.xlu1 %v562_v47  ;;  %1893 = vadd.xlane.f32.xlu0 %v561_v41  ;;  %v571_v47 = vld [vmem:[%s10757_s11 + $0x9f0] sm:$0xff] }
 0x2ce   : > { %v5565_v49 = vsel %vm4458_vm14, %v5564_v43, %v5560_v48  ;;  %v1760_v28 = vpop.xlane.xlu1 %1759  ;;  %v1758_v50 = vpop.xlane.xlu0 %1757 }
 0x2cf   : > { %v11661_v55 = vsel %vm9437_vm15, %v5565_v49, %v11253_v10  ;;  %v5573_v56 = vrot.slane %v1760_v28, %v10858_v18  ;;  %v5569_v57 = vrot.slane %v1758_v50, %v10855_v17  ;;  %v574_v50 = vld [vmem:[%s10757_s11 + $0xa08] sm:$0xff] }
 0x2d1   : > { %v5574_v13 = vsel %vm4360_vm0, %v5573_v56, %v5569_v57  ;;  %1899 = vadd.xlane.f32.xlu1 %v564_v52  ;;  %1897 = vadd.xlane.f32.xlu0 %v563_v53  ;;  %v573_v52 = vld [vmem:[%s10757_s11 + $0xa00] sm:$0xff] }
 0x2d2   : > { %v1764_v59 = vpop.xlane.xlu1 %1763  ;;  %v1762_v61 = vpop.xlane.xlu0 %1761 }
 0x2d3   : > { %v5583_v0 = vrot.slane %v1764_v59, %v10866_v22  ;;  %v5578_v3 = vrot.slane %v1762_v61, %v10863_v21 }
 0x2d5   : > { %v5579_v10 = vsel %vm4367_vm1, %v5578_v3, %v5574_v13  ;;  %1903 = vadd.xlane.f32.xlu1 %v566_v62  ;;  %1901 = vadd.xlane.f32.xlu0 %v565_v63  ;;  %v576_v62 = vld [vmem:[%s10757_s11 + $0xa18] sm:$0xff]  ;;  %v575_v63 = vld [vmem:[%s10757_s11 + $0xa10] sm:$0xff] }
 0x2d6   : > { %v1768_v4 = vpop.xlane.xlu1 %1767  ;;  %v5584_v8 = vsel %vm4374_vm2, %v5583_v0, %v5579_v10  ;;  %v1766_v11 = vpop.xlane.xlu0 %1765 }
 0x2d7   : > { %v5593_v14 = vrot.slane %v1768_v4, %v10875_v31  ;;  %v5588_v15 = vrot.slane %v1766_v11, %v10878_v32 }
 0x2d9   : > { %v5589_v20 = vsel %vm4381_vm3, %v5588_v15, %v5584_v8  ;;  %1907 = vadd.xlane.f32.xlu1 %v568_v1  ;;  %1905 = vadd.xlane.f32.xlu0 %v567_v12  ;;  %v578_v1 = vld [vmem:[%s10757_s11 + $0xa28] sm:$0xff]  ;;  %v577_v12 = vld [vmem:[%s10757_s11 + $0xa20] sm:$0xff] }
 0x2da   : > { %v1772_v23 = vpop.xlane.xlu1 %1771  ;;  %v5594_v51 = vsel %vm4388_vm4, %v5593_v14, %v5589_v20  ;;  %v1770_v25 = vpop.xlane.xlu0 %1769 }
 0x2db   : > { %v5603_v30 = vrot.slane %v1772_v23, %v10884_v36  ;;  %v5598_v33 = vrot.slane %v1770_v25, %v10890_v42 }
 0x2dd   : > { %v5599_v35 = vsel %vm4395_vm5, %v5598_v33, %v5594_v51  ;;  %1911 = vadd.xlane.f32.xlu1 %v570_v27  ;;  %1909 = vadd.xlane.f32.xlu0 %v569_v29  ;;  %v580_v27 = vld [vmem:[%s10757_s11 + $0xa38] sm:$0xff]  ;;  %v579_v29 = vld [vmem:[%s10757_s11 + $0xa30] sm:$0xff] }
 0x2de   : > { %v1776_v45 = vpop.xlane.xlu1 %1775  ;;  %v5604_v6 = vsel %vm4402_vm6, %v5603_v30, %v5599_v35  ;;  %v1774_v39 = vpop.xlane.xlu0 %1773 }
 0x2df   : > { %v5613_v41 = vrot.slane %v1776_v45, %v10902_v54  ;;  %v5608_v43 = vrot.slane %v1774_v39, %v10908_v58 }
 0x2e1   : > { %v5609_v44 = vsel %vm4409_vm7, %v5608_v43, %v5604_v6  ;;  %1915 = vadd.xlane.f32.xlu1 %v572_v40  ;;  %1913 = vadd.xlane.f32.xlu0 %v571_v47  ;;  %v582_v40 = vld [vmem:[%s10757_s11 + $0xa48] sm:$0xff]  ;;  %v581_v47 = vld [vmem:[%s10757_s11 + $0xa40] sm:$0xff] }
 0x2e2   : > { %v1780_v48 = vpop.xlane.xlu1 %1779  ;;  %v5614_v49 = vsel %vm4416_vm8, %v5613_v41, %v5609_v44  ;;  %v1778_v28 = vpop.xlane.xlu0 %1777 }
 0x2e3   : > { %v5623_v53 = vrot.slane %v1780_v48, %v10916_v2  ;;  %v5618_v56 = vrot.slane %v1778_v28, %v10922_v7  ;;  %v584_v28 = vld [vmem:[%s10757_s11 + $0xa58] sm:$0xff] }
 0x2e5   : > { %v5619_v57 = vsel %vm4423_vm9, %v5618_v56, %v5614_v49  ;;  %1919 = vadd.xlane.f32.xlu1 %v574_v50  ;;  %1917 = vadd.xlane.f32.xlu0 %v573_v52  ;;  %v583_v50 = vld [vmem:[%s10757_s11 + $0xa50] sm:$0xff] }
 0x2e6   : > { %v1784_v13 = vpop.xlane.xlu1 %1783  ;;  %v5624_v59 = vsel %vm4430_vm10, %v5623_v53, %v5619_v57  ;;  %v1782_v61 = vpop.xlane.xlu0 %1781 }
 0x2e7   : > { %v5633_v0 = vrot.slane %v1784_v13, %v10930_v16  ;;  %v5628_v3 = vrot.slane %v1782_v61, %v10936_v24  ;;  %v586_v61 = vld [vmem:[%s10757_s11 + $0xa68] sm:$0xff] }
 0x2e9   : > { %v5629_v10 = vsel %vm4437_vm11, %v5628_v3, %v5624_v59  ;;  %1923 = vadd.xlane.f32.xlu1 %v576_v62  ;;  %1921 = vadd.xlane.f32.xlu0 %v575_v63  ;;  %v585_v62 = vld [vmem:[%s10757_s11 + $0xa60] sm:$0xff] }
 0x2ea   : > { %v1788_v4 = vpop.xlane.xlu1 %1787  ;;  %v5634_v8 = vsel %vm4444_vm12, %v5633_v0, %v5629_v10  ;;  %v1786_v11 = vpop.xlane.xlu0 %1785 }
 0x2eb   : > { %v5643_v14 = vrot.slane %v1788_v4, %v10944_v34  ;;  %v5638_v15 = vrot.slane %v1786_v11, %v10949_v37  ;;  %v588_v11 = vld [vmem:[%s10757_s11 + $0xa78] sm:$0xff] }
 0x2ed   : > { %v5639_v20 = vsel %vm4451_vm13, %v5638_v15, %v5634_v8  ;;  %1927 = vadd.xlane.f32.xlu1 %v578_v1  ;;  %1925 = vadd.xlane.f32.xlu0 %v577_v12  ;;  %v587_v1 = vld [vmem:[%s10757_s11 + $0xa70] sm:$0xff] }
 0x2ee   : > { %v5644_v23 = vsel %vm4458_vm14, %v5643_v14, %v5639_v20  ;;  %v1792_v51 = vpop.xlane.xlu1 %1791  ;;  %v1790_v25 = vpop.xlane.xlu0 %1789 }
 0x2ef   : > { %v11712_v30 = vsel %vm9437_vm15, %v5644_v23, %v11302_v46  ;;  %v5652_v33 = vrot.slane %v1792_v51, %v10858_v18  ;;  %v5648_v35 = vrot.slane %v1790_v25, %v10855_v17  ;;  %v590_v25 = vld [vmem:[%s10757_s11 + $0xa88] sm:$0xff]  ;;  %vm9439_vm15 = vcmask 1042434  }
 0x2f1   : > { %v5653_v45 = vsel %vm4360_vm0, %v5652_v33, %v5648_v35  ;;  %1931 = vadd.xlane.f32.xlu1 %v580_v27  ;;  %1929 = vadd.xlane.f32.xlu0 %v579_v29  ;;  %v589_v27 = vld [vmem:[%s10757_s11 + $0xa80] sm:$0xff] }
 0x2f2   : > { %v1796_v6 = vpop.xlane.xlu1 %1795  ;;  %v1794_v39 = vpop.xlane.xlu0 %1793 }
 0x2f3   : > { %v5662_v41 = vrot.slane %v1796_v6, %v10866_v22  ;;  %v5657_v43 = vrot.slane %v1794_v39, %v10863_v21 }
 0x2f5   : > { %v5658_v46 = vsel %vm4367_vm1, %v5657_v43, %v5653_v45  ;;  %1935 = vadd.xlane.f32.xlu1 %v582_v40  ;;  %1933 = vadd.xlane.f32.xlu0 %v581_v47  ;;  %v592_v40 = vld [vmem:[%s10757_s11 + $0xa98] sm:$0xff]  ;;  %v591_v47 = vld [vmem:[%s10757_s11 + $0xa90] sm:$0xff] }
 0x2f6   : > { %v1800_v44 = vpop.xlane.xlu1 %1799  ;;  %v5663_v48 = vsel %vm4374_vm2, %v5662_v41, %v5658_v46  ;;  %v1798_v49 = vpop.xlane.xlu0 %1797 }
 0x2f7   : > { %v5672_v52 = vrot.slane %v1800_v44, %v10875_v31  ;;  %v5667_v53 = vrot.slane %v1798_v49, %v10878_v32 }
 0x2f9   : > { %v5668_v56 = vsel %vm4381_vm3, %v5667_v53, %v5663_v48  ;;  %1939 = vadd.xlane.f32.xlu1 %v584_v28  ;;  %1937 = vadd.xlane.f32.xlu0 %v583_v50  ;;  %v594_v28 = vld [vmem:[%s10757_s11 + $0xaa8] sm:$0xff]  ;;  %v593_v50 = vld [vmem:[%s10757_s11 + $0xaa0] sm:$0xff] }
 0x2fa   : > { %v1804_v57 = vpop.xlane.xlu1 %1803  ;;  %v5673_v13 = vsel %vm4388_vm4, %v5672_v52, %v5668_v56  ;;  %v1802_v59 = vpop.xlane.xlu0 %1801 }
 0x2fb   : > { %v5682_v63 = vrot.slane %v1804_v57, %v10884_v36  ;;  %v5677_v0 = vrot.slane %v1802_v59, %v10890_v42 }
 0x2fd   : > { %v5678_v3 = vsel %vm4395_vm5, %v5677_v0, %v5673_v13  ;;  %1943 = vadd.xlane.f32.xlu1 %v586_v61  ;;  %1941 = vadd.xlane.f32.xlu0 %v585_v62  ;;  %v596_v61 = vld [vmem:[%s10757_s11 + $0xab8] sm:$0xff]  ;;  %v595_v62 = vld [vmem:[%s10757_s11 + $0xab0] sm:$0xff] }
 0x2fe   : > { %v1808_v10 = vpop.xlane.xlu1 %1807  ;;  %v5683_v4 = vsel %vm4402_vm6, %v5682_v63, %v5678_v3  ;;  %v1806_v8 = vpop.xlane.xlu0 %1805 }
 0x2ff   : > { %v5692_v12 = vrot.slane %v1808_v10, %v10902_v54  ;;  %v5687_v14 = vrot.slane %v1806_v8, %v10908_v58 }
 0x301   : > { %v5688_v15 = vsel %vm4409_vm7, %v5687_v14, %v5683_v4  ;;  %1947 = vadd.xlane.f32.xlu1 %v588_v11  ;;  %1945 = vadd.xlane.f32.xlu0 %v587_v1  ;;  %v598_v11 = vld [vmem:[%s10757_s11 + $0xac8] sm:$0xff]  ;;  %v597_v1 = vld [vmem:[%s10757_s11 + $0xac0] sm:$0xff] }
 0x302   : > { %v1812_v20 = vpop.xlane.xlu1 %1811  ;;  %v5693_v23 = vsel %vm4416_vm8, %v5692_v12, %v5688_v15  ;;  %v1810_v51 = vpop.xlane.xlu0 %1809 }
 0x303   : > { %v5702_v29 = vrot.slane %v1812_v20, %v10916_v2  ;;  %v5697_v33 = vrot.slane %v1810_v51, %v10922_v7  ;;  %v600_v51 = vld [vmem:[%s10757_s11 + $0xad8] sm:$0xff] }
 0x305   : > { %v5698_v35 = vsel %vm4423_vm9, %v5697_v33, %v5693_v23  ;;  %1951 = vadd.xlane.f32.xlu1 %v590_v25  ;;  %1949 = vadd.xlane.f32.xlu0 %v589_v27  ;;  %v599_v25 = vld [vmem:[%s10757_s11 + $0xad0] sm:$0xff] }
 0x306   : > { %v1816_v45 = vpop.xlane.xlu1 %1815  ;;  %v5703_v6 = vsel %vm4430_vm10, %v5702_v29, %v5698_v35  ;;  %v1814_v39 = vpop.xlane.xlu0 %1813 }
 0x307   : > { %v5712_v41 = vrot.slane %v1816_v45, %v10930_v16  ;;  %v5707_v43 = vrot.slane %v1814_v39, %v10936_v24  ;;  %v602_v39 = vld [vmem:[%s10757_s11 + $0xae8] sm:$0xff] }
 0x309   : > { %v5708_v46 = vsel %vm4437_vm11, %v5707_v43, %v5703_v6  ;;  %1955 = vadd.xlane.f32.xlu1 %v592_v40  ;;  %1953 = vadd.xlane.f32.xlu0 %v591_v47  ;;  %v601_v40 = vld [vmem:[%s10757_s11 + $0xae0] sm:$0xff] }
 0x30a   : > { %v1820_v44 = vpop.xlane.xlu1 %1819  ;;  %v5713_v48 = vsel %vm4444_vm12, %v5712_v41, %v5708_v46  ;;  %v1818_v49 = vpop.xlane.xlu0 %1817 }
 0x30b   : > { %v5722_v52 = vrot.slane %v1820_v44, %v10944_v34  ;;  %v5717_v53 = vrot.slane %v1818_v49, %v10949_v37  ;;  %v604_v49 = vld [vmem:[%s10757_s11 + $0xaf8] sm:$0xff] }
 0x30d   : > { %v5718_v56 = vsel %vm4451_vm13, %v5717_v53, %v5713_v48  ;;  %1959 = vadd.xlane.f32.xlu1 %v594_v28  ;;  %1957 = vadd.xlane.f32.xlu0 %v593_v50  ;;  %v603_v28 = vld [vmem:[%s10757_s11 + $0xaf0] sm:$0xff] }
 0x30e   : > { %v5723_v57 = vsel %vm4458_vm14, %v5722_v52, %v5718_v56  ;;  %v1824_v13 = vpop.xlane.xlu1 %1823  ;;  %v1822_v59 = vpop.xlane.xlu0 %1821 }
 0x30f   : > { %v11763_v63 = vsel %vm9439_vm15, %v5723_v57, %v11355_v26  ;;  %v5731_v0 = vrot.slane %v1824_v13, %v10858_v18  ;;  %v5727_v3 = vrot.slane %v1822_v59, %v10855_v17  ;;  %v606_v59 = vld [vmem:[%s10757_s11 + $0xb08] sm:$0xff] }
 0x311   : > { %v5732_v10 = vsel %vm4360_vm0, %v5731_v0, %v5727_v3  ;;  %1963 = vadd.xlane.f32.xlu1 %v596_v61  ;;  %1961 = vadd.xlane.f32.xlu0 %v595_v62  ;;  %v605_v61 = vld [vmem:[%s10757_s11 + $0xb00] sm:$0xff] }
 0x312   : > { %v1828_v4 = vpop.xlane.xlu1 %1827  ;;  %v1826_v8 = vpop.xlane.xlu0 %1825 }
 0x313   : > { %v5741_v12 = vrot.slane %v1828_v4, %v10866_v22  ;;  %v5736_v14 = vrot.slane %v1826_v8, %v10863_v21 }
 0x315   : > { %v5737_v26 = vsel %vm4367_vm1, %v5736_v14, %v5732_v10  ;;  %1967 = vadd.xlane.f32.xlu1 %v598_v11  ;;  %1965 = vadd.xlane.f32.xlu0 %v597_v1  ;;  %v608_v11 = vld [vmem:[%s10757_s11 + $0xb18] sm:$0xff]  ;;  %v607_v1 = vld [vmem:[%s10757_s11 + $0xb10] sm:$0xff] }
 0x316   : > { %v1832_v15 = vpop.xlane.xlu1 %1831  ;;  %v5742_v20 = vsel %vm4374_vm2, %v5741_v12, %v5737_v26  ;;  %v1830_v23 = vpop.xlane.xlu0 %1829 }
 0x317   : > { %v5751_v27 = vrot.slane %v1832_v15, %v10875_v31  ;;  %v5746_v29 = vrot.slane %v1830_v23, %v10878_v32 }
 0x319   : > { %v5747_v33 = vsel %vm4381_vm3, %v5746_v29, %v5742_v20  ;;  %1971 = vadd.xlane.f32.xlu1 %v600_v51  ;;  %1969 = vadd.xlane.f32.xlu0 %v599_v25  ;;  %v610_v51 = vld [vmem:[%s10757_s11 + $0xb28] sm:$0xff]  ;;  %v609_v25 = vld [vmem:[%s10757_s11 + $0xb20] sm:$0xff] }
 0x31a   : > { %v1836_v35 = vpop.xlane.xlu1 %1835  ;;  %v5752_v45 = vsel %vm4388_vm4, %v5751_v27, %v5747_v33  ;;  %v1834_v6 = vpop.xlane.xlu0 %1833 }
 0x31b   : > { %v5761_v47 = vrot.slane %v1836_v35, %v10884_v36  ;;  %v5756_v41 = vrot.slane %v1834_v6, %v10890_v42 }
 0x31d   : > { %v5757_v43 = vsel %vm4395_vm5, %v5756_v41, %v5752_v45  ;;  %1975 = vadd.xlane.f32.xlu1 %v602_v39  ;;  %1973 = vadd.xlane.f32.xlu0 %v601_v40  ;;  %v612_v39 = vld [vmem:[%s10757_s11 + $0xb38] sm:$0xff]  ;;  %v611_v40 = vld [vmem:[%s10757_s11 + $0xb30] sm:$0xff] }
 0x31e   : > { %v1840_v46 = vpop.xlane.xlu1 %1839  ;;  %v5762_v44 = vsel %vm4402_vm6, %v5761_v47, %v5757_v43  ;;  %v1838_v48 = vpop.xlane.xlu0 %1837 }
 0x31f   : > { %v5771_v50 = vrot.slane %v1840_v46, %v10902_v54  ;;  %v5766_v52 = vrot.slane %v1838_v48, %v10908_v58 }
 0x321   : > { %v5767_v53 = vsel %vm4409_vm7, %v5766_v52, %v5762_v44  ;;  %1979 = vadd.xlane.f32.xlu1 %v604_v49  ;;  %1977 = vadd.xlane.f32.xlu0 %v603_v28  ;;  %v614_v49 = vld [vmem:[%s10757_s11 + $0xb48] sm:$0xff]  ;;  %v613_v28 = vld [vmem:[%s10757_s11 + $0xb40] sm:$0xff] }
 0x322   : > { %v1844_v56 = vpop.xlane.xlu1 %1843  ;;  %v5772_v57 = vsel %vm4416_vm8, %v5771_v50, %v5767_v53  ;;  %v1842_v13 = vpop.xlane.xlu0 %1841 }
 0x323   : > { %v5781_v62 = vrot.slane %v1844_v56, %v10916_v2  ;;  %v5776_v0 = vrot.slane %v1842_v13, %v10922_v7  ;;  %v616_v13 = vld [vmem:[%s10757_s11 + $0xb58] sm:$0xff] }
 0x325   : > { %v5777_v3 = vsel %vm4423_vm9, %v5776_v0, %v5772_v57  ;;  %1983 = vadd.xlane.f32.xlu1 %v606_v59  ;;  %1981 = vadd.xlane.f32.xlu0 %v605_v61  ;;  %v615_v59 = vld [vmem:[%s10757_s11 + $0xb50] sm:$0xff] }
 0x326   : > { %v1848_v10 = vpop.xlane.xlu1 %1847  ;;  %v5782_v4 = vsel %vm4430_vm10, %v5781_v62, %v5777_v3  ;;  %v1846_v8 = vpop.xlane.xlu0 %1845 }
 0x327   : > { %v5791_v12 = vrot.slane %v1848_v10, %v10930_v16  ;;  %v5786_v14 = vrot.slane %v1846_v8, %v10936_v24  ;;  %v618_v8 = vld [vmem:[%s10757_s11 + $0xb68] sm:$0xff] }
 0x329   : > { %v5787_v26 = vsel %vm4437_vm11, %v5786_v14, %v5782_v4  ;;  %1987 = vadd.xlane.f32.xlu1 %v608_v11  ;;  %1985 = vadd.xlane.f32.xlu0 %v607_v1  ;;  %v617_v11 = vld [vmem:[%s10757_s11 + $0xb60] sm:$0xff] }
 0x32a   : > { %v1852_v15 = vpop.xlane.xlu1 %1851  ;;  %v5792_v20 = vsel %vm4444_vm12, %v5791_v12, %v5787_v26  ;;  %v1850_v23 = vpop.xlane.xlu0 %1849 }
 0x32b   : > { %v5801_v27 = vrot.slane %v1852_v15, %v10944_v34  ;;  %v5796_v29 = vrot.slane %v1850_v23, %v10949_v37  ;;  %v620_v23 = vld [vmem:[%s10757_s11 + $0xb78] sm:$0xff] }
 0x32d   : > { %v5797_v33 = vsel %vm4451_vm13, %v5796_v29, %v5792_v20  ;;  %1991 = vadd.xlane.f32.xlu1 %v610_v51  ;;  %1989 = vadd.xlane.f32.xlu0 %v609_v25  ;;  %v619_v51 = vld [vmem:[%s10757_s11 + $0xb70] sm:$0xff] }
 0x32e   : > { %v5802_v35 = vsel %vm4458_vm14, %v5801_v27, %v5797_v33  ;;  %v1856_v45 = vpop.xlane.xlu1 %1855  ;;  %v1854_v6 = vpop.xlane.xlu0 %1853 }
 0x32f   : > { %v11814_v47 = vsel %vm9439_vm15, %v5802_v35, %v11406_v60  ;;  %v5810_v41 = vrot.slane %v1856_v45, %v10858_v18  ;;  %v5806_v43 = vrot.slane %v1854_v6, %v10855_v17  ;;  %v622_v6 = vld [vmem:[%s10757_s11 + $0xb88] sm:$0xff] }
 0x331   : > { %v5811_v46 = vsel %vm4360_vm0, %v5810_v41, %v5806_v43  ;;  %1995 = vadd.xlane.f32.xlu1 %v612_v39  ;;  %1993 = vadd.xlane.f32.xlu0 %v611_v40  ;;  %v621_v39 = vld [vmem:[%s10757_s11 + $0xb80] sm:$0xff] }
 0x332   : > { %v1860_v44 = vpop.xlane.xlu1 %1859  ;;  %v1858_v48 = vpop.xlane.xlu0 %1857 }
 0x333   : > { %v5820_v50 = vrot.slane %v1860_v44, %v10866_v22  ;;  %v5815_v52 = vrot.slane %v1858_v48, %v10863_v21 }
 0x335   : > { %v5816_v60 = vsel %vm4367_vm1, %v5815_v52, %v5811_v46  ;;  %1999 = vadd.xlane.f32.xlu1 %v614_v49  ;;  %1997 = vadd.xlane.f32.xlu0 %v613_v28  ;;  %v624_v49 = vld [vmem:[%s10757_s11 + $0xb98] sm:$0xff]  ;;  %v623_v28 = vld [vmem:[%s10757_s11 + $0xb90] sm:$0xff] }
 0x336   : > { %v1864_v53 = vpop.xlane.xlu1 %1863  ;;  %v5821_v56 = vsel %vm4374_vm2, %v5820_v50, %v5816_v60  ;;  %v1862_v57 = vpop.xlane.xlu0 %1861 }
 0x337   : > { %v5830_v61 = vrot.slane %v1864_v53, %v10875_v31  ;;  %v5825_v62 = vrot.slane %v1862_v57, %v10878_v32 }
 0x339   : > { %v5826_v0 = vsel %vm4381_vm3, %v5825_v62, %v5821_v56  ;;  %2003 = vadd.xlane.f32.xlu1 %v616_v13  ;;  %2001 = vadd.xlane.f32.xlu0 %v615_v59  ;;  %v626_v13 = vld [vmem:[%s10757_s11 + $0xba8] sm:$0xff]  ;;  %v625_v59 = vld [vmem:[%s10757_s11 + $0xba0] sm:$0xff] }
 0x33a   : > { %v1868_v3 = vpop.xlane.xlu1 %1867  ;;  %v5831_v10 = vsel %vm4388_vm4, %v5830_v61, %v5826_v0  ;;  %v1866_v4 = vpop.xlane.xlu0 %1865 }
 0x33b   : > { %v5840_v1 = vrot.slane %v1868_v3, %v10884_v36  ;;  %v5835_v12 = vrot.slane %v1866_v4, %v10890_v42 }
 0x33d   : > { %v5836_v14 = vsel %vm4395_vm5, %v5835_v12, %v5831_v10  ;;  %2007 = vadd.xlane.f32.xlu1 %v618_v8  ;;  %2005 = vadd.xlane.f32.xlu0 %v617_v11  ;;  %v628_v8 = vld [vmem:[%s10757_s11 + $0xbb8] sm:$0xff]  ;;  %v627_v11 = vld [vmem:[%s10757_s11 + $0xbb0] sm:$0xff] }
 0x33e   : > { %v1872_v26 = vpop.xlane.xlu1 %1871  ;;  %v5841_v15 = vsel %vm4402_vm6, %v5840_v1, %v5836_v14  ;;  %v1870_v20 = vpop.xlane.xlu0 %1869 }
 0x33f   : > { %v5850_v25 = vrot.slane %v1872_v26, %v10902_v54  ;;  %v5845_v27 = vrot.slane %v1870_v20, %v10908_v58 }
 0x341   : > { %v5846_v29 = vsel %vm4409_vm7, %v5845_v27, %v5841_v15  ;;  %2011 = vadd.xlane.f32.xlu1 %v620_v23  ;;  %2009 = vadd.xlane.f32.xlu0 %v619_v51  ;;  %v630_v23 = vld [vmem:[%s10757_s11 + $0xbc8] sm:$0xff]  ;;  %v629_v51 = vld [vmem:[%s10757_s11 + $0xbc0] sm:$0xff] }
 0x342   : > { %v1876_v33 = vpop.xlane.xlu1 %1875  ;;  %v5851_v35 = vsel %vm4416_vm8, %v5850_v25, %v5846_v29  ;;  %v1874_v45 = vpop.xlane.xlu0 %1873 }
 0x343   : > { %v5860_v40 = vrot.slane %v1876_v33, %v10916_v2  ;;  %v5855_v41 = vrot.slane %v1874_v45, %v10922_v7  ;;  %v632_v45 = vld [vmem:[%s10757_s11 + $0xbd8] sm:$0xff] }
 0x345   : > { %v5856_v43 = vsel %vm4423_vm9, %v5855_v41, %v5851_v35  ;;  %2015 = vadd.xlane.f32.xlu1 %v622_v6  ;;  %2013 = vadd.xlane.f32.xlu0 %v621_v39  ;;  %v631_v6 = vld [vmem:[%s10757_s11 + $0xbd0] sm:$0xff] }
 0x346   : > { %v1880_v46 = vpop.xlane.xlu1 %1879  ;;  %v5861_v44 = vsel %vm4430_vm10, %v5860_v40, %v5856_v43  ;;  %v1878_v48 = vpop.xlane.xlu0 %1877 }
 0x347   : > { %v5870_v50 = vrot.slane %v1880_v46, %v10930_v16  ;;  %v5865_v52 = vrot.slane %v1878_v48, %v10936_v24  ;;  %v634_v48 = vld [vmem:[%s10757_s11 + $0xbe8] sm:$0xff] }
 0x349   : > { %v5866_v60 = vsel %vm4437_vm11, %v5865_v52, %v5861_v44  ;;  %2019 = vadd.xlane.f32.xlu1 %v624_v49  ;;  %2017 = vadd.xlane.f32.xlu0 %v623_v28  ;;  %v633_v49 = vld [vmem:[%s10757_s11 + $0xbe0] sm:$0xff] }
 0x34a   : > { %v1884_v53 = vpop.xlane.xlu1 %1883  ;;  %v5871_v56 = vsel %vm4444_vm12, %v5870_v50, %v5866_v60  ;;  %v1882_v57 = vpop.xlane.xlu0 %1881 }
 0x34b   : > { %v5880_v61 = vrot.slane %v1884_v53, %v10944_v34  ;;  %v5875_v62 = vrot.slane %v1882_v57, %v10949_v37  ;;  %v636_v57 = vld [vmem:[%s10757_s11 + $0xbf8] sm:$0xff] }
 0x34d   : > { %v5876_v0 = vsel %vm4451_vm13, %v5875_v62, %v5871_v56  ;;  %2023 = vadd.xlane.f32.xlu1 %v626_v13  ;;  %2021 = vadd.xlane.f32.xlu0 %v625_v59  ;;  %v635_v13 = vld [vmem:[%s10757_s11 + $0xbf0] sm:$0xff] }
 0x34e   : > { %v5881_v3 = vsel %vm4458_vm14, %v5880_v61, %v5876_v0  ;;  %v1888_v10 = vpop.xlane.xlu1 %1887  ;;  %v1886_v4 = vpop.xlane.xlu0 %1885 }
 0x34f   : > { %v11865_v1 = vsel %vm9439_vm15, %v5881_v3, %v11457_v38  ;;  %v5889_v12 = vrot.slane %v1888_v10, %v10858_v18  ;;  %v5885_v14 = vrot.slane %v1886_v4, %v10855_v17  ;;  %v638_v4 = vld [vmem:[%s10757_s11 + $0xc08] sm:$0xff] }
 0x351   : > { %v5890_v26 = vsel %vm4360_vm0, %v5889_v12, %v5885_v14  ;;  %2027 = vadd.xlane.f32.xlu1 %v628_v8  ;;  %2025 = vadd.xlane.f32.xlu0 %v627_v11  ;;  %v637_v8 = vld [vmem:[%s10757_s11 + $0xc00] sm:$0xff] }
 0x352   : > { %v1892_v15 = vpop.xlane.xlu1 %1891  ;;  %v1890_v20 = vpop.xlane.xlu0 %1889 }
 0x353   : > { %v5899_v25 = vrot.slane %v1892_v15, %v10866_v22  ;;  %v5894_v27 = vrot.slane %v1890_v20, %v10863_v21 }
 0x355   : > { %v5895_v38 = vsel %vm4367_vm1, %v5894_v27, %v5890_v26  ;;  %2031 = vadd.xlane.f32.xlu1 %v630_v23  ;;  %2029 = vadd.xlane.f32.xlu0 %v629_v51  ;;  %v640_v23 = vld [vmem:[%s10757_s11 + $0xc18] sm:$0xff]  ;;  %v639_v51 = vld [vmem:[%s10757_s11 + $0xc10] sm:$0xff] }
 0x356   : > { %v1896_v29 = vpop.xlane.xlu1 %1895  ;;  %v5900_v33 = vsel %vm4374_vm2, %v5899_v25, %v5895_v38  ;;  %v1894_v35 = vpop.xlane.xlu0 %1893 }
 0x357   : > { %v5909_v39 = vrot.slane %v1896_v29, %v10875_v31  ;;  %v5904_v40 = vrot.slane %v1894_v35, %v10878_v32 }
 0x359   : > { %v5905_v41 = vsel %vm4381_vm3, %v5904_v40, %v5900_v33  ;;  %2035 = vadd.xlane.f32.xlu1 %v632_v45  ;;  %2033 = vadd.xlane.f32.xlu0 %v631_v6  ;;  %v642_v45 = vld [vmem:[%s10757_s11 + $0xc28] sm:$0xff]  ;;  %v641_v6 = vld [vmem:[%s10757_s11 + $0xc20] sm:$0xff] }
 0x35a   : > { %v1900_v43 = vpop.xlane.xlu1 %1899  ;;  %v5910_v46 = vsel %vm4388_vm4, %v5909_v39, %v5905_v41  ;;  %v1898_v44 = vpop.xlane.xlu0 %1897 }
 0x35b   : > { %v5919_v28 = vrot.slane %v1900_v43, %v10884_v36  ;;  %v5914_v50 = vrot.slane %v1898_v44, %v10890_v42 }
 0x35d   : > { %v5915_v52 = vsel %vm4395_vm5, %v5914_v50, %v5910_v46  ;;  %2039 = vadd.xlane.f32.xlu1 %v634_v48  ;;  %2037 = vadd.xlane.f32.xlu0 %v633_v49  ;;  %v644_v48 = vld [vmem:[%s10757_s11 + $0xc38] sm:$0xff]  ;;  %v643_v49 = vld [vmem:[%s10757_s11 + $0xc30] sm:$0xff] }
 0x35e   : > { %v1904_v60 = vpop.xlane.xlu1 %1903  ;;  %v5920_v53 = vsel %vm4402_vm6, %v5919_v28, %v5915_v52  ;;  %v1902_v56 = vpop.xlane.xlu0 %1901 }
 0x35f   : > { %v5929_v59 = vrot.slane %v1904_v60, %v10902_v54  ;;  %v5924_v61 = vrot.slane %v1902_v56, %v10908_v58 }
 0x361   : > { %v5925_v62 = vsel %vm4409_vm7, %v5924_v61, %v5920_v53  ;;  %2043 = vadd.xlane.f32.xlu1 %v636_v57  ;;  %2041 = vadd.xlane.f32.xlu0 %v635_v13  ;;  %v646_v57 = vld [vmem:[%s10757_s11 + $0xc48] sm:$0xff]  ;;  %v645_v13 = vld [vmem:[%s10757_s11 + $0xc40] sm:$0xff] }
 0x362   : > { %v1908_v0 = vpop.xlane.xlu1 %1907  ;;  %v5930_v3 = vsel %vm4416_vm8, %v5929_v59, %v5925_v62  ;;  %v1906_v10 = vpop.xlane.xlu0 %1905 }
 0x363   : > { %v5939_v11 = vrot.slane %v1908_v0, %v10916_v2  ;;  %v5934_v12 = vrot.slane %v1906_v10, %v10922_v7  ;;  %v648_v10 = vld [vmem:[%s10757_s11 + $0xc58] sm:$0xff] }
 0x365   : > { %v5935_v14 = vsel %vm4423_vm9, %v5934_v12, %v5930_v3  ;;  %2047 = vadd.xlane.f32.xlu1 %v638_v4  ;;  %2045 = vadd.xlane.f32.xlu0 %v637_v8  ;;  %v647_v4 = vld [vmem:[%s10757_s11 + $0xc50] sm:$0xff] }
 0x366   : > { %v1912_v26 = vpop.xlane.xlu1 %1911  ;;  %v5940_v15 = vsel %vm4430_vm10, %v5939_v11, %v5935_v14  ;;  %v1910_v20 = vpop.xlane.xlu0 %1909 }
 0x367   : > { %v5949_v25 = vrot.slane %v1912_v26, %v10930_v16  ;;  %v5944_v27 = vrot.slane %v1910_v20, %v10936_v24  ;;  %v650_v20 = vld [vmem:[%s10757_s11 + $0xc68] sm:$0xff] }
 0x369   : > { %v5945_v38 = vsel %vm4437_vm11, %v5944_v27, %v5940_v15  ;;  %2051 = vadd.xlane.f32.xlu1 %v640_v23  ;;  %2049 = vadd.xlane.f32.xlu0 %v639_v51  ;;  %v649_v23 = vld [vmem:[%s10757_s11 + $0xc60] sm:$0xff] }
 0x36a   : > { %v1916_v29 = vpop.xlane.xlu1 %1915  ;;  %v5950_v33 = vsel %vm4444_vm12, %v5949_v25, %v5945_v38  ;;  %v1914_v35 = vpop.xlane.xlu0 %1913 }
 0x36b   : > { %v5959_v39 = vrot.slane %v1916_v29, %v10944_v34  ;;  %v5954_v40 = vrot.slane %v1914_v35, %v10949_v37  ;;  %v652_v35 = vld [vmem:[%s10757_s11 + $0xc78] sm:$0xff] }
 0x36d   : > { %v5955_v41 = vsel %vm4451_vm13, %v5954_v40, %v5950_v33  ;;  %2055 = vadd.xlane.f32.xlu1 %v642_v45  ;;  %2053 = vadd.xlane.f32.xlu0 %v641_v6  ;;  %v651_v45 = vld [vmem:[%s10757_s11 + $0xc70] sm:$0xff] }
 0x36e   : > { %v5960_v43 = vsel %vm4458_vm14, %v5959_v39, %v5955_v41  ;;  %v1920_v46 = vpop.xlane.xlu1 %1919  ;;  %v1918_v44 = vpop.xlane.xlu0 %1917 }
 0x36f   : > { %v11916_v28 = vsel %vm9439_vm15, %v5960_v43, %v11508_v5  ;;  %v5968_v50 = vrot.slane %v1920_v46, %v10858_v18  ;;  %v5964_v52 = vrot.slane %v1918_v44, %v10855_v17  ;;  %v654_v44 = vld [vmem:[%s10757_s11 + $0xc88] sm:$0xff] }
 0x371   : > { %v5969_v60 = vsel %vm4360_vm0, %v5968_v50, %v5964_v52  ;;  %2059 = vadd.xlane.f32.xlu1 %v644_v48  ;;  %2057 = vadd.xlane.f32.xlu0 %v643_v49  ;;  %v653_v48 = vld [vmem:[%s10757_s11 + $0xc80] sm:$0xff] }
 0x372   : > { %v1924_v53 = vpop.xlane.xlu1 %1923  ;;  %v1922_v56 = vpop.xlane.xlu0 %1921 }
 0x373   : > { %v5978_v59 = vrot.slane %v1924_v53, %v10866_v22  ;;  %v5973_v61 = vrot.slane %v1922_v56, %v10863_v21 }
 0x375   : > { %v5974_v5 = vsel %vm4367_vm1, %v5973_v61, %v5969_v60  ;;  %2063 = vadd.xlane.f32.xlu1 %v646_v57  ;;  %2061 = vadd.xlane.f32.xlu0 %v645_v13  ;;  %v656_v57 = vld [vmem:[%s10757_s11 + $0xc98] sm:$0xff]  ;;  %v655_v13 = vld [vmem:[%s10757_s11 + $0xc90] sm:$0xff] }
 0x376   : > { %v1928_v62 = vpop.xlane.xlu1 %1927  ;;  %v5979_v0 = vsel %vm4374_vm2, %v5978_v59, %v5974_v5  ;;  %v1926_v3 = vpop.xlane.xlu0 %1925 }
 0x377   : > { %v5988_v8 = vrot.slane %v1928_v62, %v10875_v31  ;;  %v5983_v11 = vrot.slane %v1926_v3, %v10878_v32 }
 0x379   : > { %v5984_v12 = vsel %vm4381_vm3, %v5983_v11, %v5979_v0  ;;  %2067 = vadd.xlane.f32.xlu1 %v648_v10  ;;  %2065 = vadd.xlane.f32.xlu0 %v647_v4  ;;  %v658_v10 = vld [vmem:[%s10757_s11 + $0xca8] sm:$0xff]  ;;  %v657_v4 = vld [vmem:[%s10757_s11 + $0xca0] sm:$0xff] }
 0x37a   : > { %v1932_v14 = vpop.xlane.xlu1 %1931  ;;  %v5989_v26 = vsel %vm4388_vm4, %v5988_v8, %v5984_v12  ;;  %v1930_v15 = vpop.xlane.xlu0 %1929 }
 0x37b   : > { %v5998_v51 = vrot.slane %v1932_v14, %v10884_v36  ;;  %v5993_v25 = vrot.slane %v1930_v15, %v10890_v42 }
 0x37d   : > { %v5994_v27 = vsel %vm4395_vm5, %v5993_v25, %v5989_v26  ;;  %2071 = vadd.xlane.f32.xlu1 %v650_v20  ;;  %2069 = vadd.xlane.f32.xlu0 %v649_v23  ;;  %v660_v20 = vld [vmem:[%s10757_s11 + $0xcb8] sm:$0xff]  ;;  %v659_v23 = vld [vmem:[%s10757_s11 + $0xcb0] sm:$0xff] }
 0x37e   : > { %v1936_v38 = vpop.xlane.xlu1 %1935  ;;  %v5999_v29 = vsel %vm4402_vm6, %v5998_v51, %v5994_v27  ;;  %v1934_v33 = vpop.xlane.xlu0 %1933 }
 0x37f   : > { %v6008_v6 = vrot.slane %v1936_v38, %v10902_v54  ;;  %v6003_v39 = vrot.slane %v1934_v33, %v10908_v58 }
 0x381   : > { %v6004_v40 = vsel %vm4409_vm7, %v6003_v39, %v5999_v29  ;;  %2075 = vadd.xlane.f32.xlu1 %v652_v35  ;;  %2073 = vadd.xlane.f32.xlu0 %v651_v45  ;;  %v662_v35 = vld [vmem:[%s10757_s11 + $0xcc8] sm:$0xff]  ;;  %v661_v45 = vld [vmem:[%s10757_s11 + $0xcc0] sm:$0xff] }
 0x382   : > { %v1940_v41 = vpop.xlane.xlu1 %1939  ;;  %v6009_v43 = vsel %vm4416_vm8, %v6008_v6, %v6004_v40  ;;  %v1938_v46 = vpop.xlane.xlu0 %1937 }
 0x383   : > { %v6018_v49 = vrot.slane %v1940_v41, %v10916_v2  ;;  %v6013_v50 = vrot.slane %v1938_v46, %v10922_v7  ;;  %v664_v46 = vld [vmem:[%s10757_s11 + $0xcd8] sm:$0xff] }
 0x385   : > { %v6014_v52 = vsel %vm4423_vm9, %v6013_v50, %v6009_v43  ;;  %2079 = vadd.xlane.f32.xlu1 %v654_v44  ;;  %2077 = vadd.xlane.f32.xlu0 %v653_v48  ;;  %v663_v44 = vld [vmem:[%s10757_s11 + $0xcd0] sm:$0xff] }
 0x386   : > { %v1944_v60 = vpop.xlane.xlu1 %1943  ;;  %v6019_v53 = vsel %vm4430_vm10, %v6018_v49, %v6014_v52  ;;  %v1942_v56 = vpop.xlane.xlu0 %1941 }
 0x387   : > { %v6028_v59 = vrot.slane %v1944_v60, %v10930_v16  ;;  %v6023_v61 = vrot.slane %v1942_v56, %v10936_v24  ;;  %v666_v56 = vld [vmem:[%s10757_s11 + $0xce8] sm:$0xff] }
 0x389   : > { %v6024_v5 = vsel %vm4437_vm11, %v6023_v61, %v6019_v53  ;;  %2083 = vadd.xlane.f32.xlu1 %v656_v57  ;;  %2081 = vadd.xlane.f32.xlu0 %v655_v13  ;;  %v665_v57 = vld [vmem:[%s10757_s11 + $0xce0] sm:$0xff] }
 0x38a   : > { %v1948_v62 = vpop.xlane.xlu1 %1947  ;;  %v6029_v0 = vsel %vm4444_vm12, %v6028_v59, %v6024_v5  ;;  %v1946_v3 = vpop.xlane.xlu0 %1945 }
 0x38b   : > { %v6038_v8 = vrot.slane %v1948_v62, %v10944_v34  ;;  %v6033_v11 = vrot.slane %v1946_v3, %v10949_v37  ;;  %v668_v3 = vld [vmem:[%s10757_s11 + $0xcf8] sm:$0xff] }
 0x38d   : > { %v6034_v12 = vsel %vm4451_vm13, %v6033_v11, %v6029_v0  ;;  %2087 = vadd.xlane.f32.xlu1 %v658_v10  ;;  %2085 = vadd.xlane.f32.xlu0 %v657_v4  ;;  %v667_v10 = vld [vmem:[%s10757_s11 + $0xcf0] sm:$0xff] }
 0x38e   : > { %v6039_v14 = vsel %vm4458_vm14, %v6038_v8, %v6034_v12  ;;  %v1952_v26 = vpop.xlane.xlu1 %1951  ;;  %v1950_v15 = vpop.xlane.xlu0 %1949 }
 0x38f   : > { %v11967_v51 = vsel %vm9439_vm15, %v6039_v14, %v11559_v9  ;;  %v6047_v25 = vrot.slane %v1952_v26, %v10858_v18  ;;  %v6043_v27 = vrot.slane %v1950_v15, %v10855_v17  ;;  %v670_v15 = vld [vmem:[%s10757_s11 + $0xd08] sm:$0xff] }
 0x391   : > { %v6048_v38 = vsel %vm4360_vm0, %v6047_v25, %v6043_v27  ;;  %2091 = vadd.xlane.f32.xlu1 %v660_v20  ;;  %2089 = vadd.xlane.f32.xlu0 %v659_v23  ;;  %v669_v20 = vld [vmem:[%s10757_s11 + $0xd00] sm:$0xff] }
 0x392   : > { %v1956_v29 = vpop.xlane.xlu1 %1955  ;;  %v1954_v33 = vpop.xlane.xlu0 %1953 }
 0x393   : > { %v6057_v6 = vrot.slane %v1956_v29, %v10866_v22  ;;  %v6052_v39 = vrot.slane %v1954_v33, %v10863_v21 }
 0x395   : > { %v6053_v9 = vsel %vm4367_vm1, %v6052_v39, %v6048_v38  ;;  %2095 = vadd.xlane.f32.xlu1 %v662_v35  ;;  %2093 = vadd.xlane.f32.xlu0 %v661_v45  ;;  %v672_v35 = vld [vmem:[%s10757_s11 + $0xd18] sm:$0xff]  ;;  %v671_v45 = vld [vmem:[%s10757_s11 + $0xd10] sm:$0xff] }
 0x396   : > { %v1960_v40 = vpop.xlane.xlu1 %1959  ;;  %v6058_v41 = vsel %vm4374_vm2, %v6057_v6, %v6053_v9  ;;  %v1958_v43 = vpop.xlane.xlu0 %1957 }
 0x397   : > { %v6067_v48 = vrot.slane %v1960_v40, %v10875_v31  ;;  %v6062_v49 = vrot.slane %v1958_v43, %v10878_v32 }
 0x399   : > { %v6063_v50 = vsel %vm4381_vm3, %v6062_v49, %v6058_v41  ;;  %2099 = vadd.xlane.f32.xlu1 %v664_v46  ;;  %2097 = vadd.xlane.f32.xlu0 %v663_v44  ;;  %v674_v46 = vld [vmem:[%s10757_s11 + $0xd28] sm:$0xff]  ;;  %v673_v44 = vld [vmem:[%s10757_s11 + $0xd20] sm:$0xff] }
 0x39a   : > { %v1964_v52 = vpop.xlane.xlu1 %1963  ;;  %v6068_v60 = vsel %vm4388_vm4, %v6067_v48, %v6063_v50  ;;  %v1962_v53 = vpop.xlane.xlu0 %1961 }
 0x39b   : > { %v6077_v13 = vrot.slane %v1964_v52, %v10884_v36  ;;  %v6072_v59 = vrot.slane %v1962_v53, %v10890_v42 }
 0x39d   : > { %v6073_v61 = vsel %vm4395_vm5, %v6072_v59, %v6068_v60  ;;  %2103 = vadd.xlane.f32.xlu1 %v666_v56  ;;  %2101 = vadd.xlane.f32.xlu0 %v665_v57  ;;  %v676_v56 = vld [vmem:[%s10757_s11 + $0xd38] sm:$0xff]  ;;  %v675_v57 = vld [vmem:[%s10757_s11 + $0xd30] sm:$0xff] }
 0x39e   : > { %v1968_v5 = vpop.xlane.xlu1 %1967  ;;  %v6078_v62 = vsel %vm4402_vm6, %v6077_v13, %v6073_v61  ;;  %v1966_v0 = vpop.xlane.xlu0 %1965 }
 0x39f   : > { %v6087_v4 = vrot.slane %v1968_v5, %v10902_v54  ;;  %v6082_v8 = vrot.slane %v1966_v0, %v10908_v58 }
 0x3a1   : > { %v6083_v11 = vsel %vm4409_vm7, %v6082_v8, %v6078_v62  ;;  %2107 = vadd.xlane.f32.xlu1 %v668_v3  ;;  %2105 = vadd.xlane.f32.xlu0 %v667_v10  ;;  %v678_v3 = vld [vmem:[%s10757_s11 + $0xd48] sm:$0xff]  ;;  %v677_v10 = vld [vmem:[%s10757_s11 + $0xd40] sm:$0xff] }
 0x3a2   : > { %v1972_v12 = vpop.xlane.xlu1 %1971  ;;  %v6088_v14 = vsel %vm4416_vm8, %v6087_v4, %v6083_v11  ;;  %v1970_v26 = vpop.xlane.xlu0 %1969 }
 0x3a3   : > { %v6097_v23 = vrot.slane %v1972_v12, %v10916_v2  ;;  %v6092_v25 = vrot.slane %v1970_v26, %v10922_v7  ;;  %v680_v26 = vld [vmem:[%s10757_s11 + $0xd58] sm:$0xff] }
 0x3a5   : > { %v6093_v27 = vsel %vm4423_vm9, %v6092_v25, %v6088_v14  ;;  %2111 = vadd.xlane.f32.xlu1 %v670_v15  ;;  %2109 = vadd.xlane.f32.xlu0 %v669_v20  ;;  %v679_v15 = vld [vmem:[%s10757_s11 + $0xd50] sm:$0xff] }
 0x3a6   : > { %v1976_v38 = vpop.xlane.xlu1 %1975  ;;  %v6098_v29 = vsel %vm4430_vm10, %v6097_v23, %v6093_v27  ;;  %v1974_v33 = vpop.xlane.xlu0 %1973 }
 0x3a7   : > { %v6107_v6 = vrot.slane %v1976_v38, %v10930_v16  ;;  %v6102_v39 = vrot.slane %v1974_v33, %v10936_v24  ;;  %v682_v33 = vld [vmem:[%s10757_s11 + $0xd68] sm:$0xff] }
 0x3a9   : > { %v6103_v9 = vsel %vm4437_vm11, %v6102_v39, %v6098_v29  ;;  %2115 = vadd.xlane.f32.xlu1 %v672_v35  ;;  %2113 = vadd.xlane.f32.xlu0 %v671_v45  ;;  %v681_v35 = vld [vmem:[%s10757_s11 + $0xd60] sm:$0xff] }
 0x3aa   : > { %v1980_v40 = vpop.xlane.xlu1 %1979  ;;  %v6108_v41 = vsel %vm4444_vm12, %v6107_v6, %v6103_v9  ;;  %v1978_v43 = vpop.xlane.xlu0 %1977 }
 0x3ab   : > { %v6117_v48 = vrot.slane %v1980_v40, %v10944_v34  ;;  %v6112_v49 = vrot.slane %v1978_v43, %v10949_v37  ;;  %v684_v43 = vld [vmem:[%s10757_s11 + $0xd78] sm:$0xff] }
 0x3ad   : > { %v6113_v50 = vsel %vm4451_vm13, %v6112_v49, %v6108_v41  ;;  %2119 = vadd.xlane.f32.xlu1 %v674_v46  ;;  %2117 = vadd.xlane.f32.xlu0 %v673_v44  ;;  %v683_v46 = vld [vmem:[%s10757_s11 + $0xd70] sm:$0xff] }
 0x3ae   : > { %v6118_v52 = vsel %vm4458_vm14, %v6117_v48, %v6113_v50  ;;  %v1984_v60 = vpop.xlane.xlu1 %1983  ;;  %v1982_v53 = vpop.xlane.xlu0 %1981 }
 0x3af   : > { %v12018_v13 = vsel %vm9439_vm15, %v6118_v52, %v11610_v19  ;;  %v6126_v59 = vrot.slane %v1984_v60, %v10858_v18  ;;  %v6122_v61 = vrot.slane %v1982_v53, %v10855_v17  ;;  %v686_v53 = vld [vmem:[%s10757_s11 + $0xd88] sm:$0xff] }
 0x3b1   : > { %v6127_v5 = vsel %vm4360_vm0, %v6126_v59, %v6122_v61  ;;  %2123 = vadd.xlane.f32.xlu1 %v676_v56  ;;  %2121 = vadd.xlane.f32.xlu0 %v675_v57  ;;  %v685_v56 = vld [vmem:[%s10757_s11 + $0xd80] sm:$0xff] }
 0x3b2   : > { %v1988_v62 = vpop.xlane.xlu1 %1987  ;;  %v1986_v0 = vpop.xlane.xlu0 %1985 }
 0x3b3   : > { %v6136_v4 = vrot.slane %v1988_v62, %v10866_v22  ;;  %v6131_v8 = vrot.slane %v1986_v0, %v10863_v21 }
 0x3b5   : > { %v6132_v19 = vsel %vm4367_vm1, %v6131_v8, %v6127_v5  ;;  %2127 = vadd.xlane.f32.xlu1 %v678_v3  ;;  %2125 = vadd.xlane.f32.xlu0 %v677_v10  ;;  %v688_v3 = vld [vmem:[%s10757_s11 + $0xd98] sm:$0xff]  ;;  %v687_v10 = vld [vmem:[%s10757_s11 + $0xd90] sm:$0xff] }
 0x3b6   : > { %v1992_v11 = vpop.xlane.xlu1 %1991  ;;  %v6137_v12 = vsel %vm4374_vm2, %v6136_v4, %v6132_v19  ;;  %v1990_v14 = vpop.xlane.xlu0 %1989 }
 0x3b7   : > { %v6146_v20 = vrot.slane %v1992_v11, %v10875_v31  ;;  %v6141_v23 = vrot.slane %v1990_v14, %v10878_v32 }
 0x3b9   : > { %v6142_v25 = vsel %vm4381_vm3, %v6141_v23, %v6137_v12  ;;  %2131 = vadd.xlane.f32.xlu1 %v680_v26  ;;  %2129 = vadd.xlane.f32.xlu0 %v679_v15  ;;  %v690_v26 = vld [vmem:[%s10757_s11 + $0xda8] sm:$0xff]  ;;  %v689_v15 = vld [vmem:[%s10757_s11 + $0xda0] sm:$0xff] }
 0x3ba   : > { %v1996_v27 = vpop.xlane.xlu1 %1995  ;;  %v6147_v38 = vsel %vm4388_vm4, %v6146_v20, %v6142_v25  ;;  %v1994_v29 = vpop.xlane.xlu0 %1993 }
 0x3bb   : > { %v6156_v45 = vrot.slane %v1996_v27, %v10884_v36  ;;  %v6151_v6 = vrot.slane %v1994_v29, %v10890_v42 }
 0x3bd   : > { %v6152_v39 = vsel %vm4395_vm5, %v6151_v6, %v6147_v38  ;;  %2135 = vadd.xlane.f32.xlu1 %v682_v33  ;;  %2133 = vadd.xlane.f32.xlu0 %v681_v35  ;;  %v692_v33 = vld [vmem:[%s10757_s11 + $0xdb8] sm:$0xff]  ;;  %v691_v35 = vld [vmem:[%s10757_s11 + $0xdb0] sm:$0xff] }
 0x3be   : > { %v2000_v9 = vpop.xlane.xlu1 %1999  ;;  %v6157_v40 = vsel %vm4402_vm6, %v6156_v45, %v6152_v39  ;;  %v1998_v41 = vpop.xlane.xlu0 %1997 }
 0x3bf   : > { %v6166_v44 = vrot.slane %v2000_v9, %v10902_v54  ;;  %v6161_v48 = vrot.slane %v1998_v41, %v10908_v58 }
 0x3c1   : > { %v6162_v49 = vsel %vm4409_vm7, %v6161_v48, %v6157_v40  ;;  %2139 = vadd.xlane.f32.xlu1 %v684_v43  ;;  %2137 = vadd.xlane.f32.xlu0 %v683_v46  ;;  %v694_v43 = vld [vmem:[%s10757_s11 + $0xdc8] sm:$0xff]  ;;  %v693_v46 = vld [vmem:[%s10757_s11 + $0xdc0] sm:$0xff] }
 0x3c2   : > { %v2004_v50 = vpop.xlane.xlu1 %2003  ;;  %v6167_v52 = vsel %vm4416_vm8, %v6166_v44, %v6162_v49  ;;  %v2002_v60 = vpop.xlane.xlu0 %2001 }
 0x3c3   : > { %v6176_v57 = vrot.slane %v2004_v50, %v10916_v2  ;;  %v6171_v59 = vrot.slane %v2002_v60, %v10922_v7  ;;  %v696_v60 = vld [vmem:[%s10757_s11 + $0xdd8] sm:$0xff] }
 0x3c5   : > { %v6172_v61 = vsel %vm4423_vm9, %v6171_v59, %v6167_v52  ;;  %2143 = vadd.xlane.f32.xlu1 %v686_v53  ;;  %2141 = vadd.xlane.f32.xlu0 %v685_v56  ;;  %v695_v53 = vld [vmem:[%s10757_s11 + $0xdd0] sm:$0xff] }
 0x3c6   : > { %v2008_v5 = vpop.xlane.xlu1 %2007  ;;  %v6177_v62 = vsel %vm4430_vm10, %v6176_v57, %v6172_v61  ;;  %v2006_v0 = vpop.xlane.xlu0 %2005 }
 0x3c7   : > { %v6186_v4 = vrot.slane %v2008_v5, %v10930_v16  ;;  %v6181_v8 = vrot.slane %v2006_v0, %v10936_v24  ;;  %v698_v0 = vld [vmem:[%s10757_s11 + $0xde8] sm:$0xff] }
 0x3c9   : > { %v6182_v19 = vsel %vm4437_vm11, %v6181_v8, %v6177_v62  ;;  %2147 = vadd.xlane.f32.xlu1 %v688_v3  ;;  %2145 = vadd.xlane.f32.xlu0 %v687_v10  ;;  %v697_v3 = vld [vmem:[%s10757_s11 + $0xde0] sm:$0xff] }
 0x3ca   : > { %v2012_v11 = vpop.xlane.xlu1 %2011  ;;  %v6187_v12 = vsel %vm4444_vm12, %v6186_v4, %v6182_v19  ;;  %v2010_v14 = vpop.xlane.xlu0 %2009 }
 0x3cb   : > { %v6196_v20 = vrot.slane %v2012_v11, %v10944_v34  ;;  %v6191_v23 = vrot.slane %v2010_v14, %v10949_v37  ;;  %v700_v14 = vld [vmem:[%s10757_s11 + $0xdf8] sm:$0xff] }
 0x3cd   : > { %v6192_v25 = vsel %vm4451_vm13, %v6191_v23, %v6187_v12  ;;  %2151 = vadd.xlane.f32.xlu1 %v690_v26  ;;  %2149 = vadd.xlane.f32.xlu0 %v689_v15  ;;  %v699_v26 = vld [vmem:[%s10757_s11 + $0xdf0] sm:$0xff] }
 0x3ce   : > { %v6197_v27 = vsel %vm4458_vm14, %v6196_v20, %v6192_v25  ;;  %v2016_v38 = vpop.xlane.xlu1 %2015  ;;  %v2014_v29 = vpop.xlane.xlu0 %2013 }
 0x3cf   : > { %v12069_v45 = vsel %vm9439_vm15, %v6197_v27, %v11661_v55  ;;  %v6205_v6 = vrot.slane %v2016_v38, %v10858_v18  ;;  %v6201_v39 = vrot.slane %v2014_v29, %v10855_v17  ;;  %v702_v29 = vld [vmem:[%s10757_s11 + $0xe08] sm:$0xff] }
 0x3d1   : > { %v6206_v9 = vsel %vm4360_vm0, %v6205_v6, %v6201_v39  ;;  %2155 = vadd.xlane.f32.xlu1 %v692_v33  ;;  %2153 = vadd.xlane.f32.xlu0 %v691_v35  ;;  %v701_v33 = vld [vmem:[%s10757_s11 + $0xe00] sm:$0xff] }
 0x3d2   : > { %v2020_v40 = vpop.xlane.xlu1 %2019  ;;  %v2018_v41 = vpop.xlane.xlu0 %2017 }
 0x3d3   : > { %v6215_v44 = vrot.slane %v2020_v40, %v10866_v22  ;;  %v6210_v48 = vrot.slane %v2018_v41, %v10863_v21 }
 0x3d5   : > { %v6211_v55 = vsel %vm4367_vm1, %v6210_v48, %v6206_v9  ;;  %2159 = vadd.xlane.f32.xlu1 %v694_v43  ;;  %2157 = vadd.xlane.f32.xlu0 %v693_v46  ;;  %v704_v43 = vld [vmem:[%s10757_s11 + $0xe18] sm:$0xff]  ;;  %v703_v46 = vld [vmem:[%s10757_s11 + $0xe10] sm:$0xff] }
 0x3d6   : > { %v2024_v49 = vpop.xlane.xlu1 %2023  ;;  %v6216_v50 = vsel %vm4374_vm2, %v6215_v44, %v6211_v55  ;;  %v2022_v52 = vpop.xlane.xlu0 %2021 }
 0x3d7   : > { %v6225_v56 = vrot.slane %v2024_v49, %v10875_v31  ;;  %v6220_v57 = vrot.slane %v2022_v52, %v10878_v32 }
 0x3d9   : > { %v6221_v59 = vsel %vm4381_vm3, %v6220_v57, %v6216_v50  ;;  %2163 = vadd.xlane.f32.xlu1 %v696_v60  ;;  %2161 = vadd.xlane.f32.xlu0 %v695_v53  ;;  %v706_v60 = vld [vmem:[%s10757_s11 + $0xe28] sm:$0xff]  ;;  %v705_v53 = vld [vmem:[%s10757_s11 + $0xe20] sm:$0xff] }
 0x3da   : > { %v2028_v61 = vpop.xlane.xlu1 %2027  ;;  %v6226_v5 = vsel %vm4388_vm4, %v6225_v56, %v6221_v59  ;;  %v2026_v62 = vpop.xlane.xlu0 %2025 }
 0x3db   : > { %v6235_v10 = vrot.slane %v2028_v61, %v10884_v36  ;;  %v6230_v4 = vrot.slane %v2026_v62, %v10890_v42 }
 0x3dd   : > { %v6231_v8 = vsel %vm4395_vm5, %v6230_v4, %v6226_v5  ;;  %2167 = vadd.xlane.f32.xlu1 %v698_v0  ;;  %2165 = vadd.xlane.f32.xlu0 %v697_v3  ;;  %v708_v0 = vld [vmem:[%s10757_s11 + $0xe38] sm:$0xff]  ;;  %v707_v3 = vld [vmem:[%s10757_s11 + $0xe30] sm:$0xff] }
 0x3de   : > { %v2032_v19 = vpop.xlane.xlu1 %2031  ;;  %v6236_v11 = vsel %vm4402_vm6, %v6235_v10, %v6231_v8  ;;  %v2030_v12 = vpop.xlane.xlu0 %2029 }
 0x3df   : > { %v6245_v15 = vrot.slane %v2032_v19, %v10902_v54  ;;  %v6240_v20 = vrot.slane %v2030_v12, %v10908_v58 }
 0x3e1   : > { %v6241_v23 = vsel %vm4409_vm7, %v6240_v20, %v6236_v11  ;;  %2171 = vadd.xlane.f32.xlu1 %v700_v14  ;;  %2169 = vadd.xlane.f32.xlu0 %v699_v26  ;;  %v710_v14 = vld [vmem:[%s10757_s11 + $0xe48] sm:$0xff]  ;;  %v709_v26 = vld [vmem:[%s10757_s11 + $0xe40] sm:$0xff] }
 0x3e2   : > { %v2036_v25 = vpop.xlane.xlu1 %2035  ;;  %v6246_v27 = vsel %vm4416_vm8, %v6245_v15, %v6241_v23  ;;  %v2034_v38 = vpop.xlane.xlu0 %2033 }
 0x3e3   : > { %v6255_v35 = vrot.slane %v2036_v25, %v10916_v2  ;;  %v6250_v6 = vrot.slane %v2034_v38, %v10922_v7  ;;  %v712_v38 = vld [vmem:[%s10757_s11 + $0xe58] sm:$0xff] }
 0x3e5   : > { %v6251_v39 = vsel %vm4423_vm9, %v6250_v6, %v6246_v27  ;;  %2175 = vadd.xlane.f32.xlu1 %v702_v29  ;;  %2173 = vadd.xlane.f32.xlu0 %v701_v33  ;;  %v711_v29 = vld [vmem:[%s10757_s11 + $0xe50] sm:$0xff] }
 0x3e6   : > { %v2040_v9 = vpop.xlane.xlu1 %2039  ;;  %v6256_v40 = vsel %vm4430_vm10, %v6255_v35, %v6251_v39  ;;  %v2038_v41 = vpop.xlane.xlu0 %2037 }
 0x3e7   : > { %v6265_v44 = vrot.slane %v2040_v9, %v10930_v16  ;;  %v6260_v48 = vrot.slane %v2038_v41, %v10936_v24  ;;  %v714_v41 = vld [vmem:[%s10757_s11 + $0xe68] sm:$0xff] }
 0x3e9   : > { %v6261_v55 = vsel %vm4437_vm11, %v6260_v48, %v6256_v40  ;;  %2179 = vadd.xlane.f32.xlu1 %v704_v43  ;;  %2177 = vadd.xlane.f32.xlu0 %v703_v46  ;;  %v713_v43 = vld [vmem:[%s10757_s11 + $0xe60] sm:$0xff] }
 0x3ea   : > { %v2044_v49 = vpop.xlane.xlu1 %2043  ;;  %v6266_v50 = vsel %vm4444_vm12, %v6265_v44, %v6261_v55  ;;  %v2042_v52 = vpop.xlane.xlu0 %2041 }
 0x3eb   : > { %v6275_v56 = vrot.slane %v2044_v49, %v10944_v34  ;;  %v6270_v57 = vrot.slane %v2042_v52, %v10949_v37  ;;  %v716_v52 = vld [vmem:[%s10757_s11 + $0xe78] sm:$0xff] }
 0x3ed   : > { %v6271_v59 = vsel %vm4451_vm13, %v6270_v57, %v6266_v50  ;;  %2183 = vadd.xlane.f32.xlu1 %v706_v60  ;;  %2181 = vadd.xlane.f32.xlu0 %v705_v53  ;;  %v715_v60 = vld [vmem:[%s10757_s11 + $0xe70] sm:$0xff] }
 0x3ee   : > { %v6276_v61 = vsel %vm4458_vm14, %v6275_v56, %v6271_v59  ;;  %v2048_v5 = vpop.xlane.xlu1 %2047  ;;  %v2046_v62 = vpop.xlane.xlu0 %2045 }
 0x3ef   : > { %v12120_v10 = vsel %vm9439_vm15, %v6276_v61, %v11712_v30  ;;  %v6284_v4 = vrot.slane %v2048_v5, %v10858_v18  ;;  %v6280_v8 = vrot.slane %v2046_v62, %v10855_v17  ;;  %v718_v62 = vld [vmem:[%s10757_s11 + $0xe88] sm:$0xff]  ;;  %vm9441_vm15 = vcmask 1043459  }
 0x3f1   : > { %v6285_v19 = vsel %vm4360_vm0, %v6284_v4, %v6280_v8  ;;  %2187 = vadd.xlane.f32.xlu1 %v708_v0  ;;  %2185 = vadd.xlane.f32.xlu0 %v707_v3  ;;  %v717_v0 = vld [vmem:[%s10757_s11 + $0xe80] sm:$0xff] }
 0x3f2   : > { %v2052_v11 = vpop.xlane.xlu1 %2051  ;;  %v2050_v12 = vpop.xlane.xlu0 %2049 }
 0x3f3   : > { %v6294_v15 = vrot.slane %v2052_v11, %v10866_v22  ;;  %v6289_v20 = vrot.slane %v2050_v12, %v10863_v21 }
 0x3f5   : > { %v6290_v30 = vsel %vm4367_vm1, %v6289_v20, %v6285_v19  ;;  %2191 = vadd.xlane.f32.xlu1 %v710_v14  ;;  %2189 = vadd.xlane.f32.xlu0 %v709_v26  ;;  %v720_v14 = vld [vmem:[%s10757_s11 + $0xe98] sm:$0xff]  ;;  %v719_v26 = vld [vmem:[%s10757_s11 + $0xe90] sm:$0xff] }
 0x3f6   : > { %v2056_v23 = vpop.xlane.xlu1 %2055  ;;  %v6295_v25 = vsel %vm4374_vm2, %v6294_v15, %v6290_v30  ;;  %v2054_v27 = vpop.xlane.xlu0 %2053 }
 0x3f7   : > { %v6304_v33 = vrot.slane %v2056_v23, %v10875_v31  ;;  %v6299_v35 = vrot.slane %v2054_v27, %v10878_v32 }
 0x3f9   : > { %v6300_v6 = vsel %vm4381_vm3, %v6299_v35, %v6295_v25  ;;  %2195 = vadd.xlane.f32.xlu1 %v712_v38  ;;  %2193 = vadd.xlane.f32.xlu0 %v711_v29  ;;  %v722_v38 = vld [vmem:[%s10757_s11 + $0xea8] sm:$0xff]  ;;  %v721_v29 = vld [vmem:[%s10757_s11 + $0xea0] sm:$0xff] }
 0x3fa   : > { %v2060_v39 = vpop.xlane.xlu1 %2059  ;;  %v6305_v9 = vsel %vm4388_vm4, %v6304_v33, %v6300_v6  ;;  %v2058_v40 = vpop.xlane.xlu0 %2057 }
 0x3fb   : > { %v6314_v46 = vrot.slane %v2060_v39, %v10884_v36  ;;  %v6309_v44 = vrot.slane %v2058_v40, %v10890_v42 }
 0x3fd   : > { %v6310_v48 = vsel %vm4395_vm5, %v6309_v44, %v6305_v9  ;;  %2199 = vadd.xlane.f32.xlu1 %v714_v41  ;;  %2197 = vadd.xlane.f32.xlu0 %v713_v43  ;;  %v724_v41 = vld [vmem:[%s10757_s11 + $0xeb8] sm:$0xff]  ;;  %v723_v43 = vld [vmem:[%s10757_s11 + $0xeb0] sm:$0xff] }
 0x3fe   : > { %v2064_v55 = vpop.xlane.xlu1 %2063  ;;  %v6315_v49 = vsel %vm4402_vm6, %v6314_v46, %v6310_v48  ;;  %v2062_v50 = vpop.xlane.xlu0 %2061 }
 0x3ff   : > { %v6324_v53 = vrot.slane %v2064_v55, %v10902_v54  ;;  %v6319_v56 = vrot.slane %v2062_v50, %v10908_v58 }
 0x401   : > { %v6320_v57 = vsel %vm4409_vm7, %v6319_v56, %v6315_v49  ;;  %2203 = vadd.xlane.f32.xlu1 %v716_v52  ;;  %2201 = vadd.xlane.f32.xlu0 %v715_v60  ;;  %v726_v52 = vld [vmem:[%s10757_s11 + $0xec8] sm:$0xff]  ;;  %v725_v60 = vld [vmem:[%s10757_s11 + $0xec0] sm:$0xff] }
 0x402   : > { %v2068_v59 = vpop.xlane.xlu1 %2067  ;;  %v6325_v61 = vsel %vm4416_vm8, %v6324_v53, %v6320_v57  ;;  %v2066_v5 = vpop.xlane.xlu0 %2065 }
 0x403   : > { %v6334_v3 = vrot.slane %v2068_v59, %v10916_v2  ;;  %v6329_v4 = vrot.slane %v2066_v5, %v10922_v7  ;;  %v728_v5 = vld [vmem:[%s10757_s11 + $0xed8] sm:$0xff] }
 0x405   : > { %v6330_v8 = vsel %vm4423_vm9, %v6329_v4, %v6325_v61  ;;  %2207 = vadd.xlane.f32.xlu1 %v718_v62  ;;  %2205 = vadd.xlane.f32.xlu0 %v717_v0  ;;  %v727_v62 = vld [vmem:[%s10757_s11 + $0xed0] sm:$0xff] }
 0x406   : > { %v2072_v19 = vpop.xlane.xlu1 %2071  ;;  %v6335_v11 = vsel %vm4430_vm10, %v6334_v3, %v6330_v8  ;;  %v2070_v12 = vpop.xlane.xlu0 %2069 }
 0x407   : > { %v6344_v15 = vrot.slane %v2072_v19, %v10930_v16  ;;  %v6339_v20 = vrot.slane %v2070_v12, %v10936_v24  ;;  %v730_v12 = vld [vmem:[%s10757_s11 + $0xee8] sm:$0xff] }
 0x409   : > { %v6340_v30 = vsel %vm4437_vm11, %v6339_v20, %v6335_v11  ;;  %2211 = vadd.xlane.f32.xlu1 %v720_v14  ;;  %2209 = vadd.xlane.f32.xlu0 %v719_v26  ;;  %v729_v14 = vld [vmem:[%s10757_s11 + $0xee0] sm:$0xff] }
 0x40a   : > { %v2076_v23 = vpop.xlane.xlu1 %2075  ;;  %v6345_v25 = vsel %vm4444_vm12, %v6344_v15, %v6340_v30  ;;  %v2074_v27 = vpop.xlane.xlu0 %2073 }
 0x40b   : > { %v6354_v33 = vrot.slane %v2076_v23, %v10944_v34  ;;  %v6349_v35 = vrot.slane %v2074_v27, %v10949_v37  ;;  %v732_v27 = vld [vmem:[%s10757_s11 + $0xef8] sm:$0xff] }
 0x40d   : > { %v6350_v6 = vsel %vm4451_vm13, %v6349_v35, %v6345_v25  ;;  %2215 = vadd.xlane.f32.xlu1 %v722_v38  ;;  %2213 = vadd.xlane.f32.xlu0 %v721_v29  ;;  %v731_v38 = vld [vmem:[%s10757_s11 + $0xef0] sm:$0xff] }
 0x40e   : > { %v6355_v39 = vsel %vm4458_vm14, %v6354_v33, %v6350_v6  ;;  %v2080_v9 = vpop.xlane.xlu1 %2079  ;;  %v2078_v40 = vpop.xlane.xlu0 %2077 }
 0x40f   : > { %v12171_v46 = vsel %vm9441_vm15, %v6355_v39, %v11763_v63  ;;  %v6363_v44 = vrot.slane %v2080_v9, %v10858_v18  ;;  %v6359_v48 = vrot.slane %v2078_v40, %v10855_v17  ;;  %v734_v40 = vld [vmem:[%s10757_s11 + $0xf08] sm:$0xff] }
 0x411   : > { %v6364_v55 = vsel %vm4360_vm0, %v6363_v44, %v6359_v48  ;;  %2219 = vadd.xlane.f32.xlu1 %v724_v41  ;;  %2217 = vadd.xlane.f32.xlu0 %v723_v43  ;;  %v733_v41 = vld [vmem:[%s10757_s11 + $0xf00] sm:$0xff] }
 0x412   : > { %v2084_v49 = vpop.xlane.xlu1 %2083  ;;  %v2082_v50 = vpop.xlane.xlu0 %2081 }
 0x413   : > { %v6373_v53 = vrot.slane %v2084_v49, %v10866_v22  ;;  %v6368_v56 = vrot.slane %v2082_v50, %v10863_v21 }
 0x415   : > { %v6369_v63 = vsel %vm4367_vm1, %v6368_v56, %v6364_v55  ;;  %2223 = vadd.xlane.f32.xlu1 %v726_v52  ;;  %2221 = vadd.xlane.f32.xlu0 %v725_v60  ;;  %v736_v52 = vld [vmem:[%s10757_s11 + $0xf18] sm:$0xff]  ;;  %v735_v60 = vld [vmem:[%s10757_s11 + $0xf10] sm:$0xff] }
 0x416   : > { %v2088_v57 = vpop.xlane.xlu1 %2087  ;;  %v6374_v59 = vsel %vm4374_vm2, %v6373_v53, %v6369_v63  ;;  %v2086_v61 = vpop.xlane.xlu0 %2085 }
 0x417   : > { %v6383_v0 = vrot.slane %v2088_v57, %v10875_v31  ;;  %v6378_v3 = vrot.slane %v2086_v61, %v10878_v32 }
 0x419   : > { %v6379_v4 = vsel %vm4381_vm3, %v6378_v3, %v6374_v59  ;;  %2227 = vadd.xlane.f32.xlu1 %v728_v5  ;;  %2225 = vadd.xlane.f32.xlu0 %v727_v62  ;;  %v738_v5 = vld [vmem:[%s10757_s11 + $0xf28] sm:$0xff]  ;;  %v737_v62 = vld [vmem:[%s10757_s11 + $0xf20] sm:$0xff] }
 0x41a   : > { %v2092_v8 = vpop.xlane.xlu1 %2091  ;;  %v6384_v19 = vsel %vm4388_vm4, %v6383_v0, %v6379_v4  ;;  %v2090_v11 = vpop.xlane.xlu0 %2089 }
 0x41b   : > { %v6393_v26 = vrot.slane %v2092_v8, %v10884_v36  ;;  %v6388_v15 = vrot.slane %v2090_v11, %v10890_v42 }
 0x41d   : > { %v6389_v20 = vsel %vm4395_vm5, %v6388_v15, %v6384_v19  ;;  %2231 = vadd.xlane.f32.xlu1 %v730_v12  ;;  %2229 = vadd.xlane.f32.xlu0 %v729_v14  ;;  %v740_v12 = vld [vmem:[%s10757_s11 + $0xf38] sm:$0xff]  ;;  %v739_v14 = vld [vmem:[%s10757_s11 + $0xf30] sm:$0xff] }
 0x41e   : > { %v2096_v30 = vpop.xlane.xlu1 %2095  ;;  %v6394_v23 = vsel %vm4402_vm6, %v6393_v26, %v6389_v20  ;;  %v2094_v25 = vpop.xlane.xlu0 %2093 }
 0x41f   : > { %v6403_v29 = vrot.slane %v2096_v30, %v10902_v54  ;;  %v6398_v33 = vrot.slane %v2094_v25, %v10908_v58 }
 0x421   : > { %v6399_v35 = vsel %vm4409_vm7, %v6398_v33, %v6394_v23  ;;  %2235 = vadd.xlane.f32.xlu1 %v732_v27  ;;  %2233 = vadd.xlane.f32.xlu0 %v731_v38  ;;  %v742_v27 = vld [vmem:[%s10757_s11 + $0xf48] sm:$0xff]  ;;  %v741_v38 = vld [vmem:[%s10757_s11 + $0xf40] sm:$0xff] }
 0x422   : > { %v2100_v6 = vpop.xlane.xlu1 %2099  ;;  %v6404_v39 = vsel %vm4416_vm8, %v6403_v29, %v6399_v35  ;;  %v2098_v9 = vpop.xlane.xlu0 %2097 }
 0x423   : > { %v6413_v43 = vrot.slane %v2100_v6, %v10916_v2  ;;  %v6408_v44 = vrot.slane %v2098_v9, %v10922_v7  ;;  %v744_v9 = vld [vmem:[%s10757_s11 + $0xf58] sm:$0xff] }
 0x425   : > { %v6409_v48 = vsel %vm4423_vm9, %v6408_v44, %v6404_v39  ;;  %2239 = vadd.xlane.f32.xlu1 %v734_v40  ;;  %2237 = vadd.xlane.f32.xlu0 %v733_v41  ;;  %v743_v40 = vld [vmem:[%s10757_s11 + $0xf50] sm:$0xff] }
 0x426   : > { %v2104_v55 = vpop.xlane.xlu1 %2103  ;;  %v6414_v49 = vsel %vm4430_vm10, %v6413_v43, %v6409_v48  ;;  %v2102_v50 = vpop.xlane.xlu0 %2101 }
 0x427   : > { %v6423_v53 = vrot.slane %v2104_v55, %v10930_v16  ;;  %v6418_v56 = vrot.slane %v2102_v50, %v10936_v24  ;;  %v746_v50 = vld [vmem:[%s10757_s11 + $0xf68] sm:$0xff] }
 0x429   : > { %v6419_v63 = vsel %vm4437_vm11, %v6418_v56, %v6414_v49  ;;  %2243 = vadd.xlane.f32.xlu1 %v736_v52  ;;  %2241 = vadd.xlane.f32.xlu0 %v735_v60  ;;  %v745_v52 = vld [vmem:[%s10757_s11 + $0xf60] sm:$0xff] }
 0x42a   : > { %v2108_v57 = vpop.xlane.xlu1 %2107  ;;  %v6424_v59 = vsel %vm4444_vm12, %v6423_v53, %v6419_v63  ;;  %v2106_v61 = vpop.xlane.xlu0 %2105 }
 0x42b   : > { %v6433_v0 = vrot.slane %v2108_v57, %v10944_v34  ;;  %v6428_v3 = vrot.slane %v2106_v61, %v10949_v37  ;;  %v748_v61 = vld [vmem:[%s10757_s11 + $0xf78] sm:$0xff] }
 0x42d   : > { %v6429_v4 = vsel %vm4451_vm13, %v6428_v3, %v6424_v59  ;;  %2247 = vadd.xlane.f32.xlu1 %v738_v5  ;;  %2245 = vadd.xlane.f32.xlu0 %v737_v62  ;;  %v747_v5 = vld [vmem:[%s10757_s11 + $0xf70] sm:$0xff] }
 0x42e   : > { %v6434_v8 = vsel %vm4458_vm14, %v6433_v0, %v6429_v4  ;;  %v2112_v19 = vpop.xlane.xlu1 %2111  ;;  %v2110_v11 = vpop.xlane.xlu0 %2109 }
 0x42f   : > { %v12222_v26 = vsel %vm9441_vm15, %v6434_v8, %v11814_v47  ;;  %v6442_v15 = vrot.slane %v2112_v19, %v10858_v18  ;;  %v6438_v20 = vrot.slane %v2110_v11, %v10855_v17  ;;  %v750_v11 = vld [vmem:[%s10757_s11 + $0xf88] sm:$0xff] }
 0x431   : > { %v6443_v30 = vsel %vm4360_vm0, %v6442_v15, %v6438_v20  ;;  %2251 = vadd.xlane.f32.xlu1 %v740_v12  ;;  %2249 = vadd.xlane.f32.xlu0 %v739_v14  ;;  %v749_v12 = vld [vmem:[%s10757_s11 + $0xf80] sm:$0xff] }
 0x432   : > { %v2116_v23 = vpop.xlane.xlu1 %2115  ;;  %v2114_v25 = vpop.xlane.xlu0 %2113 }
 0x433   : > { %v6452_v29 = vrot.slane %v2116_v23, %v10866_v22  ;;  %v6447_v33 = vrot.slane %v2114_v25, %v10863_v21 }
 0x435   : > { %v6448_v47 = vsel %vm4367_vm1, %v6447_v33, %v6443_v30  ;;  %2255 = vadd.xlane.f32.xlu1 %v742_v27  ;;  %2253 = vadd.xlane.f32.xlu0 %v741_v38  ;;  %v752_v27 = vld [vmem:[%s10757_s11 + $0xf98] sm:$0xff]  ;;  %v751_v38 = vld [vmem:[%s10757_s11 + $0xf90] sm:$0xff] }
 0x436   : > { %v2120_v35 = vpop.xlane.xlu1 %2119  ;;  %v6453_v6 = vsel %vm4374_vm2, %v6452_v29, %v6448_v47  ;;  %v2118_v39 = vpop.xlane.xlu0 %2117 }
 0x437   : > { %v6462_v41 = vrot.slane %v2120_v35, %v10875_v31  ;;  %v6457_v43 = vrot.slane %v2118_v39, %v10878_v32 }
 0x439   : > { %v6458_v44 = vsel %vm4381_vm3, %v6457_v43, %v6453_v6  ;;  %2259 = vadd.xlane.f32.xlu1 %v744_v9  ;;  %2257 = vadd.xlane.f32.xlu0 %v743_v40  ;;  %v754_v9 = vld [vmem:[%s10757_s11 + $0xfa8] sm:$0xff]  ;;  %v753_v40 = vld [vmem:[%s10757_s11 + $0xfa0] sm:$0xff] }
 0x43a   : > { %v2124_v48 = vpop.xlane.xlu1 %2123  ;;  %v6463_v55 = vsel %vm4388_vm4, %v6462_v41, %v6458_v44  ;;  %v2122_v49 = vpop.xlane.xlu0 %2121 }
 0x43b   : > { %v6472_v60 = vrot.slane %v2124_v48, %v10884_v36  ;;  %v6467_v53 = vrot.slane %v2122_v49, %v10890_v42 }
 0x43d   : > { %v6468_v56 = vsel %vm4395_vm5, %v6467_v53, %v6463_v55  ;;  %2263 = vadd.xlane.f32.xlu1 %v746_v50  ;;  %2261 = vadd.xlane.f32.xlu0 %v745_v52  ;;  %v756_v50 = vld [vmem:[%s10757_s11 + $0xfb8] sm:$0xff]  ;;  %v755_v52 = vld [vmem:[%s10757_s11 + $0xfb0] sm:$0xff] }
 0x43e   : > { %v2128_v63 = vpop.xlane.xlu1 %2127  ;;  %v6473_v57 = vsel %vm4402_vm6, %v6472_v60, %v6468_v56  ;;  %v2126_v59 = vpop.xlane.xlu0 %2125 }
 0x43f   : > { %v6482_v62 = vrot.slane %v2128_v63, %v10902_v54  ;;  %v6477_v0 = vrot.slane %v2126_v59, %v10908_v58 }
 0x441   : > { %v6478_v3 = vsel %vm4409_vm7, %v6477_v0, %v6473_v57  ;;  %2267 = vadd.xlane.f32.xlu1 %v748_v61  ;;  %2265 = vadd.xlane.f32.xlu0 %v747_v5  ;;  %v758_v61 = vld [vmem:[%s10757_s11 + $0xfc8] sm:$0xff]  ;;  %v757_v5 = vld [vmem:[%s10757_s11 + $0xfc0] sm:$0xff] }
 0x442   : > { %v2132_v4 = vpop.xlane.xlu1 %2131  ;;  %v6483_v8 = vsel %vm4416_vm8, %v6482_v62, %v6478_v3  ;;  %v2130_v19 = vpop.xlane.xlu0 %2129 }
 0x443   : > { %v6492_v14 = vrot.slane %v2132_v4, %v10916_v2  ;;  %v6487_v15 = vrot.slane %v2130_v19, %v10922_v7  ;;  %v760_v19 = vld [vmem:[%s10757_s11 + $0xfd8] sm:$0xff] }
 0x445   : > { %v6488_v20 = vsel %vm4423_vm9, %v6487_v15, %v6483_v8  ;;  %2271 = vadd.xlane.f32.xlu1 %v750_v11  ;;  %2269 = vadd.xlane.f32.xlu0 %v749_v12  ;;  %v759_v11 = vld [vmem:[%s10757_s11 + $0xfd0] sm:$0xff] }
 0x446   : > { %v2136_v30 = vpop.xlane.xlu1 %2135  ;;  %v6493_v23 = vsel %vm4430_vm10, %v6492_v14, %v6488_v20  ;;  %v2134_v25 = vpop.xlane.xlu0 %2133 }
 0x447   : > { %v6502_v29 = vrot.slane %v2136_v30, %v10930_v16  ;;  %v6497_v33 = vrot.slane %v2134_v25, %v10936_v24  ;;  %v762_v25 = vld [vmem:[%s10757_s11 + $0xfe8] sm:$0xff] }
 0x449   : > { %v6498_v47 = vsel %vm4437_vm11, %v6497_v33, %v6493_v23  ;;  %2275 = vadd.xlane.f32.xlu1 %v752_v27  ;;  %2273 = vadd.xlane.f32.xlu0 %v751_v38  ;;  %v761_v27 = vld [vmem:[%s10757_s11 + $0xfe0] sm:$0xff] }
 0x44a   : > { %v2140_v35 = vpop.xlane.xlu1 %2139  ;;  %v6503_v6 = vsel %vm4444_vm12, %v6502_v29, %v6498_v47  ;;  %v2138_v39 = vpop.xlane.xlu0 %2137 }
 0x44b   : > { %v6512_v41 = vrot.slane %v2140_v35, %v10944_v34  ;;  %v6507_v43 = vrot.slane %v2138_v39, %v10949_v37  ;;  %v764_v39 = vld [vmem:[%s10757_s11 + $0xff8] sm:$0xff] }
 0x44d   : > { %v6508_v44 = vsel %vm4451_vm13, %v6507_v43, %v6503_v6  ;;  %2279 = vadd.xlane.f32.xlu1 %v754_v9  ;;  %2277 = vadd.xlane.f32.xlu0 %v753_v40  ;;  %v763_v9 = vld [vmem:[%s10757_s11 + $0xff0] sm:$0xff] }
 0x44e   : > { %v6513_v48 = vsel %vm4458_vm14, %v6512_v41, %v6508_v44  ;;  %v2144_v55 = vpop.xlane.xlu1 %2143  ;;  %v2142_v49 = vpop.xlane.xlu0 %2141 }
 0x44f   : > { %v12273_v60 = vsel %vm9441_vm15, %v6513_v48, %v11865_v1  ;;  %v6521_v53 = vrot.slane %v2144_v55, %v10858_v18  ;;  %v6517_v56 = vrot.slane %v2142_v49, %v10855_v17  ;;  %v766_v49 = vld [vmem:[%s10757_s11 + $0x1008] sm:$0xff] }
 0x451   : > { %v6522_v63 = vsel %vm4360_vm0, %v6521_v53, %v6517_v56  ;;  %2283 = vadd.xlane.f32.xlu1 %v756_v50  ;;  %2281 = vadd.xlane.f32.xlu0 %v755_v52  ;;  %v765_v50 = vld [vmem:[%s10757_s11 + $0x1000] sm:$0xff] }
 0x452   : > { %v2148_v57 = vpop.xlane.xlu1 %2147  ;;  %v2146_v59 = vpop.xlane.xlu0 %2145 }
 0x453   : > { %v6531_v62 = vrot.slane %v2148_v57, %v10866_v22  ;;  %v6526_v0 = vrot.slane %v2146_v59, %v10863_v21 }
 0x455   : > { %v6527_v1 = vsel %vm4367_vm1, %v6526_v0, %v6522_v63  ;;  %2287 = vadd.xlane.f32.xlu1 %v758_v61  ;;  %2285 = vadd.xlane.f32.xlu0 %v757_v5  ;;  %v768_v61 = vld [vmem:[%s10757_s11 + $0x1018] sm:$0xff]  ;;  %v767_v5 = vld [vmem:[%s10757_s11 + $0x1010] sm:$0xff] }
 0x456   : > { %v2152_v3 = vpop.xlane.xlu1 %2151  ;;  %v6532_v4 = vsel %vm4374_vm2, %v6531_v62, %v6527_v1  ;;  %v2150_v8 = vpop.xlane.xlu0 %2149 }
 0x457   : > { %v6541_v12 = vrot.slane %v2152_v3, %v10875_v31  ;;  %v6536_v14 = vrot.slane %v2150_v8, %v10878_v32 }
 0x459   : > { %v6537_v15 = vsel %vm4381_vm3, %v6536_v14, %v6532_v4  ;;  %2291 = vadd.xlane.f32.xlu1 %v760_v19  ;;  %2289 = vadd.xlane.f32.xlu0 %v759_v11  ;;  %v770_v19 = vld [vmem:[%s10757_s11 + $0x1028] sm:$0xff]  ;;  %v769_v11 = vld [vmem:[%s10757_s11 + $0x1020] sm:$0xff] }
 0x45a   : > { %v2156_v20 = vpop.xlane.xlu1 %2155  ;;  %v6542_v30 = vsel %vm4388_vm4, %v6541_v12, %v6537_v15  ;;  %v2154_v23 = vpop.xlane.xlu0 %2153 }
 0x45b   : > { %v6551_v38 = vrot.slane %v2156_v20, %v10884_v36  ;;  %v6546_v29 = vrot.slane %v2154_v23, %v10890_v42 }
 0x45d   : > { %v6547_v33 = vsel %vm4395_vm5, %v6546_v29, %v6542_v30  ;;  %2295 = vadd.xlane.f32.xlu1 %v762_v25  ;;  %2293 = vadd.xlane.f32.xlu0 %v761_v27  ;;  %v772_v25 = vld [vmem:[%s10757_s11 + $0x1038] sm:$0xff]  ;;  %v771_v27 = vld [vmem:[%s10757_s11 + $0x1030] sm:$0xff] }
 0x45e   : > { %v2160_v47 = vpop.xlane.xlu1 %2159  ;;  %v6552_v35 = vsel %vm4402_vm6, %v6551_v38, %v6547_v33  ;;  %v2158_v6 = vpop.xlane.xlu0 %2157 }
 0x45f   : > { %v6561_v40 = vrot.slane %v2160_v47, %v10902_v54  ;;  %v6556_v41 = vrot.slane %v2158_v6, %v10908_v58 }
 0x461   : > { %v6557_v43 = vsel %vm4409_vm7, %v6556_v41, %v6552_v35  ;;  %2299 = vadd.xlane.f32.xlu1 %v764_v39  ;;  %2297 = vadd.xlane.f32.xlu0 %v763_v9  ;;  %v774_v39 = vld [vmem:[%s10757_s11 + $0x1048] sm:$0xff]  ;;  %v773_v9 = vld [vmem:[%s10757_s11 + $0x1040] sm:$0xff] }
 0x462   : > { %v2164_v44 = vpop.xlane.xlu1 %2163  ;;  %v6562_v48 = vsel %vm4416_vm8, %v6561_v40, %v6557_v43  ;;  %v2162_v55 = vpop.xlane.xlu0 %2161 }
 0x463   : > { %v6571_v52 = vrot.slane %v2164_v44, %v10916_v2  ;;  %v6566_v53 = vrot.slane %v2162_v55, %v10922_v7  ;;  %v776_v55 = vld [vmem:[%s10757_s11 + $0x1058] sm:$0xff] }
 0x465   : > { %v6567_v56 = vsel %vm4423_vm9, %v6566_v53, %v6562_v48  ;;  %2303 = vadd.xlane.f32.xlu1 %v766_v49  ;;  %2301 = vadd.xlane.f32.xlu0 %v765_v50  ;;  %v775_v49 = vld [vmem:[%s10757_s11 + $0x1050] sm:$0xff] }
 0x466   : > { %v2168_v63 = vpop.xlane.xlu1 %2167  ;;  %v6572_v57 = vsel %vm4430_vm10, %v6571_v52, %v6567_v56  ;;  %v2166_v59 = vpop.xlane.xlu0 %2165 }
 0x467   : > { %v6581_v62 = vrot.slane %v2168_v63, %v10930_v16  ;;  %v6576_v0 = vrot.slane %v2166_v59, %v10936_v24  ;;  %v778_v59 = vld [vmem:[%s10757_s11 + $0x1068] sm:$0xff] }
 0x469   : > { %v6577_v1 = vsel %vm4437_vm11, %v6576_v0, %v6572_v57  ;;  %2307 = vadd.xlane.f32.xlu1 %v768_v61  ;;  %2305 = vadd.xlane.f32.xlu0 %v767_v5  ;;  %v777_v61 = vld [vmem:[%s10757_s11 + $0x1060] sm:$0xff] }
 0x46a   : > { %v2172_v3 = vpop.xlane.xlu1 %2171  ;;  %v6582_v4 = vsel %vm4444_vm12, %v6581_v62, %v6577_v1  ;;  %v2170_v8 = vpop.xlane.xlu0 %2169 }
 0x46b   : > { %v6591_v12 = vrot.slane %v2172_v3, %v10944_v34  ;;  %v6586_v14 = vrot.slane %v2170_v8, %v10949_v37  ;;  %v780_v8 = vld [vmem:[%s10757_s11 + $0x1078] sm:$0xff] }
 0x46d   : > { %v6587_v15 = vsel %vm4451_vm13, %v6586_v14, %v6582_v4  ;;  %2311 = vadd.xlane.f32.xlu1 %v770_v19  ;;  %2309 = vadd.xlane.f32.xlu0 %v769_v11  ;;  %v779_v19 = vld [vmem:[%s10757_s11 + $0x1070] sm:$0xff] }
 0x46e   : > { %v6592_v20 = vsel %vm4458_vm14, %v6591_v12, %v6587_v15  ;;  %v2176_v30 = vpop.xlane.xlu1 %2175  ;;  %v2174_v23 = vpop.xlane.xlu0 %2173 }
 0x46f   : > { %v12324_v38 = vsel %vm9441_vm15, %v6592_v20, %v11916_v28  ;;  %v6600_v29 = vrot.slane %v2176_v30, %v10858_v18  ;;  %v6596_v33 = vrot.slane %v2174_v23, %v10855_v17  ;;  %v782_v23 = vld [vmem:[%s10757_s11 + $0x1088] sm:$0xff] }
 0x471   : > { %v6601_v47 = vsel %vm4360_vm0, %v6600_v29, %v6596_v33  ;;  %2315 = vadd.xlane.f32.xlu1 %v772_v25  ;;  %2313 = vadd.xlane.f32.xlu0 %v771_v27  ;;  %v781_v25 = vld [vmem:[%s10757_s11 + $0x1080] sm:$0xff] }
 0x472   : > { %v2180_v35 = vpop.xlane.xlu1 %2179  ;;  %v2178_v6 = vpop.xlane.xlu0 %2177 }
 0x473   : > { %v6610_v40 = vrot.slane %v2180_v35, %v10866_v22  ;;  %v6605_v41 = vrot.slane %v2178_v6, %v10863_v21 }
 0x475   : > { %v6606_v28 = vsel %vm4367_vm1, %v6605_v41, %v6601_v47  ;;  %2319 = vadd.xlane.f32.xlu1 %v774_v39  ;;  %2317 = vadd.xlane.f32.xlu0 %v773_v9  ;;  %v784_v39 = vld [vmem:[%s10757_s11 + $0x1098] sm:$0xff]  ;;  %v783_v9 = vld [vmem:[%s10757_s11 + $0x1090] sm:$0xff] }
 0x476   : > { %v2184_v43 = vpop.xlane.xlu1 %2183  ;;  %v6611_v44 = vsel %vm4374_vm2, %v6610_v40, %v6606_v28  ;;  %v2182_v48 = vpop.xlane.xlu0 %2181 }
 0x477   : > { %v6620_v50 = vrot.slane %v2184_v43, %v10875_v31  ;;  %v6615_v52 = vrot.slane %v2182_v48, %v10878_v32 }
 0x479   : > { %v6616_v53 = vsel %vm4381_vm3, %v6615_v52, %v6611_v44  ;;  %2323 = vadd.xlane.f32.xlu1 %v776_v55  ;;  %2321 = vadd.xlane.f32.xlu0 %v775_v49  ;;  %v786_v55 = vld [vmem:[%s10757_s11 + $0x10a8] sm:$0xff]  ;;  %v785_v49 = vld [vmem:[%s10757_s11 + $0x10a0] sm:$0xff] }
 0x47a   : > { %v2188_v56 = vpop.xlane.xlu1 %2187  ;;  %v6621_v63 = vsel %vm4388_vm4, %v6620_v50, %v6616_v53  ;;  %v2186_v57 = vpop.xlane.xlu0 %2185 }
 0x47b   : > { %v6630_v5 = vrot.slane %v2188_v56, %v10884_v36  ;;  %v6625_v62 = vrot.slane %v2186_v57, %v10890_v42 }
 0x47d   : > { %v6626_v0 = vsel %vm4395_vm5, %v6625_v62, %v6621_v63  ;;  %2327 = vadd.xlane.f32.xlu1 %v778_v59  ;;  %2325 = vadd.xlane.f32.xlu0 %v777_v61  ;;  %v788_v59 = vld [vmem:[%s10757_s11 + $0x10b8] sm:$0xff]  ;;  %v787_v61 = vld [vmem:[%s10757_s11 + $0x10b0] sm:$0xff] }
 0x47e   : > { %v2192_v1 = vpop.xlane.xlu1 %2191  ;;  %v6631_v3 = vsel %vm4402_vm6, %v6630_v5, %v6626_v0  ;;  %v2190_v4 = vpop.xlane.xlu0 %2189 }
 0x47f   : > { %v6640_v11 = vrot.slane %v2192_v1, %v10902_v54  ;;  %v6635_v12 = vrot.slane %v2190_v4, %v10908_v58 }
 0x481   : > { %v6636_v14 = vsel %vm4409_vm7, %v6635_v12, %v6631_v3  ;;  %2331 = vadd.xlane.f32.xlu1 %v780_v8  ;;  %2329 = vadd.xlane.f32.xlu0 %v779_v19  ;;  %v790_v8 = vld [vmem:[%s10757_s11 + $0x10c8] sm:$0xff]  ;;  %v789_v19 = vld [vmem:[%s10757_s11 + $0x10c0] sm:$0xff] }
 0x482   : > { %v2196_v15 = vpop.xlane.xlu1 %2195  ;;  %v6641_v20 = vsel %vm4416_vm8, %v6640_v11, %v6636_v14  ;;  %v2194_v30 = vpop.xlane.xlu0 %2193 }
 0x483   : > { %v6650_v27 = vrot.slane %v2196_v15, %v10916_v2  ;;  %v6645_v29 = vrot.slane %v2194_v30, %v10922_v7  ;;  %v792_v30 = vld [vmem:[%s10757_s11 + $0x10d8] sm:$0xff] }
 0x485   : > { %v6646_v33 = vsel %vm4423_vm9, %v6645_v29, %v6641_v20  ;;  %2335 = vadd.xlane.f32.xlu1 %v782_v23  ;;  %2333 = vadd.xlane.f32.xlu0 %v781_v25  ;;  %v791_v23 = vld [vmem:[%s10757_s11 + $0x10d0] sm:$0xff] }
 0x486   : > { %v2200_v47 = vpop.xlane.xlu1 %2199  ;;  %v6651_v35 = vsel %vm4430_vm10, %v6650_v27, %v6646_v33  ;;  %v2198_v6 = vpop.xlane.xlu0 %2197 }
 0x487   : > { %v6660_v40 = vrot.slane %v2200_v47, %v10930_v16  ;;  %v6655_v41 = vrot.slane %v2198_v6, %v10936_v24  ;;  %v794_v6 = vld [vmem:[%s10757_s11 + $0x10e8] sm:$0xff] }
 0x489   : > { %v6656_v28 = vsel %vm4437_vm11, %v6655_v41, %v6651_v35  ;;  %2339 = vadd.xlane.f32.xlu1 %v784_v39  ;;  %2337 = vadd.xlane.f32.xlu0 %v783_v9  ;;  %v793_v39 = vld [vmem:[%s10757_s11 + $0x10e0] sm:$0xff] }
 0x48a   : > { %v2204_v43 = vpop.xlane.xlu1 %2203  ;;  %v6661_v44 = vsel %vm4444_vm12, %v6660_v40, %v6656_v28  ;;  %v2202_v48 = vpop.xlane.xlu0 %2201 }
 0x48b   : > { %v6670_v50 = vrot.slane %v2204_v43, %v10944_v34  ;;  %v6665_v52 = vrot.slane %v2202_v48, %v10949_v37  ;;  %v796_v48 = vld [vmem:[%s10757_s11 + $0x10f8] sm:$0xff] }
 0x48d   : > { %v6666_v53 = vsel %vm4451_vm13, %v6665_v52, %v6661_v44  ;;  %2343 = vadd.xlane.f32.xlu1 %v786_v55  ;;  %2341 = vadd.xlane.f32.xlu0 %v785_v49  ;;  %v795_v55 = vld [vmem:[%s10757_s11 + $0x10f0] sm:$0xff] }
 0x48e   : > { %v6671_v56 = vsel %vm4458_vm14, %v6670_v50, %v6666_v53  ;;  %v2208_v63 = vpop.xlane.xlu1 %2207  ;;  %v2206_v57 = vpop.xlane.xlu0 %2205 }
 0x48f   : > { %v12375_v5 = vsel %vm9441_vm15, %v6671_v56, %v11967_v51  ;;  %v6679_v62 = vrot.slane %v2208_v63, %v10858_v18  ;;  %v6675_v0 = vrot.slane %v2206_v57, %v10855_v17  ;;  %v798_v57 = vld [vmem:[%s10757_s11 + $0x1108] sm:$0xff] }
 0x491   : > { %v6680_v1 = vsel %vm4360_vm0, %v6679_v62, %v6675_v0  ;;  %2347 = vadd.xlane.f32.xlu1 %v788_v59  ;;  %2345 = vadd.xlane.f32.xlu0 %v787_v61  ;;  %v797_v59 = vld [vmem:[%s10757_s11 + $0x1100] sm:$0xff] }
 0x492   : > { %v2212_v3 = vpop.xlane.xlu1 %2211  ;;  %v2210_v4 = vpop.xlane.xlu0 %2209 }
 0x493   : > { %v6689_v11 = vrot.slane %v2212_v3, %v10866_v22  ;;  %v6684_v12 = vrot.slane %v2210_v4, %v10863_v21 }
 0x495   : > { %v6685_v51 = vsel %vm4367_vm1, %v6684_v12, %v6680_v1  ;;  %2351 = vadd.xlane.f32.xlu1 %v790_v8  ;;  %2349 = vadd.xlane.f32.xlu0 %v789_v19  ;;  %v800_v8 = vld [vmem:[%s10757_s11 + $0x1118] sm:$0xff]  ;;  %v799_v19 = vld [vmem:[%s10757_s11 + $0x1110] sm:$0xff] }
 0x496   : > { %v2216_v14 = vpop.xlane.xlu1 %2215  ;;  %v6690_v15 = vsel %vm4374_vm2, %v6689_v11, %v6685_v51  ;;  %v2214_v20 = vpop.xlane.xlu0 %2213 }
 0x497   : > { %v6699_v25 = vrot.slane %v2216_v14, %v10875_v31  ;;  %v6694_v27 = vrot.slane %v2214_v20, %v10878_v32 }
 0x499   : > { %v6695_v29 = vsel %vm4381_vm3, %v6694_v27, %v6690_v15  ;;  %2355 = vadd.xlane.f32.xlu1 %v792_v30  ;;  %2353 = vadd.xlane.f32.xlu0 %v791_v23  ;;  %v802_v30 = vld [vmem:[%s10757_s11 + $0x1128] sm:$0xff]  ;;  %v801_v23 = vld [vmem:[%s10757_s11 + $0x1120] sm:$0xff] }
 0x49a   : > { %v2220_v33 = vpop.xlane.xlu1 %2219  ;;  %v6700_v47 = vsel %vm4388_vm4, %v6699_v25, %v6695_v29  ;;  %v2218_v35 = vpop.xlane.xlu0 %2217 }
 0x49b   : > { %v6709_v9 = vrot.slane %v2220_v33, %v10884_v36  ;;  %v6704_v40 = vrot.slane %v2218_v35, %v10890_v42 }
 0x49d   : > { %v6705_v41 = vsel %vm4395_vm5, %v6704_v40, %v6700_v47  ;;  %2359 = vadd.xlane.f32.xlu1 %v794_v6  ;;  %2357 = vadd.xlane.f32.xlu0 %v793_v39  ;;  %v804_v6 = vld [vmem:[%s10757_s11 + $0x1138] sm:$0xff]  ;;  %v803_v39 = vld [vmem:[%s10757_s11 + $0x1130] sm:$0xff] }
 0x49e   : > { %v2224_v28 = vpop.xlane.xlu1 %2223  ;;  %v6710_v43 = vsel %vm4402_vm6, %v6709_v9, %v6705_v41  ;;  %v2222_v44 = vpop.xlane.xlu0 %2221 }
 0x49f   : > { %v6719_v49 = vrot.slane %v2224_v28, %v10902_v54  ;;  %v6714_v50 = vrot.slane %v2222_v44, %v10908_v58 }
 0x4a1   : > { %v6715_v52 = vsel %vm4409_vm7, %v6714_v50, %v6710_v43  ;;  %2363 = vadd.xlane.f32.xlu1 %v796_v48  ;;  %2361 = vadd.xlane.f32.xlu0 %v795_v55  ;;  %v806_v48 = vld [vmem:[%s10757_s11 + $0x1148] sm:$0xff]  ;;  %v805_v55 = vld [vmem:[%s10757_s11 + $0x1140] sm:$0xff] }
 0x4a2   : > { %v2228_v53 = vpop.xlane.xlu1 %2227  ;;  %v6720_v56 = vsel %vm4416_vm8, %v6719_v49, %v6715_v52  ;;  %v2226_v63 = vpop.xlane.xlu0 %2225 }
 0x4a3   : > { %v6729_v61 = vrot.slane %v2228_v53, %v10916_v2  ;;  %v6724_v62 = vrot.slane %v2226_v63, %v10922_v7  ;;  %v808_v63 = vld [vmem:[%s10757_s11 + $0x1158] sm:$0xff] }
 0x4a5   : > { %v6725_v0 = vsel %vm4423_vm9, %v6724_v62, %v6720_v56  ;;  %2367 = vadd.xlane.f32.xlu1 %v798_v57  ;;  %2365 = vadd.xlane.f32.xlu0 %v797_v59  ;;  %v807_v57 = vld [vmem:[%s10757_s11 + $0x1150] sm:$0xff] }
 0x4a6   : > { %v2232_v1 = vpop.xlane.xlu1 %2231  ;;  %v6730_v3 = vsel %vm4430_vm10, %v6729_v61, %v6725_v0  ;;  %v2230_v4 = vpop.xlane.xlu0 %2229 }
 0x4a7   : > { %v6739_v11 = vrot.slane %v2232_v1, %v10930_v16  ;;  %v6734_v12 = vrot.slane %v2230_v4, %v10936_v24  ;;  %v810_v4 = vld [vmem:[%s10757_s11 + $0x1168] sm:$0xff] }
 0x4a9   : > { %v6735_v51 = vsel %vm4437_vm11, %v6734_v12, %v6730_v3  ;;  %2371 = vadd.xlane.f32.xlu1 %v800_v8  ;;  %2369 = vadd.xlane.f32.xlu0 %v799_v19  ;;  %v809_v8 = vld [vmem:[%s10757_s11 + $0x1160] sm:$0xff] }
 0x4aa   : > { %v2236_v14 = vpop.xlane.xlu1 %2235  ;;  %v6740_v15 = vsel %vm4444_vm12, %v6739_v11, %v6735_v51  ;;  %v2234_v20 = vpop.xlane.xlu0 %2233 }
 0x4ab   : > { %v6749_v25 = vrot.slane %v2236_v14, %v10944_v34  ;;  %v6744_v27 = vrot.slane %v2234_v20, %v10949_v37  ;;  %v812_v20 = vld [vmem:[%s10757_s11 + $0x1178] sm:$0xff] }
 0x4ad   : > { %v6745_v29 = vsel %vm4451_vm13, %v6744_v27, %v6740_v15  ;;  %2375 = vadd.xlane.f32.xlu1 %v802_v30  ;;  %2373 = vadd.xlane.f32.xlu0 %v801_v23  ;;  %v811_v30 = vld [vmem:[%s10757_s11 + $0x1170] sm:$0xff] }
 0x4ae   : > { %v6750_v33 = vsel %vm4458_vm14, %v6749_v25, %v6745_v29  ;;  %v2240_v47 = vpop.xlane.xlu1 %2239  ;;  %v2238_v35 = vpop.xlane.xlu0 %2237 }
 0x4af   : > { %v12426_v9 = vsel %vm9441_vm15, %v6750_v33, %v12018_v13  ;;  %v6758_v40 = vrot.slane %v2240_v47, %v10858_v18  ;;  %v6754_v41 = vrot.slane %v2238_v35, %v10855_v17  ;;  %v814_v35 = vld [vmem:[%s10757_s11 + $0x1188] sm:$0xff] }
 0x4b1   : > { %v6759_v28 = vsel %vm4360_vm0, %v6758_v40, %v6754_v41  ;;  %2379 = vadd.xlane.f32.xlu1 %v804_v6  ;;  %2377 = vadd.xlane.f32.xlu0 %v803_v39  ;;  %v813_v6 = vld [vmem:[%s10757_s11 + $0x1180] sm:$0xff] }
 0x4b2   : > { %v2244_v43 = vpop.xlane.xlu1 %2243  ;;  %v2242_v44 = vpop.xlane.xlu0 %2241 }
 0x4b3   : > { %v6768_v49 = vrot.slane %v2244_v43, %v10866_v22  ;;  %v6763_v50 = vrot.slane %v2242_v44, %v10863_v21 }
 0x4b5   : > { %v6764_v13 = vsel %vm4367_vm1, %v6763_v50, %v6759_v28  ;;  %2383 = vadd.xlane.f32.xlu1 %v806_v48  ;;  %2381 = vadd.xlane.f32.xlu0 %v805_v55  ;;  %v816_v48 = vld [vmem:[%s10757_s11 + $0x1198] sm:$0xff]  ;;  %v815_v55 = vld [vmem:[%s10757_s11 + $0x1190] sm:$0xff] }
 0x4b6   : > { %v2248_v52 = vpop.xlane.xlu1 %2247  ;;  %v6769_v53 = vsel %vm4374_vm2, %v6768_v49, %v6764_v13  ;;  %v2246_v56 = vpop.xlane.xlu0 %2245 }
 0x4b7   : > { %v6778_v59 = vrot.slane %v2248_v52, %v10875_v31  ;;  %v6773_v61 = vrot.slane %v2246_v56, %v10878_v32 }
 0x4b9   : > { %v6774_v62 = vsel %vm4381_vm3, %v6773_v61, %v6769_v53  ;;  %2387 = vadd.xlane.f32.xlu1 %v808_v63  ;;  %2385 = vadd.xlane.f32.xlu0 %v807_v57  ;;  %v818_v63 = vld [vmem:[%s10757_s11 + $0x11a8] sm:$0xff]  ;;  %v817_v57 = vld [vmem:[%s10757_s11 + $0x11a0] sm:$0xff] }
 0x4ba   : > { %v2252_v0 = vpop.xlane.xlu1 %2251  ;;  %v6779_v1 = vsel %vm4388_vm4, %v6778_v59, %v6774_v62  ;;  %v2250_v3 = vpop.xlane.xlu0 %2249 }
 0x4bb   : > { %v6788_v19 = vrot.slane %v2252_v0, %v10884_v36  ;;  %v6783_v11 = vrot.slane %v2250_v3, %v10890_v42 }
 0x4bd   : > { %v6784_v12 = vsel %vm4395_vm5, %v6783_v11, %v6779_v1  ;;  %2391 = vadd.xlane.f32.xlu1 %v810_v4  ;;  %2389 = vadd.xlane.f32.xlu0 %v809_v8  ;;  %v820_v4 = vld [vmem:[%s10757_s11 + $0x11b8] sm:$0xff]  ;;  %v819_v8 = vld [vmem:[%s10757_s11 + $0x11b0] sm:$0xff] }
 0x4be   : > { %v2256_v51 = vpop.xlane.xlu1 %2255  ;;  %v6789_v14 = vsel %vm4402_vm6, %v6788_v19, %v6784_v12  ;;  %v2254_v15 = vpop.xlane.xlu0 %2253 }
 0x4bf   : > { %v6798_v23 = vrot.slane %v2256_v51, %v10902_v54  ;;  %v6793_v25 = vrot.slane %v2254_v15, %v10908_v58 }
 0x4c1   : > { %v6794_v27 = vsel %vm4409_vm7, %v6793_v25, %v6789_v14  ;;  %2395 = vadd.xlane.f32.xlu1 %v812_v20  ;;  %2393 = vadd.xlane.f32.xlu0 %v811_v30  ;;  %v822_v20 = vld [vmem:[%s10757_s11 + $0x11c8] sm:$0xff]  ;;  %v821_v30 = vld [vmem:[%s10757_s11 + $0x11c0] sm:$0xff] }
 0x4c2   : > { %v2260_v29 = vpop.xlane.xlu1 %2259  ;;  %v6799_v33 = vsel %vm4416_vm8, %v6798_v23, %v6794_v27  ;;  %v2258_v47 = vpop.xlane.xlu0 %2257 }
 0x4c3   : > { %v6808_v39 = vrot.slane %v2260_v29, %v10916_v2  ;;  %v6803_v40 = vrot.slane %v2258_v47, %v10922_v7  ;;  %v824_v47 = vld [vmem:[%s10757_s11 + $0x11d8] sm:$0xff] }
 0x4c5   : > { %v6804_v41 = vsel %vm4423_vm9, %v6803_v40, %v6799_v33  ;;  %2399 = vadd.xlane.f32.xlu1 %v814_v35  ;;  %2397 = vadd.xlane.f32.xlu0 %v813_v6  ;;  %v823_v35 = vld [vmem:[%s10757_s11 + $0x11d0] sm:$0xff] }
 0x4c6   : > { %v2264_v28 = vpop.xlane.xlu1 %2263  ;;  %v6809_v43 = vsel %vm4430_vm10, %v6808_v39, %v6804_v41  ;;  %v2262_v44 = vpop.xlane.xlu0 %2261 }
 0x4c7   : > { %v6818_v49 = vrot.slane %v2264_v28, %v10930_v16  ;;  %v6813_v50 = vrot.slane %v2262_v44, %v10936_v24  ;;  %v826_v44 = vld [vmem:[%s10757_s11 + $0x11e8] sm:$0xff] }
 0x4c9   : > { %v6814_v13 = vsel %vm4437_vm11, %v6813_v50, %v6809_v43  ;;  %2403 = vadd.xlane.f32.xlu1 %v816_v48  ;;  %2401 = vadd.xlane.f32.xlu0 %v815_v55  ;;  %v825_v48 = vld [vmem:[%s10757_s11 + $0x11e0] sm:$0xff] }
 0x4ca   : > { %v2268_v52 = vpop.xlane.xlu1 %2267  ;;  %v6819_v53 = vsel %vm4444_vm12, %v6818_v49, %v6814_v13  ;;  %v2266_v56 = vpop.xlane.xlu0 %2265 }
 0x4cb   : > { %v6828_v59 = vrot.slane %v2268_v52, %v10944_v34  ;;  %v6823_v61 = vrot.slane %v2266_v56, %v10949_v37  ;;  %v828_v56 = vld [vmem:[%s10757_s11 + $0x11f8] sm:$0xff] }
 0x4cd   : > { %v6824_v62 = vsel %vm4451_vm13, %v6823_v61, %v6819_v53  ;;  %2407 = vadd.xlane.f32.xlu1 %v818_v63  ;;  %2405 = vadd.xlane.f32.xlu0 %v817_v57  ;;  %v827_v63 = vld [vmem:[%s10757_s11 + $0x11f0] sm:$0xff] }
 0x4ce   : > { %v6829_v0 = vsel %vm4458_vm14, %v6828_v59, %v6824_v62  ;;  %v2272_v1 = vpop.xlane.xlu1 %2271  ;;  %v2270_v3 = vpop.xlane.xlu0 %2269 }
 0x4cf   : > { %v12477_v19 = vsel %vm9441_vm15, %v6829_v0, %v12069_v45  ;;  %v6837_v11 = vrot.slane %v2272_v1, %v10858_v18  ;;  %v6833_v12 = vrot.slane %v2270_v3, %v10855_v17  ;;  %v830_v3 = vld [vmem:[%s10757_s11 + $0x1208] sm:$0xff] }
 0x4d1   : > { %v6838_v51 = vsel %vm4360_vm0, %v6837_v11, %v6833_v12  ;;  %2411 = vadd.xlane.f32.xlu1 %v820_v4  ;;  %2409 = vadd.xlane.f32.xlu0 %v819_v8  ;;  %v829_v4 = vld [vmem:[%s10757_s11 + $0x1200] sm:$0xff] }
 0x4d2   : > { %v2276_v14 = vpop.xlane.xlu1 %2275  ;;  %v2274_v15 = vpop.xlane.xlu0 %2273 }
 0x4d3   : > { %v6847_v23 = vrot.slane %v2276_v14, %v10866_v22  ;;  %v6842_v25 = vrot.slane %v2274_v15, %v10863_v21 }
 0x4d5   : > { %v6843_v45 = vsel %vm4367_vm1, %v6842_v25, %v6838_v51  ;;  %2415 = vadd.xlane.f32.xlu1 %v822_v20  ;;  %2413 = vadd.xlane.f32.xlu0 %v821_v30  ;;  %v832_v20 = vld [vmem:[%s10757_s11 + $0x1218] sm:$0xff]  ;;  %v831_v30 = vld [vmem:[%s10757_s11 + $0x1210] sm:$0xff] }
 0x4d6   : > { %v2280_v27 = vpop.xlane.xlu1 %2279  ;;  %v6848_v29 = vsel %vm4374_vm2, %v6847_v23, %v6843_v45  ;;  %v2278_v33 = vpop.xlane.xlu0 %2277 }
 0x4d7   : > { %v6857_v6 = vrot.slane %v2280_v27, %v10875_v31  ;;  %v6852_v39 = vrot.slane %v2278_v33, %v10878_v32 }
 0x4d9   : > { %v6853_v40 = vsel %vm4381_vm3, %v6852_v39, %v6848_v29  ;;  %2419 = vadd.xlane.f32.xlu1 %v824_v47  ;;  %2417 = vadd.xlane.f32.xlu0 %v823_v35  ;;  %v834_v47 = vld [vmem:[%s10757_s11 + $0x1228] sm:$0xff]  ;;  %v833_v35 = vld [vmem:[%s10757_s11 + $0x1220] sm:$0xff] }
 0x4da   : > { %v2284_v41 = vpop.xlane.xlu1 %2283  ;;  %v6858_v28 = vsel %vm4388_vm4, %v6857_v6, %v6853_v40  ;;  %v2282_v43 = vpop.xlane.xlu0 %2281 }
 0x4db   : > { %v6867_v55 = vrot.slane %v2284_v41, %v10884_v36  ;;  %v6862_v49 = vrot.slane %v2282_v43, %v10890_v42 }
 0x4dd   : > { %v6863_v50 = vsel %vm4395_vm5, %v6862_v49, %v6858_v28  ;;  %2423 = vadd.xlane.f32.xlu1 %v826_v44  ;;  %2421 = vadd.xlane.f32.xlu0 %v825_v48  ;;  %v836_v44 = vld [vmem:[%s10757_s11 + $0x1238] sm:$0xff]  ;;  %v835_v48 = vld [vmem:[%s10757_s11 + $0x1230] sm:$0xff] }
 0x4de   : > { %v2288_v13 = vpop.xlane.xlu1 %2287  ;;  %v6868_v52 = vsel %vm4402_vm6, %v6867_v55, %v6863_v50  ;;  %v2286_v53 = vpop.xlane.xlu0 %2285 }
 0x4df   : > { %v6877_v57 = vrot.slane %v2288_v13, %v10902_v54  ;;  %v6872_v59 = vrot.slane %v2286_v53, %v10908_v58 }
 0x4e1   : > { %v6873_v61 = vsel %vm4409_vm7, %v6872_v59, %v6868_v52  ;;  %2427 = vadd.xlane.f32.xlu1 %v828_v56  ;;  %2425 = vadd.xlane.f32.xlu0 %v827_v63  ;;  %v838_v56 = vld [vmem:[%s10757_s11 + $0x1248] sm:$0xff]  ;;  %v837_v63 = vld [vmem:[%s10757_s11 + $0x1240] sm:$0xff] }
 0x4e2   : > { %v2292_v62 = vpop.xlane.xlu1 %2291  ;;  %v6878_v0 = vsel %vm4416_vm8, %v6877_v57, %v6873_v61  ;;  %v2290_v1 = vpop.xlane.xlu0 %2289 }
 0x4e3   : > { %v6887_v8 = vrot.slane %v2292_v62, %v10916_v2  ;;  %v6882_v11 = vrot.slane %v2290_v1, %v10922_v7  ;;  %v840_v1 = vld [vmem:[%s10757_s11 + $0x1258] sm:$0xff] }
 0x4e5   : > { %v6883_v12 = vsel %vm4423_vm9, %v6882_v11, %v6878_v0  ;;  %2431 = vadd.xlane.f32.xlu1 %v830_v3  ;;  %2429 = vadd.xlane.f32.xlu0 %v829_v4  ;;  %v839_v3 = vld [vmem:[%s10757_s11 + $0x1250] sm:$0xff] }
 0x4e6   : > { %v2296_v51 = vpop.xlane.xlu1 %2295  ;;  %v6888_v14 = vsel %vm4430_vm10, %v6887_v8, %v6883_v12  ;;  %v2294_v15 = vpop.xlane.xlu0 %2293 }
 0x4e7   : > { %v6897_v23 = vrot.slane %v2296_v51, %v10930_v16  ;;  %v6892_v25 = vrot.slane %v2294_v15, %v10936_v24  ;;  %v842_v15 = vld [vmem:[%s10757_s11 + $0x1268] sm:$0xff] }
 0x4e9   : > { %v6893_v45 = vsel %vm4437_vm11, %v6892_v25, %v6888_v14  ;;  %2435 = vadd.xlane.f32.xlu1 %v832_v20  ;;  %2433 = vadd.xlane.f32.xlu0 %v831_v30  ;;  %v841_v20 = vld [vmem:[%s10757_s11 + $0x1260] sm:$0xff] }
 0x4ea   : > { %v2300_v27 = vpop.xlane.xlu1 %2299  ;;  %v6898_v29 = vsel %vm4444_vm12, %v6897_v23, %v6893_v45  ;;  %v2298_v33 = vpop.xlane.xlu0 %2297 }
 0x4eb   : > { %v6907_v6 = vrot.slane %v2300_v27, %v10944_v34  ;;  %v6902_v39 = vrot.slane %v2298_v33, %v10949_v37  ;;  %v844_v33 = vld [vmem:[%s10757_s11 + $0x1278] sm:$0xff] }
 0x4ed   : > { %v6903_v40 = vsel %vm4451_vm13, %v6902_v39, %v6898_v29  ;;  %2439 = vadd.xlane.f32.xlu1 %v834_v47  ;;  %2437 = vadd.xlane.f32.xlu0 %v833_v35  ;;  %v843_v47 = vld [vmem:[%s10757_s11 + $0x1270] sm:$0xff] }
 0x4ee   : > { %v6908_v41 = vsel %vm4458_vm14, %v6907_v6, %v6903_v40  ;;  %v2304_v28 = vpop.xlane.xlu1 %2303  ;;  %v2302_v43 = vpop.xlane.xlu0 %2301 }
 0x4ef   : > { %v12528_v55 = vsel %vm9441_vm15, %v6908_v41, %v12120_v10  ;;  %v6916_v49 = vrot.slane %v2304_v28, %v10858_v18  ;;  %v6912_v50 = vrot.slane %v2302_v43, %v10855_v17  ;;  %v846_v43 = vld [vmem:[%s10757_s11 + $0x1288] sm:$0xff]  ;;  %vm9443_vm15 = vcmask 1044484  }
 0x4f1   : > { %v6917_v13 = vsel %vm4360_vm0, %v6916_v49, %v6912_v50  ;;  %2443 = vadd.xlane.f32.xlu1 %v836_v44  ;;  %2441 = vadd.xlane.f32.xlu0 %v835_v48  ;;  %v845_v44 = vld [vmem:[%s10757_s11 + $0x1280] sm:$0xff] }
 0x4f2   : > { %v2308_v52 = vpop.xlane.xlu1 %2307  ;;  %v2306_v53 = vpop.xlane.xlu0 %2305 }
 0x4f3   : > { %v6926_v57 = vrot.slane %v2308_v52, %v10866_v22  ;;  %v6921_v59 = vrot.slane %v2306_v53, %v10863_v21 }
 0x4f5   : > { %v6922_v10 = vsel %vm4367_vm1, %v6921_v59, %v6917_v13  ;;  %2447 = vadd.xlane.f32.xlu1 %v838_v56  ;;  %2445 = vadd.xlane.f32.xlu0 %v837_v63  ;;  %v848_v56 = vld [vmem:[%s10757_s11 + $0x1298] sm:$0xff]  ;;  %v847_v63 = vld [vmem:[%s10757_s11 + $0x1290] sm:$0xff] }
 0x4f6   : > { %v2312_v61 = vpop.xlane.xlu1 %2311  ;;  %v6927_v62 = vsel %vm4374_vm2, %v6926_v57, %v6922_v10  ;;  %v2310_v0 = vpop.xlane.xlu0 %2309 }
 0x4f7   : > { %v6936_v4 = vrot.slane %v2312_v61, %v10875_v31  ;;  %v6931_v8 = vrot.slane %v2310_v0, %v10878_v32 }
 0x4f9   : > { %v6932_v11 = vsel %vm4381_vm3, %v6931_v8, %v6927_v62  ;;  %2451 = vadd.xlane.f32.xlu1 %v840_v1  ;;  %2449 = vadd.xlane.f32.xlu0 %v839_v3  ;;  %v850_v1 = vld [vmem:[%s10757_s11 + $0x12a8] sm:$0xff]  ;;  %v849_v3 = vld [vmem:[%s10757_s11 + $0x12a0] sm:$0xff] }
 0x4fa   : > { %v2316_v12 = vpop.xlane.xlu1 %2315  ;;  %v6937_v51 = vsel %vm4388_vm4, %v6936_v4, %v6932_v11  ;;  %v2314_v14 = vpop.xlane.xlu0 %2313 }
 0x4fb   : > { %v6946_v30 = vrot.slane %v2316_v12, %v10884_v36  ;;  %v6941_v23 = vrot.slane %v2314_v14, %v10890_v42 }
 0x4fd   : > { %v6942_v25 = vsel %vm4395_vm5, %v6941_v23, %v6937_v51  ;;  %2455 = vadd.xlane.f32.xlu1 %v842_v15  ;;  %2453 = vadd.xlane.f32.xlu0 %v841_v20  ;;  %v852_v15 = vld [vmem:[%s10757_s11 + $0x12b8] sm:$0xff]  ;;  %v851_v20 = vld [vmem:[%s10757_s11 + $0x12b0] sm:$0xff] }
 0x4fe   : > { %v2320_v45 = vpop.xlane.xlu1 %2319  ;;  %v6947_v27 = vsel %vm4402_vm6, %v6946_v30, %v6942_v25  ;;  %v2318_v29 = vpop.xlane.xlu0 %2317 }
 0x4ff   : > { %v6956_v35 = vrot.slane %v2320_v45, %v10902_v54  ;;  %v6951_v6 = vrot.slane %v2318_v29, %v10908_v58 }
 0x501   : > { %v6952_v39 = vsel %vm4409_vm7, %v6951_v6, %v6947_v27  ;;  %2459 = vadd.xlane.f32.xlu1 %v844_v33  ;;  %2457 = vadd.xlane.f32.xlu0 %v843_v47  ;;  %v854_v33 = vld [vmem:[%s10757_s11 + $0x12c8] sm:$0xff]  ;;  %v853_v47 = vld [vmem:[%s10757_s11 + $0x12c0] sm:$0xff] }
 0x502   : > { %v2324_v40 = vpop.xlane.xlu1 %2323  ;;  %v6957_v41 = vsel %vm4416_vm8, %v6956_v35, %v6952_v39  ;;  %v2322_v28 = vpop.xlane.xlu0 %2321 }
 0x503   : > { %v6966_v48 = vrot.slane %v2324_v40, %v10916_v2  ;;  %v6961_v49 = vrot.slane %v2322_v28, %v10922_v7  ;;  %v856_v28 = vld [vmem:[%s10757_s11 + $0x12d8] sm:$0xff] }
 0x505   : > { %v6962_v50 = vsel %vm4423_vm9, %v6961_v49, %v6957_v41  ;;  %2463 = vadd.xlane.f32.xlu1 %v846_v43  ;;  %2461 = vadd.xlane.f32.xlu0 %v845_v44  ;;  %v855_v43 = vld [vmem:[%s10757_s11 + $0x12d0] sm:$0xff] }
 0x506   : > { %v2328_v13 = vpop.xlane.xlu1 %2327  ;;  %v6967_v52 = vsel %vm4430_vm10, %v6966_v48, %v6962_v50  ;;  %v2326_v53 = vpop.xlane.xlu0 %2325 }
 0x507   : > { %v6976_v57 = vrot.slane %v2328_v13, %v10930_v16  ;;  %v6971_v59 = vrot.slane %v2326_v53, %v10936_v24  ;;  %v858_v53 = vld [vmem:[%s10757_s11 + $0x12e8] sm:$0xff] }
 0x509   : > { %v6972_v10 = vsel %vm4437_vm11, %v6971_v59, %v6967_v52  ;;  %2467 = vadd.xlane.f32.xlu1 %v848_v56  ;;  %2465 = vadd.xlane.f32.xlu0 %v847_v63  ;;  %v857_v56 = vld [vmem:[%s10757_s11 + $0x12e0] sm:$0xff] }
 0x50a   : > { %v2332_v61 = vpop.xlane.xlu1 %2331  ;;  %v6977_v62 = vsel %vm4444_vm12, %v6976_v57, %v6972_v10  ;;  %v2330_v0 = vpop.xlane.xlu0 %2329 }
 0x50b   : > { %v6986_v4 = vrot.slane %v2332_v61, %v10944_v34  ;;  %v6981_v8 = vrot.slane %v2330_v0, %v10949_v37  ;;  %v860_v0 = vld [vmem:[%s10757_s11 + $0x12f8] sm:$0xff] }
 0x50d   : > { %v6982_v11 = vsel %vm4451_vm13, %v6981_v8, %v6977_v62  ;;  %2471 = vadd.xlane.f32.xlu1 %v850_v1  ;;  %2469 = vadd.xlane.f32.xlu0 %v849_v3  ;;  %v859_v1 = vld [vmem:[%s10757_s11 + $0x12f0] sm:$0xff] }
 0x50e   : > { %v6987_v12 = vsel %vm4458_vm14, %v6986_v4, %v6982_v11  ;;  %v2336_v51 = vpop.xlane.xlu1 %2335  ;;  %v2334_v14 = vpop.xlane.xlu0 %2333 }
 0x50f   : > { %v12579_v30 = vsel %vm9443_vm15, %v6987_v12, %v12171_v46  ;;  %v6995_v23 = vrot.slane %v2336_v51, %v10858_v18  ;;  %v6991_v25 = vrot.slane %v2334_v14, %v10855_v17  ;;  %v862_v14 = vld [vmem:[%s10757_s11 + $0x1308] sm:$0xff] }
 0x511   : > { %v6996_v45 = vsel %vm4360_vm0, %v6995_v23, %v6991_v25  ;;  %2475 = vadd.xlane.f32.xlu1 %v852_v15  ;;  %2473 = vadd.xlane.f32.xlu0 %v851_v20  ;;  %v861_v15 = vld [vmem:[%s10757_s11 + $0x1300] sm:$0xff] }
 0x512   : > { %v2340_v27 = vpop.xlane.xlu1 %2339  ;;  %v2338_v29 = vpop.xlane.xlu0 %2337 }
 0x513   : > { %v7005_v35 = vrot.slane %v2340_v27, %v10866_v22  ;;  %v7000_v6 = vrot.slane %v2338_v29, %v10863_v21 }
 0x515   : > { %v7001_v46 = vsel %vm4367_vm1, %v7000_v6, %v6996_v45  ;;  %2479 = vadd.xlane.f32.xlu1 %v854_v33  ;;  %2477 = vadd.xlane.f32.xlu0 %v853_v47  ;;  %v864_v33 = vld [vmem:[%s10757_s11 + $0x1318] sm:$0xff]  ;;  %v863_v47 = vld [vmem:[%s10757_s11 + $0x1310] sm:$0xff] }
 0x516   : > { %v2344_v39 = vpop.xlane.xlu1 %2343  ;;  %v7006_v40 = vsel %vm4374_vm2, %v7005_v35, %v7001_v46  ;;  %v2342_v41 = vpop.xlane.xlu0 %2341 }
 0x517   : > { %v7015_v44 = vrot.slane %v2344_v39, %v10875_v31  ;;  %v7010_v48 = vrot.slane %v2342_v41, %v10878_v32 }
 0x519   : > { %v7011_v49 = vsel %vm4381_vm3, %v7010_v48, %v7006_v40  ;;  %2483 = vadd.xlane.f32.xlu1 %v856_v28  ;;  %2481 = vadd.xlane.f32.xlu0 %v855_v43  ;;  %v866_v28 = vld [vmem:[%s10757_s11 + $0x1328] sm:$0xff]  ;;  %v865_v43 = vld [vmem:[%s10757_s11 + $0x1320] sm:$0xff] }
 0x51a   : > { %v2348_v50 = vpop.xlane.xlu1 %2347  ;;  %v7016_v13 = vsel %vm4388_vm4, %v7015_v44, %v7011_v49  ;;  %v2346_v52 = vpop.xlane.xlu0 %2345 }
 0x51b   : > { %v7025_v63 = vrot.slane %v2348_v50, %v10884_v36  ;;  %v7020_v57 = vrot.slane %v2346_v52, %v10890_v42 }
 0x51d   : > { %v7021_v59 = vsel %vm4395_vm5, %v7020_v57, %v7016_v13  ;;  %2487 = vadd.xlane.f32.xlu1 %v858_v53  ;;  %2485 = vadd.xlane.f32.xlu0 %v857_v56  ;;  %v868_v53 = vld [vmem:[%s10757_s11 + $0x1338] sm:$0xff]  ;;  %v867_v56 = vld [vmem:[%s10757_s11 + $0x1330] sm:$0xff] }
 0x51e   : > { %v2352_v10 = vpop.xlane.xlu1 %2351  ;;  %v7026_v61 = vsel %vm4402_vm6, %v7025_v63, %v7021_v59  ;;  %v2350_v62 = vpop.xlane.xlu0 %2349 }
 0x51f   : > { %v7035_v3 = vrot.slane %v2352_v10, %v10902_v54  ;;  %v7030_v4 = vrot.slane %v2350_v62, %v10908_v58 }
 0x521   : > { %v7031_v8 = vsel %vm4409_vm7, %v7030_v4, %v7026_v61  ;;  %2491 = vadd.xlane.f32.xlu1 %v860_v0  ;;  %2489 = vadd.xlane.f32.xlu0 %v859_v1  ;;  %v870_v0 = vld [vmem:[%s10757_s11 + $0x1348] sm:$0xff]  ;;  %v869_v1 = vld [vmem:[%s10757_s11 + $0x1340] sm:$0xff] }
 0x522   : > { %v2356_v11 = vpop.xlane.xlu1 %2355  ;;  %v7036_v12 = vsel %vm4416_vm8, %v7035_v3, %v7031_v8  ;;  %v2354_v51 = vpop.xlane.xlu0 %2353 }
 0x523   : > { %v7045_v20 = vrot.slane %v2356_v11, %v10916_v2  ;;  %v7040_v23 = vrot.slane %v2354_v51, %v10922_v7  ;;  %v872_v51 = vld [vmem:[%s10757_s11 + $0x1358] sm:$0xff] }
 0x525   : > { %v7041_v25 = vsel %vm4423_vm9, %v7040_v23, %v7036_v12  ;;  %2495 = vadd.xlane.f32.xlu1 %v862_v14  ;;  %2493 = vadd.xlane.f32.xlu0 %v861_v15  ;;  %v871_v14 = vld [vmem:[%s10757_s11 + $0x1350] sm:$0xff] }
 0x526   : > { %v2360_v45 = vpop.xlane.xlu1 %2359  ;;  %v7046_v27 = vsel %vm4430_vm10, %v7045_v20, %v7041_v25  ;;  %v2358_v29 = vpop.xlane.xlu0 %2357 }
 0x527   : > { %v7055_v35 = vrot.slane %v2360_v45, %v10930_v16  ;;  %v7050_v6 = vrot.slane %v2358_v29, %v10936_v24  ;;  %v874_v29 = vld [vmem:[%s10757_s11 + $0x1368] sm:$0xff] }
 0x529   : > { %v7051_v46 = vsel %vm4437_vm11, %v7050_v6, %v7046_v27  ;;  %2499 = vadd.xlane.f32.xlu1 %v864_v33  ;;  %2497 = vadd.xlane.f32.xlu0 %v863_v47  ;;  %v873_v33 = vld [vmem:[%s10757_s11 + $0x1360] sm:$0xff] }
 0x52a   : > { %v2364_v39 = vpop.xlane.xlu1 %2363  ;;  %v7056_v40 = vsel %vm4444_vm12, %v7055_v35, %v7051_v46  ;;  %v2362_v41 = vpop.xlane.xlu0 %2361 }
 0x52b   : > { %v7065_v44 = vrot.slane %v2364_v39, %v10944_v34  ;;  %v7060_v48 = vrot.slane %v2362_v41, %v10949_v37  ;;  %v876_v41 = vld [vmem:[%s10757_s11 + $0x1378] sm:$0xff] }
 0x52d   : > { %v7061_v49 = vsel %vm4451_vm13, %v7060_v48, %v7056_v40  ;;  %2503 = vadd.xlane.f32.xlu1 %v866_v28  ;;  %2501 = vadd.xlane.f32.xlu0 %v865_v43  ;;  %v875_v28 = vld [vmem:[%s10757_s11 + $0x1370] sm:$0xff] }
 0x52e   : > { %v7066_v50 = vsel %vm4458_vm14, %v7065_v44, %v7061_v49  ;;  %v2368_v13 = vpop.xlane.xlu1 %2367  ;;  %v2366_v52 = vpop.xlane.xlu0 %2365 }
 0x52f   : > { %v12630_v63 = vsel %vm9443_vm15, %v7066_v50, %v12222_v26  ;;  %v7074_v57 = vrot.slane %v2368_v13, %v10858_v18  ;;  %v7070_v59 = vrot.slane %v2366_v52, %v10855_v17  ;;  %v878_v52 = vld [vmem:[%s10757_s11 + $0x1388] sm:$0xff] }
 0x531   : > { %v7075_v10 = vsel %vm4360_vm0, %v7074_v57, %v7070_v59  ;;  %2507 = vadd.xlane.f32.xlu1 %v868_v53  ;;  %2505 = vadd.xlane.f32.xlu0 %v867_v56  ;;  %v877_v53 = vld [vmem:[%s10757_s11 + $0x1380] sm:$0xff] }
 0x532   : > { %v2372_v61 = vpop.xlane.xlu1 %2371  ;;  %v2370_v62 = vpop.xlane.xlu0 %2369 }
 0x533   : > { %v7084_v3 = vrot.slane %v2372_v61, %v10866_v22  ;;  %v7079_v4 = vrot.slane %v2370_v62, %v10863_v21 }
 0x535   : > { %v7080_v26 = vsel %vm4367_vm1, %v7079_v4, %v7075_v10  ;;  %2511 = vadd.xlane.f32.xlu1 %v870_v0  ;;  %2509 = vadd.xlane.f32.xlu0 %v869_v1  ;;  %v880_v0 = vld [vmem:[%s10757_s11 + $0x1398] sm:$0xff]  ;;  %v879_v1 = vld [vmem:[%s10757_s11 + $0x1390] sm:$0xff] }
 0x536   : > { %v2376_v8 = vpop.xlane.xlu1 %2375  ;;  %v7085_v11 = vsel %vm4374_vm2, %v7084_v3, %v7080_v26  ;;  %v2374_v12 = vpop.xlane.xlu0 %2373 }
 0x537   : > { %v7094_v15 = vrot.slane %v2376_v8, %v10875_v31  ;;  %v7089_v20 = vrot.slane %v2374_v12, %v10878_v32 }
 0x539   : > { %v7090_v23 = vsel %vm4381_vm3, %v7089_v20, %v7085_v11  ;;  %2515 = vadd.xlane.f32.xlu1 %v872_v51  ;;  %2513 = vadd.xlane.f32.xlu0 %v871_v14  ;;  %v882_v51 = vld [vmem:[%s10757_s11 + $0x13a8] sm:$0xff]  ;;  %v881_v14 = vld [vmem:[%s10757_s11 + $0x13a0] sm:$0xff] }
 0x53a   : > { %v2380_v25 = vpop.xlane.xlu1 %2379  ;;  %v7095_v45 = vsel %vm4388_vm4, %v7094_v15, %v7090_v23  ;;  %v2378_v27 = vpop.xlane.xlu0 %2377 }
 0x53b   : > { %v7104_v47 = vrot.slane %v2380_v25, %v10884_v36  ;;  %v7099_v35 = vrot.slane %v2378_v27, %v10890_v42 }
 0x53d   : > { %v7100_v6 = vsel %vm4395_vm5, %v7099_v35, %v7095_v45  ;;  %2519 = vadd.xlane.f32.xlu1 %v874_v29  ;;  %2517 = vadd.xlane.f32.xlu0 %v873_v33  ;;  %v884_v29 = vld [vmem:[%s10757_s11 + $0x13b8] sm:$0xff]  ;;  %v883_v33 = vld [vmem:[%s10757_s11 + $0x13b0] sm:$0xff] }
 0x53e   : > { %v2384_v46 = vpop.xlane.xlu1 %2383  ;;  %v7105_v39 = vsel %vm4402_vm6, %v7104_v47, %v7100_v6  ;;  %v2382_v40 = vpop.xlane.xlu0 %2381 }
 0x53f   : > { %v7114_v43 = vrot.slane %v2384_v46, %v10902_v54  ;;  %v7109_v44 = vrot.slane %v2382_v40, %v10908_v58 }
 0x541   : > { %v7110_v48 = vsel %vm4409_vm7, %v7109_v44, %v7105_v39  ;;  %2523 = vadd.xlane.f32.xlu1 %v876_v41  ;;  %2521 = vadd.xlane.f32.xlu0 %v875_v28  ;;  %v886_v41 = vld [vmem:[%s10757_s11 + $0x13c8] sm:$0xff]  ;;  %v885_v28 = vld [vmem:[%s10757_s11 + $0x13c0] sm:$0xff] }
 0x542   : > { %v2388_v49 = vpop.xlane.xlu1 %2387  ;;  %v7115_v50 = vsel %vm4416_vm8, %v7114_v43, %v7110_v48  ;;  %v2386_v13 = vpop.xlane.xlu0 %2385 }
 0x543   : > { %v7124_v56 = vrot.slane %v2388_v49, %v10916_v2  ;;  %v7119_v57 = vrot.slane %v2386_v13, %v10922_v7  ;;  %v888_v13 = vld [vmem:[%s10757_s11 + $0x13d8] sm:$0xff] }
 0x545   : > { %v7120_v59 = vsel %vm4423_vm9, %v7119_v57, %v7115_v50  ;;  %2527 = vadd.xlane.f32.xlu1 %v878_v52  ;;  %2525 = vadd.xlane.f32.xlu0 %v877_v53  ;;  %v887_v52 = vld [vmem:[%s10757_s11 + $0x13d0] sm:$0xff] }
 0x546   : > { %v2392_v10 = vpop.xlane.xlu1 %2391  ;;  %v7125_v61 = vsel %vm4430_vm10, %v7124_v56, %v7120_v59  ;;  %v2390_v62 = vpop.xlane.xlu0 %2389 }
 0x547   : > { %v7134_v3 = vrot.slane %v2392_v10, %v10930_v16  ;;  %v7129_v4 = vrot.slane %v2390_v62, %v10936_v24  ;;  %v890_v62 = vld [vmem:[%s10757_s11 + $0x13e8] sm:$0xff] }
 0x549   : > { %v7130_v26 = vsel %vm4437_vm11, %v7129_v4, %v7125_v61  ;;  %2531 = vadd.xlane.f32.xlu1 %v880_v0  ;;  %2529 = vadd.xlane.f32.xlu0 %v879_v1  ;;  %v889_v0 = vld [vmem:[%s10757_s11 + $0x13e0] sm:$0xff] }
 0x54a   : > { %v2396_v8 = vpop.xlane.xlu1 %2395  ;;  %v7135_v11 = vsel %vm4444_vm12, %v7134_v3, %v7130_v26  ;;  %v2394_v12 = vpop.xlane.xlu0 %2393 }
 0x54b   : > { %v7144_v15 = vrot.slane %v2396_v8, %v10944_v34  ;;  %v7139_v20 = vrot.slane %v2394_v12, %v10949_v37  ;;  %v892_v12 = vld [vmem:[%s10757_s11 + $0x13f8] sm:$0xff] }
 0x54d   : > { %v7140_v23 = vsel %vm4451_vm13, %v7139_v20, %v7135_v11  ;;  %2535 = vadd.xlane.f32.xlu1 %v882_v51  ;;  %2533 = vadd.xlane.f32.xlu0 %v881_v14  ;;  %v891_v51 = vld [vmem:[%s10757_s11 + $0x13f0] sm:$0xff] }
 0x54e   : > { %v7145_v25 = vsel %vm4458_vm14, %v7144_v15, %v7140_v23  ;;  %v2400_v45 = vpop.xlane.xlu1 %2399  ;;  %v2398_v27 = vpop.xlane.xlu0 %2397 }
 0x54f   : > { %v12681_v47 = vsel %vm9443_vm15, %v7145_v25, %v12273_v60  ;;  %v7153_v35 = vrot.slane %v2400_v45, %v10858_v18  ;;  %v7149_v6 = vrot.slane %v2398_v27, %v10855_v17  ;;  %v894_v27 = vld [vmem:[%s10757_s11 + $0x1408] sm:$0xff] }
 0x551   : > { %v7154_v46 = vsel %vm4360_vm0, %v7153_v35, %v7149_v6  ;;  %2539 = vadd.xlane.f32.xlu1 %v884_v29  ;;  %2537 = vadd.xlane.f32.xlu0 %v883_v33  ;;  %v893_v29 = vld [vmem:[%s10757_s11 + $0x1400] sm:$0xff] }
 0x552   : > { %v2404_v39 = vpop.xlane.xlu1 %2403  ;;  %v2402_v40 = vpop.xlane.xlu0 %2401 }
 0x553   : > { %v7163_v43 = vrot.slane %v2404_v39, %v10866_v22  ;;  %v7158_v44 = vrot.slane %v2402_v40, %v10863_v21 }
 0x555   : > { %v7159_v60 = vsel %vm4367_vm1, %v7158_v44, %v7154_v46  ;;  %2543 = vadd.xlane.f32.xlu1 %v886_v41  ;;  %2541 = vadd.xlane.f32.xlu0 %v885_v28  ;;  %v896_v41 = vld [vmem:[%s10757_s11 + $0x1418] sm:$0xff]  ;;  %v895_v28 = vld [vmem:[%s10757_s11 + $0x1410] sm:$0xff] }
 0x556   : > { %v2408_v48 = vpop.xlane.xlu1 %2407  ;;  %v7164_v49 = vsel %vm4374_vm2, %v7163_v43, %v7159_v60  ;;  %v2406_v50 = vpop.xlane.xlu0 %2405 }
 0x557   : > { %v7173_v53 = vrot.slane %v2408_v48, %v10875_v31  ;;  %v7168_v56 = vrot.slane %v2406_v50, %v10878_v32 }
 0x559   : > { %v7169_v57 = vsel %vm4381_vm3, %v7168_v56, %v7164_v49  ;;  %2547 = vadd.xlane.f32.xlu1 %v888_v13  ;;  %2545 = vadd.xlane.f32.xlu0 %v887_v52  ;;  %v898_v13 = vld [vmem:[%s10757_s11 + $0x1428] sm:$0xff]  ;;  %v897_v52 = vld [vmem:[%s10757_s11 + $0x1420] sm:$0xff] }
 0x55a   : > { %v2412_v59 = vpop.xlane.xlu1 %2411  ;;  %v7174_v10 = vsel %vm4388_vm4, %v7173_v53, %v7169_v57  ;;  %v2410_v61 = vpop.xlane.xlu0 %2409 }
 0x55b   : > { %v7183_v1 = vrot.slane %v2412_v59, %v10884_v36  ;;  %v7178_v3 = vrot.slane %v2410_v61, %v10890_v42 }
 0x55d   : > { %v7179_v4 = vsel %vm4395_vm5, %v7178_v3, %v7174_v10  ;;  %2551 = vadd.xlane.f32.xlu1 %v890_v62  ;;  %2549 = vadd.xlane.f32.xlu0 %v889_v0  ;;  %v900_v62 = vld [vmem:[%s10757_s11 + $0x1438] sm:$0xff]  ;;  %v899_v0 = vld [vmem:[%s10757_s11 + $0x1430] sm:$0xff] }
 0x55e   : > { %v2416_v26 = vpop.xlane.xlu1 %2415  ;;  %v7184_v8 = vsel %vm4402_vm6, %v7183_v1, %v7179_v4  ;;  %v2414_v11 = vpop.xlane.xlu0 %2413 }
 0x55f   : > { %v7193_v14 = vrot.slane %v2416_v26, %v10902_v54  ;;  %v7188_v15 = vrot.slane %v2414_v11, %v10908_v58 }
 0x561   : > { %v7189_v20 = vsel %vm4409_vm7, %v7188_v15, %v7184_v8  ;;  %2555 = vadd.xlane.f32.xlu1 %v892_v12  ;;  %2553 = vadd.xlane.f32.xlu0 %v891_v51  ;;  %v902_v12 = vld [vmem:[%s10757_s11 + $0x1448] sm:$0xff]  ;;  %v901_v51 = vld [vmem:[%s10757_s11 + $0x1440] sm:$0xff] }
 0x562   : > { %v2420_v23 = vpop.xlane.xlu1 %2419  ;;  %v7194_v25 = vsel %vm4416_vm8, %v7193_v14, %v7189_v20  ;;  %v2418_v45 = vpop.xlane.xlu0 %2417 }
 0x563   : > { %v7203_v33 = vrot.slane %v2420_v23, %v10916_v2  ;;  %v7198_v35 = vrot.slane %v2418_v45, %v10922_v7  ;;  %v904_v45 = vld [vmem:[%s10757_s11 + $0x1458] sm:$0xff] }
 0x565   : > { %v7199_v6 = vsel %vm4423_vm9, %v7198_v35, %v7194_v25  ;;  %2559 = vadd.xlane.f32.xlu1 %v894_v27  ;;  %2557 = vadd.xlane.f32.xlu0 %v893_v29  ;;  %v903_v27 = vld [vmem:[%s10757_s11 + $0x1450] sm:$0xff] }
 0x566   : > { %v2424_v46 = vpop.xlane.xlu1 %2423  ;;  %v7204_v39 = vsel %vm4430_vm10, %v7203_v33, %v7199_v6  ;;  %v2422_v40 = vpop.xlane.xlu0 %2421 }
 0x567   : > { %v7213_v43 = vrot.slane %v2424_v46, %v10930_v16  ;;  %v7208_v44 = vrot.slane %v2422_v40, %v10936_v24  ;;  %v906_v40 = vld [vmem:[%s10757_s11 + $0x1468] sm:$0xff] }
 0x569   : > { %v7209_v60 = vsel %vm4437_vm11, %v7208_v44, %v7204_v39  ;;  %2563 = vadd.xlane.f32.xlu1 %v896_v41  ;;  %2561 = vadd.xlane.f32.xlu0 %v895_v28  ;;  %v905_v41 = vld [vmem:[%s10757_s11 + $0x1460] sm:$0xff] }
 0x56a   : > { %v2428_v48 = vpop.xlane.xlu1 %2427  ;;  %v7214_v49 = vsel %vm4444_vm12, %v7213_v43, %v7209_v60  ;;  %v2426_v50 = vpop.xlane.xlu0 %2425 }
 0x56b   : > { %v7223_v53 = vrot.slane %v2428_v48, %v10944_v34  ;;  %v7218_v56 = vrot.slane %v2426_v50, %v10949_v37  ;;  %v908_v50 = vld [vmem:[%s10757_s11 + $0x1478] sm:$0xff] }
 0x56d   : > { %v7219_v57 = vsel %vm4451_vm13, %v7218_v56, %v7214_v49  ;;  %2567 = vadd.xlane.f32.xlu1 %v898_v13  ;;  %2565 = vadd.xlane.f32.xlu0 %v897_v52  ;;  %v907_v13 = vld [vmem:[%s10757_s11 + $0x1470] sm:$0xff] }
 0x56e   : > { %v7224_v59 = vsel %vm4458_vm14, %v7223_v53, %v7219_v57  ;;  %v2432_v10 = vpop.xlane.xlu1 %2431  ;;  %v2430_v61 = vpop.xlane.xlu0 %2429 }
 0x56f   : > { %v12732_v1 = vsel %vm9443_vm15, %v7224_v59, %v12324_v38  ;;  %v7232_v3 = vrot.slane %v2432_v10, %v10858_v18  ;;  %v7228_v4 = vrot.slane %v2430_v61, %v10855_v17  ;;  %v910_v61 = vld [vmem:[%s10757_s11 + $0x1488] sm:$0xff] }
 0x571   : > { %v7233_v26 = vsel %vm4360_vm0, %v7232_v3, %v7228_v4  ;;  %2571 = vadd.xlane.f32.xlu1 %v900_v62  ;;  %2569 = vadd.xlane.f32.xlu0 %v899_v0  ;;  %v909_v62 = vld [vmem:[%s10757_s11 + $0x1480] sm:$0xff] }
 0x572   : > { %v2436_v8 = vpop.xlane.xlu1 %2435  ;;  %v2434_v11 = vpop.xlane.xlu0 %2433 }
 0x573   : > { %v7242_v14 = vrot.slane %v2436_v8, %v10866_v22  ;;  %v7237_v15 = vrot.slane %v2434_v11, %v10863_v21 }
 0x575   : > { %v7238_v38 = vsel %vm4367_vm1, %v7237_v15, %v7233_v26  ;;  %2575 = vadd.xlane.f32.xlu1 %v902_v12  ;;  %2573 = vadd.xlane.f32.xlu0 %v901_v51  ;;  %v912_v12 = vld [vmem:[%s10757_s11 + $0x1498] sm:$0xff]  ;;  %v911_v51 = vld [vmem:[%s10757_s11 + $0x1490] sm:$0xff] }
 0x576   : > { %v2440_v20 = vpop.xlane.xlu1 %2439  ;;  %v7243_v23 = vsel %vm4374_vm2, %v7242_v14, %v7238_v38  ;;  %v2438_v25 = vpop.xlane.xlu0 %2437 }
 0x577   : > { %v7252_v29 = vrot.slane %v2440_v20, %v10875_v31  ;;  %v7247_v33 = vrot.slane %v2438_v25, %v10878_v32 }
 0x579   : > { %v7248_v35 = vsel %vm4381_vm3, %v7247_v33, %v7243_v23  ;;  %2579 = vadd.xlane.f32.xlu1 %v904_v45  ;;  %2577 = vadd.xlane.f32.xlu0 %v903_v27  ;;  %v914_v45 = vld [vmem:[%s10757_s11 + $0x14a8] sm:$0xff]  ;;  %v913_v27 = vld [vmem:[%s10757_s11 + $0x14a0] sm:$0xff] }
 0x57a   : > { %v2444_v6 = vpop.xlane.xlu1 %2443  ;;  %v7253_v46 = vsel %vm4388_vm4, %v7252_v29, %v7248_v35  ;;  %v2442_v39 = vpop.xlane.xlu0 %2441 }
 0x57b   : > { %v7262_v28 = vrot.slane %v2444_v6, %v10884_v36  ;;  %v7257_v43 = vrot.slane %v2442_v39, %v10890_v42 }
 0x57d   : > { %v7258_v44 = vsel %vm4395_vm5, %v7257_v43, %v7253_v46  ;;  %2583 = vadd.xlane.f32.xlu1 %v906_v40  ;;  %2581 = vadd.xlane.f32.xlu0 %v905_v41  ;;  %v916_v40 = vld [vmem:[%s10757_s11 + $0x14b8] sm:$0xff]  ;;  %v915_v41 = vld [vmem:[%s10757_s11 + $0x14b0] sm:$0xff] }
 0x57e   : > { %v2448_v60 = vpop.xlane.xlu1 %2447  ;;  %v7263_v48 = vsel %vm4402_vm6, %v7262_v28, %v7258_v44  ;;  %v2446_v49 = vpop.xlane.xlu0 %2445 }
 0x57f   : > { %v7272_v52 = vrot.slane %v2448_v60, %v10902_v54  ;;  %v7267_v53 = vrot.slane %v2446_v49, %v10908_v58 }
 0x581   : > { %v7268_v56 = vsel %vm4409_vm7, %v7267_v53, %v7263_v48  ;;  %2587 = vadd.xlane.f32.xlu1 %v908_v50  ;;  %2585 = vadd.xlane.f32.xlu0 %v907_v13  ;;  %v918_v50 = vld [vmem:[%s10757_s11 + $0x14c8] sm:$0xff]  ;;  %v917_v13 = vld [vmem:[%s10757_s11 + $0x14c0] sm:$0xff] }
 0x582   : > { %v2452_v57 = vpop.xlane.xlu1 %2451  ;;  %v7273_v59 = vsel %vm4416_vm8, %v7272_v52, %v7268_v56  ;;  %v2450_v10 = vpop.xlane.xlu0 %2449 }
 0x583   : > { %v7282_v0 = vrot.slane %v2452_v57, %v10916_v2  ;;  %v7277_v3 = vrot.slane %v2450_v10, %v10922_v7  ;;  %v920_v10 = vld [vmem:[%s10757_s11 + $0x14d8] sm:$0xff] }
 0x585   : > { %v7278_v4 = vsel %vm4423_vm9, %v7277_v3, %v7273_v59  ;;  %2591 = vadd.xlane.f32.xlu1 %v910_v61  ;;  %2589 = vadd.xlane.f32.xlu0 %v909_v62  ;;  %v919_v61 = vld [vmem:[%s10757_s11 + $0x14d0] sm:$0xff] }
 0x586   : > { %v2456_v26 = vpop.xlane.xlu1 %2455  ;;  %v7283_v8 = vsel %vm4430_vm10, %v7282_v0, %v7278_v4  ;;  %v2454_v11 = vpop.xlane.xlu0 %2453 }
 0x587   : > { %v7292_v14 = vrot.slane %v2456_v26, %v10930_v16  ;;  %v7287_v15 = vrot.slane %v2454_v11, %v10936_v24  ;;  %v922_v11 = vld [vmem:[%s10757_s11 + $0x14e8] sm:$0xff] }
 0x589   : > { %v7288_v38 = vsel %vm4437_vm11, %v7287_v15, %v7283_v8  ;;  %2595 = vadd.xlane.f32.xlu1 %v912_v12  ;;  %2593 = vadd.xlane.f32.xlu0 %v911_v51  ;;  %v921_v12 = vld [vmem:[%s10757_s11 + $0x14e0] sm:$0xff] }
 0x58a   : > { %v2460_v20 = vpop.xlane.xlu1 %2459  ;;  %v7293_v23 = vsel %vm4444_vm12, %v7292_v14, %v7288_v38  ;;  %v2458_v25 = vpop.xlane.xlu0 %2457 }
 0x58b   : > { %v7302_v29 = vrot.slane %v2460_v20, %v10944_v34  ;;  %v7297_v33 = vrot.slane %v2458_v25, %v10949_v37  ;;  %v924_v25 = vld [vmem:[%s10757_s11 + $0x14f8] sm:$0xff] }
 0x58d   : > { %v7298_v35 = vsel %vm4451_vm13, %v7297_v33, %v7293_v23  ;;  %2599 = vadd.xlane.f32.xlu1 %v914_v45  ;;  %2597 = vadd.xlane.f32.xlu0 %v913_v27  ;;  %v923_v45 = vld [vmem:[%s10757_s11 + $0x14f0] sm:$0xff] }
 0x58e   : > { %v7303_v6 = vsel %vm4458_vm14, %v7302_v29, %v7298_v35  ;;  %v2464_v46 = vpop.xlane.xlu1 %2463  ;;  %v2462_v39 = vpop.xlane.xlu0 %2461 }
 0x58f   : > { %v12783_v28 = vsel %vm9443_vm15, %v7303_v6, %v12375_v5  ;;  %v7311_v43 = vrot.slane %v2464_v46, %v10858_v18  ;;  %v7307_v44 = vrot.slane %v2462_v39, %v10855_v17  ;;  %v926_v39 = vld [vmem:[%s10757_s11 + $0x1508] sm:$0xff] }
 0x591   : > { %v7312_v60 = vsel %vm4360_vm0, %v7311_v43, %v7307_v44  ;;  %2603 = vadd.xlane.f32.xlu1 %v916_v40  ;;  %2601 = vadd.xlane.f32.xlu0 %v915_v41  ;;  %v925_v40 = vld [vmem:[%s10757_s11 + $0x1500] sm:$0xff] }
 0x592   : > { %v2468_v48 = vpop.xlane.xlu1 %2467  ;;  %v2466_v49 = vpop.xlane.xlu0 %2465 }
 0x593   : > { %v7321_v52 = vrot.slane %v2468_v48, %v10866_v22  ;;  %v7316_v53 = vrot.slane %v2466_v49, %v10863_v21 }
 0x595   : > { %v7317_v5 = vsel %vm4367_vm1, %v7316_v53, %v7312_v60  ;;  %2607 = vadd.xlane.f32.xlu1 %v918_v50  ;;  %2605 = vadd.xlane.f32.xlu0 %v917_v13  ;;  %v928_v50 = vld [vmem:[%s10757_s11 + $0x1518] sm:$0xff]  ;;  %v927_v13 = vld [vmem:[%s10757_s11 + $0x1510] sm:$0xff] }
 0x596   : > { %v2472_v56 = vpop.xlane.xlu1 %2471  ;;  %v7322_v57 = vsel %vm4374_vm2, %v7321_v52, %v7317_v5  ;;  %v2470_v59 = vpop.xlane.xlu0 %2469 }
 0x597   : > { %v7331_v62 = vrot.slane %v2472_v56, %v10875_v31  ;;  %v7326_v0 = vrot.slane %v2470_v59, %v10878_v32 }
 0x599   : > { %v7327_v3 = vsel %vm4381_vm3, %v7326_v0, %v7322_v57  ;;  %2611 = vadd.xlane.f32.xlu1 %v920_v10  ;;  %2609 = vadd.xlane.f32.xlu0 %v919_v61  ;;  %v930_v10 = vld [vmem:[%s10757_s11 + $0x1528] sm:$0xff]  ;;  %v929_v61 = vld [vmem:[%s10757_s11 + $0x1520] sm:$0xff] }
 0x59a   : > { %v2476_v4 = vpop.xlane.xlu1 %2475  ;;  %v7332_v26 = vsel %vm4388_vm4, %v7331_v62, %v7327_v3  ;;  %v2474_v8 = vpop.xlane.xlu0 %2473 }
 0x59b   : > { %v7341_v51 = vrot.slane %v2476_v4, %v10884_v36  ;;  %v7336_v14 = vrot.slane %v2474_v8, %v10890_v42 }
 0x59d   : > { %v7337_v15 = vsel %vm4395_vm5, %v7336_v14, %v7332_v26  ;;  %2615 = vadd.xlane.f32.xlu1 %v922_v11  ;;  %2613 = vadd.xlane.f32.xlu0 %v921_v12  ;;  %v932_v11 = vld [vmem:[%s10757_s11 + $0x1538] sm:$0xff]  ;;  %v931_v12 = vld [vmem:[%s10757_s11 + $0x1530] sm:$0xff] }
 0x59e   : > { %v2480_v38 = vpop.xlane.xlu1 %2479  ;;  %v7342_v20 = vsel %vm4402_vm6, %v7341_v51, %v7337_v15  ;;  %v2478_v23 = vpop.xlane.xlu0 %2477 }
 0x59f   : > { %v7351_v27 = vrot.slane %v2480_v38, %v10902_v54  ;;  %v7346_v29 = vrot.slane %v2478_v23, %v10908_v58 }
 0x5a1   : > { %v7347_v33 = vsel %vm4409_vm7, %v7346_v29, %v7342_v20  ;;  %2619 = vadd.xlane.f32.xlu1 %v924_v25  ;;  %2617 = vadd.xlane.f32.xlu0 %v923_v45  ;;  %v934_v25 = vld [vmem:[%s10757_s11 + $0x1548] sm:$0xff]  ;;  %v933_v45 = vld [vmem:[%s10757_s11 + $0x1540] sm:$0xff] }
 0x5a2   : > { %v2484_v35 = vpop.xlane.xlu1 %2483  ;;  %v7352_v6 = vsel %vm4416_vm8, %v7351_v27, %v7347_v33  ;;  %v2482_v46 = vpop.xlane.xlu0 %2481 }
 0x5a3   : > { %v7361_v41 = vrot.slane %v2484_v35, %v10916_v2  ;;  %v7356_v43 = vrot.slane %v2482_v46, %v10922_v7  ;;  %v936_v46 = vld [vmem:[%s10757_s11 + $0x1558] sm:$0xff] }
 0x5a5   : > { %v7357_v44 = vsel %vm4423_vm9, %v7356_v43, %v7352_v6  ;;  %2623 = vadd.xlane.f32.xlu1 %v926_v39  ;;  %2621 = vadd.xlane.f32.xlu0 %v925_v40  ;;  %v935_v39 = vld [vmem:[%s10757_s11 + $0x1550] sm:$0xff] }
 0x5a6   : > { %v2488_v60 = vpop.xlane.xlu1 %2487  ;;  %v7362_v48 = vsel %vm4430_vm10, %v7361_v41, %v7357_v44  ;;  %v2486_v49 = vpop.xlane.xlu0 %2485 }
 0x5a7   : > { %v7371_v52 = vrot.slane %v2488_v60, %v10930_v16  ;;  %v7366_v53 = vrot.slane %v2486_v49, %v10936_v24  ;;  %v938_v49 = vld [vmem:[%s10757_s11 + $0x1568] sm:$0xff] }
 0x5a9   : > { %v7367_v5 = vsel %vm4437_vm11, %v7366_v53, %v7362_v48  ;;  %2627 = vadd.xlane.f32.xlu1 %v928_v50  ;;  %2625 = vadd.xlane.f32.xlu0 %v927_v13  ;;  %v937_v50 = vld [vmem:[%s10757_s11 + $0x1560] sm:$0xff] }
 0x5aa   : > { %v2492_v56 = vpop.xlane.xlu1 %2491  ;;  %v7372_v57 = vsel %vm4444_vm12, %v7371_v52, %v7367_v5  ;;  %v2490_v59 = vpop.xlane.xlu0 %2489 }
 0x5ab   : > { %v7381_v62 = vrot.slane %v2492_v56, %v10944_v34  ;;  %v7376_v0 = vrot.slane %v2490_v59, %v10949_v37  ;;  %v940_v59 = vld [vmem:[%s10757_s11 + $0x1578] sm:$0xff] }
 0x5ad   : > { %v7377_v3 = vsel %vm4451_vm13, %v7376_v0, %v7372_v57  ;;  %2631 = vadd.xlane.f32.xlu1 %v930_v10  ;;  %2629 = vadd.xlane.f32.xlu0 %v929_v61  ;;  %v939_v10 = vld [vmem:[%s10757_s11 + $0x1570] sm:$0xff] }
 0x5ae   : > { %v7382_v4 = vsel %vm4458_vm14, %v7381_v62, %v7377_v3  ;;  %v2496_v26 = vpop.xlane.xlu1 %2495  ;;  %v2494_v8 = vpop.xlane.xlu0 %2493 }
 0x5af   : > { %v12834_v51 = vsel %vm9443_vm15, %v7382_v4, %v12426_v9  ;;  %v7390_v14 = vrot.slane %v2496_v26, %v10858_v18  ;;  %v7386_v15 = vrot.slane %v2494_v8, %v10855_v17  ;;  %v942_v8 = vld [vmem:[%s10757_s11 + $0x1588] sm:$0xff] }
 0x5b1   : > { %v7391_v38 = vsel %vm4360_vm0, %v7390_v14, %v7386_v15  ;;  %2635 = vadd.xlane.f32.xlu1 %v932_v11  ;;  %2633 = vadd.xlane.f32.xlu0 %v931_v12  ;;  %v941_v11 = vld [vmem:[%s10757_s11 + $0x1580] sm:$0xff] }
 0x5b2   : > { %v2500_v20 = vpop.xlane.xlu1 %2499  ;;  %v2498_v23 = vpop.xlane.xlu0 %2497 }
 0x5b3   : > { %v7400_v27 = vrot.slane %v2500_v20, %v10866_v22  ;;  %v7395_v29 = vrot.slane %v2498_v23, %v10863_v21 }
 0x5b5   : > { %v7396_v9 = vsel %vm4367_vm1, %v7395_v29, %v7391_v38  ;;  %2639 = vadd.xlane.f32.xlu1 %v934_v25  ;;  %2637 = vadd.xlane.f32.xlu0 %v933_v45  ;;  %v944_v25 = vld [vmem:[%s10757_s11 + $0x1598] sm:$0xff]  ;;  %v943_v45 = vld [vmem:[%s10757_s11 + $0x1590] sm:$0xff] }
 0x5b6   : > { %v2504_v33 = vpop.xlane.xlu1 %2503  ;;  %v7401_v35 = vsel %vm4374_vm2, %v7400_v27, %v7396_v9  ;;  %v2502_v6 = vpop.xlane.xlu0 %2501 }
 0x5b7   : > { %v7410_v40 = vrot.slane %v2504_v33, %v10875_v31  ;;  %v7405_v41 = vrot.slane %v2502_v6, %v10878_v32 }
 0x5b9   : > { %v7406_v43 = vsel %vm4381_vm3, %v7405_v41, %v7401_v35  ;;  %2643 = vadd.xlane.f32.xlu1 %v936_v46  ;;  %2641 = vadd.xlane.f32.xlu0 %v935_v39  ;;  %v946_v46 = vld [vmem:[%s10757_s11 + $0x15a8] sm:$0xff]  ;;  %v945_v39 = vld [vmem:[%s10757_s11 + $0x15a0] sm:$0xff] }
 0x5ba   : > { %v2508_v44 = vpop.xlane.xlu1 %2507  ;;  %v7411_v60 = vsel %vm4388_vm4, %v7410_v40, %v7406_v43  ;;  %v2506_v48 = vpop.xlane.xlu0 %2505 }
 0x5bb   : > { %v7420_v13 = vrot.slane %v2508_v44, %v10884_v36  ;;  %v7415_v52 = vrot.slane %v2506_v48, %v10890_v42 }
 0x5bd   : > { %v7416_v53 = vsel %vm4395_vm5, %v7415_v52, %v7411_v60  ;;  %2647 = vadd.xlane.f32.xlu1 %v938_v49  ;;  %2645 = vadd.xlane.f32.xlu0 %v937_v50  ;;  %v948_v49 = vld [vmem:[%s10757_s11 + $0x15b8] sm:$0xff]  ;;  %v947_v50 = vld [vmem:[%s10757_s11 + $0x15b0] sm:$0xff] }
 0x5be   : > { %v2512_v5 = vpop.xlane.xlu1 %2511  ;;  %v7421_v56 = vsel %vm4402_vm6, %v7420_v13, %v7416_v53  ;;  %v2510_v57 = vpop.xlane.xlu0 %2509 }
 0x5bf   : > { %v7430_v61 = vrot.slane %v2512_v5, %v10902_v54  ;;  %v7425_v62 = vrot.slane %v2510_v57, %v10908_v58 }
 0x5c1   : > { %v7426_v0 = vsel %vm4409_vm7, %v7425_v62, %v7421_v56  ;;  %2651 = vadd.xlane.f32.xlu1 %v940_v59  ;;  %2649 = vadd.xlane.f32.xlu0 %v939_v10  ;;  %v950_v59 = vld [vmem:[%s10757_s11 + $0x15c8] sm:$0xff]  ;;  %v949_v10 = vld [vmem:[%s10757_s11 + $0x15c0] sm:$0xff] }
 0x5c2   : > { %v2516_v3 = vpop.xlane.xlu1 %2515  ;;  %v7431_v4 = vsel %vm4416_vm8, %v7430_v61, %v7426_v0  ;;  %v2514_v26 = vpop.xlane.xlu0 %2513 }
 0x5c3   : > { %v7440_v12 = vrot.slane %v2516_v3, %v10916_v2  ;;  %v7435_v14 = vrot.slane %v2514_v26, %v10922_v7  ;;  %v952_v26 = vld [vmem:[%s10757_s11 + $0x15d8] sm:$0xff] }
 0x5c5   : > { %v7436_v15 = vsel %vm4423_vm9, %v7435_v14, %v7431_v4  ;;  %2655 = vadd.xlane.f32.xlu1 %v942_v8  ;;  %2653 = vadd.xlane.f32.xlu0 %v941_v11  ;;  %v951_v8 = vld [vmem:[%s10757_s11 + $0x15d0] sm:$0xff] }
 0x5c6   : > { %v2520_v38 = vpop.xlane.xlu1 %2519  ;;  %v7441_v20 = vsel %vm4430_vm10, %v7440_v12, %v7436_v15  ;;  %v2518_v23 = vpop.xlane.xlu0 %2517 }
 0x5c7   : > { %v7450_v27 = vrot.slane %v2520_v38, %v10930_v16  ;;  %v7445_v29 = vrot.slane %v2518_v23, %v10936_v24  ;;  %v954_v23 = vld [vmem:[%s10757_s11 + $0x15e8] sm:$0xff] }
 0x5c9   : > { %v7446_v9 = vsel %vm4437_vm11, %v7445_v29, %v7441_v20  ;;  %2659 = vadd.xlane.f32.xlu1 %v944_v25  ;;  %2657 = vadd.xlane.f32.xlu0 %v943_v45  ;;  %v953_v25 = vld [vmem:[%s10757_s11 + $0x15e0] sm:$0xff] }
 0x5ca   : > { %v2524_v33 = vpop.xlane.xlu1 %2523  ;;  %v7451_v35 = vsel %vm4444_vm12, %v7450_v27, %v7446_v9  ;;  %v2522_v6 = vpop.xlane.xlu0 %2521 }
 0x5cb   : > { %v7460_v40 = vrot.slane %v2524_v33, %v10944_v34  ;;  %v7455_v41 = vrot.slane %v2522_v6, %v10949_v37  ;;  %v956_v6 = vld [vmem:[%s10757_s11 + $0x15f8] sm:$0xff] }
 0x5cd   : > { %v7456_v43 = vsel %vm4451_vm13, %v7455_v41, %v7451_v35  ;;  %2663 = vadd.xlane.f32.xlu1 %v946_v46  ;;  %2661 = vadd.xlane.f32.xlu0 %v945_v39  ;;  %v955_v46 = vld [vmem:[%s10757_s11 + $0x15f0] sm:$0xff] }
 0x5ce   : > { %v7461_v44 = vsel %vm4458_vm14, %v7460_v40, %v7456_v43  ;;  %v2528_v60 = vpop.xlane.xlu1 %2527  ;;  %v2526_v48 = vpop.xlane.xlu0 %2525 }
 0x5cf   : > { %v12885_v13 = vsel %vm9443_vm15, %v7461_v44, %v12477_v19  ;;  %v7469_v52 = vrot.slane %v2528_v60, %v10858_v18  ;;  %v7465_v53 = vrot.slane %v2526_v48, %v10855_v17  ;;  %v958_v48 = vld [vmem:[%s10757_s11 + $0x1608] sm:$0xff] }
 0x5d1   : > { %v7470_v5 = vsel %vm4360_vm0, %v7469_v52, %v7465_v53  ;;  %2667 = vadd.xlane.f32.xlu1 %v948_v49  ;;  %2665 = vadd.xlane.f32.xlu0 %v947_v50  ;;  %v957_v49 = vld [vmem:[%s10757_s11 + $0x1600] sm:$0xff] }
 0x5d2   : > { %v2532_v56 = vpop.xlane.xlu1 %2531  ;;  %v2530_v57 = vpop.xlane.xlu0 %2529 }
 0x5d3   : > { %v7479_v61 = vrot.slane %v2532_v56, %v10866_v22  ;;  %v7474_v62 = vrot.slane %v2530_v57, %v10863_v21 }
 0x5d5   : > { %v7475_v19 = vsel %vm4367_vm1, %v7474_v62, %v7470_v5  ;;  %2671 = vadd.xlane.f32.xlu1 %v950_v59  ;;  %2669 = vadd.xlane.f32.xlu0 %v949_v10  ;;  %v960_v59 = vld [vmem:[%s10757_s11 + $0x1618] sm:$0xff]  ;;  %v959_v10 = vld [vmem:[%s10757_s11 + $0x1610] sm:$0xff] }
 0x5d6   : > { %v2536_v0 = vpop.xlane.xlu1 %2535  ;;  %v7480_v3 = vsel %vm4374_vm2, %v7479_v61, %v7475_v19  ;;  %v2534_v4 = vpop.xlane.xlu0 %2533 }
 0x5d7   : > { %v7489_v11 = vrot.slane %v2536_v0, %v10875_v31  ;;  %v7484_v12 = vrot.slane %v2534_v4, %v10878_v32 }
 0x5d9   : > { %v7485_v14 = vsel %vm4381_vm3, %v7484_v12, %v7480_v3  ;;  %2675 = vadd.xlane.f32.xlu1 %v952_v26  ;;  %2673 = vadd.xlane.f32.xlu0 %v951_v8  ;;  %v962_v26 = vld [vmem:[%s10757_s11 + $0x1628] sm:$0xff]  ;;  %v961_v8 = vld [vmem:[%s10757_s11 + $0x1620] sm:$0xff] }
 0x5da   : > { %v2540_v15 = vpop.xlane.xlu1 %2539  ;;  %v7490_v38 = vsel %vm4388_vm4, %v7489_v11, %v7485_v14  ;;  %v2538_v20 = vpop.xlane.xlu0 %2537 }
 0x5db   : > { %v7499_v45 = vrot.slane %v2540_v15, %v10884_v36  ;;  %v7494_v27 = vrot.slane %v2538_v20, %v10890_v42 }
 0x5dd   : > { %v7495_v29 = vsel %vm4395_vm5, %v7494_v27, %v7490_v38  ;;  %2679 = vadd.xlane.f32.xlu1 %v954_v23  ;;  %2677 = vadd.xlane.f32.xlu0 %v953_v25  ;;  %v964_v23 = vld [vmem:[%s10757_s11 + $0x1638] sm:$0xff]  ;;  %v963_v25 = vld [vmem:[%s10757_s11 + $0x1630] sm:$0xff] }
 0x5de   : > { %v2544_v9 = vpop.xlane.xlu1 %2543  ;;  %v7500_v33 = vsel %vm4402_vm6, %v7499_v45, %v7495_v29  ;;  %v2542_v35 = vpop.xlane.xlu0 %2541 }
 0x5df   : > { %v7509_v39 = vrot.slane %v2544_v9, %v10902_v54  ;;  %v7504_v40 = vrot.slane %v2542_v35, %v10908_v58 }
 0x5e1   : > { %v7505_v41 = vsel %vm4409_vm7, %v7504_v40, %v7500_v33  ;;  %2683 = vadd.xlane.f32.xlu1 %v956_v6  ;;  %2681 = vadd.xlane.f32.xlu0 %v955_v46  ;;  %v966_v6 = vld [vmem:[%s10757_s11 + $0x1648] sm:$0xff]  ;;  %v965_v46 = vld [vmem:[%s10757_s11 + $0x1640] sm:$0xff] }
 0x5e2   : > { %v2548_v43 = vpop.xlane.xlu1 %2547  ;;  %v7510_v44 = vsel %vm4416_vm8, %v7509_v39, %v7505_v41  ;;  %v2546_v60 = vpop.xlane.xlu0 %2545 }
 0x5e3   : > { %v7519_v50 = vrot.slane %v2548_v43, %v10916_v2  ;;  %v7514_v52 = vrot.slane %v2546_v60, %v10922_v7  ;;  %v968_v60 = vld [vmem:[%s10757_s11 + $0x1658] sm:$0xff] }
 0x5e5   : > { %v7515_v53 = vsel %vm4423_vm9, %v7514_v52, %v7510_v44  ;;  %2687 = vadd.xlane.f32.xlu1 %v958_v48  ;;  %2685 = vadd.xlane.f32.xlu0 %v957_v49  ;;  %v967_v48 = vld [vmem:[%s10757_s11 + $0x1650] sm:$0xff] }
 0x5e6   : > { %v2552_v5 = vpop.xlane.xlu1 %2551  ;;  %v7520_v56 = vsel %vm4430_vm10, %v7519_v50, %v7515_v53  ;;  %v2550_v57 = vpop.xlane.xlu0 %2549 }
 0x5e7   : > { %v7529_v61 = vrot.slane %v2552_v5, %v10930_v16  ;;  %v7524_v62 = vrot.slane %v2550_v57, %v10936_v24  ;;  %v970_v57 = vld [vmem:[%s10757_s11 + $0x1668] sm:$0xff] }
 0x5e9   : > { %v7525_v19 = vsel %vm4437_vm11, %v7524_v62, %v7520_v56  ;;  %2691 = vadd.xlane.f32.xlu1 %v960_v59  ;;  %2689 = vadd.xlane.f32.xlu0 %v959_v10  ;;  %v969_v59 = vld [vmem:[%s10757_s11 + $0x1660] sm:$0xff] }
 0x5ea   : > { %v2556_v0 = vpop.xlane.xlu1 %2555  ;;  %v7530_v3 = vsel %vm4444_vm12, %v7529_v61, %v7525_v19  ;;  %v2554_v4 = vpop.xlane.xlu0 %2553 }
 0x5eb   : > { %v7539_v11 = vrot.slane %v2556_v0, %v10944_v34  ;;  %v7534_v12 = vrot.slane %v2554_v4, %v10949_v37  ;;  %v972_v4 = vld [vmem:[%s10757_s11 + $0x1678] sm:$0xff] }
 0x5ed   : > { %v7535_v14 = vsel %vm4451_vm13, %v7534_v12, %v7530_v3  ;;  %2695 = vadd.xlane.f32.xlu1 %v962_v26  ;;  %2693 = vadd.xlane.f32.xlu0 %v961_v8  ;;  %v971_v26 = vld [vmem:[%s10757_s11 + $0x1670] sm:$0xff] }
 0x5ee   : > { %v7540_v15 = vsel %vm4458_vm14, %v7539_v11, %v7535_v14  ;;  %v2560_v38 = vpop.xlane.xlu1 %2559  ;;  %v2558_v20 = vpop.xlane.xlu0 %2557 }
 0x5ef   : > { %v12936_v45 = vsel %vm9443_vm15, %v7540_v15, %v12528_v55  ;;  %v7548_v27 = vrot.slane %v2560_v38, %v10858_v18  ;;  %v7544_v29 = vrot.slane %v2558_v20, %v10855_v17  ;;  %v974_v20 = vld [vmem:[%s10757_s11 + $0x1688] sm:$0xff]  ;;  %vm9445_vm15 = vcmask 1045509  }
 0x5f1   : > { %v7549_v9 = vsel %vm4360_vm0, %v7548_v27, %v7544_v29  ;;  %2699 = vadd.xlane.f32.xlu1 %v964_v23  ;;  %2697 = vadd.xlane.f32.xlu0 %v963_v25  ;;  %v973_v23 = vld [vmem:[%s10757_s11 + $0x1680] sm:$0xff] }
 0x5f2   : > { %v2564_v33 = vpop.xlane.xlu1 %2563  ;;  %v2562_v35 = vpop.xlane.xlu0 %2561 }
 0x5f3   : > { %v7558_v39 = vrot.slane %v2564_v33, %v10866_v22  ;;  %v7553_v40 = vrot.slane %v2562_v35, %v10863_v21 }
 0x5f5   : > { %v7554_v55 = vsel %vm4367_vm1, %v7553_v40, %v7549_v9  ;;  %2703 = vadd.xlane.f32.xlu1 %v966_v6  ;;  %2701 = vadd.xlane.f32.xlu0 %v965_v46  ;;  %v976_v6 = vld [vmem:[%s10757_s11 + $0x1698] sm:$0xff]  ;;  %v975_v46 = vld [vmem:[%s10757_s11 + $0x1690] sm:$0xff] }
 0x5f6   : > { %v2568_v41 = vpop.xlane.xlu1 %2567  ;;  %v7559_v43 = vsel %vm4374_vm2, %v7558_v39, %v7554_v55  ;;  %v2566_v44 = vpop.xlane.xlu0 %2565 }
 0x5f7   : > { %v7568_v49 = vrot.slane %v2568_v41, %v10875_v31  ;;  %v7563_v50 = vrot.slane %v2566_v44, %v10878_v32 }
 0x5f9   : > { %v7564_v52 = vsel %vm4381_vm3, %v7563_v50, %v7559_v43  ;;  %2707 = vadd.xlane.f32.xlu1 %v968_v60  ;;  %2705 = vadd.xlane.f32.xlu0 %v967_v48  ;;  %v978_v60 = vld [vmem:[%s10757_s11 + $0x16a8] sm:$0xff]  ;;  %v977_v48 = vld [vmem:[%s10757_s11 + $0x16a0] sm:$0xff] }
 0x5fa   : > { %v2572_v53 = vpop.xlane.xlu1 %2571  ;;  %v7569_v5 = vsel %vm4388_vm4, %v7568_v49, %v7564_v52  ;;  %v2570_v56 = vpop.xlane.xlu0 %2569 }
 0x5fb   : > { %v7578_v10 = vrot.slane %v2572_v53, %v10884_v36  ;;  %v7573_v61 = vrot.slane %v2570_v56, %v10890_v42 }
 0x5fd   : > { %v7574_v62 = vsel %vm4395_vm5, %v7573_v61, %v7569_v5  ;;  %2711 = vadd.xlane.f32.xlu1 %v970_v57  ;;  %2709 = vadd.xlane.f32.xlu0 %v969_v59  ;;  %v980_v57 = vld [vmem:[%s10757_s11 + $0x16b8] sm:$0xff]  ;;  %v979_v59 = vld [vmem:[%s10757_s11 + $0x16b0] sm:$0xff] }
 0x5fe   : > { %v2576_v19 = vpop.xlane.xlu1 %2575  ;;  %v7579_v0 = vsel %vm4402_vm6, %v7578_v10, %v7574_v62  ;;  %v2574_v3 = vpop.xlane.xlu0 %2573 }
 0x5ff   : > { %v7588_v8 = vrot.slane %v2576_v19, %v10902_v54  ;;  %v7583_v11 = vrot.slane %v2574_v3, %v10908_v58 }
 0x601   : > { %v7584_v12 = vsel %vm4409_vm7, %v7583_v11, %v7579_v0  ;;  %2715 = vadd.xlane.f32.xlu1 %v972_v4  ;;  %2713 = vadd.xlane.f32.xlu0 %v971_v26  ;;  %v982_v4 = vld [vmem:[%s10757_s11 + $0x16c8] sm:$0xff]  ;;  %v981_v26 = vld [vmem:[%s10757_s11 + $0x16c0] sm:$0xff] }
 0x602   : > { %v2580_v14 = vpop.xlane.xlu1 %2579  ;;  %v7589_v15 = vsel %vm4416_vm8, %v7588_v8, %v7584_v12  ;;  %v2578_v38 = vpop.xlane.xlu0 %2577 }
 0x603   : > { %v7598_v25 = vrot.slane %v2580_v14, %v10916_v2  ;;  %v7593_v27 = vrot.slane %v2578_v38, %v10922_v7  ;;  %v984_v38 = vld [vmem:[%s10757_s11 + $0x16d8] sm:$0xff] }
 0x605   : > { %v7594_v29 = vsel %vm4423_vm9, %v7593_v27, %v7589_v15  ;;  %2719 = vadd.xlane.f32.xlu1 %v974_v20  ;;  %2717 = vadd.xlane.f32.xlu0 %v973_v23  ;;  %v983_v20 = vld [vmem:[%s10757_s11 + $0x16d0] sm:$0xff] }
 0x606   : > { %v2584_v9 = vpop.xlane.xlu1 %2583  ;;  %v7599_v33 = vsel %vm4430_vm10, %v7598_v25, %v7594_v29  ;;  %v2582_v35 = vpop.xlane.xlu0 %2581 }
 0x607   : > { %v7608_v39 = vrot.slane %v2584_v9, %v10930_v16  ;;  %v7603_v40 = vrot.slane %v2582_v35, %v10936_v24  ;;  %v986_v35 = vld [vmem:[%s10757_s11 + $0x16e8] sm:$0xff] }
 0x609   : > { %v7604_v55 = vsel %vm4437_vm11, %v7603_v40, %v7599_v33  ;;  %2723 = vadd.xlane.f32.xlu1 %v976_v6  ;;  %2721 = vadd.xlane.f32.xlu0 %v975_v46  ;;  %v985_v6 = vld [vmem:[%s10757_s11 + $0x16e0] sm:$0xff] }
 0x60a   : > { %v2588_v41 = vpop.xlane.xlu1 %2587  ;;  %v7609_v43 = vsel %vm4444_vm12, %v7608_v39, %v7604_v55  ;;  %v2586_v44 = vpop.xlane.xlu0 %2585 }
 0x60b   : > { %v7618_v49 = vrot.slane %v2588_v41, %v10944_v34  ;;  %v7613_v50 = vrot.slane %v2586_v44, %v10949_v37  ;;  %v988_v44 = vld [vmem:[%s10757_s11 + $0x16f8] sm:$0xff] }
 0x60d   : > { %v7614_v52 = vsel %vm4451_vm13, %v7613_v50, %v7609_v43  ;;  %2727 = vadd.xlane.f32.xlu1 %v978_v60  ;;  %2725 = vadd.xlane.f32.xlu0 %v977_v48  ;;  %v987_v60 = vld [vmem:[%s10757_s11 + $0x16f0] sm:$0xff] }
 0x60e   : > { %v7619_v53 = vsel %vm4458_vm14, %v7618_v49, %v7614_v52  ;;  %v2592_v5 = vpop.xlane.xlu1 %2591  ;;  %v2590_v56 = vpop.xlane.xlu0 %2589 }
 0x60f   : > { %v12987_v10 = vsel %vm9445_vm15, %v7619_v53, %v12579_v30  ;;  %v7627_v61 = vrot.slane %v2592_v5, %v10858_v18  ;;  %v7623_v62 = vrot.slane %v2590_v56, %v10855_v17  ;;  %v990_v56 = vld [vmem:[%s10757_s11 + $0x1708] sm:$0xff] }
 0x611   : > { %v7628_v19 = vsel %vm4360_vm0, %v7627_v61, %v7623_v62  ;;  %2731 = vadd.xlane.f32.xlu1 %v980_v57  ;;  %2729 = vadd.xlane.f32.xlu0 %v979_v59  ;;  %v989_v57 = vld [vmem:[%s10757_s11 + $0x1700] sm:$0xff] }
 0x612   : > { %v2596_v0 = vpop.xlane.xlu1 %2595  ;;  %v2594_v3 = vpop.xlane.xlu0 %2593 }
 0x613   : > { %v7637_v8 = vrot.slane %v2596_v0, %v10866_v22  ;;  %v7632_v11 = vrot.slane %v2594_v3, %v10863_v21 }
 0x615   : > { %v7633_v30 = vsel %vm4367_vm1, %v7632_v11, %v7628_v19  ;;  %2735 = vadd.xlane.f32.xlu1 %v982_v4  ;;  %2733 = vadd.xlane.f32.xlu0 %v981_v26  ;;  %v992_v4 = vld [vmem:[%s10757_s11 + $0x1718] sm:$0xff]  ;;  %v991_v26 = vld [vmem:[%s10757_s11 + $0x1710] sm:$0xff] }
 0x616   : > { %v2600_v12 = vpop.xlane.xlu1 %2599  ;;  %v7638_v14 = vsel %vm4374_vm2, %v7637_v8, %v7633_v30  ;;  %v2598_v15 = vpop.xlane.xlu0 %2597 }
 0x617   : > { %v7647_v23 = vrot.slane %v2600_v12, %v10875_v31  ;;  %v7642_v25 = vrot.slane %v2598_v15, %v10878_v32 }
 0x619   : > { %v7643_v27 = vsel %vm4381_vm3, %v7642_v25, %v7638_v14  ;;  %2739 = vadd.xlane.f32.xlu1 %v984_v38  ;;  %2737 = vadd.xlane.f32.xlu0 %v983_v20  ;;  %v994_v38 = vld [vmem:[%s10757_s11 + $0x1728] sm:$0xff]  ;;  %v993_v20 = vld [vmem:[%s10757_s11 + $0x1720] sm:$0xff] }
 0x61a   : > { %v2604_v29 = vpop.xlane.xlu1 %2603  ;;  %v7648_v9 = vsel %vm4388_vm4, %v7647_v23, %v7643_v27  ;;  %v2602_v33 = vpop.xlane.xlu0 %2601 }
 0x61b   : > { %v7657_v46 = vrot.slane %v2604_v29, %v10884_v36  ;;  %v7652_v39 = vrot.slane %v2602_v33, %v10890_v42 }
 0x61d   : > { %v7653_v40 = vsel %vm4395_vm5, %v7652_v39, %v7648_v9  ;;  %2743 = vadd.xlane.f32.xlu1 %v986_v35  ;;  %2741 = vadd.xlane.f32.xlu0 %v985_v6  ;;  %v996_v35 = vld [vmem:[%s10757_s11 + $0x1738] sm:$0xff]  ;;  %v995_v6 = vld [vmem:[%s10757_s11 + $0x1730] sm:$0xff] }
 0x61e   : > { %v2608_v55 = vpop.xlane.xlu1 %2607  ;;  %v7658_v41 = vsel %vm4402_vm6, %v7657_v46, %v7653_v40  ;;  %v2606_v43 = vpop.xlane.xlu0 %2605 }
 0x61f   : > { %v7667_v48 = vrot.slane %v2608_v55, %v10902_v54  ;;  %v7662_v49 = vrot.slane %v2606_v43, %v10908_v58 }
 0x621   : > { %v7663_v50 = vsel %vm4409_vm7, %v7662_v49, %v7658_v41  ;;  %2747 = vadd.xlane.f32.xlu1 %v988_v44  ;;  %2745 = vadd.xlane.f32.xlu0 %v987_v60  ;;  %v998_v44 = vld [vmem:[%s10757_s11 + $0x1748] sm:$0xff]  ;;  %v997_v60 = vld [vmem:[%s10757_s11 + $0x1740] sm:$0xff] }
 0x622   : > { %v2612_v52 = vpop.xlane.xlu1 %2611  ;;  %v7668_v53 = vsel %vm4416_vm8, %v7667_v48, %v7663_v50  ;;  %v2610_v5 = vpop.xlane.xlu0 %2609 }
 0x623   : > { %v7677_v59 = vrot.slane %v2612_v52, %v10916_v2  ;;  %v7672_v61 = vrot.slane %v2610_v5, %v10922_v7  ;;  %v1000_v5 = vld [vmem:[%s10757_s11 + $0x1758] sm:$0xff] }
 0x625   : > { %v7673_v62 = vsel %vm4423_vm9, %v7672_v61, %v7668_v53  ;;  %2751 = vadd.xlane.f32.xlu1 %v990_v56  ;;  %2749 = vadd.xlane.f32.xlu0 %v989_v57  ;;  %v999_v56 = vld [vmem:[%s10757_s11 + $0x1750] sm:$0xff] }
 0x626   : > { %v2616_v19 = vpop.xlane.xlu1 %2615  ;;  %v7678_v0 = vsel %vm4430_vm10, %v7677_v59, %v7673_v62  ;;  %v2614_v3 = vpop.xlane.xlu0 %2613 }
 0x627   : > { %v7687_v8 = vrot.slane %v2616_v19, %v10930_v16  ;;  %v7682_v11 = vrot.slane %v2614_v3, %v10936_v24  ;;  %v1002_v3 = vld [vmem:[%s10757_s11 + $0x1768] sm:$0xff] }
 0x629   : > { %v7683_v30 = vsel %vm4437_vm11, %v7682_v11, %v7678_v0  ;;  %2755 = vadd.xlane.f32.xlu1 %v992_v4  ;;  %2753 = vadd.xlane.f32.xlu0 %v991_v26  ;;  %v1001_v4 = vld [vmem:[%s10757_s11 + $0x1760] sm:$0xff] }
 0x62a   : > { %v2620_v12 = vpop.xlane.xlu1 %2619  ;;  %v7688_v14 = vsel %vm4444_vm12, %v7687_v8, %v7683_v30  ;;  %v2618_v15 = vpop.xlane.xlu0 %2617 }
 0x62b   : > { %v7697_v23 = vrot.slane %v2620_v12, %v10944_v34  ;;  %v7692_v25 = vrot.slane %v2618_v15, %v10949_v37  ;;  %v1004_v15 = vld [vmem:[%s10757_s11 + $0x1778] sm:$0xff] }
 0x62d   : > { %v7693_v27 = vsel %vm4451_vm13, %v7692_v25, %v7688_v14  ;;  %2759 = vadd.xlane.f32.xlu1 %v994_v38  ;;  %2757 = vadd.xlane.f32.xlu0 %v993_v20  ;;  %v1003_v38 = vld [vmem:[%s10757_s11 + $0x1770] sm:$0xff] }
 0x62e   : > { %v7698_v29 = vsel %vm4458_vm14, %v7697_v23, %v7693_v27  ;;  %v2624_v9 = vpop.xlane.xlu1 %2623  ;;  %v2622_v33 = vpop.xlane.xlu0 %2621 }
 0x62f   : > { %v13038_v46 = vsel %vm9445_vm15, %v7698_v29, %v12630_v63  ;;  %v7706_v39 = vrot.slane %v2624_v9, %v10858_v18  ;;  %v7702_v40 = vrot.slane %v2622_v33, %v10855_v17  ;;  %v1006_v33 = vld [vmem:[%s10757_s11 + $0x1788] sm:$0xff] }
 0x631   : > { %v7707_v55 = vsel %vm4360_vm0, %v7706_v39, %v7702_v40  ;;  %2763 = vadd.xlane.f32.xlu1 %v996_v35  ;;  %2761 = vadd.xlane.f32.xlu0 %v995_v6  ;;  %v1005_v35 = vld [vmem:[%s10757_s11 + $0x1780] sm:$0xff] }
 0x632   : > { %v2628_v41 = vpop.xlane.xlu1 %2627  ;;  %v2626_v43 = vpop.xlane.xlu0 %2625 }
 0x633   : > { %v7716_v48 = vrot.slane %v2628_v41, %v10866_v22  ;;  %v7711_v49 = vrot.slane %v2626_v43, %v10863_v21 }
 0x635   : > { %v7712_v63 = vsel %vm4367_vm1, %v7711_v49, %v7707_v55  ;;  %2767 = vadd.xlane.f32.xlu1 %v998_v44  ;;  %2765 = vadd.xlane.f32.xlu0 %v997_v60  ;;  %v1008_v44 = vld [vmem:[%s10757_s11 + $0x1798] sm:$0xff]  ;;  %v1007_v60 = vld [vmem:[%s10757_s11 + $0x1790] sm:$0xff] }
 0x636   : > { %v2632_v50 = vpop.xlane.xlu1 %2631  ;;  %v7717_v52 = vsel %vm4374_vm2, %v7716_v48, %v7712_v63  ;;  %v2630_v53 = vpop.xlane.xlu0 %2629 }
 0x637   : > { %v7726_v57 = vrot.slane %v2632_v50, %v10875_v31  ;;  %v7721_v59 = vrot.slane %v2630_v53, %v10878_v32 }
 0x639   : > { %v7722_v61 = vsel %vm4381_vm3, %v7721_v59, %v7717_v52  ;;  %2771 = vadd.xlane.f32.xlu1 %v1000_v5  ;;  %2769 = vadd.xlane.f32.xlu0 %v999_v56  ;;  %v1010_v5 = vld [vmem:[%s10757_s11 + $0x17a8] sm:$0xff]  ;;  %v1009_v56 = vld [vmem:[%s10757_s11 + $0x17a0] sm:$0xff] }
 0x63a   : > { %v2636_v62 = vpop.xlane.xlu1 %2635  ;;  %v7727_v19 = vsel %vm4388_vm4, %v7726_v57, %v7722_v61  ;;  %v2634_v0 = vpop.xlane.xlu0 %2633 }
 0x63b   : > { %v7736_v26 = vrot.slane %v2636_v62, %v10884_v36  ;;  %v7731_v8 = vrot.slane %v2634_v0, %v10890_v42 }
 0x63d   : > { %v7732_v11 = vsel %vm4395_vm5, %v7731_v8, %v7727_v19  ;;  %2775 = vadd.xlane.f32.xlu1 %v1002_v3  ;;  %2773 = vadd.xlane.f32.xlu0 %v1001_v4  ;;  %v1012_v3 = vld [vmem:[%s10757_s11 + $0x17b8] sm:$0xff]  ;;  %v1011_v4 = vld [vmem:[%s10757_s11 + $0x17b0] sm:$0xff] }
 0x63e   : > { %v2640_v30 = vpop.xlane.xlu1 %2639  ;;  %v7737_v12 = vsel %vm4402_vm6, %v7736_v26, %v7732_v11  ;;  %v2638_v14 = vpop.xlane.xlu0 %2637 }
 0x63f   : > { %v7746_v20 = vrot.slane %v2640_v30, %v10902_v54  ;;  %v7741_v23 = vrot.slane %v2638_v14, %v10908_v58 }
 0x641   : > { %v7742_v25 = vsel %vm4409_vm7, %v7741_v23, %v7737_v12  ;;  %2779 = vadd.xlane.f32.xlu1 %v1004_v15  ;;  %2777 = vadd.xlane.f32.xlu0 %v1003_v38  ;;  %v1014_v15 = vld [vmem:[%s10757_s11 + $0x17c8] sm:$0xff]  ;;  %v1013_v38 = vld [vmem:[%s10757_s11 + $0x17c0] sm:$0xff] }
 0x642   : > { %v2644_v27 = vpop.xlane.xlu1 %2643  ;;  %v7747_v29 = vsel %vm4416_vm8, %v7746_v20, %v7742_v25  ;;  %v2642_v9 = vpop.xlane.xlu0 %2641 }
 0x643   : > { %v7756_v6 = vrot.slane %v2644_v27, %v10916_v2  ;;  %v7751_v39 = vrot.slane %v2642_v9, %v10922_v7  ;;  %v1016_v9 = vld [vmem:[%s10757_s11 + $0x17d8] sm:$0xff] }
 0x645   : > { %v7752_v40 = vsel %vm4423_vm9, %v7751_v39, %v7747_v29  ;;  %2783 = vadd.xlane.f32.xlu1 %v1006_v33  ;;  %2781 = vadd.xlane.f32.xlu0 %v1005_v35  ;;  %v1015_v33 = vld [vmem:[%s10757_s11 + $0x17d0] sm:$0xff] }
 0x646   : > { %v2648_v55 = vpop.xlane.xlu1 %2647  ;;  %v7757_v41 = vsel %vm4430_vm10, %v7756_v6, %v7752_v40  ;;  %v2646_v43 = vpop.xlane.xlu0 %2645 }
 0x647   : > { %v7766_v48 = vrot.slane %v2648_v55, %v10930_v16  ;;  %v7761_v49 = vrot.slane %v2646_v43, %v10936_v24  ;;  %v1018_v43 = vld [vmem:[%s10757_s11 + $0x17e8] sm:$0xff] }
 0x649   : > { %v7762_v63 = vsel %vm4437_vm11, %v7761_v49, %v7757_v41  ;;  %2787 = vadd.xlane.f32.xlu1 %v1008_v44  ;;  %2785 = vadd.xlane.f32.xlu0 %v1007_v60  ;;  %v1017_v44 = vld [vmem:[%s10757_s11 + $0x17e0] sm:$0xff] }
 0x64a   : > { %v2652_v50 = vpop.xlane.xlu1 %2651  ;;  %v7767_v52 = vsel %vm4444_vm12, %v7766_v48, %v7762_v63  ;;  %v2650_v53 = vpop.xlane.xlu0 %2649 }
 0x64b   : > { %v7776_v57 = vrot.slane %v2652_v50, %v10944_v34  ;;  %v7771_v59 = vrot.slane %v2650_v53, %v10949_v37  ;;  %v1020_v53 = vld [vmem:[%s10757_s11 + $0x17f8] sm:$0xff] }
 0x64d   : > { %v7772_v61 = vsel %vm4451_vm13, %v7771_v59, %v7767_v52  ;;  %2791 = vadd.xlane.f32.xlu1 %v1010_v5  ;;  %2789 = vadd.xlane.f32.xlu0 %v1009_v56  ;;  %v1019_v5 = vld [vmem:[%s10757_s11 + $0x17f0] sm:$0xff] }
 0x64e   : > { %v7777_v62 = vsel %vm4458_vm14, %v7776_v57, %v7772_v61  ;;  %v2656_v19 = vpop.xlane.xlu1 %2655  ;;  %v2654_v0 = vpop.xlane.xlu0 %2653 }
 0x64f   : > { %v13089_v26 = vsel %vm9445_vm15, %v7777_v62, %v12681_v47  ;;  %v7785_v8 = vrot.slane %v2656_v19, %v10858_v18  ;;  %v7781_v11 = vrot.slane %v2654_v0, %v10855_v17  ;;  %v1022_v0 = vld [vmem:[%s10757_s11 + $0x1808] sm:$0xff] }
 0x651   : > { %v7786_v30 = vsel %vm4360_vm0, %v7785_v8, %v7781_v11  ;;  %2795 = vadd.xlane.f32.xlu1 %v1012_v3  ;;  %2793 = vadd.xlane.f32.xlu0 %v1011_v4  ;;  %v1021_v3 = vld [vmem:[%s10757_s11 + $0x1800] sm:$0xff] }
 0x652   : > { %v2660_v12 = vpop.xlane.xlu1 %2659  ;;  %v2658_v14 = vpop.xlane.xlu0 %2657 }
 0x653   : > { %v7795_v20 = vrot.slane %v2660_v12, %v10866_v22  ;;  %v7790_v23 = vrot.slane %v2658_v14, %v10863_v21 }
 0x655   : > { %v7791_v47 = vsel %vm4367_vm1, %v7790_v23, %v7786_v30  ;;  %2799 = vadd.xlane.f32.xlu1 %v1014_v15  ;;  %2797 = vadd.xlane.f32.xlu0 %v1013_v38  ;;  %v1024_v15 = vld [vmem:[%s10757_s11 + $0x1818] sm:$0xff]  ;;  %v1023_v38 = vld [vmem:[%s10757_s11 + $0x1810] sm:$0xff] }
 0x656   : > { %v2664_v25 = vpop.xlane.xlu1 %2663  ;;  %v7796_v27 = vsel %vm4374_vm2, %v7795_v20, %v7791_v47  ;;  %v2662_v29 = vpop.xlane.xlu0 %2661 }
 0x657   : > { %v7805_v35 = vrot.slane %v2664_v25, %v10875_v31  ;;  %v7800_v6 = vrot.slane %v2662_v29, %v10878_v32 }
 0x659   : > { %v7801_v39 = vsel %vm4381_vm3, %v7800_v6, %v7796_v27  ;;  %2803 = vadd.xlane.f32.xlu1 %v1016_v9  ;;  %2801 = vadd.xlane.f32.xlu0 %v1015_v33  ;;  %v1026_v9 = vld [vmem:[%s10757_s11 + $0x1828] sm:$0xff]  ;;  %v1025_v33 = vld [vmem:[%s10757_s11 + $0x1820] sm:$0xff] }
 0x65a   : > { %v2668_v40 = vpop.xlane.xlu1 %2667  ;;  %v7806_v55 = vsel %vm4388_vm4, %v7805_v35, %v7801_v39  ;;  %v2666_v41 = vpop.xlane.xlu0 %2665 }
 0x65b   : > { %v7815_v60 = vrot.slane %v2668_v40, %v10884_v36  ;;  %v7810_v48 = vrot.slane %v2666_v41, %v10890_v42 }
 0x65d   : > { %v7811_v49 = vsel %vm4395_vm5, %v7810_v48, %v7806_v55  ;;  %2807 = vadd.xlane.f32.xlu1 %v1018_v43  ;;  %2805 = vadd.xlane.f32.xlu0 %v1017_v44  ;;  %v1028_v43 = vld [vmem:[%s10757_s11 + $0x1838] sm:$0xff]  ;;  %v1027_v44 = vld [vmem:[%s10757_s11 + $0x1830] sm:$0xff] }
 0x65e   : > { %v2672_v63 = vpop.xlane.xlu1 %2671  ;;  %v7816_v50 = vsel %vm4402_vm6, %v7815_v60, %v7811_v49  ;;  %v2670_v52 = vpop.xlane.xlu0 %2669 }
 0x65f   : > { %v7825_v56 = vrot.slane %v2672_v63, %v10902_v54  ;;  %v7820_v57 = vrot.slane %v2670_v52, %v10908_v58 }
 0x661   : > { %v7821_v59 = vsel %vm4409_vm7, %v7820_v57, %v7816_v50  ;;  %2811 = vadd.xlane.f32.xlu1 %v1020_v53  ;;  %2809 = vadd.xlane.f32.xlu0 %v1019_v5  ;;  %v1030_v53 = vld [vmem:[%s10757_s11 + $0x1848] sm:$0xff]  ;;  %v1029_v5 = vld [vmem:[%s10757_s11 + $0x1840] sm:$0xff] }
 0x662   : > { %v2676_v61 = vpop.xlane.xlu1 %2675  ;;  %v7826_v62 = vsel %vm4416_vm8, %v7825_v56, %v7821_v59  ;;  %v2674_v19 = vpop.xlane.xlu0 %2673 }
 0x663   : > { %v7835_v4 = vrot.slane %v2676_v61, %v10916_v2  ;;  %v7830_v8 = vrot.slane %v2674_v19, %v10922_v7  ;;  %v1032_v19 = vld [vmem:[%s10757_s11 + $0x1858] sm:$0xff] }
 0x665   : > { %v7831_v11 = vsel %vm4423_vm9, %v7830_v8, %v7826_v62  ;;  %2815 = vadd.xlane.f32.xlu1 %v1022_v0  ;;  %2813 = vadd.xlane.f32.xlu0 %v1021_v3  ;;  %v1031_v0 = vld [vmem:[%s10757_s11 + $0x1850] sm:$0xff] }
 0x666   : > { %v2680_v30 = vpop.xlane.xlu1 %2679  ;;  %v7836_v12 = vsel %vm4430_vm10, %v7835_v4, %v7831_v11  ;;  %v2678_v14 = vpop.xlane.xlu0 %2677 }
 0x667   : > { %v7845_v20 = vrot.slane %v2680_v30, %v10930_v16  ;;  %v7840_v23 = vrot.slane %v2678_v14, %v10936_v24  ;;  %v1034_v14 = vld [vmem:[%s10757_s11 + $0x1868] sm:$0xff] }
 0x669   : > { %v7841_v47 = vsel %vm4437_vm11, %v7840_v23, %v7836_v12  ;;  %2819 = vadd.xlane.f32.xlu1 %v1024_v15  ;;  %2817 = vadd.xlane.f32.xlu0 %v1023_v38  ;;  %v1033_v15 = vld [vmem:[%s10757_s11 + $0x1860] sm:$0xff] }
 0x66a   : > { %v2684_v25 = vpop.xlane.xlu1 %2683  ;;  %v7846_v27 = vsel %vm4444_vm12, %v7845_v20, %v7841_v47  ;;  %v2682_v29 = vpop.xlane.xlu0 %2681 }
 0x66b   : > { %v7855_v35 = vrot.slane %v2684_v25, %v10944_v34  ;;  %v7850_v6 = vrot.slane %v2682_v29, %v10949_v37  ;;  %v1036_v29 = vld [vmem:[%s10757_s11 + $0x1878] sm:$0xff] }
 0x66d   : > { %v7851_v39 = vsel %vm4451_vm13, %v7850_v6, %v7846_v27  ;;  %2823 = vadd.xlane.f32.xlu1 %v1026_v9  ;;  %2821 = vadd.xlane.f32.xlu0 %v1025_v33  ;;  %v1035_v9 = vld [vmem:[%s10757_s11 + $0x1870] sm:$0xff] }
 0x66e   : > { %v7856_v40 = vsel %vm4458_vm14, %v7855_v35, %v7851_v39  ;;  %v2688_v55 = vpop.xlane.xlu1 %2687  ;;  %v2686_v41 = vpop.xlane.xlu0 %2685 }
 0x66f   : > { %v13140_v60 = vsel %vm9445_vm15, %v7856_v40, %v12732_v1  ;;  %v7864_v48 = vrot.slane %v2688_v55, %v10858_v18  ;;  %v7860_v49 = vrot.slane %v2686_v41, %v10855_v17  ;;  %v1038_v41 = vld [vmem:[%s10757_s11 + $0x1888] sm:$0xff] }
 0x671   : > { %v7865_v63 = vsel %vm4360_vm0, %v7864_v48, %v7860_v49  ;;  %2827 = vadd.xlane.f32.xlu1 %v1028_v43  ;;  %2825 = vadd.xlane.f32.xlu0 %v1027_v44  ;;  %v1037_v43 = vld [vmem:[%s10757_s11 + $0x1880] sm:$0xff] }
 0x672   : > { %v2692_v50 = vpop.xlane.xlu1 %2691  ;;  %v2690_v52 = vpop.xlane.xlu0 %2689 }
 0x673   : > { %v7874_v56 = vrot.slane %v2692_v50, %v10866_v22  ;;  %v7869_v57 = vrot.slane %v2690_v52, %v10863_v21 }
 0x675   : > { %v7870_v1 = vsel %vm4367_vm1, %v7869_v57, %v7865_v63  ;;  %2831 = vadd.xlane.f32.xlu1 %v1030_v53  ;;  %2829 = vadd.xlane.f32.xlu0 %v1029_v5  ;;  %v1040_v53 = vld [vmem:[%s10757_s11 + $0x1898] sm:$0xff]  ;;  %v1039_v5 = vld [vmem:[%s10757_s11 + $0x1890] sm:$0xff] }
 0x676   : > { %v2696_v59 = vpop.xlane.xlu1 %2695  ;;  %v7875_v61 = vsel %vm4374_vm2, %v7874_v56, %v7870_v1  ;;  %v2694_v62 = vpop.xlane.xlu0 %2693 }
 0x677   : > { %v7884_v3 = vrot.slane %v2696_v59, %v10875_v31  ;;  %v7879_v4 = vrot.slane %v2694_v62, %v10878_v32 }
 0x679   : > { %v7880_v8 = vsel %vm4381_vm3, %v7879_v4, %v7875_v61  ;;  %2835 = vadd.xlane.f32.xlu1 %v1032_v19  ;;  %2833 = vadd.xlane.f32.xlu0 %v1031_v0  ;;  %v1042_v19 = vld [vmem:[%s10757_s11 + $0x18a8] sm:$0xff]  ;;  %v1041_v0 = vld [vmem:[%s10757_s11 + $0x18a0] sm:$0xff] }
 0x67a   : > { %v2700_v11 = vpop.xlane.xlu1 %2699  ;;  %v7885_v30 = vsel %vm4388_vm4, %v7884_v3, %v7880_v8  ;;  %v2698_v12 = vpop.xlane.xlu0 %2697 }
 0x67b   : > { %v7894_v38 = vrot.slane %v2700_v11, %v10884_v36  ;;  %v7889_v20 = vrot.slane %v2698_v12, %v10890_v42 }
 0x67d   : > { %v7890_v23 = vsel %vm4395_vm5, %v7889_v20, %v7885_v30  ;;  %2839 = vadd.xlane.f32.xlu1 %v1034_v14  ;;  %2837 = vadd.xlane.f32.xlu0 %v1033_v15  ;;  %v1044_v14 = vld [vmem:[%s10757_s11 + $0x18b8] sm:$0xff]  ;;  %v1043_v15 = vld [vmem:[%s10757_s11 + $0x18b0] sm:$0xff] }
 0x67e   : > { %v2704_v47 = vpop.xlane.xlu1 %2703  ;;  %v7895_v25 = vsel %vm4402_vm6, %v7894_v38, %v7890_v23  ;;  %v2702_v27 = vpop.xlane.xlu0 %2701 }
 0x67f   : > { %v7904_v33 = vrot.slane %v2704_v47, %v10902_v54  ;;  %v7899_v35 = vrot.slane %v2702_v27, %v10908_v58 }
 0x681   : > { %v7900_v6 = vsel %vm4409_vm7, %v7899_v35, %v7895_v25  ;;  %2843 = vadd.xlane.f32.xlu1 %v1036_v29  ;;  %2841 = vadd.xlane.f32.xlu0 %v1035_v9  ;;  %v1046_v29 = vld [vmem:[%s10757_s11 + $0x18c8] sm:$0xff]  ;;  %v1045_v9 = vld [vmem:[%s10757_s11 + $0x18c0] sm:$0xff] }
 0x682   : > { %v2708_v39 = vpop.xlane.xlu1 %2707  ;;  %v7905_v40 = vsel %vm4416_vm8, %v7904_v33, %v7900_v6  ;;  %v2706_v55 = vpop.xlane.xlu0 %2705 }
 0x683   : > { %v7914_v44 = vrot.slane %v2708_v39, %v10916_v2  ;;  %v7909_v48 = vrot.slane %v2706_v55, %v10922_v7  ;;  %v1048_v55 = vld [vmem:[%s10757_s11 + $0x18d8] sm:$0xff] }
 0x685   : > { %v7910_v49 = vsel %vm4423_vm9, %v7909_v48, %v7905_v40  ;;  %2847 = vadd.xlane.f32.xlu1 %v1038_v41  ;;  %2845 = vadd.xlane.f32.xlu0 %v1037_v43  ;;  %v1047_v41 = vld [vmem:[%s10757_s11 + $0x18d0] sm:$0xff] }
 0x686   : > { %v2712_v63 = vpop.xlane.xlu1 %2711  ;;  %v7915_v50 = vsel %vm4430_vm10, %v7914_v44, %v7910_v49  ;;  %v2710_v52 = vpop.xlane.xlu0 %2709 }
 0x687   : > { %v7924_v56 = vrot.slane %v2712_v63, %v10930_v16  ;;  %v7919_v57 = vrot.slane %v2710_v52, %v10936_v24  ;;  %v1050_v52 = vld [vmem:[%s10757_s11 + $0x18e8] sm:$0xff] }
 0x689   : > { %v7920_v1 = vsel %vm4437_vm11, %v7919_v57, %v7915_v50  ;;  %2851 = vadd.xlane.f32.xlu1 %v1040_v53  ;;  %2849 = vadd.xlane.f32.xlu0 %v1039_v5  ;;  %v1049_v53 = vld [vmem:[%s10757_s11 + $0x18e0] sm:$0xff] }
 0x68a   : > { %v2716_v59 = vpop.xlane.xlu1 %2715  ;;  %v7925_v61 = vsel %vm4444_vm12, %v7924_v56, %v7920_v1  ;;  %v2714_v62 = vpop.xlane.xlu0 %2713 }
 0x68b   : > { %v7934_v3 = vrot.slane %v2716_v59, %v10944_v34  ;;  %v7929_v4 = vrot.slane %v2714_v62, %v10949_v37  ;;  %v1052_v62 = vld [vmem:[%s10757_s11 + $0x18f8] sm:$0xff] }
 0x68d   : > { %v7930_v8 = vsel %vm4451_vm13, %v7929_v4, %v7925_v61  ;;  %2855 = vadd.xlane.f32.xlu1 %v1042_v19  ;;  %2853 = vadd.xlane.f32.xlu0 %v1041_v0  ;;  %v1051_v19 = vld [vmem:[%s10757_s11 + $0x18f0] sm:$0xff] }
 0x68e   : > { %v7935_v11 = vsel %vm4458_vm14, %v7934_v3, %v7930_v8  ;;  %v2720_v30 = vpop.xlane.xlu1 %2719  ;;  %v2718_v12 = vpop.xlane.xlu0 %2717 }
 0x68f   : > { %v13191_v38 = vsel %vm9445_vm15, %v7935_v11, %v12783_v28  ;;  %v7943_v20 = vrot.slane %v2720_v30, %v10858_v18  ;;  %v7939_v23 = vrot.slane %v2718_v12, %v10855_v17  ;;  %v1054_v12 = vld [vmem:[%s10757_s11 + $0x1908] sm:$0xff] }
 0x691   : > { %v7944_v47 = vsel %vm4360_vm0, %v7943_v20, %v7939_v23  ;;  %2859 = vadd.xlane.f32.xlu1 %v1044_v14  ;;  %2857 = vadd.xlane.f32.xlu0 %v1043_v15  ;;  %v1053_v14 = vld [vmem:[%s10757_s11 + $0x1900] sm:$0xff] }
 0x692   : > { %v2724_v25 = vpop.xlane.xlu1 %2723  ;;  %v2722_v27 = vpop.xlane.xlu0 %2721 }
 0x693   : > { %v7953_v33 = vrot.slane %v2724_v25, %v10866_v22  ;;  %v7948_v35 = vrot.slane %v2722_v27, %v10863_v21 }
 0x695   : > { %v7949_v28 = vsel %vm4367_vm1, %v7948_v35, %v7944_v47  ;;  %2863 = vadd.xlane.f32.xlu1 %v1046_v29  ;;  %2861 = vadd.xlane.f32.xlu0 %v1045_v9  ;;  %v1056_v29 = vld [vmem:[%s10757_s11 + $0x1918] sm:$0xff]  ;;  %v1055_v9 = vld [vmem:[%s10757_s11 + $0x1910] sm:$0xff] }
 0x696   : > { %v2728_v6 = vpop.xlane.xlu1 %2727  ;;  %v7954_v39 = vsel %vm4374_vm2, %v7953_v33, %v7949_v28  ;;  %v2726_v40 = vpop.xlane.xlu0 %2725 }
 0x697   : > { %v7963_v43 = vrot.slane %v2728_v6, %v10875_v31  ;;  %v7958_v44 = vrot.slane %v2726_v40, %v10878_v32 }
 0x699   : > { %v7959_v48 = vsel %vm4381_vm3, %v7958_v44, %v7954_v39  ;;  %2867 = vadd.xlane.f32.xlu1 %v1048_v55  ;;  %2865 = vadd.xlane.f32.xlu0 %v1047_v41  ;;  %v1058_v55 = vld [vmem:[%s10757_s11 + $0x1928] sm:$0xff]  ;;  %v1057_v41 = vld [vmem:[%s10757_s11 + $0x1920] sm:$0xff] }
 0x69a   : > { %v2732_v49 = vpop.xlane.xlu1 %2731  ;;  %v7964_v63 = vsel %vm4388_vm4, %v7963_v43, %v7959_v48  ;;  %v2730_v50 = vpop.xlane.xlu0 %2729 }
 0x69b   : > { %v7973_v5 = vrot.slane %v2732_v49, %v10884_v36  ;;  %v7968_v56 = vrot.slane %v2730_v50, %v10890_v42 }
 0x69d   : > { %v7969_v57 = vsel %vm4395_vm5, %v7968_v56, %v7964_v63  ;;  %2871 = vadd.xlane.f32.xlu1 %v1050_v52  ;;  %2869 = vadd.xlane.f32.xlu0 %v1049_v53  ;;  %v1060_v52 = vld [vmem:[%s10757_s11 + $0x1938] sm:$0xff]  ;;  %v1059_v53 = vld [vmem:[%s10757_s11 + $0x1930] sm:$0xff] }
 0x69e   : > { %v2736_v1 = vpop.xlane.xlu1 %2735  ;;  %v7974_v59 = vsel %vm4402_vm6, %v7973_v5, %v7969_v57  ;;  %v2734_v61 = vpop.xlane.xlu0 %2733 }
 0x69f   : > { %v7983_v0 = vrot.slane %v2736_v1, %v10902_v54  ;;  %v7978_v3 = vrot.slane %v2734_v61, %v10908_v58 }
 0x6a1   : > { %v7979_v4 = vsel %vm4409_vm7, %v7978_v3, %v7974_v59  ;;  %2875 = vadd.xlane.f32.xlu1 %v1052_v62  ;;  %2873 = vadd.xlane.f32.xlu0 %v1051_v19  ;;  %v1062_v62 = vld [vmem:[%s10757_s11 + $0x1948] sm:$0xff]  ;;  %v1061_v19 = vld [vmem:[%s10757_s11 + $0x1940] sm:$0xff] }
 0x6a2   : > { %v2740_v8 = vpop.xlane.xlu1 %2739  ;;  %v7984_v11 = vsel %vm4416_vm8, %v7983_v0, %v7979_v4  ;;  %v2738_v30 = vpop.xlane.xlu0 %2737 }
 0x6a3   : > { %v7993_v15 = vrot.slane %v2740_v8, %v10916_v2  ;;  %v7988_v20 = vrot.slane %v2738_v30, %v10922_v7  ;;  %v1064_v30 = vld [vmem:[%s10757_s11 + $0x1958] sm:$0xff] }
 0x6a5   : > { %v7989_v23 = vsel %vm4423_vm9, %v7988_v20, %v7984_v11  ;;  %2879 = vadd.xlane.f32.xlu1 %v1054_v12  ;;  %2877 = vadd.xlane.f32.xlu0 %v1053_v14  ;;  %v1063_v12 = vld [vmem:[%s10757_s11 + $0x1950] sm:$0xff] }
 0x6a6   : > { %v2744_v47 = vpop.xlane.xlu1 %2743  ;;  %v7994_v25 = vsel %vm4430_vm10, %v7993_v15, %v7989_v23  ;;  %v2742_v27 = vpop.xlane.xlu0 %2741 }
 0x6a7   : > { %v8003_v33 = vrot.slane %v2744_v47, %v10930_v16  ;;  %v7998_v35 = vrot.slane %v2742_v27, %v10936_v24  ;;  %v1066_v27 = vld [vmem:[%s10757_s11 + $0x1968] sm:$0xff] }
 0x6a9   : > { %v7999_v28 = vsel %vm4437_vm11, %v7998_v35, %v7994_v25  ;;  %2883 = vadd.xlane.f32.xlu1 %v1056_v29  ;;  %2881 = vadd.xlane.f32.xlu0 %v1055_v9  ;;  %v1065_v29 = vld [vmem:[%s10757_s11 + $0x1960] sm:$0xff] }
 0x6aa   : > { %v2748_v6 = vpop.xlane.xlu1 %2747  ;;  %v8004_v39 = vsel %vm4444_vm12, %v8003_v33, %v7999_v28  ;;  %v2746_v40 = vpop.xlane.xlu0 %2745 }
 0x6ab   : > { %v8013_v43 = vrot.slane %v2748_v6, %v10944_v34  ;;  %v8008_v44 = vrot.slane %v2746_v40, %v10949_v37  ;;  %v1068_v40 = vld [vmem:[%s10757_s11 + $0x1978] sm:$0xff] }
 0x6ad   : > { %v8009_v48 = vsel %vm4451_vm13, %v8008_v44, %v8004_v39  ;;  %2887 = vadd.xlane.f32.xlu1 %v1058_v55  ;;  %2885 = vadd.xlane.f32.xlu0 %v1057_v41  ;;  %v1067_v55 = vld [vmem:[%s10757_s11 + $0x1970] sm:$0xff] }
 0x6ae   : > { %v8014_v49 = vsel %vm4458_vm14, %v8013_v43, %v8009_v48  ;;  %v2752_v63 = vpop.xlane.xlu1 %2751  ;;  %v2750_v50 = vpop.xlane.xlu0 %2749 }
 0x6af   : > { %v13242_v5 = vsel %vm9445_vm15, %v8014_v49, %v12834_v51  ;;  %v8022_v56 = vrot.slane %v2752_v63, %v10858_v18  ;;  %v8018_v57 = vrot.slane %v2750_v50, %v10855_v17  ;;  %v1070_v50 = vld [vmem:[%s10757_s11 + $0x1988] sm:$0xff] }
 0x6b1   : > { %v8023_v1 = vsel %vm4360_vm0, %v8022_v56, %v8018_v57  ;;  %2891 = vadd.xlane.f32.xlu1 %v1060_v52  ;;  %2889 = vadd.xlane.f32.xlu0 %v1059_v53  ;;  %v1069_v52 = vld [vmem:[%s10757_s11 + $0x1980] sm:$0xff] }
 0x6b2   : > { %v2756_v59 = vpop.xlane.xlu1 %2755  ;;  %v2754_v61 = vpop.xlane.xlu0 %2753 }
 0x6b3   : > { %v8032_v0 = vrot.slane %v2756_v59, %v10866_v22  ;;  %v8027_v3 = vrot.slane %v2754_v61, %v10863_v21 }
 0x6b5   : > { %v8028_v51 = vsel %vm4367_vm1, %v8027_v3, %v8023_v1  ;;  %2895 = vadd.xlane.f32.xlu1 %v1062_v62  ;;  %2893 = vadd.xlane.f32.xlu0 %v1061_v19  ;;  %v1072_v62 = vld [vmem:[%s10757_s11 + $0x1998] sm:$0xff]  ;;  %v1071_v19 = vld [vmem:[%s10757_s11 + $0x1990] sm:$0xff] }
 0x6b6   : > { %v2760_v4 = vpop.xlane.xlu1 %2759  ;;  %v8033_v8 = vsel %vm4374_vm2, %v8032_v0, %v8028_v51  ;;  %v2758_v11 = vpop.xlane.xlu0 %2757 }
 0x6b7   : > { %v8042_v14 = vrot.slane %v2760_v4, %v10875_v31  ;;  %v8037_v15 = vrot.slane %v2758_v11, %v10878_v32 }
 0x6b9   : > { %v8038_v20 = vsel %vm4381_vm3, %v8037_v15, %v8033_v8  ;;  %2899 = vadd.xlane.f32.xlu1 %v1064_v30  ;;  %2897 = vadd.xlane.f32.xlu0 %v1063_v12  ;;  %v1074_v30 = vld [vmem:[%s10757_s11 + $0x19a8] sm:$0xff]  ;;  %v1073_v12 = vld [vmem:[%s10757_s11 + $0x19a0] sm:$0xff] }
 0x6ba   : > { %v2764_v23 = vpop.xlane.xlu1 %2763  ;;  %v8043_v47 = vsel %vm4388_vm4, %v8042_v14, %v8038_v20  ;;  %v2762_v25 = vpop.xlane.xlu0 %2761 }
 0x6bb   : > { %v8052_v9 = vrot.slane %v2764_v23, %v10884_v36  ;;  %v8047_v33 = vrot.slane %v2762_v25, %v10890_v42 }
 0x6bd   : > { %v8048_v35 = vsel %vm4395_vm5, %v8047_v33, %v8043_v47  ;;  %2903 = vadd.xlane.f32.xlu1 %v1066_v27  ;;  %2901 = vadd.xlane.f32.xlu0 %v1065_v29  ;;  %v1076_v27 = vld [vmem:[%s10757_s11 + $0x19b8] sm:$0xff]  ;;  %v1075_v29 = vld [vmem:[%s10757_s11 + $0x19b0] sm:$0xff] }
 0x6be   : > { %v2768_v28 = vpop.xlane.xlu1 %2767  ;;  %v8053_v6 = vsel %vm4402_vm6, %v8052_v9, %v8048_v35  ;;  %v2766_v39 = vpop.xlane.xlu0 %2765 }
 0x6bf   : > { %v8062_v41 = vrot.slane %v2768_v28, %v10902_v54  ;;  %v8057_v43 = vrot.slane %v2766_v39, %v10908_v58 }
 0x6c1   : > { %v8058_v44 = vsel %vm4409_vm7, %v8057_v43, %v8053_v6  ;;  %2907 = vadd.xlane.f32.xlu1 %v1068_v40  ;;  %2905 = vadd.xlane.f32.xlu0 %v1067_v55  ;;  %v1078_v40 = vld [vmem:[%s10757_s11 + $0x19c8] sm:$0xff]  ;;  %v1077_v55 = vld [vmem:[%s10757_s11 + $0x19c0] sm:$0xff] }
 0x6c2   : > { %v2772_v48 = vpop.xlane.xlu1 %2771  ;;  %v8063_v49 = vsel %vm4416_vm8, %v8062_v41, %v8058_v44  ;;  %v2770_v63 = vpop.xlane.xlu0 %2769 }
 0x6c3   : > { %v8072_v53 = vrot.slane %v2772_v48, %v10916_v2  ;;  %v8067_v56 = vrot.slane %v2770_v63, %v10922_v7  ;;  %v1080_v63 = vld [vmem:[%s10757_s11 + $0x19d8] sm:$0xff] }
 0x6c5   : > { %v8068_v57 = vsel %vm4423_vm9, %v8067_v56, %v8063_v49  ;;  %2911 = vadd.xlane.f32.xlu1 %v1070_v50  ;;  %2909 = vadd.xlane.f32.xlu0 %v1069_v52  ;;  %v1079_v50 = vld [vmem:[%s10757_s11 + $0x19d0] sm:$0xff] }
 0x6c6   : > { %v2776_v1 = vpop.xlane.xlu1 %2775  ;;  %v8073_v59 = vsel %vm4430_vm10, %v8072_v53, %v8068_v57  ;;  %v2774_v61 = vpop.xlane.xlu0 %2773 }
 0x6c7   : > { %v8082_v0 = vrot.slane %v2776_v1, %v10930_v16  ;;  %v8077_v3 = vrot.slane %v2774_v61, %v10936_v24  ;;  %v1082_v61 = vld [vmem:[%s10757_s11 + $0x19e8] sm:$0xff] }
 0x6c9   : > { %v8078_v51 = vsel %vm4437_vm11, %v8077_v3, %v8073_v59  ;;  %2915 = vadd.xlane.f32.xlu1 %v1072_v62  ;;  %2913 = vadd.xlane.f32.xlu0 %v1071_v19  ;;  %v1081_v62 = vld [vmem:[%s10757_s11 + $0x19e0] sm:$0xff] }
 0x6ca   : > { %v2780_v4 = vpop.xlane.xlu1 %2779  ;;  %v8083_v8 = vsel %vm4444_vm12, %v8082_v0, %v8078_v51  ;;  %v2778_v11 = vpop.xlane.xlu0 %2777 }
 0x6cb   : > { %v8092_v14 = vrot.slane %v2780_v4, %v10944_v34  ;;  %v8087_v15 = vrot.slane %v2778_v11, %v10949_v37  ;;  %v1084_v11 = vld [vmem:[%s10757_s11 + $0x19f8] sm:$0xff] }
 0x6cd   : > { %v8088_v20 = vsel %vm4451_vm13, %v8087_v15, %v8083_v8  ;;  %2919 = vadd.xlane.f32.xlu1 %v1074_v30  ;;  %2917 = vadd.xlane.f32.xlu0 %v1073_v12  ;;  %v1083_v30 = vld [vmem:[%s10757_s11 + $0x19f0] sm:$0xff] }
 0x6ce   : > { %v8093_v23 = vsel %vm4458_vm14, %v8092_v14, %v8088_v20  ;;  %v2784_v47 = vpop.xlane.xlu1 %2783  ;;  %v2782_v25 = vpop.xlane.xlu0 %2781 }
 0x6cf   : > { %v13293_v9 = vsel %vm9445_vm15, %v8093_v23, %v12885_v13  ;;  %v8101_v33 = vrot.slane %v2784_v47, %v10858_v18  ;;  %v8097_v35 = vrot.slane %v2782_v25, %v10855_v17  ;;  %v1086_v25 = vld [vmem:[%s10757_s11 + $0x1a08] sm:$0xff] }
 0x6d1   : > { %v8102_v28 = vsel %vm4360_vm0, %v8101_v33, %v8097_v35  ;;  %2923 = vadd.xlane.f32.xlu1 %v1076_v27  ;;  %2921 = vadd.xlane.f32.xlu0 %v1075_v29  ;;  %v1085_v27 = vld [vmem:[%s10757_s11 + $0x1a00] sm:$0xff] }
 0x6d2   : > { %v2788_v6 = vpop.xlane.xlu1 %2787  ;;  %v2786_v39 = vpop.xlane.xlu0 %2785 }
 0x6d3   : > { %v8111_v41 = vrot.slane %v2788_v6, %v10866_v22  ;;  %v8106_v43 = vrot.slane %v2786_v39, %v10863_v21 }
 0x6d5   : > { %v8107_v13 = vsel %vm4367_vm1, %v8106_v43, %v8102_v28  ;;  %2927 = vadd.xlane.f32.xlu1 %v1078_v40  ;;  %2925 = vadd.xlane.f32.xlu0 %v1077_v55  ;;  %v1088_v40 = vld [vmem:[%s10757_s11 + $0x1a18] sm:$0xff]  ;;  %v1087_v55 = vld [vmem:[%s10757_s11 + $0x1a10] sm:$0xff] }
 0x6d6   : > { %v2792_v44 = vpop.xlane.xlu1 %2791  ;;  %v8112_v48 = vsel %vm4374_vm2, %v8111_v41, %v8107_v13  ;;  %v2790_v49 = vpop.xlane.xlu0 %2789 }
 0x6d7   : > { %v8121_v52 = vrot.slane %v2792_v44, %v10875_v31  ;;  %v8116_v53 = vrot.slane %v2790_v49, %v10878_v32 }
 0x6d9   : > { %v8117_v56 = vsel %vm4381_vm3, %v8116_v53, %v8112_v48  ;;  %2931 = vadd.xlane.f32.xlu1 %v1080_v63  ;;  %2929 = vadd.xlane.f32.xlu0 %v1079_v50  ;;  %v1090_v63 = vld [vmem:[%s10757_s11 + $0x1a28] sm:$0xff]  ;;  %v1089_v50 = vld [vmem:[%s10757_s11 + $0x1a20] sm:$0xff] }
 0x6da   : > { %v2796_v57 = vpop.xlane.xlu1 %2795  ;;  %v8122_v1 = vsel %vm4388_vm4, %v8121_v52, %v8117_v56  ;;  %v2794_v59 = vpop.xlane.xlu0 %2793 }
 0x6db   : > { %v8131_v19 = vrot.slane %v2796_v57, %v10884_v36  ;;  %v8126_v0 = vrot.slane %v2794_v59, %v10890_v42 }
 0x6dd   : > { %v8127_v3 = vsel %vm4395_vm5, %v8126_v0, %v8122_v1  ;;  %2935 = vadd.xlane.f32.xlu1 %v1082_v61  ;;  %2933 = vadd.xlane.f32.xlu0 %v1081_v62  ;;  %v1092_v61 = vld [vmem:[%s10757_s11 + $0x1a38] sm:$0xff]  ;;  %v1091_v62 = vld [vmem:[%s10757_s11 + $0x1a30] sm:$0xff] }
 0x6de   : > { %v2800_v51 = vpop.xlane.xlu1 %2799  ;;  %v8132_v4 = vsel %vm4402_vm6, %v8131_v19, %v8127_v3  ;;  %v2798_v8 = vpop.xlane.xlu0 %2797 }
 0x6df   : > { %v8141_v12 = vrot.slane %v2800_v51, %v10902_v54  ;;  %v8136_v14 = vrot.slane %v2798_v8, %v10908_v58 }
 0x6e1   : > { %v8137_v15 = vsel %vm4409_vm7, %v8136_v14, %v8132_v4  ;;  %2939 = vadd.xlane.f32.xlu1 %v1084_v11  ;;  %2937 = vadd.xlane.f32.xlu0 %v1083_v30  ;;  %v1094_v11 = vld [vmem:[%s10757_s11 + $0x1a48] sm:$0xff]  ;;  %v1093_v30 = vld [vmem:[%s10757_s11 + $0x1a40] sm:$0xff] }
 0x6e2   : > { %v2804_v20 = vpop.xlane.xlu1 %2803  ;;  %v8142_v23 = vsel %vm4416_vm8, %v8141_v12, %v8137_v15  ;;  %v2802_v47 = vpop.xlane.xlu0 %2801 }
 0x6e3   : > { %v8151_v29 = vrot.slane %v2804_v20, %v10916_v2  ;;  %v8146_v33 = vrot.slane %v2802_v47, %v10922_v7  ;;  %v1096_v47 = vld [vmem:[%s10757_s11 + $0x1a58] sm:$0xff] }
 0x6e5   : > { %v8147_v35 = vsel %vm4423_vm9, %v8146_v33, %v8142_v23  ;;  %2943 = vadd.xlane.f32.xlu1 %v1086_v25  ;;  %2941 = vadd.xlane.f32.xlu0 %v1085_v27  ;;  %v1095_v25 = vld [vmem:[%s10757_s11 + $0x1a50] sm:$0xff] }
 0x6e6   : > { %v2808_v28 = vpop.xlane.xlu1 %2807  ;;  %v8152_v6 = vsel %vm4430_vm10, %v8151_v29, %v8147_v35  ;;  %v2806_v39 = vpop.xlane.xlu0 %2805 }
 0x6e7   : > { %v8161_v41 = vrot.slane %v2808_v28, %v10930_v16  ;;  %v8156_v43 = vrot.slane %v2806_v39, %v10936_v24  ;;  %v1098_v39 = vld [vmem:[%s10757_s11 + $0x1a68] sm:$0xff] }
 0x6e9   : > { %v8157_v13 = vsel %vm4437_vm11, %v8156_v43, %v8152_v6  ;;  %2947 = vadd.xlane.f32.xlu1 %v1088_v40  ;;  %2945 = vadd.xlane.f32.xlu0 %v1087_v55  ;;  %v1097_v40 = vld [vmem:[%s10757_s11 + $0x1a60] sm:$0xff] }
 0x6ea   : > { %v2812_v44 = vpop.xlane.xlu1 %2811  ;;  %v8162_v48 = vsel %vm4444_vm12, %v8161_v41, %v8157_v13  ;;  %v2810_v49 = vpop.xlane.xlu0 %2809 }
 0x6eb   : > { %v8171_v52 = vrot.slane %v2812_v44, %v10944_v34  ;;  %v8166_v53 = vrot.slane %v2810_v49, %v10949_v37  ;;  %v1100_v49 = vld [vmem:[%s10757_s11 + $0x1a78] sm:$0xff] }
 0x6ed   : > { %v8167_v56 = vsel %vm4451_vm13, %v8166_v53, %v8162_v48  ;;  %2951 = vadd.xlane.f32.xlu1 %v1090_v63  ;;  %2949 = vadd.xlane.f32.xlu0 %v1089_v50  ;;  %v1099_v63 = vld [vmem:[%s10757_s11 + $0x1a70] sm:$0xff] }
 0x6ee   : > { %v8172_v57 = vsel %vm4458_vm14, %v8171_v52, %v8167_v56  ;;  %v2816_v1 = vpop.xlane.xlu1 %2815  ;;  %v2814_v59 = vpop.xlane.xlu0 %2813 }
 0x6ef   : > { %v13344_v19 = vsel %vm9445_vm15, %v8172_v57, %v12936_v45  ;;  %v8180_v0 = vrot.slane %v2816_v1, %v10858_v18  ;;  %v8176_v3 = vrot.slane %v2814_v59, %v10855_v17  ;;  %v1102_v59 = vld [vmem:[%s10757_s11 + $0x1a88] sm:$0xff]  ;;  %vm9447_vm15 = vcmask 1046534  }
 0x6f1   : > { %v8181_v51 = vsel %vm4360_vm0, %v8180_v0, %v8176_v3  ;;  %2955 = vadd.xlane.f32.xlu1 %v1092_v61  ;;  %2953 = vadd.xlane.f32.xlu0 %v1091_v62  ;;  %v1101_v61 = vld [vmem:[%s10757_s11 + $0x1a80] sm:$0xff] }
 0x6f2   : > { %v2820_v4 = vpop.xlane.xlu1 %2819  ;;  %v2818_v8 = vpop.xlane.xlu0 %2817 }
 0x6f3   : > { %v8190_v12 = vrot.slane %v2820_v4, %v10866_v22  ;;  %v8185_v14 = vrot.slane %v2818_v8, %v10863_v21 }
 0x6f5   : > { %v8186_v45 = vsel %vm4367_vm1, %v8185_v14, %v8181_v51  ;;  %2959 = vadd.xlane.f32.xlu1 %v1094_v11  ;;  %2957 = vadd.xlane.f32.xlu0 %v1093_v30  ;;  %v1104_v11 = vld [vmem:[%s10757_s11 + $0x1a98] sm:$0xff]  ;;  %v1103_v30 = vld [vmem:[%s10757_s11 + $0x1a90] sm:$0xff] }
 0x6f6   : > { %v2824_v15 = vpop.xlane.xlu1 %2823  ;;  %v8191_v20 = vsel %vm4374_vm2, %v8190_v12, %v8186_v45  ;;  %v2822_v23 = vpop.xlane.xlu0 %2821 }
 0x6f7   : > { %v8200_v27 = vrot.slane %v2824_v15, %v10875_v31  ;;  %v8195_v29 = vrot.slane %v2822_v23, %v10878_v32 }
 0x6f9   : > { %v8196_v33 = vsel %vm4381_vm3, %v8195_v29, %v8191_v20  ;;  %2963 = vadd.xlane.f32.xlu1 %v1096_v47  ;;  %2961 = vadd.xlane.f32.xlu0 %v1095_v25  ;;  %v1106_v47 = vld [vmem:[%s10757_s11 + $0x1aa8] sm:$0xff]  ;;  %v1105_v25 = vld [vmem:[%s10757_s11 + $0x1aa0] sm:$0xff] }
 0x6fa   : > { %v2828_v35 = vpop.xlane.xlu1 %2827  ;;  %v8201_v28 = vsel %vm4388_vm4, %v8200_v27, %v8196_v33  ;;  %v2826_v6 = vpop.xlane.xlu0 %2825 }
 0x6fb   : > { %v8210_v55 = vrot.slane %v2828_v35, %v10884_v36  ;;  %v8205_v41 = vrot.slane %v2826_v6, %v10890_v42 }
 0x6fd   : > { %v8206_v43 = vsel %vm4395_vm5, %v8205_v41, %v8201_v28  ;;  %2967 = vadd.xlane.f32.xlu1 %v1098_v39  ;;  %2965 = vadd.xlane.f32.xlu0 %v1097_v40  ;;  %v1108_v39 = vld [vmem:[%s10757_s11 + $0x1ab8] sm:$0xff]  ;;  %v1107_v40 = vld [vmem:[%s10757_s11 + $0x1ab0] sm:$0xff] }
 0x6fe   : > { %v2832_v13 = vpop.xlane.xlu1 %2831  ;;  %v8211_v44 = vsel %vm4402_vm6, %v8210_v55, %v8206_v43  ;;  %v2830_v48 = vpop.xlane.xlu0 %2829 }
 0x6ff   : > { %v8220_v50 = vrot.slane %v2832_v13, %v10902_v54  ;;  %v8215_v52 = vrot.slane %v2830_v48, %v10908_v58 }
 0x701   : > { %v8216_v53 = vsel %vm4409_vm7, %v8215_v52, %v8211_v44  ;;  %2971 = vadd.xlane.f32.xlu1 %v1100_v49  ;;  %2969 = vadd.xlane.f32.xlu0 %v1099_v63  ;;  %v1110_v49 = vld [vmem:[%s10757_s11 + $0x1ac8] sm:$0xff]  ;;  %v1109_v63 = vld [vmem:[%s10757_s11 + $0x1ac0] sm:$0xff] }
 0x702   : > { %v2836_v56 = vpop.xlane.xlu1 %2835  ;;  %v8221_v57 = vsel %vm4416_vm8, %v8220_v50, %v8216_v53  ;;  %v2834_v1 = vpop.xlane.xlu0 %2833 }
 0x703   : > { %v8230_v62 = vrot.slane %v2836_v56, %v10916_v2  ;;  %v8225_v0 = vrot.slane %v2834_v1, %v10922_v7  ;;  %v1112_v1 = vld [vmem:[%s10757_s11 + $0x1ad8] sm:$0xff] }
 0x705   : > { %v8226_v3 = vsel %vm4423_vm9, %v8225_v0, %v8221_v57  ;;  %2975 = vadd.xlane.f32.xlu1 %v1102_v59  ;;  %2973 = vadd.xlane.f32.xlu0 %v1101_v61  ;;  %v1111_v59 = vld [vmem:[%s10757_s11 + $0x1ad0] sm:$0xff] }
 0x706   : > { %v2840_v51 = vpop.xlane.xlu1 %2839  ;;  %v8231_v4 = vsel %vm4430_vm10, %v8230_v62, %v8226_v3  ;;  %v2838_v8 = vpop.xlane.xlu0 %2837 }
 0x707   : > { %v8240_v12 = vrot.slane %v2840_v51, %v10930_v16  ;;  %v8235_v14 = vrot.slane %v2838_v8, %v10936_v24  ;;  %v1114_v8 = vld [vmem:[%s10757_s11 + $0x1ae8] sm:$0xff] }
 0x709   : > { %v8236_v45 = vsel %vm4437_vm11, %v8235_v14, %v8231_v4  ;;  %2979 = vadd.xlane.f32.xlu1 %v1104_v11  ;;  %2977 = vadd.xlane.f32.xlu0 %v1103_v30  ;;  %v1113_v11 = vld [vmem:[%s10757_s11 + $0x1ae0] sm:$0xff] }
 0x70a   : > { %v2844_v15 = vpop.xlane.xlu1 %2843  ;;  %v8241_v20 = vsel %vm4444_vm12, %v8240_v12, %v8236_v45  ;;  %v2842_v23 = vpop.xlane.xlu0 %2841 }
 0x70b   : > { %v8250_v27 = vrot.slane %v2844_v15, %v10944_v34  ;;  %v8245_v29 = vrot.slane %v2842_v23, %v10949_v37  ;;  %v1116_v23 = vld [vmem:[%s10757_s11 + $0x1af8] sm:$0xff] }
 0x70d   : > { %v8246_v33 = vsel %vm4451_vm13, %v8245_v29, %v8241_v20  ;;  %2983 = vadd.xlane.f32.xlu1 %v1106_v47  ;;  %2981 = vadd.xlane.f32.xlu0 %v1105_v25  ;;  %v1115_v47 = vld [vmem:[%s10757_s11 + $0x1af0] sm:$0xff] }
 0x70e   : > { %v8251_v35 = vsel %vm4458_vm14, %v8250_v27, %v8246_v33  ;;  %v2848_v28 = vpop.xlane.xlu1 %2847  ;;  %v2846_v6 = vpop.xlane.xlu0 %2845 }
 0x70f   : > { %v13395_v55 = vsel %vm9447_vm15, %v8251_v35, %v12987_v10  ;;  %v8259_v41 = vrot.slane %v2848_v28, %v10858_v18  ;;  %v8255_v43 = vrot.slane %v2846_v6, %v10855_v17  ;;  %v1118_v6 = vld [vmem:[%s10757_s11 + $0x1b08] sm:$0xff] }
 0x711   : > { %v8260_v13 = vsel %vm4360_vm0, %v8259_v41, %v8255_v43  ;;  %2987 = vadd.xlane.f32.xlu1 %v1108_v39  ;;  %2985 = vadd.xlane.f32.xlu0 %v1107_v40  ;;  %v1117_v39 = vld [vmem:[%s10757_s11 + $0x1b00] sm:$0xff] }
 0x712   : > { %v2852_v44 = vpop.xlane.xlu1 %2851  ;;  %v2850_v48 = vpop.xlane.xlu0 %2849 }
 0x713   : > { %v8269_v50 = vrot.slane %v2852_v44, %v10866_v22  ;;  %v8264_v52 = vrot.slane %v2850_v48, %v10863_v21 }
 0x715   : > { %v8265_v10 = vsel %vm4367_vm1, %v8264_v52, %v8260_v13  ;;  %2991 = vadd.xlane.f32.xlu1 %v1110_v49  ;;  %2989 = vadd.xlane.f32.xlu0 %v1109_v63  ;;  %v1120_v49 = vld [vmem:[%s10757_s11 + $0x1b18] sm:$0xff]  ;;  %v1119_v63 = vld [vmem:[%s10757_s11 + $0x1b10] sm:$0xff] }
 0x716   : > { %v2856_v53 = vpop.xlane.xlu1 %2855  ;;  %v8270_v56 = vsel %vm4374_vm2, %v8269_v50, %v8265_v10  ;;  %v2854_v57 = vpop.xlane.xlu0 %2853 }
 0x717   : > { %v8279_v61 = vrot.slane %v2856_v53, %v10875_v31  ;;  %v8274_v62 = vrot.slane %v2854_v57, %v10878_v32 }
 0x719   : > { %v8275_v0 = vsel %vm4381_vm3, %v8274_v62, %v8270_v56  ;;  %2995 = vadd.xlane.f32.xlu1 %v1112_v1  ;;  %2993 = vadd.xlane.f32.xlu0 %v1111_v59  ;;  %v1122_v1 = vld [vmem:[%s10757_s11 + $0x1b28] sm:$0xff]  ;;  %v1121_v59 = vld [vmem:[%s10757_s11 + $0x1b20] sm:$0xff] }
 0x71a   : > { %v2860_v3 = vpop.xlane.xlu1 %2859  ;;  %v8280_v51 = vsel %vm4388_vm4, %v8279_v61, %v8275_v0  ;;  %v2858_v4 = vpop.xlane.xlu0 %2857 }
 0x71b   : > { %v8289_v30 = vrot.slane %v2860_v3, %v10884_v36  ;;  %v8284_v12 = vrot.slane %v2858_v4, %v10890_v42 }
 0x71d   : > { %v8285_v14 = vsel %vm4395_vm5, %v8284_v12, %v8280_v51  ;;  %2999 = vadd.xlane.f32.xlu1 %v1114_v8  ;;  %2997 = vadd.xlane.f32.xlu0 %v1113_v11  ;;  %v1124_v8 = vld [vmem:[%s10757_s11 + $0x1b38] sm:$0xff]  ;;  %v1123_v11 = vld [vmem:[%s10757_s11 + $0x1b30] sm:$0xff] }
 0x71e   : > { %v2864_v45 = vpop.xlane.xlu1 %2863  ;;  %v8290_v15 = vsel %vm4402_vm6, %v8289_v30, %v8285_v14  ;;  %v2862_v20 = vpop.xlane.xlu0 %2861 }
 0x71f   : > { %v8299_v25 = vrot.slane %v2864_v45, %v10902_v54  ;;  %v8294_v27 = vrot.slane %v2862_v20, %v10908_v58 }
 0x721   : > { %v8295_v29 = vsel %vm4409_vm7, %v8294_v27, %v8290_v15  ;;  %3003 = vadd.xlane.f32.xlu1 %v1116_v23  ;;  %3001 = vadd.xlane.f32.xlu0 %v1115_v47  ;;  %v1126_v23 = vld [vmem:[%s10757_s11 + $0x1b48] sm:$0xff]  ;;  %v1125_v47 = vld [vmem:[%s10757_s11 + $0x1b40] sm:$0xff] }
 0x722   : > { %v2868_v33 = vpop.xlane.xlu1 %2867  ;;  %v8300_v35 = vsel %vm4416_vm8, %v8299_v25, %v8295_v29  ;;  %v2866_v28 = vpop.xlane.xlu0 %2865 }
 0x723   : > { %v8309_v40 = vrot.slane %v2868_v33, %v10916_v2  ;;  %v8304_v41 = vrot.slane %v2866_v28, %v10922_v7  ;;  %v1128_v28 = vld [vmem:[%s10757_s11 + $0x1b58] sm:$0xff] }
 0x725   : > { %v8305_v43 = vsel %vm4423_vm9, %v8304_v41, %v8300_v35  ;;  %3007 = vadd.xlane.f32.xlu1 %v1118_v6  ;;  %3005 = vadd.xlane.f32.xlu0 %v1117_v39  ;;  %v1127_v6 = vld [vmem:[%s10757_s11 + $0x1b50] sm:$0xff] }
 0x726   : > { %v2872_v13 = vpop.xlane.xlu1 %2871  ;;  %v8310_v44 = vsel %vm4430_vm10, %v8309_v40, %v8305_v43  ;;  %v2870_v48 = vpop.xlane.xlu0 %2869 }
 0x727   : > { %v8319_v50 = vrot.slane %v2872_v13, %v10930_v16  ;;  %v8314_v52 = vrot.slane %v2870_v48, %v10936_v24  ;;  %v1130_v48 = vld [vmem:[%s10757_s11 + $0x1b68] sm:$0xff] }
 0x729   : > { %v8315_v10 = vsel %vm4437_vm11, %v8314_v52, %v8310_v44  ;;  %3011 = vadd.xlane.f32.xlu1 %v1120_v49  ;;  %3009 = vadd.xlane.f32.xlu0 %v1119_v63  ;;  %v1129_v49 = vld [vmem:[%s10757_s11 + $0x1b60] sm:$0xff] }
 0x72a   : > { %v2876_v53 = vpop.xlane.xlu1 %2875  ;;  %v8320_v56 = vsel %vm4444_vm12, %v8319_v50, %v8315_v10  ;;  %v2874_v57 = vpop.xlane.xlu0 %2873 }
 0x72b   : > { %v8329_v61 = vrot.slane %v2876_v53, %v10944_v34  ;;  %v8324_v62 = vrot.slane %v2874_v57, %v10949_v37  ;;  %v1132_v57 = vld [vmem:[%s10757_s11 + $0x1b78] sm:$0xff] }
 0x72d   : > { %v8325_v0 = vsel %vm4451_vm13, %v8324_v62, %v8320_v56  ;;  %3015 = vadd.xlane.f32.xlu1 %v1122_v1  ;;  %3013 = vadd.xlane.f32.xlu0 %v1121_v59  ;;  %v1131_v1 = vld [vmem:[%s10757_s11 + $0x1b70] sm:$0xff] }
 0x72e   : > { %v8330_v3 = vsel %vm4458_vm14, %v8329_v61, %v8325_v0  ;;  %v2880_v51 = vpop.xlane.xlu1 %2879  ;;  %v2878_v4 = vpop.xlane.xlu0 %2877 }
 0x72f   : > { %v13446_v30 = vsel %vm9447_vm15, %v8330_v3, %v13038_v46  ;;  %v8338_v12 = vrot.slane %v2880_v51, %v10858_v18  ;;  %v8334_v14 = vrot.slane %v2878_v4, %v10855_v17  ;;  %v1134_v4 = vld [vmem:[%s10757_s11 + $0x1b88] sm:$0xff] }
 0x731   : > { %v8339_v45 = vsel %vm4360_vm0, %v8338_v12, %v8334_v14  ;;  %3019 = vadd.xlane.f32.xlu1 %v1124_v8  ;;  %3017 = vadd.xlane.f32.xlu0 %v1123_v11  ;;  %v1133_v8 = vld [vmem:[%s10757_s11 + $0x1b80] sm:$0xff] }
 0x732   : > { %v2884_v15 = vpop.xlane.xlu1 %2883  ;;  %v2882_v20 = vpop.xlane.xlu0 %2881 }
 0x733   : > { %v8348_v25 = vrot.slane %v2884_v15, %v10866_v22  ;;  %v8343_v27 = vrot.slane %v2882_v20, %v10863_v21 }
 0x735   : > { %v8344_v46 = vsel %vm4367_vm1, %v8343_v27, %v8339_v45  ;;  %3023 = vadd.xlane.f32.xlu1 %v1126_v23  ;;  %3021 = vadd.xlane.f32.xlu0 %v1125_v47  ;;  %v1136_v23 = vld [vmem:[%s10757_s11 + $0x1b98] sm:$0xff]  ;;  %v1135_v47 = vld [vmem:[%s10757_s11 + $0x1b90] sm:$0xff] }
 0x736   : > { %v2888_v29 = vpop.xlane.xlu1 %2887  ;;  %v8349_v33 = vsel %vm4374_vm2, %v8348_v25, %v8344_v46  ;;  %v2886_v35 = vpop.xlane.xlu0 %2885 }
 0x737   : > { %v8358_v39 = vrot.slane %v2888_v29, %v10875_v31  ;;  %v8353_v40 = vrot.slane %v2886_v35, %v10878_v32 }
 0x739   : > { %v8354_v41 = vsel %vm4381_vm3, %v8353_v40, %v8349_v33  ;;  %3027 = vadd.xlane.f32.xlu1 %v1128_v28  ;;  %3025 = vadd.xlane.f32.xlu0 %v1127_v6  ;;  %v1138_v28 = vld [vmem:[%s10757_s11 + $0x1ba8] sm:$0xff]  ;;  %v1137_v6 = vld [vmem:[%s10757_s11 + $0x1ba0] sm:$0xff] }
 0x73a   : > { %v2892_v43 = vpop.xlane.xlu1 %2891  ;;  %v8359_v13 = vsel %vm4388_vm4, %v8358_v39, %v8354_v41  ;;  %v2890_v44 = vpop.xlane.xlu0 %2889 }
 0x73b   : > { %v8368_v63 = vrot.slane %v2892_v43, %v10884_v36  ;;  %v8363_v50 = vrot.slane %v2890_v44, %v10890_v42 }
 0x73d   : > { %v8364_v52 = vsel %vm4395_vm5, %v8363_v50, %v8359_v13  ;;  %3031 = vadd.xlane.f32.xlu1 %v1130_v48  ;;  %3029 = vadd.xlane.f32.xlu0 %v1129_v49  ;;  %v1140_v48 = vld [vmem:[%s10757_s11 + $0x1bb8] sm:$0xff]  ;;  %v1139_v49 = vld [vmem:[%s10757_s11 + $0x1bb0] sm:$0xff] }
 0x73e   : > { %v2896_v10 = vpop.xlane.xlu1 %2895  ;;  %v8369_v53 = vsel %vm4402_vm6, %v8368_v63, %v8364_v52  ;;  %v2894_v56 = vpop.xlane.xlu0 %2893 }
 0x73f   : > { %v8378_v59 = vrot.slane %v2896_v10, %v10902_v54  ;;  %v8373_v61 = vrot.slane %v2894_v56, %v10908_v58 }
 0x741   : > { %v8374_v62 = vsel %vm4409_vm7, %v8373_v61, %v8369_v53  ;;  %3035 = vadd.xlane.f32.xlu1 %v1132_v57  ;;  %3033 = vadd.xlane.f32.xlu0 %v1131_v1  ;;  %v1142_v57 = vld [vmem:[%s10757_s11 + $0x1bc8] sm:$0xff]  ;;  %v1141_v1 = vld [vmem:[%s10757_s11 + $0x1bc0] sm:$0xff] }
 0x742   : > { %v2900_v0 = vpop.xlane.xlu1 %2899  ;;  %v8379_v3 = vsel %vm4416_vm8, %v8378_v59, %v8374_v62  ;;  %v2898_v51 = vpop.xlane.xlu0 %2897 }
 0x743   : > { %v8388_v11 = vrot.slane %v2900_v0, %v10916_v2  ;;  %v8383_v12 = vrot.slane %v2898_v51, %v10922_v7  ;;  %v1144_v51 = vld [vmem:[%s10757_s11 + $0x1bd8] sm:$0xff] }
 0x745   : > { %v8384_v14 = vsel %vm4423_vm9, %v8383_v12, %v8379_v3  ;;  %3039 = vadd.xlane.f32.xlu1 %v1134_v4  ;;  %3037 = vadd.xlane.f32.xlu0 %v1133_v8  ;;  %v1143_v4 = vld [vmem:[%s10757_s11 + $0x1bd0] sm:$0xff] }
 0x746   : > { %v2904_v45 = vpop.xlane.xlu1 %2903  ;;  %v8389_v15 = vsel %vm4430_vm10, %v8388_v11, %v8384_v14  ;;  %v2902_v20 = vpop.xlane.xlu0 %2901 }
 0x747   : > { %v8398_v25 = vrot.slane %v2904_v45, %v10930_v16  ;;  %v8393_v27 = vrot.slane %v2902_v20, %v10936_v24  ;;  %v1146_v20 = vld [vmem:[%s10757_s11 + $0x1be8] sm:$0xff] }
 0x749   : > { %v8394_v46 = vsel %vm4437_vm11, %v8393_v27, %v8389_v15  ;;  %3043 = vadd.xlane.f32.xlu1 %v1136_v23  ;;  %3041 = vadd.xlane.f32.xlu0 %v1135_v47  ;;  %v1145_v23 = vld [vmem:[%s10757_s11 + $0x1be0] sm:$0xff] }
 0x74a   : > { %v2908_v29 = vpop.xlane.xlu1 %2907  ;;  %v8399_v33 = vsel %vm4444_vm12, %v8398_v25, %v8394_v46  ;;  %v2906_v35 = vpop.xlane.xlu0 %2905 }
 0x74b   : > { %v8408_v39 = vrot.slane %v2908_v29, %v10944_v34  ;;  %v8403_v40 = vrot.slane %v2906_v35, %v10949_v37  ;;  %v1148_v35 = vld [vmem:[%s10757_s11 + $0x1bf8] sm:$0xff] }
 0x74d   : > { %v8404_v41 = vsel %vm4451_vm13, %v8403_v40, %v8399_v33  ;;  %3047 = vadd.xlane.f32.xlu1 %v1138_v28  ;;  %3045 = vadd.xlane.f32.xlu0 %v1137_v6  ;;  %v1147_v28 = vld [vmem:[%s10757_s11 + $0x1bf0] sm:$0xff] }
 0x74e   : > { %v8409_v43 = vsel %vm4458_vm14, %v8408_v39, %v8404_v41  ;;  %v2912_v13 = vpop.xlane.xlu1 %2911  ;;  %v2910_v44 = vpop.xlane.xlu0 %2909 }
 0x74f   : > { %v13497_v63 = vsel %vm9447_vm15, %v8409_v43, %v13089_v26  ;;  %v8417_v50 = vrot.slane %v2912_v13, %v10858_v18  ;;  %v8413_v52 = vrot.slane %v2910_v44, %v10855_v17  ;;  %v1150_v44 = vld [vmem:[%s10757_s11 + $0x1c08] sm:$0xff] }
 0x751   : > { %v8418_v10 = vsel %vm4360_vm0, %v8417_v50, %v8413_v52  ;;  %3051 = vadd.xlane.f32.xlu1 %v1140_v48  ;;  %3049 = vadd.xlane.f32.xlu0 %v1139_v49  ;;  %v1149_v48 = vld [vmem:[%s10757_s11 + $0x1c00] sm:$0xff] }
 0x752   : > { %v2916_v53 = vpop.xlane.xlu1 %2915  ;;  %v2914_v56 = vpop.xlane.xlu0 %2913 }
 0x753   : > { %v8427_v59 = vrot.slane %v2916_v53, %v10866_v22  ;;  %v8422_v61 = vrot.slane %v2914_v56, %v10863_v21 }
 0x755   : > { %v8423_v26 = vsel %vm4367_vm1, %v8422_v61, %v8418_v10  ;;  %3055 = vadd.xlane.f32.xlu1 %v1142_v57  ;;  %3053 = vadd.xlane.f32.xlu0 %v1141_v1  ;;  %v1152_v57 = vld [vmem:[%s10757_s11 + $0x1c18] sm:$0xff]  ;;  %v1151_v1 = vld [vmem:[%s10757_s11 + $0x1c10] sm:$0xff] }
 0x756   : > { %v2920_v62 = vpop.xlane.xlu1 %2919  ;;  %v8428_v0 = vsel %vm4374_vm2, %v8427_v59, %v8423_v26  ;;  %v2918_v3 = vpop.xlane.xlu0 %2917 }
 0x757   : > { %v8437_v8 = vrot.slane %v2920_v62, %v10875_v31  ;;  %v8432_v11 = vrot.slane %v2918_v3, %v10878_v32 }
 0x759   : > { %v8433_v12 = vsel %vm4381_vm3, %v8432_v11, %v8428_v0  ;;  %3059 = vadd.xlane.f32.xlu1 %v1144_v51  ;;  %3057 = vadd.xlane.f32.xlu0 %v1143_v4  ;;  %v1154_v51 = vld [vmem:[%s10757_s11 + $0x1c28] sm:$0xff]  ;;  %v1153_v4 = vld [vmem:[%s10757_s11 + $0x1c20] sm:$0xff] }
 0x75a   : > { %v2924_v14 = vpop.xlane.xlu1 %2923  ;;  %v8438_v45 = vsel %vm4388_vm4, %v8437_v8, %v8433_v12  ;;  %v2922_v15 = vpop.xlane.xlu0 %2921 }
 0x75b   : > { %v8447_v47 = vrot.slane %v2924_v14, %v10884_v36  ;;  %v8442_v25 = vrot.slane %v2922_v15, %v10890_v42 }
 0x75d   : > { %v8443_v27 = vsel %vm4395_vm5, %v8442_v25, %v8438_v45  ;;  %3063 = vadd.xlane.f32.xlu1 %v1146_v20  ;;  %3061 = vadd.xlane.f32.xlu0 %v1145_v23  ;;  %v1156_v20 = vld [vmem:[%s10757_s11 + $0x1c38] sm:$0xff]  ;;  %v1155_v23 = vld [vmem:[%s10757_s11 + $0x1c30] sm:$0xff] }
 0x75e   : > { %v2928_v46 = vpop.xlane.xlu1 %2927  ;;  %v8448_v29 = vsel %vm4402_vm6, %v8447_v47, %v8443_v27  ;;  %v2926_v33 = vpop.xlane.xlu0 %2925 }
 0x75f   : > { %v8457_v6 = vrot.slane %v2928_v46, %v10902_v54  ;;  %v8452_v39 = vrot.slane %v2926_v33, %v10908_v58 }
 0x761   : > { %v8453_v40 = vsel %vm4409_vm7, %v8452_v39, %v8448_v29  ;;  %3067 = vadd.xlane.f32.xlu1 %v1148_v35  ;;  %3065 = vadd.xlane.f32.xlu0 %v1147_v28  ;;  %v1158_v35 = vld [vmem:[%s10757_s11 + $0x1c48] sm:$0xff]  ;;  %v1157_v28 = vld [vmem:[%s10757_s11 + $0x1c40] sm:$0xff] }
 0x762   : > { %v2932_v41 = vpop.xlane.xlu1 %2931  ;;  %v8458_v43 = vsel %vm4416_vm8, %v8457_v6, %v8453_v40  ;;  %v2930_v13 = vpop.xlane.xlu0 %2929 }
 0x763   : > { %v8467_v49 = vrot.slane %v2932_v41, %v10916_v2  ;;  %v8462_v50 = vrot.slane %v2930_v13, %v10922_v7  ;;  %v1160_v13 = vld [vmem:[%s10757_s11 + $0x1c58] sm:$0xff] }
 0x765   : > { %v8463_v52 = vsel %vm4423_vm9, %v8462_v50, %v8458_v43  ;;  %3071 = vadd.xlane.f32.xlu1 %v1150_v44  ;;  %3069 = vadd.xlane.f32.xlu0 %v1149_v48  ;;  %v1159_v44 = vld [vmem:[%s10757_s11 + $0x1c50] sm:$0xff] }
 0x766   : > { %v2936_v10 = vpop.xlane.xlu1 %2935  ;;  %v8468_v53 = vsel %vm4430_vm10, %v8467_v49, %v8463_v52  ;;  %v2934_v56 = vpop.xlane.xlu0 %2933 }
 0x767   : > { %v8477_v59 = vrot.slane %v2936_v10, %v10930_v16  ;;  %v8472_v61 = vrot.slane %v2934_v56, %v10936_v24  ;;  %v1162_v56 = vld [vmem:[%s10757_s11 + $0x1c68] sm:$0xff] }
 0x769   : > { %v8473_v26 = vsel %vm4437_vm11, %v8472_v61, %v8468_v53  ;;  %3075 = vadd.xlane.f32.xlu1 %v1152_v57  ;;  %3073 = vadd.xlane.f32.xlu0 %v1151_v1  ;;  %v1161_v57 = vld [vmem:[%s10757_s11 + $0x1c60] sm:$0xff] }
 0x76a   : > { %v2940_v62 = vpop.xlane.xlu1 %2939  ;;  %v8478_v0 = vsel %vm4444_vm12, %v8477_v59, %v8473_v26  ;;  %v2938_v3 = vpop.xlane.xlu0 %2937 }
 0x76b   : > { %v8487_v8 = vrot.slane %v2940_v62, %v10944_v34  ;;  %v8482_v11 = vrot.slane %v2938_v3, %v10949_v37  ;;  %v1164_v3 = vld [vmem:[%s10757_s11 + $0x1c78] sm:$0xff] }
 0x76d   : > { %v8483_v12 = vsel %vm4451_vm13, %v8482_v11, %v8478_v0  ;;  %3079 = vadd.xlane.f32.xlu1 %v1154_v51  ;;  %3077 = vadd.xlane.f32.xlu0 %v1153_v4  ;;  %v1163_v51 = vld [vmem:[%s10757_s11 + $0x1c70] sm:$0xff] }
 0x76e   : > { %v8488_v14 = vsel %vm4458_vm14, %v8487_v8, %v8483_v12  ;;  %v2944_v45 = vpop.xlane.xlu1 %2943  ;;  %v2942_v15 = vpop.xlane.xlu0 %2941 }
 0x76f   : > { %v13548_v47 = vsel %vm9447_vm15, %v8488_v14, %v13140_v60  ;;  %v8496_v25 = vrot.slane %v2944_v45, %v10858_v18  ;;  %v8492_v27 = vrot.slane %v2942_v15, %v10855_v17  ;;  %v1166_v15 = vld [vmem:[%s10757_s11 + $0x1c88] sm:$0xff] }
 0x771   : > { %v8497_v46 = vsel %vm4360_vm0, %v8496_v25, %v8492_v27  ;;  %3083 = vadd.xlane.f32.xlu1 %v1156_v20  ;;  %3081 = vadd.xlane.f32.xlu0 %v1155_v23  ;;  %v1165_v20 = vld [vmem:[%s10757_s11 + $0x1c80] sm:$0xff] }
 0x772   : > { %v2948_v29 = vpop.xlane.xlu1 %2947  ;;  %v2946_v33 = vpop.xlane.xlu0 %2945 }
 0x773   : > { %v8506_v6 = vrot.slane %v2948_v29, %v10866_v22  ;;  %v8501_v39 = vrot.slane %v2946_v33, %v10863_v21 }
 0x775   : > { %v8502_v60 = vsel %vm4367_vm1, %v8501_v39, %v8497_v46  ;;  %3087 = vadd.xlane.f32.xlu1 %v1158_v35  ;;  %3085 = vadd.xlane.f32.xlu0 %v1157_v28  ;;  %v1168_v35 = vld [vmem:[%s10757_s11 + $0x1c98] sm:$0xff]  ;;  %v1167_v28 = vld [vmem:[%s10757_s11 + $0x1c90] sm:$0xff] }
 0x776   : > { %v2952_v40 = vpop.xlane.xlu1 %2951  ;;  %v8507_v41 = vsel %vm4374_vm2, %v8506_v6, %v8502_v60  ;;  %v2950_v43 = vpop.xlane.xlu0 %2949 }
 0x777   : > { %v8516_v48 = vrot.slane %v2952_v40, %v10875_v31  ;;  %v8511_v49 = vrot.slane %v2950_v43, %v10878_v32 }
 0x779   : > { %v8512_v50 = vsel %vm4381_vm3, %v8511_v49, %v8507_v41  ;;  %3091 = vadd.xlane.f32.xlu1 %v1160_v13  ;;  %3089 = vadd.xlane.f32.xlu0 %v1159_v44  ;;  %v1170_v13 = vld [vmem:[%s10757_s11 + $0x1ca8] sm:$0xff]  ;;  %v1169_v44 = vld [vmem:[%s10757_s11 + $0x1ca0] sm:$0xff] }
 0x77a   : > { %v2956_v52 = vpop.xlane.xlu1 %2955  ;;  %v8517_v10 = vsel %vm4388_vm4, %v8516_v48, %v8512_v50  ;;  %v2954_v53 = vpop.xlane.xlu0 %2953 }
 0x77b   : > { %v8526_v1 = vrot.slane %v2956_v52, %v10884_v36  ;;  %v8521_v59 = vrot.slane %v2954_v53, %v10890_v42 }
 0x77d   : > { %v8522_v61 = vsel %vm4395_vm5, %v8521_v59, %v8517_v10  ;;  %3095 = vadd.xlane.f32.xlu1 %v1162_v56  ;;  %3093 = vadd.xlane.f32.xlu0 %v1161_v57  ;;  %v1172_v56 = vld [vmem:[%s10757_s11 + $0x1cb8] sm:$0xff]  ;;  %v1171_v57 = vld [vmem:[%s10757_s11 + $0x1cb0] sm:$0xff] }
 0x77e   : > { %v2960_v26 = vpop.xlane.xlu1 %2959  ;;  %v8527_v62 = vsel %vm4402_vm6, %v8526_v1, %v8522_v61  ;;  %v2958_v0 = vpop.xlane.xlu0 %2957 }
 0x77f   : > { %v8536_v4 = vrot.slane %v2960_v26, %v10902_v54  ;;  %v8531_v8 = vrot.slane %v2958_v0, %v10908_v58 }
 0x781   : > { %v8532_v11 = vsel %vm4409_vm7, %v8531_v8, %v8527_v62  ;;  %3099 = vadd.xlane.f32.xlu1 %v1164_v3  ;;  %3097 = vadd.xlane.f32.xlu0 %v1163_v51  ;;  %v1174_v3 = vld [vmem:[%s10757_s11 + $0x1cc8] sm:$0xff]  ;;  %v1173_v51 = vld [vmem:[%s10757_s11 + $0x1cc0] sm:$0xff] }
 0x782   : > { %v2964_v12 = vpop.xlane.xlu1 %2963  ;;  %v8537_v14 = vsel %vm4416_vm8, %v8536_v4, %v8532_v11  ;;  %v2962_v45 = vpop.xlane.xlu0 %2961 }
 0x783   : > { %v8546_v23 = vrot.slane %v2964_v12, %v10916_v2  ;;  %v8541_v25 = vrot.slane %v2962_v45, %v10922_v7  ;;  %v1176_v45 = vld [vmem:[%s10757_s11 + $0x1cd8] sm:$0xff] }
 0x785   : > { %v8542_v27 = vsel %vm4423_vm9, %v8541_v25, %v8537_v14  ;;  %3103 = vadd.xlane.f32.xlu1 %v1166_v15  ;;  %3101 = vadd.xlane.f32.xlu0 %v1165_v20  ;;  %v1175_v15 = vld [vmem:[%s10757_s11 + $0x1cd0] sm:$0xff] }
 0x786   : > { %v2968_v46 = vpop.xlane.xlu1 %2967  ;;  %v8547_v29 = vsel %vm4430_vm10, %v8546_v23, %v8542_v27  ;;  %v2966_v33 = vpop.xlane.xlu0 %2965 }
 0x787   : > { %v8556_v6 = vrot.slane %v2968_v46, %v10930_v16  ;;  %v8551_v39 = vrot.slane %v2966_v33, %v10936_v24  ;;  %v1178_v33 = vld [vmem:[%s10757_s11 + $0x1ce8] sm:$0xff] }
 0x789   : > { %v8552_v60 = vsel %vm4437_vm11, %v8551_v39, %v8547_v29  ;;  %3107 = vadd.xlane.f32.xlu1 %v1168_v35  ;;  %3105 = vadd.xlane.f32.xlu0 %v1167_v28  ;;  %v1177_v35 = vld [vmem:[%s10757_s11 + $0x1ce0] sm:$0xff] }
 0x78a   : > { %v2972_v40 = vpop.xlane.xlu1 %2971  ;;  %v8557_v41 = vsel %vm4444_vm12, %v8556_v6, %v8552_v60  ;;  %v2970_v43 = vpop.xlane.xlu0 %2969 }
 0x78b   : > { %v8566_v48 = vrot.slane %v2972_v40, %v10944_v34  ;;  %v8561_v49 = vrot.slane %v2970_v43, %v10949_v37  ;;  %v1180_v43 = vld [vmem:[%s10757_s11 + $0x1cf8] sm:$0xff] }
 0x78d   : > { %v8562_v50 = vsel %vm4451_vm13, %v8561_v49, %v8557_v41  ;;  %3111 = vadd.xlane.f32.xlu1 %v1170_v13  ;;  %3109 = vadd.xlane.f32.xlu0 %v1169_v44  ;;  %v1179_v13 = vld [vmem:[%s10757_s11 + $0x1cf0] sm:$0xff] }
 0x78e   : > { %v8567_v52 = vsel %vm4458_vm14, %v8566_v48, %v8562_v50  ;;  %v2976_v10 = vpop.xlane.xlu1 %2975  ;;  %v2974_v53 = vpop.xlane.xlu0 %2973 }
 0x78f   : > { %v13599_v1 = vsel %vm9447_vm15, %v8567_v52, %v13191_v38  ;;  %v8575_v59 = vrot.slane %v2976_v10, %v10858_v18  ;;  %v8571_v61 = vrot.slane %v2974_v53, %v10855_v17  ;;  %v1182_v53 = vld [vmem:[%s10757_s11 + $0x1d08] sm:$0xff] }
 0x791   : > { %v8576_v26 = vsel %vm4360_vm0, %v8575_v59, %v8571_v61  ;;  %3115 = vadd.xlane.f32.xlu1 %v1172_v56  ;;  %3113 = vadd.xlane.f32.xlu0 %v1171_v57  ;;  %v1181_v56 = vld [vmem:[%s10757_s11 + $0x1d00] sm:$0xff] }
 0x792   : > { %v2980_v62 = vpop.xlane.xlu1 %2979  ;;  %v2978_v0 = vpop.xlane.xlu0 %2977 }
 0x793   : > { %v8585_v4 = vrot.slane %v2980_v62, %v10866_v22  ;;  %v8580_v8 = vrot.slane %v2978_v0, %v10863_v21 }
 0x795   : > { %v8581_v38 = vsel %vm4367_vm1, %v8580_v8, %v8576_v26  ;;  %3119 = vadd.xlane.f32.xlu1 %v1174_v3  ;;  %3117 = vadd.xlane.f32.xlu0 %v1173_v51  ;;  %v1184_v3 = vld [vmem:[%s10757_s11 + $0x1d18] sm:$0xff]  ;;  %v1183_v51 = vld [vmem:[%s10757_s11 + $0x1d10] sm:$0xff] }
 0x796   : > { %v2984_v11 = vpop.xlane.xlu1 %2983  ;;  %v8586_v12 = vsel %vm4374_vm2, %v8585_v4, %v8581_v38  ;;  %v2982_v14 = vpop.xlane.xlu0 %2981 }
 0x797   : > { %v8595_v20 = vrot.slane %v2984_v11, %v10875_v31  ;;  %v8590_v23 = vrot.slane %v2982_v14, %v10878_v32 }
 0x799   : > { %v8591_v25 = vsel %vm4381_vm3, %v8590_v23, %v8586_v12  ;;  %3123 = vadd.xlane.f32.xlu1 %v1176_v45  ;;  %3121 = vadd.xlane.f32.xlu0 %v1175_v15  ;;  %v1186_v45 = vld [vmem:[%s10757_s11 + $0x1d28] sm:$0xff]  ;;  %v1185_v15 = vld [vmem:[%s10757_s11 + $0x1d20] sm:$0xff] }
 0x79a   : > { %v2988_v27 = vpop.xlane.xlu1 %2987  ;;  %v8596_v46 = vsel %vm4388_vm4, %v8595_v20, %v8591_v25  ;;  %v2986_v29 = vpop.xlane.xlu0 %2985 }
 0x79b   : > { %v8605_v28 = vrot.slane %v2988_v27, %v10884_v36  ;;  %v8600_v6 = vrot.slane %v2986_v29, %v10890_v42 }
 0x79d   : > { %v8601_v39 = vsel %vm4395_vm5, %v8600_v6, %v8596_v46  ;;  %3127 = vadd.xlane.f32.xlu1 %v1178_v33  ;;  %3125 = vadd.xlane.f32.xlu0 %v1177_v35  ;;  %v1188_v33 = vld [vmem:[%s10757_s11 + $0x1d38] sm:$0xff]  ;;  %v1187_v35 = vld [vmem:[%s10757_s11 + $0x1d30] sm:$0xff] }
 0x79e   : > { %v2992_v60 = vpop.xlane.xlu1 %2991  ;;  %v8606_v40 = vsel %vm4402_vm6, %v8605_v28, %v8601_v39  ;;  %v2990_v41 = vpop.xlane.xlu0 %2989 }
 0x79f   : > { %v8615_v44 = vrot.slane %v2992_v60, %v10902_v54  ;;  %v8610_v48 = vrot.slane %v2990_v41, %v10908_v58 }
 0x7a1   : > { %v8611_v49 = vsel %vm4409_vm7, %v8610_v48, %v8606_v40  ;;  %3131 = vadd.xlane.f32.xlu1 %v1180_v43  ;;  %3129 = vadd.xlane.f32.xlu0 %v1179_v13  ;;  %v1190_v43 = vld [vmem:[%s10757_s11 + $0x1d48] sm:$0xff]  ;;  %v1189_v13 = vld [vmem:[%s10757_s11 + $0x1d40] sm:$0xff] }
 0x7a2   : > { %v2996_v50 = vpop.xlane.xlu1 %2995  ;;  %v8616_v52 = vsel %vm4416_vm8, %v8615_v44, %v8611_v49  ;;  %v2994_v10 = vpop.xlane.xlu0 %2993 }
 0x7a3   : > { %v8625_v57 = vrot.slane %v2996_v50, %v10916_v2  ;;  %v8620_v59 = vrot.slane %v2994_v10, %v10922_v7  ;;  %v1192_v10 = vld [vmem:[%s10757_s11 + $0x1d58] sm:$0xff] }
 0x7a5   : > { %v8621_v61 = vsel %vm4423_vm9, %v8620_v59, %v8616_v52  ;;  %3135 = vadd.xlane.f32.xlu1 %v1182_v53  ;;  %3133 = vadd.xlane.f32.xlu0 %v1181_v56  ;;  %v1191_v53 = vld [vmem:[%s10757_s11 + $0x1d50] sm:$0xff] }
 0x7a6   : > { %v3000_v26 = vpop.xlane.xlu1 %2999  ;;  %v8626_v62 = vsel %vm4430_vm10, %v8625_v57, %v8621_v61  ;;  %v2998_v0 = vpop.xlane.xlu0 %2997 }
 0x7a7   : > { %v8635_v4 = vrot.slane %v3000_v26, %v10930_v16  ;;  %v8630_v8 = vrot.slane %v2998_v0, %v10936_v24  ;;  %v1194_v0 = vld [vmem:[%s10757_s11 + $0x1d68] sm:$0xff] }
 0x7a9   : > { %v8631_v38 = vsel %vm4437_vm11, %v8630_v8, %v8626_v62  ;;  %3139 = vadd.xlane.f32.xlu1 %v1184_v3  ;;  %3137 = vadd.xlane.f32.xlu0 %v1183_v51  ;;  %v1193_v3 = vld [vmem:[%s10757_s11 + $0x1d60] sm:$0xff] }
 0x7aa   : > { %v3004_v11 = vpop.xlane.xlu1 %3003  ;;  %v8636_v12 = vsel %vm4444_vm12, %v8635_v4, %v8631_v38  ;;  %v3002_v14 = vpop.xlane.xlu0 %3001 }
 0x7ab   : > { %v8645_v20 = vrot.slane %v3004_v11, %v10944_v34  ;;  %v8640_v23 = vrot.slane %v3002_v14, %v10949_v37  ;;  %v1196_v14 = vld [vmem:[%s10757_s11 + $0x1d78] sm:$0xff] }
 0x7ad   : > { %v8641_v25 = vsel %vm4451_vm13, %v8640_v23, %v8636_v12  ;;  %3143 = vadd.xlane.f32.xlu1 %v1186_v45  ;;  %3141 = vadd.xlane.f32.xlu0 %v1185_v15  ;;  %v1195_v45 = vld [vmem:[%s10757_s11 + $0x1d70] sm:$0xff] }
 0x7ae   : > { %v8646_v27 = vsel %vm4458_vm14, %v8645_v20, %v8641_v25  ;;  %v3008_v46 = vpop.xlane.xlu1 %3007  ;;  %v3006_v29 = vpop.xlane.xlu0 %3005 }
 0x7af   : > { %v8654_v28 = vrot.slane %v3008_v46, %v10858_v18  ;;  %v8650_v6 = vrot.slane %v3006_v29, %v10855_v17  ;;  %v13652_v39 = vsel %vm9447_vm15, %v8646_v27, %v13242_v5  ;;  %v1198_v29 = vld [vmem:[%s10757_s11 + $0x1d88] sm:$0xff] }
 0x7b1   : > { %v8655_v60 = vsel %vm4360_vm0, %v8654_v28, %v8650_v6  ;;  %3147 = vadd.xlane.f32.xlu1 %v1188_v33  ;;  %3145 = vadd.xlane.f32.xlu0 %v1187_v35  ;;  %v1197_v33 = vld [vmem:[%s10757_s11 + $0x1d80] sm:$0xff] }
 0x7b2   : > { %v3012_v40 = vpop.xlane.xlu1 %3011  ;;  %v3010_v41 = vpop.xlane.xlu0 %3009 }
 0x7b3   : > { %v8664_v44 = vrot.slane %v3012_v40, %v10866_v22  ;;  %v8659_v48 = vrot.slane %v3010_v41, %v10863_v21 }
 0x7b5   : > { %v8660_v49 = vsel %vm4367_vm1, %v8659_v48, %v8655_v60  ;;  %3151 = vadd.xlane.f32.xlu1 %v1190_v43  ;;  %3149 = vadd.xlane.f32.xlu0 %v1189_v13  ;;  %v1200_v43 = vld [vmem:[%s10757_s11 + $0x1d98] sm:$0xff]  ;;  %v1199_v13 = vld [vmem:[%s10757_s11 + $0x1d90] sm:$0xff] }
 0x7b6   : > { %v3016_v5 = vpop.xlane.xlu1 %3015  ;;  %v8665_v50 = vsel %vm4374_vm2, %v8664_v44, %v8660_v49  ;;  %v3014_v52 = vpop.xlane.xlu0 %3013 }
 0x7b7   : > { %v8674_v56 = vrot.slane %v3016_v5, %v10875_v31  ;;  %v8669_v57 = vrot.slane %v3014_v52, %v10878_v32 }
 0x7b9   : > { %v8670_v59 = vsel %vm4381_vm3, %v8669_v57, %v8665_v50  ;;  %3155 = vadd.xlane.f32.xlu1 %v1192_v10  ;;  %3153 = vadd.xlane.f32.xlu0 %v1191_v53  ;;  %v1202_v10 = vld [vmem:[%s10757_s11 + $0x1da8] sm:$0xff]  ;;  %v1201_v53 = vld [vmem:[%s10757_s11 + $0x1da0] sm:$0xff] }
 0x7ba   : > { %v3020_v61 = vpop.xlane.xlu1 %3019  ;;  %v8675_v26 = vsel %vm4388_vm4, %v8674_v56, %v8670_v59  ;;  %v3018_v62 = vpop.xlane.xlu0 %3017 }
 0x7bb   : > { %v8684_v51 = vrot.slane %v3020_v61, %v10884_v36  ;;  %v8679_v4 = vrot.slane %v3018_v62, %v10890_v42 }
 0x7bd   : > { %v8680_v8 = vsel %vm4395_vm5, %v8679_v4, %v8675_v26  ;;  %3159 = vadd.xlane.f32.xlu1 %v1194_v0  ;;  %3157 = vadd.xlane.f32.xlu0 %v1193_v3  ;;  %v1204_v0 = vld [vmem:[%s10757_s11 + $0x1db8] sm:$0xff]  ;;  %v1203_v3 = vld [vmem:[%s10757_s11 + $0x1db0] sm:$0xff] }
 0x7be   : > { %v3024_v38 = vpop.xlane.xlu1 %3023  ;;  %v8685_v11 = vsel %vm4402_vm6, %v8684_v51, %v8680_v8  ;;  %v3022_v12 = vpop.xlane.xlu0 %3021 }
 0x7bf   : > { %v8694_v15 = vrot.slane %v3024_v38, %v10902_v54  ;;  %v8689_v20 = vrot.slane %v3022_v12, %v10908_v58 }
 0x7c1   : > { %v8690_v23 = vsel %vm4409_vm7, %v8689_v20, %v8685_v11  ;;  %3163 = vadd.xlane.f32.xlu1 %v1196_v14  ;;  %3161 = vadd.xlane.f32.xlu0 %v1195_v45  ;;  %v1206_v14 = vld [vmem:[%s10757_s11 + $0x1dc8] sm:$0xff]  ;;  %v1205_v45 = vld [vmem:[%s10757_s11 + $0x1dc0] sm:$0xff] }
 0x7c2   : > { %v3028_v25 = vpop.xlane.xlu1 %3027  ;;  %v8695_v27 = vsel %vm4416_vm8, %v8694_v15, %v8690_v23  ;;  %v3026_v46 = vpop.xlane.xlu0 %3025 }
 0x7c3   : > { %v8704_v35 = vrot.slane %v3028_v25, %v10916_v2  ;;  %v8699_v28 = vrot.slane %v3026_v46, %v10922_v7  ;;  %v1208_v46 = vld [vmem:[%s10757_s11 + $0x1dd8] sm:$0xff] }
 0x7c5   : > { %v8700_v6 = vsel %vm4423_vm9, %v8699_v28, %v8695_v27  ;;  %3167 = vadd.xlane.f32.xlu1 %v1198_v29  ;;  %3165 = vadd.xlane.f32.xlu0 %v1197_v33  ;;  %v1207_v29 = vld [vmem:[%s10757_s11 + $0x1dd0] sm:$0xff] }
 0x7c6   : > { %v3032_v60 = vpop.xlane.xlu1 %3031  ;;  %v8705_v40 = vsel %vm4430_vm10, %v8704_v35, %v8700_v6  ;;  %v3030_v41 = vpop.xlane.xlu0 %3029 }
 0x7c7   : > { %v8714_v44 = vrot.slane %v3032_v60, %v10930_v16  ;;  %v8709_v48 = vrot.slane %v3030_v41, %v10936_v24  ;;  %v1210_v41 = vld [vmem:[%s10757_s11 + $0x1de8] sm:$0xff] }
 0x7c9   : > { %v8710_v49 = vsel %vm4437_vm11, %v8709_v48, %v8705_v40  ;;  %3171 = vadd.xlane.f32.xlu1 %v1200_v43  ;;  %3169 = vadd.xlane.f32.xlu0 %v1199_v13  ;;  %v1209_v43 = vld [vmem:[%s10757_s11 + $0x1de0] sm:$0xff] }
 0x7ca   : > { %v3036_v5 = vpop.xlane.xlu1 %3035  ;;  %v8715_v50 = vsel %vm4444_vm12, %v8714_v44, %v8710_v49  ;;  %v3034_v52 = vpop.xlane.xlu0 %3033 }
 0x7cb   : > { %v8724_v56 = vrot.slane %v3036_v5, %v10944_v34  ;;  %v8719_v57 = vrot.slane %v3034_v52, %v10949_v37  ;;  %v1212_v52 = vld [vmem:[%s10757_s11 + $0x1df8] sm:$0xff] }
 0x7cd   : > { %v8720_v59 = vsel %vm4451_vm13, %v8719_v57, %v8715_v50  ;;  %3175 = vadd.xlane.f32.xlu1 %v1202_v10  ;;  %3173 = vadd.xlane.f32.xlu0 %v1201_v53  ;;  %v1211_v10 = vld [vmem:[%s10757_s11 + $0x1df0] sm:$0xff] }
 0x7ce   : > { %v8725_v61 = vsel %vm4458_vm14, %v8724_v56, %v8720_v59  ;;  %v3040_v26 = vpop.xlane.xlu1 %3039  ;;  %v3038_v62 = vpop.xlane.xlu0 %3037 }
 0x7cf   : > { %v8733_v51 = vrot.slane %v3040_v26, %v10858_v18  ;;  %v8729_v4 = vrot.slane %v3038_v62, %v10855_v17  ;;  %v13703_v8 = vsel %vm9447_vm15, %v8725_v61, %v13293_v9  ;;  %v1214_v62 = vld [vmem:[%s10757_s11 + $0x1e08] sm:$0xff] }
 0x7d1   : > { %v8734_v38 = vsel %vm4360_vm0, %v8733_v51, %v8729_v4  ;;  %3179 = vadd.xlane.f32.xlu1 %v1204_v0  ;;  %3177 = vadd.xlane.f32.xlu0 %v1203_v3  ;;  %v1213_v0 = vld [vmem:[%s10757_s11 + $0x1e00] sm:$0xff] }
 0x7d2   : > { %v3044_v11 = vpop.xlane.xlu1 %3043  ;;  %v3042_v12 = vpop.xlane.xlu0 %3041 }
 0x7d3   : > { %v8743_v15 = vrot.slane %v3044_v11, %v10866_v22  ;;  %v8738_v20 = vrot.slane %v3042_v12, %v10863_v21 }
 0x7d5   : > { %v8739_v23 = vsel %vm4367_vm1, %v8738_v20, %v8734_v38  ;;  %3183 = vadd.xlane.f32.xlu1 %v1206_v14  ;;  %3181 = vadd.xlane.f32.xlu0 %v1205_v45  ;;  %v1216_v14 = vld [vmem:[%s10757_s11 + $0x1e18] sm:$0xff]  ;;  %v1215_v45 = vld [vmem:[%s10757_s11 + $0x1e10] sm:$0xff] }
 0x7d6   : > { %v3048_v9 = vpop.xlane.xlu1 %3047  ;;  %v8744_v25 = vsel %vm4374_vm2, %v8743_v15, %v8739_v23  ;;  %v3046_v27 = vpop.xlane.xlu0 %3045 }
 0x7d7   : > { %v8753_v33 = vrot.slane %v3048_v9, %v10875_v31  ;;  %v8748_v35 = vrot.slane %v3046_v27, %v10878_v32 }
 0x7d9   : > { %v8749_v28 = vsel %vm4381_vm3, %v8748_v35, %v8744_v25  ;;  %3187 = vadd.xlane.f32.xlu1 %v1208_v46  ;;  %3185 = vadd.xlane.f32.xlu0 %v1207_v29  ;;  %v1218_v46 = vld [vmem:[%s10757_s11 + $0x1e28] sm:$0xff]  ;;  %v1217_v29 = vld [vmem:[%s10757_s11 + $0x1e20] sm:$0xff] }
 0x7da   : > { %v3052_v6 = vpop.xlane.xlu1 %3051  ;;  %v8754_v60 = vsel %vm4388_vm4, %v8753_v33, %v8749_v28  ;;  %v3050_v40 = vpop.xlane.xlu0 %3049 }
 0x7db   : > { %v8763_v13 = vrot.slane %v3052_v6, %v10884_v36  ;;  %v8758_v44 = vrot.slane %v3050_v40, %v10890_v42 }
 0x7dd   : > { %v8759_v48 = vsel %vm4395_vm5, %v8758_v44, %v8754_v60  ;;  %3191 = vadd.xlane.f32.xlu1 %v1210_v41  ;;  %3189 = vadd.xlane.f32.xlu0 %v1209_v43  ;;  %v1220_v41 = vld [vmem:[%s10757_s11 + $0x1e38] sm:$0xff]  ;;  %v1219_v43 = vld [vmem:[%s10757_s11 + $0x1e30] sm:$0xff] }
 0x7de   : > { %v3056_v49 = vpop.xlane.xlu1 %3055  ;;  %v8764_v5 = vsel %vm4402_vm6, %v8763_v13, %v8759_v48  ;;  %v3054_v50 = vpop.xlane.xlu0 %3053 }
 0x7df   : > { %v8773_v53 = vrot.slane %v3056_v49, %v10902_v54  ;;  %v8768_v56 = vrot.slane %v3054_v50, %v10908_v58  ;;  %v1222_v50 = vld [vmem:[%s10757_s11 + $0x1e48] sm:$0xff] }
 0x7e1   : > { %v8769_v57 = vsel %vm4409_vm7, %v8768_v56, %v8764_v5  ;;  %3195 = vadd.xlane.f32.xlu1 %v1212_v52  ;;  %3193 = vadd.xlane.f32.xlu0 %v1211_v10  ;;  %v1221_v52 = vld [vmem:[%s10757_s11 + $0x1e40] sm:$0xff] }
 0x7e2   : > { %v3060_v59 = vpop.xlane.xlu1 %3059  ;;  %v8774_v61 = vsel %vm4416_vm8, %v8773_v53, %v8769_v57  ;;  %v3058_v26 = vpop.xlane.xlu0 %3057 }
 0x7e3   : > { %v8783_v3 = vrot.slane %v3060_v59, %v10916_v2  ;;  %v8778_v51 = vrot.slane %v3058_v26, %v10922_v7  ;;  %v1223_v26 = vld [vmem:[%s10757_s11 + $0x1e50] sm:$0xff] }
 0x7e5   : > { %v8779_v4 = vsel %vm4423_vm9, %v8778_v51, %v8774_v61  ;;  %3199 = vadd.xlane.f32.xlu1 %v1214_v62  ;;  %3197 = vadd.xlane.f32.xlu0 %v1213_v0  ;;  %v1224_v61 = vld [vmem:[%s10757_s11 + $0x1e58] sm:$0xff] }
 0x7e6   : > { %v3064_v38 = vpop.xlane.xlu1 %3063  ;;  %v8784_v11 = vsel %vm4430_vm10, %v8783_v3, %v8779_v4  ;;  %v3062_v12 = vpop.xlane.xlu0 %3061 }
 0x7e7   : > { %v8793_v15 = vrot.slane %v3064_v38, %v10930_v16  ;;  %v8788_v20 = vrot.slane %v3062_v12, %v10936_v24  ;;  %v1225_v12 = vld [vmem:[%s10757_s11 + $0x1e60] sm:$0xff] }
 0x7e9   : > { %v8789_v23 = vsel %vm4437_vm11, %v8788_v20, %v8784_v11  ;;  %3203 = vadd.xlane.f32.xlu1 %v1216_v14  ;;  %3201 = vadd.xlane.f32.xlu0 %v1215_v45  ;;  %v1226_v11 = vld [vmem:[%s10757_s11 + $0x1e68] sm:$0xff] }
 0x7ea   : > { %v3068_v9 = vpop.xlane.xlu1 %3067  ;;  %v8794_v25 = vsel %vm4444_vm12, %v8793_v15, %v8789_v23  ;;  %v3066_v27 = vpop.xlane.xlu0 %3065 }
 0x7eb   : > { %v8803_v33 = vrot.slane %v3068_v9, %v10944_v34  ;;  %v8798_v35 = vrot.slane %v3066_v27, %v10949_v37  ;;  %v1227_v27 = vld [vmem:[%s10757_s11 + $0x1e70] sm:$0xff] }
 0x7ed   : > { %v8799_v28 = vsel %vm4451_vm13, %v8798_v35, %v8794_v25  ;;  %3207 = vadd.xlane.f32.xlu1 %v1218_v46  ;;  %3205 = vadd.xlane.f32.xlu0 %v1217_v29  ;;  %v1228_v25 = vld [vmem:[%s10757_s11 + $0x1e78] sm:$0xff] }
 0x7ee   : > { %v8804_v6 = vsel %vm4458_vm14, %v8803_v33, %v8799_v28  ;;  %v3072_v60 = vpop.xlane.xlu1 %3071  ;;  %v3070_v40 = vpop.xlane.xlu0 %3069 }
 0x7ef   : > { %v13752_v13 = vsel %vm9447_vm15, %v8804_v6, %v13344_v19  ;;  %v8812_v44 = vrot.slane %v3072_v60, %v10858_v18  ;;  %v8808_v48 = vrot.slane %v3070_v40, %v10855_v17  ;;  %v1230_v60 = vld [vmem:[%s10757_s11 + $0x1e88] sm:$0xff]  ;;  %v1229_v40 = vld [vmem:[%s10757_s11 + $0x1e80] sm:$0xff]  ;;  %vm9449_vm15 = vcmask 1047559  }
 0x7f1   : > { %3211 = vadd.xlane.f32.xlu1 %v1220_v41  ;;  %3209 = vadd.xlane.f32.xlu0 %v1219_v43  ;;  %v8813_v53 = vsel %vm4360_vm0, %v8812_v44, %v8808_v48 }
 0x7f2   : > { %v3076_v49 = vpop.xlane.xlu1 %3075  ;;  %v3074_v5 = vpop.xlane.xlu0 %3073 }
 0x7f3   : > { %v8817_v10 = vrot.slane %v3074_v5, %v10863_v21  ;;  %v8822_v56 = vrot.slane %v3076_v49, %v10866_v22 }
 0x7f5   : > { %v8818_v19 = vsel %vm4367_vm1, %v8817_v10, %v8813_v53  ;;  %3215 = vadd.xlane.f32.xlu1 %v1222_v50  ;;  %3213 = vadd.xlane.f32.xlu0 %v1221_v52  ;;  %v1245_v50 = vld [vmem:[%s10757_s11 + $0x1f00] sm:$0xff]  ;;  %v1231_v52 = vld [vmem:[%s10757_s11 + $0x1e90] sm:$0xff] }
 0x7f6   : > { %v3080_v57 = vpop.xlane.xlu1 %3079  ;;  %v3078_v59 = vpop.xlane.xlu0 %3077  ;;  %v8823_v3 = vsel %vm4374_vm2, %v8822_v56, %v8818_v19 }
 0x7f7   : > { %v8827_v62 = vrot.slane %v3078_v59, %v10878_v32  ;;  %v8832_v0 = vrot.slane %v3080_v57, %v10875_v31 }
 0x7f9   : > { %v8828_v51 = vsel %vm4381_vm3, %v8827_v62, %v8823_v3  ;;  %3219 = vadd.xlane.f32.xlu1 %v1224_v61  ;;  %3217 = vadd.xlane.f32.xlu0 %v1223_v26  ;;  %v1261_v61 = vld [vmem:[%s10757_s11 + $0x1f80] sm:$0xff]  ;;  %v1246_v26 = vld [vmem:[%s10757_s11 + $0x1f08] sm:$0xff] }
 0x7fa   : > { %v3084_v4 = vpop.xlane.xlu1 %3083  ;;  %v3082_v38 = vpop.xlane.xlu0 %3081  ;;  %v8833_v15 = vsel %vm4388_vm4, %v8832_v0, %v8828_v51  ;;  %v245_v51 = vld [vmem:[#allocation2 + $0x30] sm:$0xff] }
 0x7fb   : > { %v8837_v14 = vrot.slane %v3082_v38, %v10890_v42  ;;  %v8842_v45 = vrot.slane %v3084_v4, %v10884_v36 }
 0x7fd   : > { %v8838_v20 = vsel %vm4395_vm5, %v8837_v14, %v8833_v15  ;;  %3223 = vadd.xlane.f32.xlu1 %v1226_v11  ;;  %3221 = vadd.xlane.f32.xlu0 %v1225_v12  ;;  %v1247_v14 = vld [vmem:[%s10757_s11 + $0x1f10] sm:$0xff] }
 0x7fe   : > { %v3088_v23 = vpop.xlane.xlu1 %3087  ;;  %v3086_v9 = vpop.xlane.xlu0 %3085  ;;  %v8843_v33 = vsel %vm4402_vm6, %v8842_v45, %v8838_v20  ;;  %v1262_v45 = vld [vmem:[%s10757_s11 + $0x1f88] sm:$0xff] }
 0x7ff   : > { %v8847_v46 = vrot.slane %v3086_v9, %v10908_v58  ;;  %v8852_v29 = vrot.slane %v3088_v23, %v10902_v54 }
 0x801   : > { %v8848_v35 = vsel %vm4409_vm7, %v8847_v46, %v8843_v33  ;;  %3227 = vadd.xlane.f32.xlu1 %v1228_v25  ;;  %3225 = vadd.xlane.f32.xlu0 %v1227_v27  ;;  %v1232_v46 = vld [vmem:[%s10757_s11 + $0x1e98] sm:$0xff] }
 0x802   : > { %v3092_v28 = vpop.xlane.xlu1 %3091  ;;  %v3090_v6 = vpop.xlane.xlu0 %3089  ;;  %v8853_v44 = vsel %vm4416_vm8, %v8852_v29, %v8848_v35  ;;  %v1263_v29 = vld [vmem:[%s10757_s11 + $0x1f90] sm:$0xff] }
 0x803   : > { %v8857_v41 = vrot.slane %v3090_v6, %v10922_v7  ;;  %v8862_v43 = vrot.slane %v3092_v28, %v10916_v2 }
 0x805   : > { %v8858_v48 = vsel %vm4423_vm9, %v8857_v41, %v8853_v44  ;;  %3231 = vadd.xlane.f32.xlu1 %v1230_v60  ;;  %3229 = vadd.xlane.f32.xlu0 %v1229_v40  ;;  %v1264_v40 = vld [vmem:[%s10757_s11 + $0x1f98] sm:$0xff] }
 0x806   : > { %v3096_v49 = vpop.xlane.xlu1 %3095  ;;  %v3094_v5 = vpop.xlane.xlu0 %3093  ;;  %v8863_v56 = vsel %vm4430_vm10, %v8862_v43, %v8858_v48  ;;  %v1248_v41 = vld [vmem:[%s10757_s11 + $0x1f18] sm:$0xff] }
 0x807   : > { %v8867_v10 = vrot.slane %v3094_v5, %v10936_v24  ;;  %v8872_v53 = vrot.slane %v3096_v49, %v10930_v16 }
 0x809   : > { %v8868_v19 = vsel %vm4437_vm11, %v8867_v10, %v8863_v56  ;;  %3261 = vadd.xlane.f32.xlu1 %v1245_v50  ;;  %3233 = vadd.xlane.f32.xlu0 %v1231_v52  ;;  %v1249_v52 = vld [vmem:[%s10757_s11 + $0x1f20] sm:$0xff] }
 0x80a   : > { %v3100_v57 = vpop.xlane.xlu1 %3099  ;;  %v3098_v59 = vpop.xlane.xlu0 %3097  ;;  %v8873_v3 = vsel %vm4444_vm12, %v8872_v53, %v8868_v19  ;;  %v1233_v10 = vld [vmem:[%s10757_s11 + $0x1ea0] sm:$0xff] }
 0x80b   : > { %v8882_v62 = vrot.slane %v3100_v57, %v10944_v34  ;;  %v8877_v0 = vrot.slane %v3098_v59, %v10949_v37 }
 0x80d   : > { %v8878_v4 = vsel %vm4451_vm13, %v8877_v0, %v8873_v3  ;;  %3293 = vadd.xlane.f32.xlu1 %v1261_v61  ;;  %3263 = vadd.xlane.f32.xlu0 %v1246_v26  ;;  %v1234_v26 = vld [vmem:[%s10757_s11 + $0x1ea8] sm:$0xff] }
 0x80e   : > { %v8883_v38 = vsel %vm4458_vm14, %v8882_v62, %v8878_v4  ;;  %v3104_v11 = vpop.xlane.xlu1 %3103  ;;  %v3102_v12 = vpop.xlane.xlu0 %3101  ;;  %v1265_v62 = vld [vmem:[%s10757_s11 + $0x1fa0] sm:$0xff] }
 0x80f   : > { %v9450_v15 = vsel %vm9449_vm15, %v8883_v38, %v13395_v55  ;;  %v8891_v23 = vrot.slane %v3104_v11, %v10858_v18  ;;  %v8887_v9 = vrot.slane %v3102_v12, %v10855_v17  ;;  %v1266_v12 = vld [vmem:[%s10757_s11 + $0x1fa8] sm:$0xff] }
 0x810   : > { %v9508_v20 = vadd.f32 %v9450_v15, %v245_v51 }
 0x811   : > { %3265 = vadd.xlane.f32.xlu1 %v1247_v14  ;;  %3295 = vadd.xlane.f32.xlu0 %v1262_v45  ;;  %v8892_v35 = vsel %vm4360_vm0, %v8891_v23, %v8887_v9  ;;  %v1250_v14 = vld [vmem:[%s10757_s11 + $0x1f28] sm:$0xff] }
 0x812   : > { %9516 = vst [vmem:[#allocation2 + $0x30] sm:$0xff] %v9508_v20  ;;  %v3108_v25 = vpop.xlane.xlu1 %3107  ;;  %v3106_v27 = vpop.xlane.xlu0 %3105 }
 0x813   : > { %v8896_v33 = vrot.slane %v3106_v27, %v10863_v21  ;;  %v8901_v55 = vrot.slane %v3108_v25, %v10866_v22  ;;  %v1251_v27 = vld [vmem:[%s10757_s11 + $0x1f30] sm:$0xff] }
 0x815   : > { %v8897_v28 = vsel %vm4367_vm1, %v8896_v33, %v8892_v35  ;;  %3235 = vadd.xlane.f32.xlu1 %v1232_v46  ;;  %3297 = vadd.xlane.f32.xlu0 %v1263_v29  ;;  %v1235_v46 = vld [vmem:[%s10757_s11 + $0x1eb0] sm:$0xff] }
 0x816   : > { %v3112_v6 = vpop.xlane.xlu1 %3111  ;;  %v3110_v60 = vpop.xlane.xlu0 %3109  ;;  %v8902_v48 = vsel %vm4374_vm2, %v8901_v55, %v8897_v28 }
 0x817   : > { %v8906_v43 = vrot.slane %v3110_v60, %v10878_v32  ;;  %v8911_v44 = vrot.slane %v3112_v6, %v10875_v31  ;;  %v1236_v60 = vld [vmem:[%s10757_s11 + $0x1eb8] sm:$0xff] }
 0x819   : > { %v8907_v49 = vsel %vm4381_vm3, %v8906_v43, %v8902_v48  ;;  %3299 = vadd.xlane.f32.xlu1 %v1264_v40  ;;  %3267 = vadd.xlane.f32.xlu0 %v1248_v41  ;;  %v1267_v40 = vld [vmem:[%s10757_s11 + $0x1fb0] sm:$0xff]  ;;  %v246_v48 = vld [vmem:[#allocation2] sm:$0xff] }
 0x81a   : > { %v3116_v5 = vpop.xlane.xlu1 %3115  ;;  %v3114_v50 = vpop.xlane.xlu0 %3113  ;;  %v8912_v19 = vsel %vm4388_vm4, %v8911_v44, %v8907_v49 }
 0x81b   : > { %v8916_v53 = vrot.slane %v3114_v50, %v10890_v42  ;;  %v8921_v56 = vrot.slane %v3116_v5, %v10884_v36 }
 0x81d   : > { %v8917_v57 = vsel %vm4395_vm5, %v8916_v53, %v8912_v19  ;;  %3269 = vadd.xlane.f32.xlu1 %v1249_v52  ;;  %3237 = vadd.xlane.f32.xlu0 %v1233_v10  ;;  %v1268_v10 = vld [vmem:[%s10757_s11 + $0x1fb8] sm:$0xff] }
 0x81e   : > { %v3120_v59 = vpop.xlane.xlu1 %3119  ;;  %v3118_v61 = vpop.xlane.xlu0 %3117  ;;  %v8922_v51 = vsel %vm4402_vm6, %v8921_v56, %v8917_v57  ;;  %v1252_v53 = vld [vmem:[%s10757_s11 + $0x1f38] sm:$0xff] }
 0x81f   : > { %v8926_v0 = vrot.slane %v3118_v61, %v10908_v58  ;;  %v8931_v3 = vrot.slane %v3120_v59, %v10902_v54 }
 0x821   : > { %v8927_v4 = vsel %vm4409_vm7, %v8926_v0, %v8922_v51  ;;  %3239 = vadd.xlane.f32.xlu1 %v1234_v26  ;;  %3301 = vadd.xlane.f32.xlu0 %v1265_v62  ;;  %v1253_v62 = vld [vmem:[%s10757_s11 + $0x1f40] sm:$0xff] }
 0x822   : > { %v3124_v38 = vpop.xlane.xlu1 %3123  ;;  %v3122_v11 = vpop.xlane.xlu0 %3121  ;;  %v8932_v20 = vsel %vm4416_vm8, %v8931_v3, %v8927_v4  ;;  %v1237_v0 = vld [vmem:[%s10757_s11 + $0x1ec0] sm:$0xff] }
 0x823   : > { %v8936_v45 = vrot.slane %v3122_v11, %v10922_v7  ;;  %v8941_v15 = vrot.slane %v3124_v38, %v10916_v2 }
 0x825   : > { %v8937_v23 = vsel %vm4423_vm9, %v8936_v45, %v8932_v20  ;;  %3303 = vadd.xlane.f32.xlu1 %v1266_v12  ;;  %3271 = vadd.xlane.f32.xlu0 %v1250_v14  ;;  %v1238_v12 = vld [vmem:[%s10757_s11 + $0x1ec8] sm:$0xff]  ;;  %v1269_v14 = vld [vmem:[%s10757_s11 + $0x1fc0] sm:$0xff] }
 0x826   : > { %v3128_v9 = vpop.xlane.xlu1 %3127  ;;  %v3126_v25 = vpop.xlane.xlu0 %3125  ;;  %v8942_v35 = vsel %vm4430_vm10, %v8941_v15, %v8937_v23 }
 0x827   : > { %v8946_v29 = vrot.slane %v3126_v25, %v10936_v24  ;;  %v8951_v33 = vrot.slane %v3128_v9, %v10930_v16 }
 0x829   : > { %v8947_v55 = vsel %vm4437_vm11, %v8946_v29, %v8942_v35  ;;  %3273 = vadd.xlane.f32.xlu1 %v1251_v27  ;;  %3241 = vadd.xlane.f32.xlu0 %v1235_v46  ;;  %v1270_v27 = vld [vmem:[%s10757_s11 + $0x1fc8] sm:$0xff] }
 0x82a   : > { %v3132_v28 = vpop.xlane.xlu1 %3131  ;;  %v3130_v6 = vpop.xlane.xlu0 %3129  ;;  %v8952_v44 = vsel %vm4444_vm12, %v8951_v33, %v8947_v55  ;;  %v1254_v46 = vld [vmem:[%s10757_s11 + $0x1f48] sm:$0xff] }
 0x82b   : > { %v8961_v41 = vrot.slane %v3132_v28, %v10944_v34  ;;  %v8956_v43 = vrot.slane %v3130_v6, %v10949_v37 }
 0x82d   : > { %v8957_v49 = vsel %vm4451_vm13, %v8956_v43, %v8952_v44  ;;  %3243 = vadd.xlane.f32.xlu1 %v1236_v60  ;;  %3305 = vadd.xlane.f32.xlu0 %v1267_v40  ;;  %v1255_v60 = vld [vmem:[%s10757_s11 + $0x1f50] sm:$0xff] }
 0x82e   : > { %v8962_v5 = vsel %vm4458_vm14, %v8961_v41, %v8957_v49  ;;  %v3136_v50 = vpop.xlane.xlu1 %3135  ;;  %v3134_v52 = vpop.xlane.xlu0 %3133  ;;  %v1239_v40 = vld [vmem:[%s10757_s11 + $0x1ed0] sm:$0xff] }
 0x82f   : > { %v9457_v56 = vsel %vm9449_vm15, %v8962_v5, %v13446_v30  ;;  %v8970_v57 = vrot.slane %v3136_v50, %v10858_v18  ;;  %v8966_v59 = vrot.slane %v3134_v52, %v10855_v17  ;;  %v1240_v50 = vld [vmem:[%s10757_s11 + $0x1ed8] sm:$0xff]  ;;  %v1271_v52 = vld [vmem:[%s10757_s11 + $0x1fd0] sm:$0xff] }
 0x830   : > { %v9509_v19 = vadd.f32 %v9457_v56, %v246_v48 }
 0x831   : > { %3307 = vadd.xlane.f32.xlu1 %v1268_v10  ;;  %3275 = vadd.xlane.f32.xlu0 %v1252_v53  ;;  %v8971_v51 = vsel %vm4360_vm0, %v8970_v57, %v8966_v59 }
 0x832   : > { %9517 = vst [vmem:[#allocation2] sm:$0xff] %v9509_v19  ;;  %v3140_v61 = vpop.xlane.xlu1 %3139  ;;  %v3138_v26 = vpop.xlane.xlu0 %3137 }
 0x833   : > { %v8975_v3 = vrot.slane %v3138_v26, %v10863_v21  ;;  %v8980_v30 = vrot.slane %v3140_v61, %v10866_v22  ;;  %v1272_v61 = vld [vmem:[%s10757_s11 + $0x1fd8] sm:$0xff] }
 0x834   : > { %v1256_v26 = vld [vmem:[%s10757_s11 + $0x1f58] sm:$0xff] }
 0x835   : > { %v8976_v4 = vsel %vm4367_vm1, %v8975_v3, %v8971_v51  ;;  %3277 = vadd.xlane.f32.xlu1 %v1253_v62  ;;  %3245 = vadd.xlane.f32.xlu0 %v1237_v0 }
 0x836   : > { %v3144_v38 = vpop.xlane.xlu1 %3143  ;;  %v3142_v11 = vpop.xlane.xlu0 %3141  ;;  %v8981_v20 = vsel %vm4374_vm2, %v8980_v30, %v8976_v4 }
 0x837   : > { %v8985_v45 = vrot.slane %v3142_v11, %v10878_v32  ;;  %v8990_v15 = vrot.slane %v3144_v38, %v10875_v31  ;;  %v1257_v38 = vld [vmem:[%s10757_s11 + $0x1f60] sm:$0xff] }
 0x838   : > { %v1241_v11 = vld [vmem:[%s10757_s11 + $0x1ee0] sm:$0xff] }
 0x839   : > { %v8986_v23 = vsel %vm4381_vm3, %v8985_v45, %v8981_v20  ;;  %3247 = vadd.xlane.f32.xlu1 %v1238_v12  ;;  %3309 = vadd.xlane.f32.xlu0 %v1269_v14 }
 0x83a   : > { %v3148_v9 = vpop.xlane.xlu1 %3147  ;;  %v3146_v25 = vpop.xlane.xlu0 %3145  ;;  %v8991_v35 = vsel %vm4388_vm4, %v8990_v15, %v8986_v23  ;;  %v247_v15 = vld [vmem:[#allocation2 + $0x18] sm:$0xff] }
 0x83b   : > { %v8995_v29 = vrot.slane %v3146_v25, %v10890_v42  ;;  %v9000_v33 = vrot.slane %v3148_v9, %v10884_v36 }
 0x83d   : > { %v8996_v55 = vsel %vm4395_vm5, %v8995_v29, %v8991_v35  ;;  %3311 = vadd.xlane.f32.xlu1 %v1270_v27  ;;  %3279 = vadd.xlane.f32.xlu0 %v1254_v46  ;;  %v1242_v27 = vld [vmem:[%s10757_s11 + $0x1ee8] sm:$0xff]  ;;  %v1273_v46 = vld [vmem:[%s10757_s11 + $0x1fe0] sm:$0xff] }
 0x83e   : > { %v3152_v28 = vpop.xlane.xlu1 %3151  ;;  %v3150_v6 = vpop.xlane.xlu0 %3149  ;;  %v9001_v44 = vsel %vm4402_vm6, %v9000_v33, %v8996_v55 }
 0x83f   : > { %v9005_v41 = vrot.slane %v3150_v6, %v10908_v58  ;;  %v9010_v43 = vrot.slane %v3152_v28, %v10902_v54 }
 0x841   : > { %v9006_v48 = vsel %vm4409_vm7, %v9005_v41, %v9001_v44  ;;  %3281 = vadd.xlane.f32.xlu1 %v1255_v60  ;;  %3249 = vadd.xlane.f32.xlu0 %v1239_v40  ;;  %v1274_v60 = vld [vmem:[%s10757_s11 + $0x1fe8] sm:$0xff] }
 0x842   : > { %v3156_v49 = vpop.xlane.xlu1 %3155  ;;  %v3154_v5 = vpop.xlane.xlu0 %3153  ;;  %v9011_v56 = vsel %vm4416_vm8, %v9010_v43, %v9006_v48  ;;  %v1258_v40 = vld [vmem:[%s10757_s11 + $0x1f68] sm:$0xff] }
 0x843   : > { %v9015_v10 = vrot.slane %v3154_v5, %v10922_v7  ;;  %v9020_v53 = vrot.slane %v3156_v49, %v10916_v2  ;;  %v1259_v5 = vld [vmem:[%s10757_s11 + $0x1f70] sm:$0xff] }
 0x845   : > { %v9016_v19 = vsel %vm4423_vm9, %v9015_v10, %v9011_v56  ;;  %3251 = vadd.xlane.f32.xlu1 %v1240_v50  ;;  %3313 = vadd.xlane.f32.xlu0 %v1271_v52  ;;  %v1243_v50 = vld [vmem:[%s10757_s11 + $0x1ef0] sm:$0xff] }
 0x846   : > { %v3160_v57 = vpop.xlane.xlu1 %3159  ;;  %v3158_v59 = vpop.xlane.xlu0 %3157  ;;  %v9021_v3 = vsel %vm4430_vm10, %v9020_v53, %v9016_v19 }
 0x847   : > { %v9025_v62 = vrot.slane %v3158_v59, %v10936_v24  ;;  %v9030_v0 = vrot.slane %v3160_v57, %v10930_v16  ;;  %v1244_v59 = vld [vmem:[%s10757_s11 + $0x1ef8] sm:$0xff] }
 0x849   : > { %v9026_v51 = vsel %vm4437_vm11, %v9025_v62, %v9021_v3  ;;  %3315 = vadd.xlane.f32.xlu1 %v1272_v61  ;;  %3283 = vadd.xlane.f32.xlu0 %v1256_v26  ;;  %v1275_v61 = vld [vmem:[%s10757_s11 + $0x1ff0] sm:$0xff] }
 0x84a   : > { %v3164_v30 = vpop.xlane.xlu1 %3163  ;;  %v3162_v4 = vpop.xlane.xlu0 %3161  ;;  %v9031_v45 = vsel %vm4444_vm12, %v9030_v0, %v9026_v51 }
 0x84b   : > { %v9040_v12 = vrot.slane %v3164_v30, %v10944_v34  ;;  %v9035_v14 = vrot.slane %v3162_v4, %v10949_v37  ;;  %v1276_v4 = vld [vmem:[%s10757_s11 + $0x1ff8] sm:$0xff] }
 0x84d   : > { %v9036_v20 = vsel %vm4451_vm13, %v9035_v14, %v9031_v45  ;;  %3285 = vadd.xlane.f32.xlu1 %v1257_v38  ;;  %3253 = vadd.xlane.f32.xlu0 %v1241_v11  ;;  %v1260_v38 = vld [vmem:[%s10757_s11 + $0x1f78] sm:$0xff] }
 0x84e   : > { %v9041_v23 = vsel %vm4458_vm14, %v9040_v12, %v9036_v20  ;;  %v3168_v9 = vpop.xlane.xlu1 %3167  ;;  %v3166_v25 = vpop.xlane.xlu0 %3165 }
 0x84f   : > { %v9464_v29 = vsel %vm9449_vm15, %v9041_v23, %v13497_v63  ;;  %v9049_v35 = vrot.slane %v3168_v9, %v10858_v18  ;;  %v9045_v55 = vrot.slane %v3166_v25, %v10855_v17 }
 0x850   : > { %v9510_v33 = vadd.f32 %v9464_v29, %v247_v15 }
 0x851   : > { %3255 = vadd.xlane.f32.xlu1 %v1242_v27  ;;  %3317 = vadd.xlane.f32.xlu0 %v1273_v46  ;;  %v9050_v43 = vsel %vm4360_vm0, %v9049_v35, %v9045_v55 }
 0x852   : > { %9518 = vst [vmem:[#allocation2 + $0x18] sm:$0xff] %v9510_v33  ;;  %v3172_v28 = vpop.xlane.xlu1 %3171  ;;  %v3170_v6 = vpop.xlane.xlu0 %3169 }
 0x853   : > { %v9054_v41 = vrot.slane %v3170_v6, %v10863_v21  ;;  %v9059_v63 = vrot.slane %v3172_v28, %v10866_v22 }
 0x855   : > { %v9055_v44 = vsel %vm4367_vm1, %v9054_v41, %v9050_v43  ;;  %3319 = vadd.xlane.f32.xlu1 %v1274_v60  ;;  %3287 = vadd.xlane.f32.xlu0 %v1258_v40 }
 0x856   : > { %v3176_v48 = vpop.xlane.xlu1 %3175  ;;  %v3174_v49 = vpop.xlane.xlu0 %3173  ;;  %v9060_v53 = vsel %vm4374_vm2, %v9059_v63, %v9055_v44  ;;  %v248_v63 = vld [vmem:[#allocation2 + $0x10] sm:$0xff] }
 0x857   : > { %v9064_v52 = vrot.slane %v3174_v49, %v10878_v32  ;;  %v9069_v10 = vrot.slane %v3176_v48, %v10875_v31 }
 0x859   : > { %v9065_v56 = vsel %vm4381_vm3, %v9064_v52, %v9060_v53  ;;  %3289 = vadd.xlane.f32.xlu1 %v1259_v5  ;;  %3257 = vadd.xlane.f32.xlu0 %v1243_v50 }
 0x85a   : > { %v3180_v19 = vpop.xlane.xlu1 %3179  ;;  %v3178_v57 = vpop.xlane.xlu0 %3177  ;;  %v9070_v0 = vsel %vm4388_vm4, %v9069_v10, %v9065_v56 }
 0x85b   : > { %v9074_v26 = vrot.slane %v3178_v57, %v10890_v42  ;;  %v9079_v62 = vrot.slane %v3180_v19, %v10884_v36 }
 0x85d   : > { %v9075_v3 = vsel %vm4395_vm5, %v9074_v26, %v9070_v0  ;;  %3259 = vadd.xlane.f32.xlu1 %v1244_v59  ;;  %3321 = vadd.xlane.f32.xlu0 %v1275_v61 }
 0x85e   : > { %v3184_v51 = vpop.xlane.xlu1 %3183  ;;  %v3182_v30 = vpop.xlane.xlu0 %3181  ;;  %v9080_v14 = vsel %vm4402_vm6, %v9079_v62, %v9075_v3 }
 0x85f   : > { %v9084_v11 = vrot.slane %v3182_v30, %v10908_v58  ;;  %v9089_v12 = vrot.slane %v3184_v51, %v10902_v54 }
 0x861   : > { %v9085_v45 = vsel %vm4409_vm7, %v9084_v11, %v9080_v14  ;;  %3323 = vadd.xlane.f32.xlu1 %v1276_v4  ;;  %3291 = vadd.xlane.f32.xlu0 %v1260_v38 }
 0x862   : > { %v3188_v15 = vpop.xlane.xlu1 %3187  ;;  %v3186_v20 = vpop.xlane.xlu0 %3185  ;;  %v9090_v25 = vsel %vm4416_vm8, %v9089_v12, %v9085_v45 }
 0x863   : > { %v9094_v23 = vrot.slane %v3186_v20, %v10922_v7  ;;  %v9099_v9 = vrot.slane %v3188_v15, %v10916_v2 }
 0x865   : > { %v9095_v27 = vsel %vm4423_vm9, %v9094_v23, %v9090_v25 }
 0x866   : > { %v3192_v46 = vpop.xlane.xlu1 %3191  ;;  %v3190_v29 = vpop.xlane.xlu0 %3189  ;;  %v9100_v55 = vsel %vm4430_vm10, %v9099_v9, %v9095_v27 }
 0x867   : > { %v9104_v33 = vrot.slane %v3190_v29, %v10936_v24  ;;  %v9109_v35 = vrot.slane %v3192_v46, %v10930_v16 }
 0x869   : > { %v9105_v28 = vsel %vm4437_vm11, %v9104_v33, %v9100_v55 }
 0x86a   : > { %v3196_v6 = vpop.xlane.xlu1 %3195  ;;  %v3194_v60 = vpop.xlane.xlu0 %3193  ;;  %v9110_v43 = vsel %vm4444_vm12, %v9109_v35, %v9105_v28 }
 0x86b   : > { %v9119_v40 = vrot.slane %v3196_v6, %v10944_v34  ;;  %v9114_v41 = vrot.slane %v3194_v60, %v10949_v37 }
 0x86d   : > { %v9115_v44 = vsel %vm4451_vm13, %v9114_v41, %v9110_v43 }
 0x86e   : > { %v9120_v48 = vsel %vm4458_vm14, %v9119_v40, %v9115_v44  ;;  %v3200_v49 = vpop.xlane.xlu1 %3199  ;;  %v3198_v5 = vpop.xlane.xlu0 %3197 }
 0x86f   : > { %v9471_v50 = vsel %vm9449_vm15, %v9120_v48, %v13548_v47  ;;  %v9128_v10 = vrot.slane %v3200_v49, %v10858_v18  ;;  %v9124_v53 = vrot.slane %v3198_v5, %v10855_v17 }
 0x870   : > { %v9511_v52 = vadd.f32 %v9471_v50, %v248_v63 }
 0x871   : > { %v9129_v59 = vsel %vm4360_vm0, %v9128_v10, %v9124_v53 }
 0x872   : > { %9519 = vst [vmem:[#allocation2 + $0x10] sm:$0xff] %v9511_v52  ;;  %v3204_v56 = vpop.xlane.xlu1 %3203  ;;  %v3202_v19 = vpop.xlane.xlu0 %3201  ;;  %v249_v52 = vld [vmem:[#allocation2 + $0x8] sm:$0xff] }
 0x873   : > { %v9133_v57 = vrot.slane %v3202_v19, %v10863_v21  ;;  %v9138_v61 = vrot.slane %v3204_v56, %v10866_v22 }
 0x875   : > { %v9134_v26 = vsel %vm4367_vm1, %v9133_v57, %v9129_v59 }
 0x876   : > { %v3208_v62 = vpop.xlane.xlu1 %3207  ;;  %v3206_v0 = vpop.xlane.xlu0 %3205  ;;  %v9139_v51 = vsel %vm4374_vm2, %v9138_v61, %v9134_v26 }
 0x877   : > { %v9143_v47 = vrot.slane %v3206_v0, %v10878_v32  ;;  %v9148_v3 = vrot.slane %v3208_v62, %v10875_v31 }
 0x879   : > { %v9144_v30 = vsel %vm4381_vm3, %v9143_v47, %v9139_v51 }
 0x87a   : > { %v3212_v4 = vpop.xlane.xlu1 %3211  ;;  %v3210_v38 = vpop.xlane.xlu0 %3209  ;;  %v9149_v14 = vsel %vm4388_vm4, %v9148_v3, %v9144_v30 }
 0x87b   : > { %v9153_v11 = vrot.slane %v3210_v38, %v10890_v42  ;;  %v9158_v12 = vrot.slane %v3212_v4, %v10884_v36 }
 0x87d   : > { %v9154_v45 = vsel %vm4395_vm5, %v9153_v11, %v9149_v14 }
 0x87e   : > { %v3216_v15 = vpop.xlane.xlu1 %3215  ;;  %v3214_v20 = vpop.xlane.xlu0 %3213  ;;  %v9159_v25 = vsel %vm4402_vm6, %v9158_v12, %v9154_v45 }
 0x87f   : > { %v9163_v23 = vrot.slane %v3214_v20, %v10908_v58  ;;  %v9168_v9 = vrot.slane %v3216_v15, %v10902_v54 }
 0x881   : > { %v9164_v27 = vsel %vm4409_vm7, %v9163_v23, %v9159_v25 }
 0x882   : > { %v3220_v46 = vpop.xlane.xlu1 %3219  ;;  %v3218_v29 = vpop.xlane.xlu0 %3217  ;;  %v9169_v55 = vsel %vm4416_vm8, %v9168_v9, %v9164_v27 }
 0x883   : > { %v9173_v33 = vrot.slane %v3218_v29, %v10922_v7  ;;  %v9178_v35 = vrot.slane %v3220_v46, %v10916_v2 }
 0x885   : > { %v9174_v28 = vsel %vm4423_vm9, %v9173_v33, %v9169_v55 }
 0x886   : > { %v3224_v6 = vpop.xlane.xlu1 %3223  ;;  %v3222_v60 = vpop.xlane.xlu0 %3221  ;;  %v9179_v43 = vsel %vm4430_vm10, %v9178_v35, %v9174_v28 }
 0x887   : > { %v9183_v40 = vrot.slane %v3222_v60, %v10936_v24  ;;  %v9188_v41 = vrot.slane %v3224_v6, %v10930_v16 }
 0x889   : > { %v9184_v63 = vsel %vm4437_vm11, %v9183_v40, %v9179_v43 }
 0x88a   : > { %v3228_v44 = vpop.xlane.xlu1 %3227  ;;  %v3226_v48 = vpop.xlane.xlu0 %3225  ;;  %v9189_v50 = vsel %vm4444_vm12, %v9188_v41, %v9184_v63 }
 0x88b   : > { %v9198_v49 = vrot.slane %v3228_v44, %v10944_v34  ;;  %v9193_v5 = vrot.slane %v3226_v48, %v10949_v37 }
 0x88d   : > { %v9194_v10 = vsel %vm4451_vm13, %v9193_v5, %v9189_v50 }
 0x88e   : > { %v9199_v53 = vsel %vm4458_vm14, %v9198_v49, %v9194_v10  ;;  %v3232_v56 = vpop.xlane.xlu1 %3231  ;;  %v3230_v19 = vpop.xlane.xlu0 %3229 }
 0x88f   : > { %v9478_v57 = vsel %vm9449_vm15, %v9199_v53, %v13599_v1  ;;  %v9207_v59 = vrot.slane %v3232_v56, %v10858_v18  ;;  %v9203_v61 = vrot.slane %v3230_v19, %v10855_v17 }
 0x890   : > { %v9512_v26 = vadd.f32 %v9478_v57, %v249_v52 }
 0x891   : > { %v9208_v62 = vsel %vm4360_vm0, %v9207_v59, %v9203_v61 }
 0x892   : > { %9520 = vst [vmem:[#allocation2 + $0x8] sm:$0xff] %v9512_v26  ;;  %v3262_v0 = vpop.xlane.xlu1 %3261  ;;  %v3234_v47 = vpop.xlane.xlu0 %3233 }
 0x893   : > { %v9212_v3 = vrot.slane %v3234_v47, %v10863_v21  ;;  %v9282_v38 = vrot.slane %v3262_v0, %v10855_v17 }
 0x895   : > { %v9213_v51 = vsel %vm4367_vm1, %v9212_v3, %v9208_v62 }
 0x896   : > { %v3294_v30 = vpop.xlane.xlu1 %3293  ;;  %v3264_v4 = vpop.xlane.xlu0 %3263 }
 0x897   : > { %v9286_v1 = vrot.slane %v3264_v4, %v10858_v18  ;;  %v9361_v45 = vrot.slane %v3294_v30, %v10855_v17 }
 0x899   : > { %v9287_v11 = vsel %vm4360_vm0, %v9286_v1, %v9282_v38 }
 0x89a   : > { %v3266_v12 = vpop.xlane.xlu1 %3265  ;;  %v3296_v14 = vpop.xlane.xlu0 %3295 }
 0x89b   : > { %v9291_v15 = vrot.slane %v3266_v12, %v10863_v21  ;;  %v9365_v20 = vrot.slane %v3296_v14, %v10858_v18 }
 0x89d   : > { %v9292_v23 = vsel %vm4367_vm1, %v9291_v15, %v9287_v11  ;;  %v9366_v9 = vsel %vm4360_vm0, %v9365_v20, %v9361_v45 }
 0x89e   : > { %v3236_v25 = vpop.xlane.xlu1 %3235  ;;  %v3298_v27 = vpop.xlane.xlu0 %3297 }
 0x89f   : > { %v9217_v61 = vrot.slane %v3236_v25, %v10866_v22  ;;  %v9370_v26 = vrot.slane %v3298_v27, %v10863_v21 }
 0x8a1   : > { %v9218_v11 = vsel %vm4374_vm2, %v9217_v61, %v9213_v51  ;;  %v9371_v21 = vsel %vm4367_vm1, %v9370_v26, %v9366_v9 }
 0x8a2   : > { %v3300_v46 = vpop.xlane.xlu1 %3299  ;;  %v3268_v29 = vpop.xlane.xlu0 %3267 }
 0x8a3   : > { %v9375_v47 = vrot.slane %v3300_v46, %v10866_v22  ;;  %v9296_v3 = vrot.slane %v3268_v29, %v10866_v22 }
 0x8a5   : > { %v9376_v22 = vsel %vm4374_vm2, %v9375_v47, %v9371_v21  ;;  %v9297_v20 = vsel %vm4374_vm2, %v9296_v3, %v9292_v23 }
 0x8a6   : > { %v3270_v33 = vpop.xlane.xlu1 %3269  ;;  %v3238_v35 = vpop.xlane.xlu0 %3237 }
 0x8a7   : > { %v9301_v30 = vrot.slane %v3270_v33, %v10878_v32  ;;  %v9222_v4 = vrot.slane %v3238_v35, %v10878_v32 }
 0x8a9   : > { %v9223_v51 = vsel %vm4381_vm3, %v9222_v4, %v9218_v11 }
 0x8aa   : > { %v3240_v55 = vpop.xlane.xlu1 %3239  ;;  %v3302_v28 = vpop.xlane.xlu0 %3301 }
 0x8ab   : > { %v9227_v38 = vrot.slane %v3240_v55, %v10875_v31  ;;  %v9380_v1 = vrot.slane %v3302_v28, %v10878_v32  ;;  %v9302_v32 = vsel %vm4381_vm3, %v9301_v30, %v9297_v20 }
 0x8ad   : > { %v9381_v29 = vsel %vm4381_vm3, %v9380_v1, %v9376_v22 }
 0x8ae   : > { %v3304_v6 = vpop.xlane.xlu1 %3303  ;;  %v3272_v60 = vpop.xlane.xlu0 %3271 }
 0x8af   : > { %v9385_v12 = vrot.slane %v3304_v6, %v10875_v31  ;;  %v9306_v14 = vrot.slane %v3272_v60, %v10875_v31  ;;  %v9228_v31 = vsel %vm4388_vm4, %v9227_v38, %v9223_v51 }
 0x8b1   : > { %v9386_v35 = vsel %vm4388_vm4, %v9385_v12, %v9381_v29  ;;  %v9307_v55 = vsel %vm4388_vm4, %v9306_v14, %v9302_v32 }
 0x8b2   : > { %v3274_v40 = vpop.xlane.xlu1 %3273  ;;  %v3242_v17 = vpop.xlane.xlu0 %3241 }
 0x8b3   : > { %v9311_v25 = vrot.slane %v3274_v40, %v10890_v42  ;;  %v9232_v27 = vrot.slane %v3242_v17, %v10890_v42 }
 0x8b5   : > { %v9233_v17 = vsel %vm4395_vm5, %v9232_v27, %v9228_v31 }
 0x8b6   : > { %v3244_v41 = vpop.xlane.xlu1 %3243  ;;  %v3306_v43 = vpop.xlane.xlu0 %3305 }
 0x8b7   : > { %v9237_v9 = vrot.slane %v3244_v41, %v10884_v36  ;;  %v9390_v46 = vrot.slane %v3306_v43, %v10890_v42  ;;  %v9312_v42 = vsel %vm4395_vm5, %v9311_v25, %v9307_v55 }
 0x8b9   : > { %v9238_v43 = vsel %vm4402_vm6, %v9237_v9, %v9233_v17 }
 0x8ba   : > { %v3308_v63 = vpop.xlane.xlu1 %3307  ;;  %v3276_v18 = vpop.xlane.xlu0 %3275 }
 0x8bb   : > { %v9395_v33 = vrot.slane %v3308_v63, %v10884_v36  ;;  %v9316_v23 = vrot.slane %v3276_v18, %v10884_v36  ;;  %v9391_v63 = vsel %vm4395_vm5, %v9390_v46, %v9386_v35 }
 0x8bd   : > { %v9317_v61 = vsel %vm4402_vm6, %v9316_v23, %v9312_v42  ;;  %v251_v42 = vld [vmem:[#allocation2 + $0x28] sm:$0xff] }
 0x8be   : > { %v3278_v44 = vpop.xlane.xlu1 %3277  ;;  %v3246_v48 = vpop.xlane.xlu0 %3245 }
 0x8bf   : > { %v9321_v28 = vrot.slane %v3278_v44, %v10908_v58  ;;  %v9242_v6 = vrot.slane %v3246_v48, %v10908_v58  ;;  %v9396_v48 = vsel %vm4402_vm6, %v9395_v33, %v9391_v63 }
 0x8c1   : > { %v9243_v26 = vsel %vm4409_vm7, %v9242_v6, %v9238_v43 }
 0x8c2   : > { %v13988_v49 = vpop.xlane.xlu1 %3247  ;;  %v13990_v5 = vpop.xlane.xlu0 %3309 }
 0x8c3   : > { %v9247_v41 = vrot.slane %v13988_v49, %v10902_v54  ;;  %v9400_v36 = vrot.slane %v13990_v5, %v10908_v58  ;;  %v9322_v5 = vsel %vm4409_vm7, %v9321_v28, %v9317_v61 }
 0x8c5   : > { %v9248_v30 = vsel %vm4416_vm8, %v9247_v41, %v9243_v26  ;;  %v9401_v4 = vsel %vm4409_vm7, %v9400_v36, %v9396_v48 }
 0x8c6   : > { %v13992_v50 = vpop.xlane.xlu1 %3311  ;;  %v13994_v52 = vpop.xlane.xlu0 %3279 }
 0x8c7   : > { %v9405_v18 = vrot.slane %v13992_v50, %v10902_v54  ;;  %v9326_v49 = vrot.slane %v13994_v52, %v10902_v54 }
 0x8c9   : > { %v9327_v1 = vsel %vm4416_vm8, %v9326_v49, %v9322_v5 }
 0x8ca   : > { %v13996_v10 = vpop.xlane.xlu1 %3281  ;;  %v13998_v53 = vpop.xlane.xlu0 %3249 }
 0x8cb   : > { %v9252_v44 = vrot.slane %v13998_v53, %v10922_v7  ;;  %v9331_v50 = vrot.slane %v13996_v10, %v10922_v7 }
 0x8cd   : > { %v9253_v38 = vsel %vm4423_vm9, %v9252_v44, %v9248_v30 }
 0x8ce   : > { %v14000_v56 = vpop.xlane.xlu1 %3251  ;;  %v14002_v19 = vpop.xlane.xlu0 %3313 }
 0x8cf   : > { %v9257_v58 = vrot.slane %v14000_v56, %v10916_v2  ;;  %v9410_v54 = vrot.slane %v14002_v19, %v10922_v7  ;;  %v9406_v56 = vsel %vm4416_vm8, %v9405_v18, %v9401_v4  ;;  %v9332_v19 = vsel %vm4423_vm9, %v9331_v50, %v9327_v1 }
 0x8d1   : > { %v9258_v11 = vsel %vm4430_vm10, %v9257_v58, %v9253_v38  ;;  %v9411_v20 = vsel %vm4423_vm9, %v9410_v54, %v9406_v56 }
 0x8d2   : > { %v14004_v57 = vpop.xlane.xlu1 %3315  ;;  %v14006_v59 = vpop.xlane.xlu0 %3283 }
 0x8d3   : > { %v9415_v10 = vrot.slane %v14004_v57, %v10916_v2  ;;  %v9336_v21 = vrot.slane %v14006_v59, %v10916_v2 }
 0x8d5   : > { %v9337_v51 = vsel %vm4430_vm10, %v9336_v21, %v9332_v19 }
 0x8d6   : > { %v14010_v62 = vpop.xlane.xlu1 %3285  ;;  %v14012_v0 = vpop.xlane.xlu0 %3253 }
 0x8d7   : > { %v9262_v53 = vrot.slane %v14012_v0, %v10936_v24  ;;  %v9341_v12 = vrot.slane %v14010_v62, %v10936_v24  ;;  %v250_v62 = vld [vmem:[#allocation2 + $0x20] sm:$0xff] }
 0x8d9   : > { %v9263_v14 = vsel %vm4437_vm11, %v9262_v53, %v9258_v11  ;;  %v9342_v31 = vsel %vm4437_vm11, %v9341_v12, %v9337_v51 }
 0x8da   : > { %v3256_v45 = vpop.xlane.xlu1 %3255  ;;  %v14024_v15 = vpop.xlane.xlu0 %3317 }
 0x8db   : > { %v9267_v52 = vrot.slane %v3256_v45, %v10930_v16  ;;  %v9420_v7 = vrot.slane %v14024_v15, %v10936_v24  ;;  %v9416_v15 = vsel %vm4430_vm10, %v9415_v10, %v9411_v20 }
 0x8dd   : > { %v9268_v25 = vsel %vm4444_vm12, %v9267_v52, %v9263_v14  ;;  %v9421_v9 = vsel %vm4437_vm11, %v9420_v7, %v9416_v15 }
 0x8de   : > { %v3320_v60 = vpop.xlane.xlu1 %3319  ;;  %v3288_v40 = vpop.xlane.xlu0 %3287 }
 0x8df   : > { %v9425_v57 = vrot.slane %v3320_v60, %v10930_v16  ;;  %v9346_v2 = vrot.slane %v3288_v40, %v10930_v16  ;;  %v252_v40 = vld [vmem:[#allocation2 + $0x38] sm:$0xff] }
 0x8e1   : > { %v9426_v16 = vsel %vm4444_vm12, %v9425_v57, %v9421_v9  ;;  %v9347_v35 = vsel %vm4444_vm12, %v9346_v2, %v9342_v31 }
 0x8e2   : > { %v3290_v47 = vpop.xlane.xlu1 %3289  ;;  %v3258_v3 = vpop.xlane.xlu0 %3257 }
 0x8e3   : > { %v9272_v0 = vrot.slane %v3258_v3, %v10949_v37  ;;  %v9351_v27 = vrot.slane %v3290_v47, %v10949_v37 }
 0x8e5   : > { %v9273_v24 = vsel %vm4451_vm13, %v9272_v0, %v9268_v25  ;;  %v9352_v6 = vsel %vm4451_vm13, %v9351_v27, %v9347_v35 }
 0x8e6   : > { %v3260_v45 = vpop.xlane.xlu1 %3259  ;;  %v3322_v22 = vpop.xlane.xlu0 %3321 }
 0x8e7   : > { %v9277_v59 = vrot.slane %v3260_v45, %v10944_v34  ;;  %v9430_v32 = vrot.slane %v3322_v22, %v10949_v37 }
 0x8e9   : > { %v9278_v46 = vsel %vm4458_vm14, %v9277_v59, %v9273_v24  ;;  %v9431_v60 = vsel %vm4451_vm13, %v9430_v32, %v9426_v16 }
 0x8ea   : > { %v9485_v29 = vsel %vm9449_vm15, %v9278_v46, %v13652_v39  ;;  %v3324_v33 = vpop.xlane.xlu1 %3323  ;;  %v3292_v23 = vpop.xlane.xlu0 %3291 }
 0x8eb   : > { %v9513_v55 = vadd.f32 %v9485_v29, %v250_v62  ;;  %v9435_v37 = vrot.slane %v3324_v33, %v10944_v34  ;;  %v9356_v28 = vrot.slane %v3292_v23, %v10944_v34 }
 0x8ed   : > { %9521 = vst [vmem:[#allocation2 + $0x20] sm:$0xff] %v9513_v55  ;;  %v9436_v17 = vsel %vm4458_vm14, %v9435_v37, %v9431_v60  ;;  %v9357_v39 = vsel %vm4458_vm14, %v9356_v28, %v9352_v6  ;;  %9527 = sbr.rel (%p10084_p6) target bundleno = 2561 (0xa01), region = 52 }
 0x8ee   : > { %v9499_v41 = vsel %vm9449_vm15, %v9436_v17, %v13752_v13  ;;  %v9492_v36 = vsel %vm9449_vm15, %v9357_v39, %v13703_v8 }
 0x8ef   : > { %v9515_v43 = vadd.f32 %v9499_v41, %v252_v40  ;;  %v9514_v63 = vadd.f32 %v9492_v36, %v251_v42 }
 0x8f1   : > { %9523 = vst [vmem:[#allocation2 + $0x38] sm:$0xff] %v9515_v43  ;;  %9522 = vst [vmem:[#allocation2 + $0x28] sm:$0xff] %v9514_v63 }
 0x8f2   : > { %v9567_v34 = vld [vmem:[#allocation6 + $0xf8] sm:$0xff]  ;;  %v9566_v61 = vld [vmem:[#allocation6 + $0xf0] sm:$0xff]  ;;  %v9565_v8 = vld [vmem:[#allocation6 + $0xe8] sm:$0xff] }
 0x8f3   : > { %v9599_v18 = vld [vmem:[#allocation6 + $0x1f8] sm:$0xff]  ;;  %10091 = vmatprep.subr.mxu0 %v9567_v34  ;;  %v9598_v49 = vld [vmem:[#allocation6 + $0x1f0] sm:$0xff]  ;;  %v9597_v5 = vld [vmem:[#allocation6 + $0x1e8] sm:$0xff] }
 0x8f4   : > { %v9551_v44 = vld [vmem:[#allocation6 + $0x78] sm:$0xff]  ;;  %10126 = vmatprep.subr.mxu1 %v9599_v18  ;;  %v9550_v13 = vld [vmem:[#allocation6 + $0x70] sm:$0xff]  ;;  %v9549_v26 = vld [vmem:[#allocation6 + $0x68] sm:$0xff] }
 0x8f5   : > { %v9583_v48 = vld [vmem:[#allocation6 + $0x178] sm:$0xff]  ;;  %10092 = vmatpush3.msra.mxu0 %v9551_v44  ;;  %v9582_v58 = vld [vmem:[#allocation6 + $0x170] sm:$0xff]  ;;  %v9581_v50 = vld [vmem:[#allocation6 + $0x168] sm:$0xff] }
 0x8f6   : > { %10127 = vmatpush3.msra.mxu1 %v9583_v48  ;;  %10093 = vmatprep.subr.mxu0 %v9566_v61  ;;  %v9564_v53 = vld [vmem:[#allocation6 + $0xe0] sm:$0xff]  ;;  %v9563_v4 = vld [vmem:[#allocation6 + $0xd8] sm:$0xff]  ;;  %v9562_v38 = vld [vmem:[#allocation6 + $0xd0] sm:$0xff] }
 0x8f7   : > { %10128 = vmatprep.subr.mxu1 %v9598_v49  ;;  %10094 = vmatpush3.msra.mxu0 %v9550_v13  ;;  %v9596_v47 = vld [vmem:[#allocation6 + $0x1e0] sm:$0xff]  ;;  %v9595_v54 = vld [vmem:[#allocation6 + $0x1d8] sm:$0xff]  ;;  %v9594_v10 = vld [vmem:[#allocation6 + $0x1d0] sm:$0xff] }
 0x8f8   : > { %10129 = vmatpush3.msra.mxu1 %v9582_v58  ;;  %10095 = vmatprep.subr.mxu0 %v9565_v8  ;;  %v9548_v3 = vld [vmem:[#allocation6 + $0x60] sm:$0xff]  ;;  %v9547_v52 = vld [vmem:[#allocation6 + $0x58] sm:$0xff]  ;;  %v9546_v0 = vld [vmem:[#allocation6 + $0x50] sm:$0xff] }
 0x8f9   : > { %10130 = vmatprep.subr.mxu1 %v9597_v5  ;;  %v9580_v30 = vld [vmem:[#allocation6 + $0x160] sm:$0xff]  ;;  %10096 = vmatpush3.msra.mxu0 %v9549_v26  ;;  %v9579_v56 = vld [vmem:[#allocation6 + $0x158] sm:$0xff]  ;;  %v9578_v1 = vld [vmem:[#allocation6 + $0x150] sm:$0xff] }
 0x8fa   : > { %10131 = vmatpush3.msra.mxu1 %v9581_v50  ;;  %10097 = vmatprep.subr.mxu0 %v9564_v53  ;;  %v9561_v11 = vld [vmem:[#allocation6 + $0xc8] sm:$0xff]  ;;  %v9560_v12 = vld [vmem:[#allocation6 + $0xc0] sm:$0xff]  ;;  %v9559_v22 = vld [vmem:[#allocation6 + $0xb8] sm:$0xff] }
 0x8fb   : > { %10132 = vmatprep.subr.mxu1 %v9596_v47  ;;  %10098 = vmatpush3.msra.mxu0 %v9548_v3  ;;  %v9593_v21 = vld [vmem:[#allocation6 + $0x1c8] sm:$0xff]  ;;  %v9592_v14 = vld [vmem:[#allocation6 + $0x1c0] sm:$0xff]  ;;  %v9591_v20 = vld [vmem:[#allocation6 + $0x1b8] sm:$0xff] }
 0x8fc   : > { %10133 = vmatpush3.msra.mxu1 %v9580_v30  ;;  %10099 = vmatprep.subr.mxu0 %v9563_v4  ;;  %v9545_v7 = vld [vmem:[#allocation6 + $0x48] sm:$0xff]  ;;  %v9544_v57 = vld [vmem:[#allocation6 + $0x40] sm:$0xff]  ;;  %v9543_v25 = vld [vmem:[#allocation6 + $0x38] sm:$0xff] }
 0x8fd   : > { %10134 = vmatprep.subr.mxu1 %v9595_v54  ;;  %10100 = vmatpush3.msra.mxu0 %v9547_v52  ;;  %v9577_v19 = vld [vmem:[#allocation6 + $0x148] sm:$0xff]  ;;  %v9576_v45 = vld [vmem:[#allocation6 + $0x140] sm:$0xff]  ;;  %v9575_v2 = vld [vmem:[#allocation6 + $0x138] sm:$0xff] }
 0x8fe   : > { %10135 = vmatpush3.msra.mxu1 %v9579_v56  ;;  %10101 = vmatprep.subr.mxu0 %v9562_v38  ;;  %v9558_v59 = vld [vmem:[#allocation6 + $0xb0] sm:$0xff]  ;;  %v9557_v62 = vld [vmem:[#allocation6 + $0xa8] sm:$0xff]  ;;  %v9556_v46 = vld [vmem:[#allocation6 + $0xa0] sm:$0xff] }
 0x8ff   : > { %10136 = vmatprep.subr.mxu1 %v9594_v10  ;;  %10102 = vmatpush3.msra.mxu0 %v9546_v0  ;;  %v9590_v15 = vld [vmem:[#allocation6 + $0x1b0] sm:$0xff]  ;;  %v9589_v32 = vld [vmem:[#allocation6 + $0x1a8] sm:$0xff]  ;;  %v9588_v31 = vld [vmem:[#allocation6 + $0x1a0] sm:$0xff] }
 0x900   : > { %10137 = vmatpush3.msra.mxu1 %v9578_v1  ;;  %10103 = vmatprep.subr.mxu0 %v9561_v11  ;;  %v9542_v27 = vld [vmem:[#allocation6 + $0x30] sm:$0xff]  ;;  %v9541_v51 = vld [vmem:[#allocation6 + $0x28] sm:$0xff]  ;;  %v9540_v16 = vld [vmem:[#allocation6 + $0x20] sm:$0xff] }
 0x901   : > { %10138 = vmatprep.subr.mxu1 %v9593_v21  ;;  %10104 = vmatpush3.msra.mxu0 %v9545_v7  ;;  %v9574_v24 = vld [vmem:[#allocation6 + $0x130] sm:$0xff]  ;;  %v9573_v9 = vld [vmem:[#allocation6 + $0x128] sm:$0xff]  ;;  %v9572_v29 = vld [vmem:[#allocation6 + $0x120] sm:$0xff] }
 0x902   : > { %10139 = vmatpush3.msra.mxu1 %v9577_v19  ;;  %10105 = vmatprep.subr.mxu0 %v9560_v12  ;;  %v9555_v33 = vld [vmem:[#allocation6 + $0x98] sm:$0xff]  ;;  %v9554_v37 = vld [vmem:[#allocation6 + $0x90] sm:$0xff]  ;;  %v9553_v40 = vld [vmem:[#allocation6 + $0x88] sm:$0xff] }
 0x903   : > { %10140 = vmatprep.subr.mxu1 %v9592_v14  ;;  %10106 = vmatpush3.msra.mxu0 %v9544_v57  ;;  %v9587_v23 = vld [vmem:[#allocation6 + $0x198] sm:$0xff]  ;;  %v9586_v28 = vld [vmem:[#allocation6 + $0x190] sm:$0xff]  ;;  %v9585_v42 = vld [vmem:[#allocation6 + $0x188] sm:$0xff] }
 0x904   : > { %10141 = vmatpush3.msra.mxu1 %v9576_v45  ;;  %10107 = vmatprep.subr.mxu0 %v9559_v22  ;;  %v9539_v35 = vld [vmem:[#allocation6 + $0x18] sm:$0xff]  ;;  %v9538_v6 = vld [vmem:[#allocation6 + $0x10] sm:$0xff]  ;;  %v9537_v17 = vld [vmem:[#allocation6 + $0x8] sm:$0xff] }
 0x905   : > { %10142 = vmatprep.subr.mxu1 %v9591_v20  ;;  %10108 = vmatpush3.msra.mxu0 %v9543_v25  ;;  %v9571_v55 = vld [vmem:[#allocation6 + $0x118] sm:$0xff]  ;;  %v9570_v60 = vld [vmem:[#allocation6 + $0x110] sm:$0xff]  ;;  %v9569_v39 = vld [vmem:[#allocation6 + $0x108] sm:$0xff] }
 0x906   : > { %10143 = vmatpush3.msra.mxu1 %v9575_v2  ;;  %10109 = vmatprep.subr.mxu0 %v9558_v59  ;;  %v9552_v41 = vld [vmem:[#allocation6 + $0x80] sm:$0xff]  ;;  %v9528_v18 = vld [vmem:[#allocation2 + $0x30] sm:$0xff]  ;;  %v9631_v48 = vld [vmem:[#allocation6 + $0x2f8] sm:$0xff] }
 0x907   : > { %10144 = vmatprep.subr.mxu1 %v9590_v15  ;;  %10110 = vmatpush3.msra.mxu0 %v9542_v27  ;;  %v9584_v36 = vld [vmem:[#allocation6 + $0x180] sm:$0xff]  ;;  %v9531_v44 = vld [vmem:[#allocation2 + $0x10] sm:$0xff]  ;;  %v9663_v61 = vld [vmem:[#allocation6 + $0x3f8] sm:$0xff] }
 0x908   : > { %10145 = vmatpush3.msra.mxu1 %v9574_v24  ;;  %10111 = vmatprep.subr.mxu0 %v9557_v62  ;;  %v9536_v43 = vld [vmem:[#allocation6] sm:$0xff]  ;;  %v9530_v49 = vld [vmem:[#allocation2 + $0x18] sm:$0xff]  ;;  %v9630_v8 = vld [vmem:[#allocation6 + $0x2f0] sm:$0xff] }
 0x909   : > { %10146 = vmatprep.subr.mxu1 %v9589_v32  ;;  %10112 = vmatpush3.msra.mxu0 %v9541_v51  ;;  %v9529_v63 = vld [vmem:[#allocation2] sm:$0xff]  ;;  %v9615_v13 = vld [vmem:[#allocation6 + $0x278] sm:$0xff]  ;;  %v9662_v5 = vld [vmem:[#allocation6 + $0x3f0] sm:$0xff] }
 0x90a   : > { %10147 = vmatpush3.msra.mxu1 %v9573_v9  ;;  %10113 = vmatprep.subr.mxu0 %v9556_v46  ;;  %v9568_v34 = vld [vmem:[#allocation6 + $0x100] sm:$0xff]  ;;  %v9647_v58 = vld [vmem:[#allocation6 + $0x378] sm:$0xff]  ;;  %v9614_v26 = vld [vmem:[#allocation6 + $0x270] sm:$0xff] }
 0x90b   : > { %10148 = vmatprep.subr.mxu1 %v9588_v31  ;;  %10114 = vmatpush3.msra.mxu0 %v9540_v16  ;;  %v9646_v50 = vld [vmem:[#allocation6 + $0x370] sm:$0xff]  ;;  %v9629_v53 = vld [vmem:[#allocation6 + $0x2e8] sm:$0xff]  ;;  %v9628_v4 = vld [vmem:[#allocation6 + $0x2e0] sm:$0xff] }
 0x90c   : > { %10149 = vmatpush3.msra.mxu1 %v9572_v29  ;;  %10115 = vmatprep.subr.mxu0 %v9555_v33  ;;  %v9661_v47 = vld [vmem:[#allocation6 + $0x3e8] sm:$0xff]  ;;  %v9660_v54 = vld [vmem:[#allocation6 + $0x3e0] sm:$0xff]  ;;  %v9627_v38 = vld [vmem:[#allocation6 + $0x2d8] sm:$0xff] }
 0x90d   : > { %10150 = vmatprep.subr.mxu1 %v9587_v23  ;;  %10116 = vmatpush3.msra.mxu0 %v9539_v35  ;;  %v9613_v3 = vld [vmem:[#allocation6 + $0x268] sm:$0xff]  ;;  %v9612_v52 = vld [vmem:[#allocation6 + $0x260] sm:$0xff]  ;;  %v9659_v10 = vld [vmem:[#allocation6 + $0x3d8] sm:$0xff] }
 0x90e   : > { %10151 = vmatpush3.msra.mxu1 %v9571_v55  ;;  %10117 = vmatprep.subr.mxu0 %v9554_v37  ;;  %v9645_v30 = vld [vmem:[#allocation6 + $0x368] sm:$0xff]  ;;  %v9644_v56 = vld [vmem:[#allocation6 + $0x360] sm:$0xff]  ;;  %v9611_v0 = vld [vmem:[#allocation6 + $0x258] sm:$0xff] }
 0x90f   : > { %10152 = vmatprep.subr.mxu1 %v9586_v28  ;;  %10118 = vmatpush3.msra.mxu0 %v9538_v6  ;;  %v9643_v1 = vld [vmem:[#allocation6 + $0x358] sm:$0xff]  ;;  %v9626_v11 = vld [vmem:[#allocation6 + $0x2d0] sm:$0xff]  ;;  %v9625_v12 = vld [vmem:[#allocation6 + $0x2c8] sm:$0xff] }
 0x910   : > { %10153 = vmatpush3.msra.mxu1 %v9570_v60  ;;  %10119 = vmatprep.subr.mxu0 %v9553_v40  ;;  %v9658_v21 = vld [vmem:[#allocation6 + $0x3d0] sm:$0xff]  ;;  %v9657_v14 = vld [vmem:[#allocation6 + $0x3c8] sm:$0xff]  ;;  %v9624_v22 = vld [vmem:[#allocation6 + $0x2c0] sm:$0xff] }
 0x911   : > { %10154 = vmatprep.subr.mxu1 %v9585_v42  ;;  %10120 = vmatpush3.msra.mxu0 %v9537_v17  ;;  %v9610_v7 = vld [vmem:[#allocation6 + $0x250] sm:$0xff]  ;;  %v9609_v57 = vld [vmem:[#allocation6 + $0x248] sm:$0xff]  ;;  %v9656_v20 = vld [vmem:[#allocation6 + $0x3c0] sm:$0xff] }
 0x912   : > { %10155 = vmatpush3.msra.mxu1 %v9569_v39  ;;  %10121 = vmatprep.subr.mxu0 %v9552_v41  ;;  %v9642_v19 = vld [vmem:[#allocation6 + $0x350] sm:$0xff]  ;;  %v9641_v45 = vld [vmem:[#allocation6 + $0x348] sm:$0xff]  ;;  %v9608_v25 = vld [vmem:[#allocation6 + $0x240] sm:$0xff] }
 0x913   : > { %10156 = vmatprep.subr.mxu1 %v9584_v36  ;;  %10122 = vmatpush3.msra.mxu0 %v9536_v43  ;;  %v9640_v2 = vld [vmem:[#allocation6 + $0x340] sm:$0xff]  ;;  %v9623_v59 = vld [vmem:[#allocation6 + $0x2b8] sm:$0xff]  ;;  %v9622_v62 = vld [vmem:[#allocation6 + $0x2b0] sm:$0xff] }
 0x914   : > { %9735 = vmatprep.mubr.f32.mxu0 %v9529_v63  ;;  %10157 = vmatpush3.msra.mxu1 %v9568_v34  ;;  %v9655_v15 = vld [vmem:[#allocation6 + $0x3b8] sm:$0xff]  ;;  %v9654_v32 = vld [vmem:[#allocation6 + $0x3b0] sm:$0xff]  ;;  %v9621_v46 = vld [vmem:[#allocation6 + $0x2a8] sm:$0xff] }
 0x915   : > { %9736 = vmatmul.mubr.f32.vlgmr.msra.gmra.mxu0 %v9528_v18  ;;  %9805 = vmatprep.mubr.f32.mxu1 %v9531_v44  ;;  %v9607_v27 = vld [vmem:[#allocation6 + $0x238] sm:$0xff]  ;;  %v9606_v51 = vld [vmem:[#allocation6 + $0x230] sm:$0xff]  ;;  %v9653_v31 = vld [vmem:[#allocation6 + $0x3a8] sm:$0xff] }
 0x916   : > { %10161 = vmatprep.subr.mxu0 %v9631_v48  ;;  %10196 = vmatprep.subr.mxu1 %v9663_v61  ;;  %v9639_v24 = vld [vmem:[#allocation6 + $0x338] sm:$0xff]  ;;  %v9638_v9 = vld [vmem:[#allocation6 + $0x330] sm:$0xff]  ;;  %v9605_v16 = vld [vmem:[#allocation6 + $0x228] sm:$0xff] }
 0x917   : > { %9806 = vmatmul.mubr.f32.vlgmr.msra.gmra.mxu1 %v9530_v49  ;;  %10162 = vmatpush3.msra.mxu0 %v9615_v13  ;;  %v9637_v29 = vld [vmem:[#allocation6 + $0x328] sm:$0xff]  ;;  %v9620_v33 = vld [vmem:[#allocation6 + $0x2a0] sm:$0xff]  ;;  %v9619_v37 = vld [vmem:[#allocation6 + $0x298] sm:$0xff] }
 0x918   : > { %10197 = vmatpush3.msra.mxu1 %v9647_v58  ;;  %10163 = vmatprep.subr.mxu0 %v9630_v8  ;;  %v9652_v23 = vld [vmem:[#allocation6 + $0x3a0] sm:$0xff]  ;;  %v9651_v28 = vld [vmem:[#allocation6 + $0x398] sm:$0xff]  ;;  %v9618_v40 = vld [vmem:[#allocation6 + $0x290] sm:$0xff] }
 0x919   : > { %10198 = vmatprep.subr.mxu1 %v9662_v5  ;;  %10164 = vmatpush3.msra.mxu0 %v9614_v26  ;;  %v9604_v35 = vld [vmem:[#allocation6 + $0x220] sm:$0xff]  ;;  %v9603_v6 = vld [vmem:[#allocation6 + $0x218] sm:$0xff]  ;;  %v9650_v42 = vld [vmem:[#allocation6 + $0x390] sm:$0xff] }
 0x91a   : > { %10199 = vmatpush3.msra.mxu1 %v9646_v50  ;;  %10165 = vmatprep.subr.mxu0 %v9629_v53  ;;  %v9636_v55 = vld [vmem:[#allocation6 + $0x320] sm:$0xff]  ;;  %v9635_v60 = vld [vmem:[#allocation6 + $0x318] sm:$0xff]  ;;  %v9602_v17 = vld [vmem:[#allocation6 + $0x210] sm:$0xff] }
 0x91b   : > { %10200 = vmatprep.subr.mxu1 %v9661_v47  ;;  %10166 = vmatpush3.msra.mxu0 %v9613_v3  ;;  %v9634_v39 = vld [vmem:[#allocation6 + $0x310] sm:$0xff]  ;;  %v9617_v41 = vld [vmem:[#allocation6 + $0x288] sm:$0xff]  ;;  %v9616_v34 = vld [vmem:[#allocation6 + $0x280] sm:$0xff] }
 0x91c   : > { %10201 = vmatpush3.msra.mxu1 %v9645_v30  ;;  %10167 = vmatprep.subr.mxu0 %v9628_v4  ;;  %v9649_v36 = vld [vmem:[#allocation6 + $0x388] sm:$0xff]  ;;  %v9648_v18 = vld [vmem:[#allocation6 + $0x380] sm:$0xff]  ;;  %v9535_v49 = vld [vmem:[#allocation2 + $0x38] sm:$0xff] }
 0x91d   : > { %10202 = vmatprep.subr.mxu1 %v9660_v54  ;;  %10168 = vmatpush3.msra.mxu0 %v9612_v52  ;;  %v9601_v43 = vld [vmem:[#allocation6 + $0x208] sm:$0xff]  ;;  %v9600_v44 = vld [vmem:[#allocation6 + $0x200] sm:$0xff] }
 0x91e   : > { %10203 = vmatpush3.msra.mxu1 %v9644_v56  ;;  %10169 = vmatprep.subr.mxu0 %v9627_v38  ;;  %v9633_v63 = vld [vmem:[#allocation6 + $0x308] sm:$0xff]  ;;  %v9533_v48 = vld [vmem:[#allocation2 + $0x20] sm:$0xff] }
 0x91f   : > { %10204 = vmatprep.subr.mxu1 %v9659_v10  ;;  %10170 = vmatpush3.msra.mxu0 %v9611_v0  ;;  %v9632_v61 = vld [vmem:[#allocation6 + $0x300] sm:$0xff]  ;;  %v9532_v13 = vld [vmem:[#allocation2 + $0x8] sm:$0xff] }
 0x920   : > { %10205 = vmatpush3.msra.mxu1 %v9643_v1  ;;  %10171 = vmatprep.subr.mxu0 %v9626_v11  ;;  %v9534_v58 = vld [vmem:[#allocation2 + $0x28] sm:$0xff]  ;;  %v10085_v53 = vld [vmem:[#allocation8] ss:$0 sm:$0xff] }
 0x921   : > { %10206 = vmatprep.subr.mxu1 %v9658_v21  ;;  %10172 = vmatpush3.msra.mxu0 %v9610_v7 }
 0x922   : > { %10207 = vmatpush3.msra.mxu1 %v9642_v19  ;;  %10173 = vmatprep.subr.mxu0 %v9625_v12 }
 0x923   : > { %10208 = vmatprep.subr.mxu1 %v9657_v14  ;;  %10174 = vmatpush3.msra.mxu0 %v9609_v57 }
 0x924   : > { %10209 = vmatpush3.msra.mxu1 %v9641_v45  ;;  %10175 = vmatprep.subr.mxu0 %v9624_v22 }
 0x925   : > { %10210 = vmatprep.subr.mxu1 %v9656_v20  ;;  %10176 = vmatpush3.msra.mxu0 %v9608_v25 }
 0x926   : > { %10211 = vmatpush3.msra.mxu1 %v9640_v2  ;;  %10177 = vmatprep.subr.mxu0 %v9623_v59 }
 0x927   : > { %10212 = vmatprep.subr.mxu1 %v9655_v15  ;;  %10178 = vmatpush3.msra.mxu0 %v9607_v27 }
 0x928   : > { %10213 = vmatpush3.msra.mxu1 %v9639_v24  ;;  %10179 = vmatprep.subr.mxu0 %v9622_v62 }
 0x929   : > { %10214 = vmatprep.subr.mxu1 %v9654_v32  ;;  %10180 = vmatpush3.msra.mxu0 %v9606_v51 }
 0x92a   : > { %10215 = vmatpush3.msra.mxu1 %v9638_v9  ;;  %10181 = vmatprep.subr.mxu0 %v9621_v46 }
 0x92b   : > { %10216 = vmatprep.subr.mxu1 %v9653_v31  ;;  %10182 = vmatpush3.msra.mxu0 %v9605_v16 }
 0x92c   : > { %10217 = vmatpush3.msra.mxu1 %v9637_v29  ;;  %10183 = vmatprep.subr.mxu0 %v9620_v33 }
 0x92d   : > { %10218 = vmatprep.subr.mxu1 %v9652_v23  ;;  %10184 = vmatpush3.msra.mxu0 %v9604_v35 }
 0x92e   : > { %10219 = vmatpush3.msra.mxu1 %v9636_v55  ;;  %10185 = vmatprep.subr.mxu0 %v9619_v37 }
 0x92f   : > { %10220 = vmatprep.subr.mxu1 %v9651_v28  ;;  %10186 = vmatpush3.msra.mxu0 %v9603_v6 }
 0x930   : > { %10221 = vmatpush3.msra.mxu1 %v9635_v60  ;;  %10187 = vmatprep.subr.mxu0 %v9618_v40 }
 0x931   : > { %10222 = vmatprep.subr.mxu1 %v9650_v42  ;;  %10188 = vmatpush3.msra.mxu0 %v9602_v17 }
 0x932   : > { %10223 = vmatpush3.msra.mxu1 %v9634_v39  ;;  %10189 = vmatprep.subr.mxu0 %v9617_v41 }
 0x933   : > { %10224 = vmatprep.subr.mxu1 %v9649_v36  ;;  %10190 = vmatpush3.msra.mxu0 %v9601_v43 }
 0x934   : > { %10225 = vmatpush3.msra.mxu1 %v9633_v63  ;;  %10191 = vmatprep.subr.mxu0 %v9616_v34 }
 0x935   : > { %10226 = vmatprep.subr.mxu1 %v9648_v18  ;;  %10192 = vmatpush3.msra.mxu0 %v9600_v44 }
 0x936   : > { %9875 = vmatprep.mubr.f32.mxu0 %v9533_v48  ;;  %10227 = vmatpush3.msra.mxu1 %v9632_v61 }
 0x937   : > { %9945 = vmatprep.mubr.f32.mxu1 %v9535_v49  ;;  %9876 = vmatmul.mubr.f32.vlgmr.msra.gmra.mxu0 %v9532_v13 }
 0x938   : > { %9946 = vmatmul.mubr.f32.vlgmr.msra.gmra.mxu1 %v9534_v58 }
 0x9d5   : > { %v10123_v8 = vpop.f32.mrf.mxu0 }
 0x9d7   : > { %v10158_v5 = vpop.f32.mrf.mxu1  ;;  %v10124_v26 = vpop.f32.mrf.mxu0 }
 0x9d8   : > { %v10125_v50 = vadd.f32 %v10124_v26, %v10123_v8 }
 0x9d9   : > { %v10159_v47 = vpop.f32.mrf.mxu1 }
 0x9da   : > { %v9738_v3 = vadd.f32 %v10125_v50, %v10085_v53  ;;  %v10160_v30 = vadd.f32 %v10159_v47, %v10158_v5 }
 0x9dc   : > { %v9808_v38 = vadd.f32 %v10160_v30, %v9738_v3 }
 0x9f7   : > { %v10193_v4 = vpop.f32.mrf.mxu0 }
 0x9f8   : > { %v10228_v54 = vpop.f32.mrf.mxu1 }
 0x9f9   : > { %v10194_v52 = vpop.f32.mrf.mxu0 }
 0x9fa   : > { %v10229_v56 = vpop.f32.mrf.mxu1  ;;  %v10195_v10 = vadd.f32 %v10194_v52, %v10193_v4 }
 0x9fb   : > { %v10230_v1 = vadd.f32 %v10229_v56, %v10228_v54 }
 0x9fc   : > { %v9878_v0 = vadd.f32 %v10195_v10, %v9808_v38 }
 0x9fe   : > { %v9948_v11 = vadd.f32 %v10230_v1, %v9878_v0 }
 0xa00   : > { %9951 = vst [vmem:[%s231_s5] sm:$0xff] %v9948_v11 }
 0xa01 PF: > { %s10087_s18 = sshll.u32 %s10550_s19, 7  ;;  %s14212_s9 = sld [smem:[#allocation20_spill]] }
 0xa02   : > { %s9966_s15 = sshll.u32 %s231_s5, 4  ;;  %s9953_s27 = scalar_lea.sflag [#allocation5], %s229_s20  ;;  %s9967_s15 = int_to_ptr.vmem [resolvable:$true] %s9966_s15 }
 0xa03   : > { %s10438_s8 = scalar_lea.vmem %s9967_s15, 128  ;;  %p14213_p5 = scmp.ne.s32.totalorder %s14198_s30, 0 }
 0xa04   : > { %p10439_p7 = scmp.ne.s32.totalorder %s9967_s15, %s10438_s8  ;;  %s10571_s1 = smov [#allocation9]  }
 0xa05   : > { %s10442_s2 = sshll.u32 %s10571_s1, 4  ;;  %s10443_s2 = int_to_ptr.vmem [resolvable:$false] %s10442_s2 }
 0xa06   : > { %p10440_p1 = pnand %p10439_p7, %p14213_p5  ;;  %s10444_s12 = scalar_lea.vmem %s10443_s2, 256 }
 0xa07   : > { %s9964_s23 = scalar_lea.hbm %s14212_s9, %s10087_s18  ;;  %p10445_p2 = scmp.lt.s32.totalorder %s9967_s15, %s10443_s2 }
 0xa08   : > { %p10441_p4 = pneg %p10440_p1  ;;  %p10446_p12 = scmp.lt.s32.totalorder %s10444_s12, %s10438_s8 }
 0xa0a   : > { %p10447_p3 = por %p10446_p12, %p10445_p2 }
 0xa0c   : > { %p10448_p10 = pnand %p10447_p3, %p10441_p4 }
 0xa0e   : > { %10451 = shalt.err (!%p10448_p10)
}
 0xa0f   : > { %s10452_s19 = scalar_lea.hbm %s9964_s23, 128  ;;  %s10456_s7 = scalar_lea.hbm %s14212_s9, 256 }
 0xa10   : > { %p10453_p9 = scmp.ne.s32.totalorder %s9964_s23, %s10452_s19  ;;  %p10457_p13 = scmp.lt.s32.totalorder %s9964_s23, %s14212_s9 }
 0xa11   : > { %p10458_p0 = scmp.lt.s32.totalorder %s10456_s7, %s10452_s19 }
 0xa12   : > { %p10454_p11 = pnand %p10453_p9, %p14213_p5 }
 0xa13   : > { %p10459_p6 = por %p10458_p0, %p10457_p13 }
 0xa14   : > { %p10455_p8 = pneg %p10454_p11 }
 0xa16   : > { %p10460_p7 = pnand %p10459_p6, %p10455_p8 }
 0xa18   : > { %10463 = shalt.err (!%p10460_p7)
}
 0xa19   : > { %10241 = dma.vmem_to_hbm [thread:$0]  (%p14213_p5), %s9967_s15, 128, %s9964_s23, %s9953_s27  }
 0xa1a PF: > { %s14214_s11 = sld [smem:[#allocation15_spill]] }
 0xa1b   : > { %s14215_s20 = sld [smem:[#allocation13_spill]] }
 0xa1c   : > { %s14216_s4 = sld [smem:[#allocation16_spill]] }
 0xa20   : > { %p10263_p1 = scmp.ge.s32.totalorder %s14214_s11, 2 }
 0xa21   : > { %s9978_s5 = sand.u32 1, %s14215_s20  }
 0xa22   : > { %p14217_p4 = scmp.ne.s32.totalorder %s14216_s4, 0  ;;  %s9979_s18 = scalar_lea.sflag [#allocation5], %s9978_s5 }
 0xa24   : > { %p10255_p2 = pnand %p10263_p1, %p14217_p4 }
 0xa26   : > { %p10256_p12 = pneg %p10255_p2 }
 0xa28   : > { %10517 = dma.done.wait (%p10256_p12), %s9979_s18, 128  }
 0xa29   : > { %10519 = vsyncadd (%p10256_p12), %s9979_s18, 4294967168  ;;  %s20_s26 = sadd.s32 1, %s14214_s11   ;;  %s14218_s18 = sld [smem:[#allocation14_spill]] }
 0xa2a   : > { %p17_p3 = scmp.ge.s32.totalorder %s20_s26, 6   ;;  %s14219_s20 = sld [smem:[#allocation17_spill]] }
 0xa2b   : > { %s14220_s12 = smov %s10526_s13  ;;  %s14221_s13 = smov %s10530_s14 }
 0xa2c   : > { %s14222_s14 = smov %s10741_s22  ;;  %s14223_s15 = smov %s10538_s16 }
 0xa2d   : > { %s14224_s16 = smov %s10542_s17  ;;  %s14225_s17 = smov %s10746_s10 }
 0xa2e   : > { %s14226_s19 = smov %s10558_s21  ;;  %s14227_s21 = smov %s14234_s28 }
 0xa2f   : > { %s14228_s22 = smov %s20_s26  ;;  %19 = sbr.rel (!%p17_p3) target bundleno = 14 (0xe), region = 93 }
 0xa34   :  { %9984 = vsyncpa [#allocation4], 1 }
 0xa35   :  { %9986 = vsyncpa [#allocation4 + $0x1], 1 }
 0xa36   :  { %9987 = vsyncpa [#allocation7], 1 }
 0xa37   :  { %9988 = vsyncpa [#allocation5], 1 }
 0xa38   :  { %9990 = vsyncpa [#allocation5 + $0x1], 1 }

</bundles_post_ra>
